<compile_context>
chip_gen: v6e
topology: v6e:2x2x1
jax: 0.10.0
libtpu: 0.0.40
codegen_flags: <defaults>
</compile_context>

<pallas_src>
import functools

import jax
import jax.numpy as jnp
from jax import lax
from jax.experimental import pallas as pl
from jax.experimental.pallas import tpu as pltpu

# ----------------------------- model hyper-params ---------------------------
NDEPTHS = [48, 32, 8]
DEPTH_RATIOS = [4, 2, 1]
MIN_INTERVAL = 2.5
STAGE_SCALES = [4, 2, 1]
FEAT_OUT = [32, 16, 8]   # FeatureNet(base=8, unet) stage out_channels
DEP_OUT = [32, 16, 8]    # ResNet18_block3(base=8) stage out_channels


def _round_up(x, m):
    return (x + m - 1) // m * m


def _pick_c_chunk(C):
    """Channel chunk: full C when small, else a divisor that keeps the ref
    block's sublane dim a multiple of 8."""
    if C <= 16:
        return C
    for cand in (16, 8):
        if C % cand == 0:
            return cand
    return C  # fall back: whole C in one chunk (block dim == full dim is legal)


def _pick_hw_tile(HW, c_chunk, D, num_src):
    """Lane-dense spatial tile (multiple of 128).  Sized so one src block is
    ~2 MiB (capped so all double-buffered src blocks stay under ~8 MiB), which
    keeps per-step DMA >> per-step overhead while fitting v7x's 64 MiB VMEM."""
    hw_needed = _round_up(HW, 128)
    budget_bytes = min(2 * 1024 * 1024, (8 * 1024 * 1024) // max(num_src, 1))
    t = (budget_bytes // (c_chunk * D * 2)) // 128 * 128
    t = max(128, min(t, 8192))
    return min(t, hw_needed)


# ----------------------------- Pallas hot path ------------------------------
def _cost_volume_kernel(*refs, num_views, c_chunk):
    """Fused multi-view variance cost volume -> cost regularization (1x1x1)
    -> softmax over depth -> depth regression + photometric confidence.

    refs (set up by fused_cost_volume):
      ref_ref    : (1, Cc, HWt)     bf16  reference-view features (no D bcast in HBM)
      src_ref[v] : (1, Cc, D, HWt)  bf16  warped source-view volumes, v = 1..V-1
      dv_ref     : (1, D, HWt)      f32   per-pixel depth hypotheses
      wa_ref     : (C,)             f32   SMEM weights, w/V
      wb_ref     : (C,)             f32   SMEM weights, w/V^2
      depth_ref  : (1, 1, HWt)      f32   out
      conf_ref   : (1, 1, HWt)      f32   out
      cost_acc   : (D, HWt)         f32   VMEM scratch accumulator (across C chunks)
    """
    num_src = num_views - 1
    ref_ref = refs[0]
    src_refs = refs[1:1 + num_src]
    dv_ref = refs[1 + num_src]
    wa_ref = refs[2 + num_src]
    wb_ref = refs[3 + num_src]
    depth_ref = refs[4 + num_src]
    conf_ref = refs[5 + num_src]
    cost_acc = refs[6 + num_src]

    c = pl.program_id(2)

    @pl.when(c == 0)
    def _init():
        cost_acc[...] = jnp.zeros_like(cost_acc)

    acc = cost_acc[...]                                     # (D, HWt) f32
    for i in range(c_chunk):
        # reference view: broadcast over depth inside vregs (free), never in HBM
        r = ref_ref[0, i:i + 1, :].astype(jnp.float32)      # (1, HWt)
        s0 = src_refs[0][0, i].astype(jnp.float32)          # (D, HWt)
        vol_sum = s0
        vol_sq = s0 * s0
        for v in range(1, num_src):
            sv = src_refs[v][0, i].astype(jnp.float32)
            vol_sum = vol_sum + sv
            vol_sq = vol_sq + sv * sv
        vol_sum = vol_sum + r
        vol_sq = vol_sq + r * r
        # w * (E[x^2] - E[x]^2) == (w/V)*sq_sum - (w/V^2)*sum^2 ; the per-channel
        # constants are pre-scaled on the host to shave VALU work per element.
        # TODO(synk): RED_Regularization (recurrent encoder-decoder) definition
        # is not provided; approximated by a deterministic 1x1x1 conv (channel
        # reduction) so softmax / regression semantics downstream stay exact.
        w_a = wa_ref[c * c_chunk + i]                       # scalar read (SMEM)
        w_b = wb_ref[c * c_chunk + i]
        acc = acc + (vol_sq * w_a - (vol_sum * vol_sum) * w_b)
    cost_acc[...] = acc

    @pl.when(c == pl.num_programs(2) - 1)
    def _finalize():
        cost = cost_acc[...]
        cmax = jnp.max(cost, axis=0, keepdims=True)
        e = jnp.exp(cost - cmax)                            # unnormalized probs
        denom = jnp.sum(e, axis=0, keepdims=True)           # (1, HWt)
        dv = dv_ref[0]                                      # (D, HWt) f32
        num_depth = jnp.sum(e * dv, axis=0, keepdims=True)  # deferred softmax norm
        num_conf = jnp.max(e, axis=0, keepdims=True)
        inv = pl.reciprocal(denom, approx=True)             # single EUP reciprocal
        depth_ref[...] = (num_depth * inv)[None]
        conf_ref[...] = (num_conf * inv)[None]


def fused_cost_volume(ref_fea, src_vols, dv, regw, hw_valid, c_chunk, hw_tile):
    """ref_fea: (B, C, HWp) bf16; src_vols: list[(B, C, D, HWp) bf16];
    dv: (B, D, HWp) f32; regw: (C,) f32.  HWp is already a multiple of
    hw_tile.  Returns depth, conf as (B, hw_valid) f32."""
    B, C, HWp = ref_fea.shape
    D = dv.shape[1]
    num_src = len(src_vols)
    assert num_src >= 1
    num_views = num_src + 1
    assert C % c_chunk == 0 and HWp % hw_tile == 0
    n_c = C // c_chunk
    n_hw = HWp // hw_tile

    # Pre-scale the channel-reduction weights (saves a mul per channel per elem).
    w_a = (regw / num_views).astype(jnp.float32)
    w_b = (regw / (num_views * num_views)).astype(jnp.float32)

    kernel = functools.partial(_cost_volume_kernel,
                               num_views=num_views, c_chunk=c_chunk)

    ref_spec = pl.BlockSpec((1, c_chunk, hw_tile), lambda b, h, c: (b, c, h))
    src_spec = pl.BlockSpec((1, c_chunk, D, hw_tile),
                            lambda b, h, c: (b, c, 0, h))
    dv_spec = pl.BlockSpec((1, D, hw_tile), lambda b, h, c: (b, 0, h))
    smem_spec = pl.BlockSpec(memory_space=pltpu.MemorySpace.SMEM)
    out_spec = pl.BlockSpec((1, 1, hw_tile), lambda b, h, c: (b, 0, h))

    grid_spec = pltpu.PrefetchScalarGridSpec(
        num_scalar_prefetch=0,
        grid=(B, n_hw, n_c),
        in_specs=[ref_spec] + [src_spec] * num_src + [dv_spec, smem_spec,
                                                      smem_spec],
        out_specs=(out_spec, out_spec),
        scratch_shapes=[pltpu.VMEM((D, hw_tile), jnp.float32)],
    )
    depth, conf = pl.pallas_call(
        kernel,
        out_shape=(jax.ShapeDtypeStruct((B, 1, HWp), jnp.float32),
                   jax.ShapeDtypeStruct((B, 1, HWp), jnp.float32)),
        grid_spec=grid_spec,
        compiler_params=pltpu.CompilerParams(
            dimension_semantics=("parallel", "parallel", "arbitrary"),
            vmem_limit_bytes=32 * 1024 * 1024),
    )(ref_fea, *src_vols, dv, w_a, w_b)
    return depth[:, 0, :hw_valid], conf[:, 0, :hw_valid]


# ----------------------------- JAX glue code ---------------------------------
def conv2d_relu(x, w, b, stride):
    # x: (B, Cin, H, W), w: (Cout, Cin, kh, kw)
    y = lax.conv_general_dilated(
        x, w, window_strides=(stride, stride), padding='SAME',
        dimension_numbers=('NCHW', 'OIHW', 'NCHW'))
    return jax.nn.relu(y + b[None, :, None, None])


def _bilinear_sample_one(fea, x, y):
    """fea: (C, H, W); x, y: (N,) pixel coords; zeros padding outside."""
    C, H, W = fea.shape
    x0 = jnp.floor(x)
    y0 = jnp.floor(y)
    x1 = x0 + 1.0
    y1 = y0 + 1.0
    wx1 = x - x0
    wx0 = 1.0 - wx1
    wy1 = y - y0
    wy0 = 1.0 - wy1
    flat = fea.reshape(C, H * W)

    def corner(xi, yi, wgt):
        valid = (xi >= 0) & (xi <= W - 1) & (yi >= 0) & (yi <= H - 1)
        xc = jnp.clip(xi, 0, W - 1).astype(jnp.int32)
        yc = jnp.clip(yi, 0, H - 1).astype(jnp.int32)
        vals = jnp.take(flat, yc * W + xc, axis=1)      # (C, N)
        return vals * (wgt * valid.astype(fea.dtype))[None, :]

    return (corner(x0, y0, wx0 * wy0) + corner(x1, y0, wx1 * wy0) +
            corner(x0, y1, wx0 * wy1) + corner(x1, y1, wx1 * wy1))


def homo_warp_flat(src_fea, src_proj, ref_proj, dv_flat, H, W):
    """Homography warp straight into the padded, flattened layout.

    src_fea: (B,C,H,W); src/ref_proj: (B,4,4); dv_flat: (B,D,HWp) with HWp
    already padded to the kernel's tile grid.  Returns (B, C, D, HWp)."""
    B, C, _, _ = src_fea.shape
    D, HWp = dv_flat.shape[1], dv_flat.shape[2]
    HW = H * W
    proj = src_proj @ jnp.linalg.inv(ref_proj)
    rot = proj[:, :3, :3]
    trans = proj[:, :3, 3:4]
    yy, xx = jnp.meshgrid(jnp.arange(H, dtype=jnp.float32),
                          jnp.arange(W, dtype=jnp.float32), indexing='ij')
    xyz = jnp.stack([xx.ravel(), yy.ravel(),
                     jnp.ones(HW, jnp.float32)], axis=0)          # (3, HW)
    if HWp != HW:                                                 # pad coords, not volumes
        pad_col = jnp.array([[0.0], [0.0], [1.0]], jnp.float32)
        xyz = jnp.concatenate(
            [xyz, jnp.broadcast_to(pad_col, (3, HWp - HW))], axis=1)
    xyz = jnp.broadcast_to(xyz[None], (B, 3, HWp))
    rot_xyz = rot @ xyz                                           # (B,3,HWp)
    rot_depth_xyz = rot_xyz[:, :, None, :] * dv_flat[:, None]     # (B,3,D,HWp)
    proj_xyz = rot_depth_xyz + trans[:, :, :, None]               # (B,3,D,HWp)
    z = proj_xyz[:, 2]
    z = jnp.where(jnp.abs(z) < 1e-6, 1e-6, z)
    px = (proj_xyz[:, 0] / z).reshape(B, D * HWp)
    py = (proj_xyz[:, 1] / z).reshape(B, D * HWp)
    warped = jax.vmap(_bilinear_sample_one)(src_fea, px, py)      # (B,C,D*HWp)
    return warped.reshape(B, C, D, HWp)


def get_depth_range_samples(cur_depth, ndepth, depth_interval_pixel, shape):
    B, H, W = shape
    ar = jnp.arange(ndepth, dtype=jnp.float32)
    if cur_depth.ndim == 2:                                       # (B, Dinit)
        cmin = cur_depth[:, 0]
        cmax = cur_depth[:, -1]
        interval = (cmax - cmin) / (ndepth - 1)
        samples = cmin[:, None] + ar[None, :] * interval[:, None]  # (B, nd)
        samples = jnp.broadcast_to(samples[:, :, None, None], (B, ndepth, H, W))
    else:                                                         # (B, H, W)
        cmin = cur_depth - ndepth / 2.0 * depth_interval_pixel
        cmax = cur_depth + ndepth / 2.0 * depth_interval_pixel
        new_int = (cmax - cmin) / (ndepth - 1)
        samples = cmin[:, None] + ar[None, :, None, None] * new_int[:, None]
    return samples


def init_params(key):
    params = {}
    keys = jax.random.split(key, 16)
    for s in range(3):
        # TODO(synk): exact FeatureNet / ResNet18_block3 architectures are not
        # provided; a single deterministic 3x3 strided conv per stage is used
        # to produce features with the correct channel counts / resolutions.
        params[f'img_w{s}'] = 0.1 * jax.random.normal(
            keys[2 * s], (FEAT_OUT[s], 3, 3, 3), jnp.float32)
        params[f'img_b{s}'] = jnp.zeros((FEAT_OUT[s],), jnp.float32)
        params[f'dep_w{s}'] = 0.1 * jax.random.normal(
            keys[2 * s + 1], (DEP_OUT[s], 1, 3, 3), jnp.float32)
        params[f'dep_b{s}'] = jnp.zeros((DEP_OUT[s],), jnp.float32)
        C = FEAT_OUT[s] + DEP_OUT[s]
        params[f'reg_w{s}'] = 0.1 * jax.random.normal(
            keys[10 + s], (C,), jnp.float32)
    return params


def cascade_rednet_forward(params, imgs, dAnythings, proj_matrices, depth_values):
    B, V, _, H, W = imgs.shape
    # per-view feature extraction (image + depth-anything features, concat)
    total_features = []
    for v in range(V):
        img = imgs[:, v]
        dep = dAnythings[:, v]
        feats = {}
        for s in range(3):
            fi = conv2d_relu(img, params[f'img_w{s}'], params[f'img_b{s}'],
                             STAGE_SCALES[s])
            fd = conv2d_relu(dep, params[f'dep_w{s}'], params[f'dep_b{s}'],
                             STAGE_SCALES[s])
            feats[s] = jnp.concatenate([fi, fd], axis=1)
        total_features.append(feats)

    outputs = {}
    depth = None
    for s in range(3):
        scale = STAGE_SCALES[s]
        nd = NDEPTHS[s]
        h_s, w_s = H // scale, W // scale
        HW = h_s * w_s

        if depth is None:
            cur_depth = depth_values                               # (B, Dinit)
        else:
            cur_depth = jax.image.resize(depth, (B, H, W), method='bilinear')
        drs = get_depth_range_samples(cur_depth, nd,
                                      DEPTH_RATIOS[s] * MIN_INTERVAL,
                                      (B, H, W))                   # (B,nd,H,W)
        dv = jax.image.resize(drs, (B, nd, h_s, w_s), method='trilinear')

        feats_stage = [f[s] for f in total_features]
        projs_stage = proj_matrices[f'stage{s + 1}']               # (B,V,4,4)
        ref_fea = feats_stage[0]
        C = ref_fea.shape[1]
        ref_proj = projs_stage[:, 0]

        # Tiling choice (lane-dense, sized for VMEM / per-step DMA amortization).
        c_chunk = _pick_c_chunk(C)
        hw_tile = _pick_hw_tile(HW, c_chunk, nd, V - 1)
        hw_pad = _round_up(HW, hw_tile)

        # Small arrays are padded cheaply; the big warped volumes are produced
        # directly at the padded width by padding coordinates before the gather.
        dv_flat = dv.reshape(B, nd, HW)
        if hw_pad != HW:
            dv_flat = jnp.pad(dv_flat, ((0, 0), (0, 0), (0, hw_pad - HW)),
                              mode='edge')
        dv_flat = dv_flat.astype(jnp.float32)

        ref_flat = ref_fea.reshape(B, C, HW)
        if hw_pad != HW:
            ref_flat = jnp.pad(ref_flat, ((0, 0), (0, 0), (0, hw_pad - HW)))
        ref_flat = ref_flat.astype(jnp.bfloat16)

        src_vols = []
        for vi in range(1, V):
            w = homo_warp_flat(feats_stage[vi], projs_stage[:, vi], ref_proj,
                               dv_flat, h_s, w_s)
            src_vols.append(w.astype(jnp.bfloat16))                # (B,C,nd,HWp)

        depth_flat, conf_flat = fused_cost_volume(
            ref_flat, src_vols, dv_flat, params[f'reg_w{s}'],
            hw_valid=HW, c_chunk=c_chunk, hw_tile=hw_tile)
        depth = depth_flat.reshape(B, h_s, w_s)
        conf = conf_flat.reshape(B, h_s, w_s)

        stage_out = {'depth': depth, 'photometric_confidence': conf}
        outputs[f'stage{s + 1}'] = stage_out
        outputs.update(stage_out)
    return outputs


def build_proj_matrices(B, V, H, W):
    projs = {}
    for s, scale in enumerate(STAGE_SCALES):
        f = 80.0 / scale
        cx = (W / scale) / 2.0
        cy = (H / scale) / 2.0
        K = jnp.array([[f, 0., cx, 0.],
                       [0., f, cy, 0.],
                       [0., 0., 1., 0.],
                       [0., 0., 0., 1.]], jnp.float32)
        mats = []
        for v in range(V):
            E = jnp.eye(4, dtype=jnp.float32)
            E = E.at[0, 3].set(0.2 * v).at[1, 3].set(0.1 * v)
            mats.append(K @ E)
        P = jnp.stack(mats, axis=0)                                # (V,4,4)
        projs[f'stage{s + 1}'] = jnp.broadcast_to(P[None], (B, V, 4, 4))
    return projs


if __name__ == "__main__":
    key = jax.random.PRNGKey(0)
    k_img, k_dep, k_par = jax.random.split(key, 3)

    B, V, H, W = 2, 3, 16, 16
    imgs = jax.random.normal(k_img, (B, V, 3, H, W), jnp.float32)
    dAnythings = jax.random.normal(k_dep, (B, V, 1, H, W), jnp.float32)
    depth_values = jnp.broadcast_to(
        jnp.linspace(425.0, 935.0, NDEPTHS[0], dtype=jnp.float32)[None],
        (B, NDEPTHS[0]))
    proj_matrices = build_proj_matrices(B, V, H, W)
    params = init_params(k_par)

    forward = jax.jit(cascade_rednet_forward)
    outputs = forward(params, imgs, dAnythings, proj_matrices, depth_values)
    jax.block_until_ready(outputs)
    assert outputs['depth'].shape == (B, H, W)
    assert outputs['photometric_confidence'].shape == (B, H, W)
    assert bool(jnp.all(jnp.isfinite(outputs['depth'])))
    print("KERNEL_OK")
</pallas_src>

<mosaic_0001>
module attributes {stable_mosaic.version = 11 : i64} {
  func.func @_cost_volume_kernel(%arg0: i32, %arg1: i32, %arg2: i32, %arg3: memref<1x16x128xbf16, #tpu.memory_space<vmem>>, %arg4: memref<1x16x48x128xbf16, #tpu.memory_space<vmem>>, %arg5: memref<1x16x48x128xbf16, #tpu.memory_space<vmem>>, %arg6: memref<1x48x128xf32, #tpu.memory_space<vmem>>, %arg7: memref<64xf32, #tpu.memory_space<smem>>, %arg8: memref<64xf32, #tpu.memory_space<smem>>, %arg9: memref<1x1x128xf32, #tpu.memory_space<vmem>>, %arg10: memref<1x1x128xf32, #tpu.memory_space<vmem>>, %arg11: memref<48x128xf32, #tpu.memory_space<vmem>>) attributes {dimension_semantics = [#tpu.dimension_semantics<parallel>, #tpu.dimension_semantics<parallel>, #tpu.dimension_semantics<arbitrary>], iteration_bounds = array<i64: 2, 1, 4>, scalar_prefetch = 0 : i64, scratch_operands = 1 : i64, tpu.core_type = #tpu.core_type<tc>, window_params = [{transform_indices = @transform_0, window_bounds = array<i64: 1, 16, 128>}, {transform_indices = @transform_1, window_bounds = array<i64: 1, 16, 48, 128>}, {transform_indices = @transform_2, window_bounds = array<i64: 1, 16, 48, 128>}, {transform_indices = @transform_3, window_bounds = array<i64: 1, 48, 128>}, {transform_indices = @transform_4, window_bounds = array<i64: 64>}, {transform_indices = @transform_5, window_bounds = array<i64: 64>}, {transform_indices = @transform_6, window_bounds = array<i64: 1, 1, 128>}, {transform_indices = @transform_7, window_bounds = array<i64: 1, 1, 128>}]} {
    %c0_i32 = arith.constant 0 : i32
    %0 = arith.cmpi eq, %arg2, %c0_i32 : i32
    %1 = arith.extui %0 : i1 to i32
    %c0_i32_0 = arith.constant 0 : i32
    %2 = arith.cmpi ne, %1, %c0_i32_0 : i32
    scf.if %2 {
      %cst = arith.constant 0.000000e+00 : f32
      %536 = vector.broadcast %cst : f32 to vector<48x128xf32>
      %c0_215 = arith.constant 0 : index
      %c0_216 = arith.constant 0 : index
      %537 = vector.load %arg11[%c0_215, %c0_216] : memref<48x128xf32, #tpu.memory_space<vmem>>, vector<48x128xf32>
      tpu.vector_store %arg11[%c0_215, %c0_216], %536 {strides = array<i32>} : memref<48x128xf32, #tpu.memory_space<vmem>>, vector<48x128xf32>,
    } else {
    }
    %c0 = arith.constant 0 : index
    %c0_1 = arith.constant 0 : index
    %3 = vector.load %arg11[%c0, %c0_1] : memref<48x128xf32, #tpu.memory_space<vmem>>, vector<48x128xf32>
    %c0_2 = arith.constant 0 : index
    %c0_3 = arith.constant 0 : index
    %c0_4 = arith.constant 0 : index
    %4 = vector.load %arg3[%c0_2, %c0_3, %c0_4] : memref<1x16x128xbf16, #tpu.memory_space<vmem>>, vector<1x1x128xbf16>
    %5 = vector.shape_cast %4 : vector<1x1x128xbf16> to vector<1x128xbf16>
    %6 = arith.extf %5 : vector<1x128xbf16> to vector<1x128xf32>
    %c0_5 = arith.constant 0 : index
    %c0_6 = arith.constant 0 : index
    %c0_7 = arith.constant 0 : index
    %c0_8 = arith.constant 0 : index
    %7 = vector.load %arg4[%c0_5, %c0_6, %c0_7, %c0_8] : memref<1x16x48x128xbf16, #tpu.memory_space<vmem>>, vector<1x1x48x128xbf16>
    %8 = vector.shape_cast %7 : vector<1x1x48x128xbf16> to vector<48x128xbf16>
    %9 = arith.extf %8 : vector<48x128xbf16> to vector<48x128xf32>
    %10 = arith.mulf %9, %9 : vector<48x128xf32>
    %c0_9 = arith.constant 0 : index
    %c0_10 = arith.constant 0 : index
    %c0_11 = arith.constant 0 : index
    %c0_12 = arith.constant 0 : index
    %11 = vector.load %arg5[%c0_9, %c0_10, %c0_11, %c0_12] : memref<1x16x48x128xbf16, #tpu.memory_space<vmem>>, vector<1x1x48x128xbf16>
    %12 = vector.shape_cast %11 : vector<1x1x48x128xbf16> to vector<48x128xbf16>
    %13 = arith.extf %12 : vector<48x128xbf16> to vector<48x128xf32>
    %14 = arith.addf %9, %13 : vector<48x128xf32>
    %15 = arith.mulf %13, %13 : vector<48x128xf32>
    %16 = arith.addf %10, %15 : vector<48x128xf32>
    %17 = vector.broadcast %6 : vector<1x128xf32> to vector<48x128xf32>
    %18 = arith.addf %14, %17 : vector<48x128xf32>
    %19 = arith.mulf %6, %6 : vector<1x128xf32>
    %20 = vector.broadcast %19 : vector<1x128xf32> to vector<48x128xf32>
    %21 = arith.addf %16, %20 : vector<48x128xf32>
    %c16_i32 = arith.constant 16 : i32
    %22 = arith.muli %arg2, %c16_i32 : i32
    %c0_i32_13 = arith.constant 0 : i32
    %23 = arith.addi %22, %c0_i32_13 : i32
    %24 = arith.index_cast %23 : i32 to index
    %25 = memref.load %arg7[%24] : memref<64xf32, #tpu.memory_space<smem>>
    %c16_i32_14 = arith.constant 16 : i32
    %26 = arith.muli %arg2, %c16_i32_14 : i32
    %c0_i32_15 = arith.constant 0 : i32
    %27 = arith.addi %26, %c0_i32_15 : i32
    %28 = arith.index_cast %27 : i32 to index
    %29 = memref.load %arg8[%28] : memref<64xf32, #tpu.memory_space<smem>>
    %30 = vector.broadcast %25 : f32 to vector<48x128xf32>
    %31 = arith.mulf %21, %30 : vector<48x128xf32>
    %32 = arith.mulf %18, %18 : vector<48x128xf32>
    %33 = vector.broadcast %29 : f32 to vector<48x128xf32>
    %34 = arith.mulf %32, %33 : vector<48x128xf32>
    %35 = arith.subf %31, %34 : vector<48x128xf32>
    %36 = arith.addf %3, %35 : vector<48x128xf32>
    %c0_16 = arith.constant 0 : index
    %c1 = arith.constant 1 : index
    %c0_17 = arith.constant 0 : index
    %37 = vector.load %arg3[%c0_16, %c1, %c0_17] : memref<1x16x128xbf16, #tpu.memory_space<vmem>>, vector<1x1x128xbf16>
    %38 = vector.shape_cast %37 : vector<1x1x128xbf16> to vector<1x128xbf16>
    %39 = arith.extf %38 : vector<1x128xbf16> to vector<1x128xf32>
    %c0_18 = arith.constant 0 : index
    %c1_19 = arith.constant 1 : index
    %c0_20 = arith.constant 0 : index
    %c0_21 = arith.constant 0 : index
    %40 = vector.load %arg4[%c0_18, %c1_19, %c0_20, %c0_21] : memref<1x16x48x128xbf16, #tpu.memory_space<vmem>>, vector<1x1x48x128xbf16>
    %41 = vector.shape_cast %40 : vector<1x1x48x128xbf16> to vector<48x128xbf16>
    %42 = arith.extf %41 : vector<48x128xbf16> to vector<48x128xf32>
    %43 = arith.mulf %42, %42 : vector<48x128xf32>
    %c0_22 = arith.constant 0 : index
    %c1_23 = arith.constant 1 : index
    %c0_24 = arith.constant 0 : index
    %c0_25 = arith.constant 0 : index
    %44 = vector.load %arg5[%c0_22, %c1_23, %c0_24, %c0_25] : memref<1x16x48x128xbf16, #tpu.memory_space<vmem>>, vector<1x1x48x128xbf16>
    %45 = vector.shape_cast %44 : vector<1x1x48x128xbf16> to vector<48x128xbf16>
    %46 = arith.extf %45 : vector<48x128xbf16> to vector<48x128xf32>
    %47 = arith.addf %42, %46 : vector<48x128xf32>
    %48 = arith.mulf %46, %46 : vector<48x128xf32>
    %49 = arith.addf %43, %48 : vector<48x128xf32>
    %50 = vector.broadcast %39 : vector<1x128xf32> to vector<48x128xf32>
    %51 = arith.addf %47, %50 : vector<48x128xf32>
    %52 = arith.mulf %39, %39 : vector<1x128xf32>
    %53 = vector.broadcast %52 : vector<1x128xf32> to vector<48x128xf32>
    %54 = arith.addf %49, %53 : vector<48x128xf32>
    %c16_i32_26 = arith.constant 16 : i32
    %55 = arith.muli %arg2, %c16_i32_26 : i32
    %c1_i32 = arith.constant 1 : i32
    %56 = arith.addi %55, %c1_i32 : i32
    %57 = arith.index_cast %56 : i32 to index
    %58 = memref.load %arg7[%57] : memref<64xf32, #tpu.memory_space<smem>>
    %c16_i32_27 = arith.constant 16 : i32
    %59 = arith.muli %arg2, %c16_i32_27 : i32
    %c1_i32_28 = arith.constant 1 : i32
    %60 = arith.addi %59, %c1_i32_28 : i32
    %61 = arith.index_cast %60 : i32 to index
    %62 = memref.load %arg8[%61] : memref<64xf32, #tpu.memory_space<smem>>
    %63 = vector.broadcast %58 : f32 to vector<48x128xf32>
    %64 = arith.mulf %54, %63 : vector<48x128xf32>
    %65 = arith.mulf %51, %51 : vector<48x128xf32>
    %66 = vector.broadcast %62 : f32 to vector<48x128xf32>
    %67 = arith.mulf %65, %66 : vector<48x128xf32>
    %68 = arith.subf %64, %67 : vector<48x128xf32>
    %69 = arith.addf %36, %68 : vector<48x128xf32>
    %c0_29 = arith.constant 0 : index
    %c2 = arith.constant 2 : index
    %c0_30 = arith.constant 0 : index
    %70 = vector.load %arg3[%c0_29, %c2, %c0_30] : memref<1x16x128xbf16, #tpu.memory_space<vmem>>, vector<1x1x128xbf16>
    %71 = vector.shape_cast %70 : vector<1x1x128xbf16> to vector<1x128xbf16>
    %72 = arith.extf %71 : vector<1x128xbf16> to vector<1x128xf32>
    %c0_31 = arith.constant 0 : index
    %c2_32 = arith.constant 2 : index
    %c0_33 = arith.constant 0 : index
    %c0_34 = arith.constant 0 : index
    %73 = vector.load %arg4[%c0_31, %c2_32, %c0_33, %c0_34] : memref<1x16x48x128xbf16, #tpu.memory_space<vmem>>, vector<1x1x48x128xbf16>
    %74 = vector.shape_cast %73 : vector<1x1x48x128xbf16> to vector<48x128xbf16>
    %75 = arith.extf %74 : vector<48x128xbf16> to vector<48x128xf32>
    %76 = arith.mulf %75, %75 : vector<48x128xf32>
    %c0_35 = arith.constant 0 : index
    %c2_36 = arith.constant 2 : index
    %c0_37 = arith.constant 0 : index
    %c0_38 = arith.constant 0 : index
    %77 = vector.load %arg5[%c0_35, %c2_36, %c0_37, %c0_38] : memref<1x16x48x128xbf16, #tpu.memory_space<vmem>>, vector<1x1x48x128xbf16>
    %78 = vector.shape_cast %77 : vector<1x1x48x128xbf16> to vector<48x128xbf16>
    %79 = arith.extf %78 : vector<48x128xbf16> to vector<48x128xf32>
    %80 = arith.addf %75, %79 : vector<48x128xf32>
    %81 = arith.mulf %79, %79 : vector<48x128xf32>
    %82 = arith.addf %76, %81 : vector<48x128xf32>
    %83 = vector.broadcast %72 : vector<1x128xf32> to vector<48x128xf32>
    %84 = arith.addf %80, %83 : vector<48x128xf32>
    %85 = arith.mulf %72, %72 : vector<1x128xf32>
    %86 = vector.broadcast %85 : vector<1x128xf32> to vector<48x128xf32>
    %87 = arith.addf %82, %86 : vector<48x128xf32>
    %c16_i32_39 = arith.constant 16 : i32
    %88 = arith.muli %arg2, %c16_i32_39 : i32
    %c2_i32 = arith.constant 2 : i32
    %89 = arith.addi %88, %c2_i32 : i32
    %90 = arith.index_cast %89 : i32 to index
    %91 = memref.load %arg7[%90] : memref<64xf32, #tpu.memory_space<smem>>
    %c16_i32_40 = arith.constant 16 : i32
    %92 = arith.muli %arg2, %c16_i32_40 : i32
    %c2_i32_41 = arith.constant 2 : i32
    %93 = arith.addi %92, %c2_i32_41 : i32
    %94 = arith.index_cast %93 : i32 to index
    %95 = memref.load %arg8[%94] : memref<64xf32, #tpu.memory_space<smem>>
    %96 = vector.broadcast %91 : f32 to vector<48x128xf32>
    %97 = arith.mulf %87, %96 : vector<48x128xf32>
    %98 = arith.mulf %84, %84 : vector<48x128xf32>
    %99 = vector.broadcast %95 : f32 to vector<48x128xf32>
    %100 = arith.mulf %98, %99 : vector<48x128xf32>
    %101 = arith.subf %97, %100 : vector<48x128xf32>
    %102 = arith.addf %69, %101 : vector<48x128xf32>
    %c0_42 = arith.constant 0 : index
    %c3 = arith.constant 3 : index
    %c0_43 = arith.constant 0 : index
    %103 = vector.load %arg3[%c0_42, %c3, %c0_43] : memref<1x16x128xbf16, #tpu.memory_space<vmem>>, vector<1x1x128xbf16>
    %104 = vector.shape_cast %103 : vector<1x1x128xbf16> to vector<1x128xbf16>
    %105 = arith.extf %104 : vector<1x128xbf16> to vector<1x128xf32>
    %c0_44 = arith.constant 0 : index
    %c3_45 = arith.constant 3 : index
    %c0_46 = arith.constant 0 : index
    %c0_47 = arith.constant 0 : index
    %106 = vector.load %arg4[%c0_44, %c3_45, %c0_46, %c0_47] : memref<1x16x48x128xbf16, #tpu.memory_space<vmem>>, vector<1x1x48x128xbf16>
    %107 = vector.shape_cast %106 : vector<1x1x48x128xbf16> to vector<48x128xbf16>
    %108 = arith.extf %107 : vector<48x128xbf16> to vector<48x128xf32>
    %109 = arith.mulf %108, %108 : vector<48x128xf32>
    %c0_48 = arith.constant 0 : index
    %c3_49 = arith.constant 3 : index
    %c0_50 = arith.constant 0 : index
    %c0_51 = arith.constant 0 : index
    %110 = vector.load %arg5[%c0_48, %c3_49, %c0_50, %c0_51] : memref<1x16x48x128xbf16, #tpu.memory_space<vmem>>, vector<1x1x48x128xbf16>
    %111 = vector.shape_cast %110 : vector<1x1x48x128xbf16> to vector<48x128xbf16>
    %112 = arith.extf %111 : vector<48x128xbf16> to vector<48x128xf32>
    %113 = arith.addf %108, %112 : vector<48x128xf32>
    %114 = arith.mulf %112, %112 : vector<48x128xf32>
    %115 = arith.addf %109, %114 : vector<48x128xf32>
    %116 = vector.broadcast %105 : vector<1x128xf32> to vector<48x128xf32>
    %117 = arith.addf %113, %116 : vector<48x128xf32>
    %118 = arith.mulf %105, %105 : vector<1x128xf32>
    %119 = vector.broadcast %118 : vector<1x128xf32> to vector<48x128xf32>
    %120 = arith.addf %115, %119 : vector<48x128xf32>
    %c16_i32_52 = arith.constant 16 : i32
    %121 = arith.muli %arg2, %c16_i32_52 : i32
    %c3_i32 = arith.constant 3 : i32
    %122 = arith.addi %121, %c3_i32 : i32
    %123 = arith.index_cast %122 : i32 to index
    %124 = memref.load %arg7[%123] : memref<64xf32, #tpu.memory_space<smem>>
    %c16_i32_53 = arith.constant 16 : i32
    %125 = arith.muli %arg2, %c16_i32_53 : i32
    %c3_i32_54 = arith.constant 3 : i32
    %126 = arith.addi %125, %c3_i32_54 : i32
    %127 = arith.index_cast %126 : i32 to index
    %128 = memref.load %arg8[%127] : memref<64xf32, #tpu.memory_space<smem>>
    %129 = vector.broadcast %124 : f32 to vector<48x128xf32>
    %130 = arith.mulf %120, %129 : vector<48x128xf32>
    %131 = arith.mulf %117, %117 : vector<48x128xf32>
    %132 = vector.broadcast %128 : f32 to vector<48x128xf32>
    %133 = arith.mulf %131, %132 : vector<48x128xf32>
    %134 = arith.subf %130, %133 : vector<48x128xf32>
    %135 = arith.addf %102, %134 : vector<48x128xf32>
    %c0_55 = arith.constant 0 : index
    %c4 = arith.constant 4 : index
    %c0_56 = arith.constant 0 : index
    %136 = vector.load %arg3[%c0_55, %c4, %c0_56] : memref<1x16x128xbf16, #tpu.memory_space<vmem>>, vector<1x1x128xbf16>
    %137 = vector.shape_cast %136 : vector<1x1x128xbf16> to vector<1x128xbf16>
    %138 = arith.extf %137 : vector<1x128xbf16> to vector<1x128xf32>
    %c0_57 = arith.constant 0 : index
    %c4_58 = arith.constant 4 : index
    %c0_59 = arith.constant 0 : index
    %c0_60 = arith.constant 0 : index
    %139 = vector.load %arg4[%c0_57, %c4_58, %c0_59, %c0_60] : memref<1x16x48x128xbf16, #tpu.memory_space<vmem>>, vector<1x1x48x128xbf16>
    %140 = vector.shape_cast %139 : vector<1x1x48x128xbf16> to vector<48x128xbf16>
    %141 = arith.extf %140 : vector<48x128xbf16> to vector<48x128xf32>
    %142 = arith.mulf %141, %141 : vector<48x128xf32>
    %c0_61 = arith.constant 0 : index
    %c4_62 = arith.constant 4 : index
    %c0_63 = arith.constant 0 : index
    %c0_64 = arith.constant 0 : index
    %143 = vector.load %arg5[%c0_61, %c4_62, %c0_63, %c0_64] : memref<1x16x48x128xbf16, #tpu.memory_space<vmem>>, vector<1x1x48x128xbf16>
    %144 = vector.shape_cast %143 : vector<1x1x48x128xbf16> to vector<48x128xbf16>
    %145 = arith.extf %144 : vector<48x128xbf16> to vector<48x128xf32>
    %146 = arith.addf %141, %145 : vector<48x128xf32>
    %147 = arith.mulf %145, %145 : vector<48x128xf32>
    %148 = arith.addf %142, %147 : vector<48x128xf32>
    %149 = vector.broadcast %138 : vector<1x128xf32> to vector<48x128xf32>
    %150 = arith.addf %146, %149 : vector<48x128xf32>
    %151 = arith.mulf %138, %138 : vector<1x128xf32>
    %152 = vector.broadcast %151 : vector<1x128xf32> to vector<48x128xf32>
    %153 = arith.addf %148, %152 : vector<48x128xf32>
    %c16_i32_65 = arith.constant 16 : i32
    %154 = arith.muli %arg2, %c16_i32_65 : i32
    %c4_i32 = arith.constant 4 : i32
    %155 = arith.addi %154, %c4_i32 : i32
    %156 = arith.index_cast %155 : i32 to index
    %157 = memref.load %arg7[%156] : memref<64xf32, #tpu.memory_space<smem>>
    %c16_i32_66 = arith.constant 16 : i32
    %158 = arith.muli %arg2, %c16_i32_66 : i32
    %c4_i32_67 = arith.constant 4 : i32
    %159 = arith.addi %158, %c4_i32_67 : i32
    %160 = arith.index_cast %159 : i32 to index
    %161 = memref.load %arg8[%160] : memref<64xf32, #tpu.memory_space<smem>>
    %162 = vector.broadcast %157 : f32 to vector<48x128xf32>
    %163 = arith.mulf %153, %162 : vector<48x128xf32>
    %164 = arith.mulf %150, %150 : vector<48x128xf32>
    %165 = vector.broadcast %161 : f32 to vector<48x128xf32>
    %166 = arith.mulf %164, %165 : vector<48x128xf32>
    %167 = arith.subf %163, %166 : vector<48x128xf32>
    %168 = arith.addf %135, %167 : vector<48x128xf32>
    %c0_68 = arith.constant 0 : index
    %c5 = arith.constant 5 : index
    %c0_69 = arith.constant 0 : index
    %169 = vector.load %arg3[%c0_68, %c5, %c0_69] : memref<1x16x128xbf16, #tpu.memory_space<vmem>>, vector<1x1x128xbf16>
    %170 = vector.shape_cast %169 : vector<1x1x128xbf16> to vector<1x128xbf16>
    %171 = arith.extf %170 : vector<1x128xbf16> to vector<1x128xf32>
    %c0_70 = arith.constant 0 : index
    %c5_71 = arith.constant 5 : index
    %c0_72 = arith.constant 0 : index
    %c0_73 = arith.constant 0 : index
    %172 = vector.load %arg4[%c0_70, %c5_71, %c0_72, %c0_73] : memref<1x16x48x128xbf16, #tpu.memory_space<vmem>>, vector<1x1x48x128xbf16>
    %173 = vector.shape_cast %172 : vector<1x1x48x128xbf16> to vector<48x128xbf16>
    %174 = arith.extf %173 : vector<48x128xbf16> to vector<48x128xf32>
    %175 = arith.mulf %174, %174 : vector<48x128xf32>
    %c0_74 = arith.constant 0 : index
    %c5_75 = arith.constant 5 : index
    %c0_76 = arith.constant 0 : index
    %c0_77 = arith.constant 0 : index
    %176 = vector.load %arg5[%c0_74, %c5_75, %c0_76, %c0_77] : memref<1x16x48x128xbf16, #tpu.memory_space<vmem>>, vector<1x1x48x128xbf16>
    %177 = vector.shape_cast %176 : vector<1x1x48x128xbf16> to vector<48x128xbf16>
    %178 = arith.extf %177 : vector<48x128xbf16> to vector<48x128xf32>
    %179 = arith.addf %174, %178 : vector<48x128xf32>
    %180 = arith.mulf %178, %178 : vector<48x128xf32>
    %181 = arith.addf %175, %180 : vector<48x128xf32>
    %182 = vector.broadcast %171 : vector<1x128xf32> to vector<48x128xf32>
    %183 = arith.addf %179, %182 : vector<48x128xf32>
    %184 = arith.mulf %171, %171 : vector<1x128xf32>
    %185 = vector.broadcast %184 : vector<1x128xf32> to vector<48x128xf32>
    %186 = arith.addf %181, %185 : vector<48x128xf32>
    %c16_i32_78 = arith.constant 16 : i32
    %187 = arith.muli %arg2, %c16_i32_78 : i32
    %c5_i32 = arith.constant 5 : i32
    %188 = arith.addi %187, %c5_i32 : i32
    %189 = arith.index_cast %188 : i32 to index
    %190 = memref.load %arg7[%189] : memref<64xf32, #tpu.memory_space<smem>>
    %c16_i32_79 = arith.constant 16 : i32
    %191 = arith.muli %arg2, %c16_i32_79 : i32
    %c5_i32_80 = arith.constant 5 : i32
    %192 = arith.addi %191, %c5_i32_80 : i32
    %193 = arith.index_cast %192 : i32 to index
    %194 = memref.load %arg8[%193] : memref<64xf32, #tpu.memory_space<smem>>
    %195 = vector.broadcast %190 : f32 to vector<48x128xf32>
    %196 = arith.mulf %186, %195 : vector<48x128xf32>
    %197 = arith.mulf %183, %183 : vector<48x128xf32>
    %198 = vector.broadcast %194 : f32 to vector<48x128xf32>
    %199 = arith.mulf %197, %198 : vector<48x128xf32>
    %200 = arith.subf %196, %199 : vector<48x128xf32>
    %201 = arith.addf %168, %200 : vector<48x128xf32>
    %c0_81 = arith.constant 0 : index
    %c6 = arith.constant 6 : index
    %c0_82 = arith.constant 0 : index
    %202 = vector.load %arg3[%c0_81, %c6, %c0_82] : memref<1x16x128xbf16, #tpu.memory_space<vmem>>, vector<1x1x128xbf16>
    %203 = vector.shape_cast %202 : vector<1x1x128xbf16> to vector<1x128xbf16>
    %204 = arith.extf %203 : vector<1x128xbf16> to vector<1x128xf32>
    %c0_83 = arith.constant 0 : index
    %c6_84 = arith.constant 6 : index
    %c0_85 = arith.constant 0 : index
    %c0_86 = arith.constant 0 : index
    %205 = vector.load %arg4[%c0_83, %c6_84, %c0_85, %c0_86] : memref<1x16x48x128xbf16, #tpu.memory_space<vmem>>, vector<1x1x48x128xbf16>
    %206 = vector.shape_cast %205 : vector<1x1x48x128xbf16> to vector<48x128xbf16>
    %207 = arith.extf %206 : vector<48x128xbf16> to vector<48x128xf32>
    %208 = arith.mulf %207, %207 : vector<48x128xf32>
    %c0_87 = arith.constant 0 : index
    %c6_88 = arith.constant 6 : index
    %c0_89 = arith.constant 0 : index
    %c0_90 = arith.constant 0 : index
    %209 = vector.load %arg5[%c0_87, %c6_88, %c0_89, %c0_90] : memref<1x16x48x128xbf16, #tpu.memory_space<vmem>>, vector<1x1x48x128xbf16>
    %210 = vector.shape_cast %209 : vector<1x1x48x128xbf16> to vector<48x128xbf16>
    %211 = arith.extf %210 : vector<48x128xbf16> to vector<48x128xf32>
    %212 = arith.addf %207, %211 : vector<48x128xf32>
    %213 = arith.mulf %211, %211 : vector<48x128xf32>
    %214 = arith.addf %208, %213 : vector<48x128xf32>
    %215 = vector.broadcast %204 : vector<1x128xf32> to vector<48x128xf32>
    %216 = arith.addf %212, %215 : vector<48x128xf32>
    %217 = arith.mulf %204, %204 : vector<1x128xf32>
    %218 = vector.broadcast %217 : vector<1x128xf32> to vector<48x128xf32>
    %219 = arith.addf %214, %218 : vector<48x128xf32>
    %c16_i32_91 = arith.constant 16 : i32
    %220 = arith.muli %arg2, %c16_i32_91 : i32
    %c6_i32 = arith.constant 6 : i32
    %221 = arith.addi %220, %c6_i32 : i32
    %222 = arith.index_cast %221 : i32 to index
    %223 = memref.load %arg7[%222] : memref<64xf32, #tpu.memory_space<smem>>
    %c16_i32_92 = arith.constant 16 : i32
    %224 = arith.muli %arg2, %c16_i32_92 : i32
    %c6_i32_93 = arith.constant 6 : i32
    %225 = arith.addi %224, %c6_i32_93 : i32
    %226 = arith.index_cast %225 : i32 to index
    %227 = memref.load %arg8[%226] : memref<64xf32, #tpu.memory_space<smem>>
    %228 = vector.broadcast %223 : f32 to vector<48x128xf32>
    %229 = arith.mulf %219, %228 : vector<48x128xf32>
    %230 = arith.mulf %216, %216 : vector<48x128xf32>
    %231 = vector.broadcast %227 : f32 to vector<48x128xf32>
    %232 = arith.mulf %230, %231 : vector<48x128xf32>
    %233 = arith.subf %229, %232 : vector<48x128xf32>
    %234 = arith.addf %201, %233 : vector<48x128xf32>
    %c0_94 = arith.constant 0 : index
    %c7 = arith.constant 7 : index
    %c0_95 = arith.constant 0 : index
    %235 = vector.load %arg3[%c0_94, %c7, %c0_95] : memref<1x16x128xbf16, #tpu.memory_space<vmem>>, vector<1x1x128xbf16>
    %236 = vector.shape_cast %235 : vector<1x1x128xbf16> to vector<1x128xbf16>
    %237 = arith.extf %236 : vector<1x128xbf16> to vector<1x128xf32>
    %c0_96 = arith.constant 0 : index
    %c7_97 = arith.constant 7 : index
    %c0_98 = arith.constant 0 : index
    %c0_99 = arith.constant 0 : index
    %238 = vector.load %arg4[%c0_96, %c7_97, %c0_98, %c0_99] : memref<1x16x48x128xbf16, #tpu.memory_space<vmem>>, vector<1x1x48x128xbf16>
    %239 = vector.shape_cast %238 : vector<1x1x48x128xbf16> to vector<48x128xbf16>
    %240 = arith.extf %239 : vector<48x128xbf16> to vector<48x128xf32>
    %241 = arith.mulf %240, %240 : vector<48x128xf32>
    %c0_100 = arith.constant 0 : index
    %c7_101 = arith.constant 7 : index
    %c0_102 = arith.constant 0 : index
    %c0_103 = arith.constant 0 : index
    %242 = vector.load %arg5[%c0_100, %c7_101, %c0_102, %c0_103] : memref<1x16x48x128xbf16, #tpu.memory_space<vmem>>, vector<1x1x48x128xbf16>
    %243 = vector.shape_cast %242 : vector<1x1x48x128xbf16> to vector<48x128xbf16>
    %244 = arith.extf %243 : vector<48x128xbf16> to vector<48x128xf32>
    %245 = arith.addf %240, %244 : vector<48x128xf32>
    %246 = arith.mulf %244, %244 : vector<48x128xf32>
    %247 = arith.addf %241, %246 : vector<48x128xf32>
    %248 = vector.broadcast %237 : vector<1x128xf32> to vector<48x128xf32>
    %249 = arith.addf %245, %248 : vector<48x128xf32>
    %250 = arith.mulf %237, %237 : vector<1x128xf32>
    %251 = vector.broadcast %250 : vector<1x128xf32> to vector<48x128xf32>
    %252 = arith.addf %247, %251 : vector<48x128xf32>
    %c16_i32_104 = arith.constant 16 : i32
    %253 = arith.muli %arg2, %c16_i32_104 : i32
    %c7_i32 = arith.constant 7 : i32
    %254 = arith.addi %253, %c7_i32 : i32
    %255 = arith.index_cast %254 : i32 to index
    %256 = memref.load %arg7[%255] : memref<64xf32, #tpu.memory_space<smem>>
    %c16_i32_105 = arith.constant 16 : i32
    %257 = arith.muli %arg2, %c16_i32_105 : i32
    %c7_i32_106 = arith.constant 7 : i32
    %258 = arith.addi %257, %c7_i32_106 : i32
    %259 = arith.index_cast %258 : i32 to index
    %260 = memref.load %arg8[%259] : memref<64xf32, #tpu.memory_space<smem>>
    %261 = vector.broadcast %256 : f32 to vector<48x128xf32>
    %262 = arith.mulf %252, %261 : vector<48x128xf32>
    %263 = arith.mulf %249, %249 : vector<48x128xf32>
    %264 = vector.broadcast %260 : f32 to vector<48x128xf32>
    %265 = arith.mulf %263, %264 : vector<48x128xf32>
    %266 = arith.subf %262, %265 : vector<48x128xf32>
    %267 = arith.addf %234, %266 : vector<48x128xf32>
    %c0_107 = arith.constant 0 : index
    %c8 = arith.constant 8 : index
    %c0_108 = arith.constant 0 : index
    %268 = vector.load %arg3[%c0_107, %c8, %c0_108] : memref<1x16x128xbf16, #tpu.memory_space<vmem>>, vector<1x1x128xbf16>
    %269 = vector.shape_cast %268 : vector<1x1x128xbf16> to vector<1x128xbf16>
    %270 = arith.extf %269 : vector<1x128xbf16> to vector<1x128xf32>
    %c0_109 = arith.constant 0 : index
    %c8_110 = arith.constant 8 : index
    %c0_111 = arith.constant 0 : index
    %c0_112 = arith.constant 0 : index
    %271 = vector.load %arg4[%c0_109, %c8_110, %c0_111, %c0_112] : memref<1x16x48x128xbf16, #tpu.memory_space<vmem>>, vector<1x1x48x128xbf16>
    %272 = vector.shape_cast %271 : vector<1x1x48x128xbf16> to vector<48x128xbf16>
    %273 = arith.extf %272 : vector<48x128xbf16> to vector<48x128xf32>
    %274 = arith.mulf %273, %273 : vector<48x128xf32>
    %c0_113 = arith.constant 0 : index
    %c8_114 = arith.constant 8 : index
    %c0_115 = arith.constant 0 : index
    %c0_116 = arith.constant 0 : index
    %275 = vector.load %arg5[%c0_113, %c8_114, %c0_115, %c0_116] : memref<1x16x48x128xbf16, #tpu.memory_space<vmem>>, vector<1x1x48x128xbf16>
    %276 = vector.shape_cast %275 : vector<1x1x48x128xbf16> to vector<48x128xbf16>
    %277 = arith.extf %276 : vector<48x128xbf16> to vector<48x128xf32>
    %278 = arith.addf %273, %277 : vector<48x128xf32>
    %279 = arith.mulf %277, %277 : vector<48x128xf32>
    %280 = arith.addf %274, %279 : vector<48x128xf32>
    %281 = vector.broadcast %270 : vector<1x128xf32> to vector<48x128xf32>
    %282 = arith.addf %278, %281 : vector<48x128xf32>
    %283 = arith.mulf %270, %270 : vector<1x128xf32>
    %284 = vector.broadcast %283 : vector<1x128xf32> to vector<48x128xf32>
    %285 = arith.addf %280, %284 : vector<48x128xf32>
    %c16_i32_117 = arith.constant 16 : i32
    %286 = arith.muli %arg2, %c16_i32_117 : i32
    %c8_i32 = arith.constant 8 : i32
    %287 = arith.addi %286, %c8_i32 : i32
    %288 = arith.index_cast %287 : i32 to index
    %289 = memref.load %arg7[%288] : memref<64xf32, #tpu.memory_space<smem>>
    %c16_i32_118 = arith.constant 16 : i32
    %290 = arith.muli %arg2, %c16_i32_118 : i32
    %c8_i32_119 = arith.constant 8 : i32
    %291 = arith.addi %290, %c8_i32_119 : i32
    %292 = arith.index_cast %291 : i32 to index
    %293 = memref.load %arg8[%292] : memref<64xf32, #tpu.memory_space<smem>>
    %294 = vector.broadcast %289 : f32 to vector<48x128xf32>
    %295 = arith.mulf %285, %294 : vector<48x128xf32>
    %296 = arith.mulf %282, %282 : vector<48x128xf32>
    %297 = vector.broadcast %293 : f32 to vector<48x128xf32>
    %298 = arith.mulf %296, %297 : vector<48x128xf32>
    %299 = arith.subf %295, %298 : vector<48x128xf32>
    %300 = arith.addf %267, %299 : vector<48x128xf32>
    %c0_120 = arith.constant 0 : index
    %c9 = arith.constant 9 : index
    %c0_121 = arith.constant 0 : index
    %301 = vector.load %arg3[%c0_120, %c9, %c0_121] : memref<1x16x128xbf16, #tpu.memory_space<vmem>>, vector<1x1x128xbf16>
    %302 = vector.shape_cast %301 : vector<1x1x128xbf16> to vector<1x128xbf16>
    %303 = arith.extf %302 : vector<1x128xbf16> to vector<1x128xf32>
    %c0_122 = arith.constant 0 : index
    %c9_123 = arith.constant 9 : index
    %c0_124 = arith.constant 0 : index
    %c0_125 = arith.constant 0 : index
    %304 = vector.load %arg4[%c0_122, %c9_123, %c0_124, %c0_125] : memref<1x16x48x128xbf16, #tpu.memory_space<vmem>>, vector<1x1x48x128xbf16>
    %305 = vector.shape_cast %304 : vector<1x1x48x128xbf16> to vector<48x128xbf16>
    %306 = arith.extf %305 : vector<48x128xbf16> to vector<48x128xf32>
    %307 = arith.mulf %306, %306 : vector<48x128xf32>
    %c0_126 = arith.constant 0 : index
    %c9_127 = arith.constant 9 : index
    %c0_128 = arith.constant 0 : index
    %c0_129 = arith.constant 0 : index
    %308 = vector.load %arg5[%c0_126, %c9_127, %c0_128, %c0_129] : memref<1x16x48x128xbf16, #tpu.memory_space<vmem>>, vector<1x1x48x128xbf16>
    %309 = vector.shape_cast %308 : vector<1x1x48x128xbf16> to vector<48x128xbf16>
    %310 = arith.extf %309 : vector<48x128xbf16> to vector<48x128xf32>
    %311 = arith.addf %306, %310 : vector<48x128xf32>
    %312 = arith.mulf %310, %310 : vector<48x128xf32>
    %313 = arith.addf %307, %312 : vector<48x128xf32>
    %314 = vector.broadcast %303 : vector<1x128xf32> to vector<48x128xf32>
    %315 = arith.addf %311, %314 : vector<48x128xf32>
    %316 = arith.mulf %303, %303 : vector<1x128xf32>
    %317 = vector.broadcast %316 : vector<1x128xf32> to vector<48x128xf32>
    %318 = arith.addf %313, %317 : vector<48x128xf32>
    %c16_i32_130 = arith.constant 16 : i32
    %319 = arith.muli %arg2, %c16_i32_130 : i32
    %c9_i32 = arith.constant 9 : i32
    %320 = arith.addi %319, %c9_i32 : i32
    %321 = arith.index_cast %320 : i32 to index
    %322 = memref.load %arg7[%321] : memref<64xf32, #tpu.memory_space<smem>>
    %c16_i32_131 = arith.constant 16 : i32
    %323 = arith.muli %arg2, %c16_i32_131 : i32
    %c9_i32_132 = arith.constant 9 : i32
    %324 = arith.addi %323, %c9_i32_132 : i32
    %325 = arith.index_cast %324 : i32 to index
    %326 = memref.load %arg8[%325] : memref<64xf32, #tpu.memory_space<smem>>
    %327 = vector.broadcast %322 : f32 to vector<48x128xf32>
    %328 = arith.mulf %318, %327 : vector<48x128xf32>
    %329 = arith.mulf %315, %315 : vector<48x128xf32>
    %330 = vector.broadcast %326 : f32 to vector<48x128xf32>
    %331 = arith.mulf %329, %330 : vector<48x128xf32>
    %332 = arith.subf %328, %331 : vector<48x128xf32>
    %333 = arith.addf %300, %332 : vector<48x128xf32>
    %c0_133 = arith.constant 0 : index
    %c10 = arith.constant 10 : index
    %c0_134 = arith.constant 0 : index
    %334 = vector.load %arg3[%c0_133, %c10, %c0_134] : memref<1x16x128xbf16, #tpu.memory_space<vmem>>, vector<1x1x128xbf16>
    %335 = vector.shape_cast %334 : vector<1x1x128xbf16> to vector<1x128xbf16>
    %336 = arith.extf %335 : vector<1x128xbf16> to vector<1x128xf32>
    %c0_135 = arith.constant 0 : index
    %c10_136 = arith.constant 10 : index
    %c0_137 = arith.constant 0 : index
    %c0_138 = arith.constant 0 : index
    %337 = vector.load %arg4[%c0_135, %c10_136, %c0_137, %c0_138] : memref<1x16x48x128xbf16, #tpu.memory_space<vmem>>, vector<1x1x48x128xbf16>
    %338 = vector.shape_cast %337 : vector<1x1x48x128xbf16> to vector<48x128xbf16>
    %339 = arith.extf %338 : vector<48x128xbf16> to vector<48x128xf32>
    %340 = arith.mulf %339, %339 : vector<48x128xf32>
    %c0_139 = arith.constant 0 : index
    %c10_140 = arith.constant 10 : index
    %c0_141 = arith.constant 0 : index
    %c0_142 = arith.constant 0 : index
    %341 = vector.load %arg5[%c0_139, %c10_140, %c0_141, %c0_142] : memref<1x16x48x128xbf16, #tpu.memory_space<vmem>>, vector<1x1x48x128xbf16>
    %342 = vector.shape_cast %341 : vector<1x1x48x128xbf16> to vector<48x128xbf16>
    %343 = arith.extf %342 : vector<48x128xbf16> to vector<48x128xf32>
    %344 = arith.addf %339, %343 : vector<48x128xf32>
    %345 = arith.mulf %343, %343 : vector<48x128xf32>
    %346 = arith.addf %340, %345 : vector<48x128xf32>
    %347 = vector.broadcast %336 : vector<1x128xf32> to vector<48x128xf32>
    %348 = arith.addf %344, %347 : vector<48x128xf32>
    %349 = arith.mulf %336, %336 : vector<1x128xf32>
    %350 = vector.broadcast %349 : vector<1x128xf32> to vector<48x128xf32>
    %351 = arith.addf %346, %350 : vector<48x128xf32>
    %c16_i32_143 = arith.constant 16 : i32
    %352 = arith.muli %arg2, %c16_i32_143 : i32
    %c10_i32 = arith.constant 10 : i32
    %353 = arith.addi %352, %c10_i32 : i32
    %354 = arith.index_cast %353 : i32 to index
    %355 = memref.load %arg7[%354] : memref<64xf32, #tpu.memory_space<smem>>
    %c16_i32_144 = arith.constant 16 : i32
    %356 = arith.muli %arg2, %c16_i32_144 : i32
    %c10_i32_145 = arith.constant 10 : i32
    %357 = arith.addi %356, %c10_i32_145 : i32
    %358 = arith.index_cast %357 : i32 to index
    %359 = memref.load %arg8[%358] : memref<64xf32, #tpu.memory_space<smem>>
    %360 = vector.broadcast %355 : f32 to vector<48x128xf32>
    %361 = arith.mulf %351, %360 : vector<48x128xf32>
    %362 = arith.mulf %348, %348 : vector<48x128xf32>
    %363 = vector.broadcast %359 : f32 to vector<48x128xf32>
    %364 = arith.mulf %362, %363 : vector<48x128xf32>
    %365 = arith.subf %361, %364 : vector<48x128xf32>
    %366 = arith.addf %333, %365 : vector<48x128xf32>
    %c0_146 = arith.constant 0 : index
    %c11 = arith.constant 11 : index
    %c0_147 = arith.constant 0 : index
    %367 = vector.load %arg3[%c0_146, %c11, %c0_147] : memref<1x16x128xbf16, #tpu.memory_space<vmem>>, vector<1x1x128xbf16>
    %368 = vector.shape_cast %367 : vector<1x1x128xbf16> to vector<1x128xbf16>
    %369 = arith.extf %368 : vector<1x128xbf16> to vector<1x128xf32>
    %c0_148 = arith.constant 0 : index
    %c11_149 = arith.constant 11 : index
    %c0_150 = arith.constant 0 : index
    %c0_151 = arith.constant 0 : index
    %370 = vector.load %arg4[%c0_148, %c11_149, %c0_150, %c0_151] : memref<1x16x48x128xbf16, #tpu.memory_space<vmem>>, vector<1x1x48x128xbf16>
    %371 = vector.shape_cast %370 : vector<1x1x48x128xbf16> to vector<48x128xbf16>
    %372 = arith.extf %371 : vector<48x128xbf16> to vector<48x128xf32>
    %373 = arith.mulf %372, %372 : vector<48x128xf32>
    %c0_152 = arith.constant 0 : index
    %c11_153 = arith.constant 11 : index
    %c0_154 = arith.constant 0 : index
    %c0_155 = arith.constant 0 : index
    %374 = vector.load %arg5[%c0_152, %c11_153, %c0_154, %c0_155] : memref<1x16x48x128xbf16, #tpu.memory_space<vmem>>, vector<1x1x48x128xbf16>
    %375 = vector.shape_cast %374 : vector<1x1x48x128xbf16> to vector<48x128xbf16>
    %376 = arith.extf %375 : vector<48x128xbf16> to vector<48x128xf32>
    %377 = arith.addf %372, %376 : vector<48x128xf32>
    %378 = arith.mulf %376, %376 : vector<48x128xf32>
    %379 = arith.addf %373, %378 : vector<48x128xf32>
    %380 = vector.broadcast %369 : vector<1x128xf32> to vector<48x128xf32>
    %381 = arith.addf %377, %380 : vector<48x128xf32>
    %382 = arith.mulf %369, %369 : vector<1x128xf32>
    %383 = vector.broadcast %382 : vector<1x128xf32> to vector<48x128xf32>
    %384 = arith.addf %379, %383 : vector<48x128xf32>
    %c16_i32_156 = arith.constant 16 : i32
    %385 = arith.muli %arg2, %c16_i32_156 : i32
    %c11_i32 = arith.constant 11 : i32
    %386 = arith.addi %385, %c11_i32 : i32
    %387 = arith.index_cast %386 : i32 to index
    %388 = memref.load %arg7[%387] : memref<64xf32, #tpu.memory_space<smem>>
    %c16_i32_157 = arith.constant 16 : i32
    %389 = arith.muli %arg2, %c16_i32_157 : i32
    %c11_i32_158 = arith.constant 11 : i32
    %390 = arith.addi %389, %c11_i32_158 : i32
    %391 = arith.index_cast %390 : i32 to index
    %392 = memref.load %arg8[%391] : memref<64xf32, #tpu.memory_space<smem>>
    %393 = vector.broadcast %388 : f32 to vector<48x128xf32>
    %394 = arith.mulf %384, %393 : vector<48x128xf32>
    %395 = arith.mulf %381, %381 : vector<48x128xf32>
    %396 = vector.broadcast %392 : f32 to vector<48x128xf32>
    %397 = arith.mulf %395, %396 : vector<48x128xf32>
    %398 = arith.subf %394, %397 : vector<48x128xf32>
    %399 = arith.addf %366, %398 : vector<48x128xf32>
    %c0_159 = arith.constant 0 : index
    %c12 = arith.constant 12 : index
    %c0_160 = arith.constant 0 : index
    %400 = vector.load %arg3[%c0_159, %c12, %c0_160] : memref<1x16x128xbf16, #tpu.memory_space<vmem>>, vector<1x1x128xbf16>
    %401 = vector.shape_cast %400 : vector<1x1x128xbf16> to vector<1x128xbf16>
    %402 = arith.extf %401 : vector<1x128xbf16> to vector<1x128xf32>
    %c0_161 = arith.constant 0 : index
    %c12_162 = arith.constant 12 : index
    %c0_163 = arith.constant 0 : index
    %c0_164 = arith.constant 0 : index
    %403 = vector.load %arg4[%c0_161, %c12_162, %c0_163, %c0_164] : memref<1x16x48x128xbf16, #tpu.memory_space<vmem>>, vector<1x1x48x128xbf16>
    %404 = vector.shape_cast %403 : vector<1x1x48x128xbf16> to vector<48x128xbf16>
    %405 = arith.extf %404 : vector<48x128xbf16> to vector<48x128xf32>
    %406 = arith.mulf %405, %405 : vector<48x128xf32>
    %c0_165 = arith.constant 0 : index
    %c12_166 = arith.constant 12 : index
    %c0_167 = arith.constant 0 : index
    %c0_168 = arith.constant 0 : index
    %407 = vector.load %arg5[%c0_165, %c12_166, %c0_167, %c0_168] : memref<1x16x48x128xbf16, #tpu.memory_space<vmem>>, vector<1x1x48x128xbf16>
    %408 = vector.shape_cast %407 : vector<1x1x48x128xbf16> to vector<48x128xbf16>
    %409 = arith.extf %408 : vector<48x128xbf16> to vector<48x128xf32>
    %410 = arith.addf %405, %409 : vector<48x128xf32>
    %411 = arith.mulf %409, %409 : vector<48x128xf32>
    %412 = arith.addf %406, %411 : vector<48x128xf32>
    %413 = vector.broadcast %402 : vector<1x128xf32> to vector<48x128xf32>
    %414 = arith.addf %410, %413 : vector<48x128xf32>
    %415 = arith.mulf %402, %402 : vector<1x128xf32>
    %416 = vector.broadcast %415 : vector<1x128xf32> to vector<48x128xf32>
    %417 = arith.addf %412, %416 : vector<48x128xf32>
    %c16_i32_169 = arith.constant 16 : i32
    %418 = arith.muli %arg2, %c16_i32_169 : i32
    %c12_i32 = arith.constant 12 : i32
    %419 = arith.addi %418, %c12_i32 : i32
    %420 = arith.index_cast %419 : i32 to index
    %421 = memref.load %arg7[%420] : memref<64xf32, #tpu.memory_space<smem>>
    %c16_i32_170 = arith.constant 16 : i32
    %422 = arith.muli %arg2, %c16_i32_170 : i32
    %c12_i32_171 = arith.constant 12 : i32
    %423 = arith.addi %422, %c12_i32_171 : i32
    %424 = arith.index_cast %423 : i32 to index
    %425 = memref.load %arg8[%424] : memref<64xf32, #tpu.memory_space<smem>>
    %426 = vector.broadcast %421 : f32 to vector<48x128xf32>
    %427 = arith.mulf %417, %426 : vector<48x128xf32>
    %428 = arith.mulf %414, %414 : vector<48x128xf32>
    %429 = vector.broadcast %425 : f32 to vector<48x128xf32>
    %430 = arith.mulf %428, %429 : vector<48x128xf32>
    %431 = arith.subf %427, %430 : vector<48x128xf32>
    %432 = arith.addf %399, %431 : vector<48x128xf32>
    %c0_172 = arith.constant 0 : index
    %c13 = arith.constant 13 : index
    %c0_173 = arith.constant 0 : index
    %433 = vector.load %arg3[%c0_172, %c13, %c0_173] : memref<1x16x128xbf16, #tpu.memory_space<vmem>>, vector<1x1x128xbf16>
    %434 = vector.shape_cast %433 : vector<1x1x128xbf16> to vector<1x128xbf16>
    %435 = arith.extf %434 : vector<1x128xbf16> to vector<1x128xf32>
    %c0_174 = arith.constant 0 : index
    %c13_175 = arith.constant 13 : index
    %c0_176 = arith.constant 0 : index
    %c0_177 = arith.constant 0 : index
    %436 = vector.load %arg4[%c0_174, %c13_175, %c0_176, %c0_177] : memref<1x16x48x128xbf16, #tpu.memory_space<vmem>>, vector<1x1x48x128xbf16>
    %437 = vector.shape_cast %436 : vector<1x1x48x128xbf16> to vector<48x128xbf16>
    %438 = arith.extf %437 : vector<48x128xbf16> to vector<48x128xf32>
    %439 = arith.mulf %438, %438 : vector<48x128xf32>
    %c0_178 = arith.constant 0 : index
    %c13_179 = arith.constant 13 : index
    %c0_180 = arith.constant 0 : index
    %c0_181 = arith.constant 0 : index
    %440 = vector.load %arg5[%c0_178, %c13_179, %c0_180, %c0_181] : memref<1x16x48x128xbf16, #tpu.memory_space<vmem>>, vector<1x1x48x128xbf16>
    %441 = vector.shape_cast %440 : vector<1x1x48x128xbf16> to vector<48x128xbf16>
    %442 = arith.extf %441 : vector<48x128xbf16> to vector<48x128xf32>
    %443 = arith.addf %438, %442 : vector<48x128xf32>
    %444 = arith.mulf %442, %442 : vector<48x128xf32>
    %445 = arith.addf %439, %444 : vector<48x128xf32>
    %446 = vector.broadcast %435 : vector<1x128xf32> to vector<48x128xf32>
    %447 = arith.addf %443, %446 : vector<48x128xf32>
    %448 = arith.mulf %435, %435 : vector<1x128xf32>
    %449 = vector.broadcast %448 : vector<1x128xf32> to vector<48x128xf32>
    %450 = arith.addf %445, %449 : vector<48x128xf32>
    %c16_i32_182 = arith.constant 16 : i32
    %451 = arith.muli %arg2, %c16_i32_182 : i32
    %c13_i32 = arith.constant 13 : i32
    %452 = arith.addi %451, %c13_i32 : i32
    %453 = arith.index_cast %452 : i32 to index
    %454 = memref.load %arg7[%453] : memref<64xf32, #tpu.memory_space<smem>>
    %c16_i32_183 = arith.constant 16 : i32
    %455 = arith.muli %arg2, %c16_i32_183 : i32
    %c13_i32_184 = arith.constant 13 : i32
    %456 = arith.addi %455, %c13_i32_184 : i32
    %457 = arith.index_cast %456 : i32 to index
    %458 = memref.load %arg8[%457] : memref<64xf32, #tpu.memory_space<smem>>
    %459 = vector.broadcast %454 : f32 to vector<48x128xf32>
    %460 = arith.mulf %450, %459 : vector<48x128xf32>
    %461 = arith.mulf %447, %447 : vector<48x128xf32>
    %462 = vector.broadcast %458 : f32 to vector<48x128xf32>
    %463 = arith.mulf %461, %462 : vector<48x128xf32>
    %464 = arith.subf %460, %463 : vector<48x128xf32>
    %465 = arith.addf %432, %464 : vector<48x128xf32>
    %c0_185 = arith.constant 0 : index
    %c14 = arith.constant 14 : index
    %c0_186 = arith.constant 0 : index
    %466 = vector.load %arg3[%c0_185, %c14, %c0_186] : memref<1x16x128xbf16, #tpu.memory_space<vmem>>, vector<1x1x128xbf16>
    %467 = vector.shape_cast %466 : vector<1x1x128xbf16> to vector<1x128xbf16>
    %468 = arith.extf %467 : vector<1x128xbf16> to vector<1x128xf32>
    %c0_187 = arith.constant 0 : index
    %c14_188 = arith.constant 14 : index
    %c0_189 = arith.constant 0 : index
    %c0_190 = arith.constant 0 : index
    %469 = vector.load %arg4[%c0_187, %c14_188, %c0_189, %c0_190] : memref<1x16x48x128xbf16, #tpu.memory_space<vmem>>, vector<1x1x48x128xbf16>
    %470 = vector.shape_cast %469 : vector<1x1x48x128xbf16> to vector<48x128xbf16>
    %471 = arith.extf %470 : vector<48x128xbf16> to vector<48x128xf32>
    %472 = arith.mulf %471, %471 : vector<48x128xf32>
    %c0_191 = arith.constant 0 : index
    %c14_192 = arith.constant 14 : index
    %c0_193 = arith.constant 0 : index
    %c0_194 = arith.constant 0 : index
    %473 = vector.load %arg5[%c0_191, %c14_192, %c0_193, %c0_194] : memref<1x16x48x128xbf16, #tpu.memory_space<vmem>>, vector<1x1x48x128xbf16>
    %474 = vector.shape_cast %473 : vector<1x1x48x128xbf16> to vector<48x128xbf16>
    %475 = arith.extf %474 : vector<48x128xbf16> to vector<48x128xf32>
    %476 = arith.addf %471, %475 : vector<48x128xf32>
    %477 = arith.mulf %475, %475 : vector<48x128xf32>
    %478 = arith.addf %472, %477 : vector<48x128xf32>
    %479 = vector.broadcast %468 : vector<1x128xf32> to vector<48x128xf32>
    %480 = arith.addf %476, %479 : vector<48x128xf32>
    %481 = arith.mulf %468, %468 : vector<1x128xf32>
    %482 = vector.broadcast %481 : vector<1x128xf32> to vector<48x128xf32>
    %483 = arith.addf %478, %482 : vector<48x128xf32>
    %c16_i32_195 = arith.constant 16 : i32
    %484 = arith.muli %arg2, %c16_i32_195 : i32
    %c14_i32 = arith.constant 14 : i32
    %485 = arith.addi %484, %c14_i32 : i32
    %486 = arith.index_cast %485 : i32 to index
    %487 = memref.load %arg7[%486] : memref<64xf32, #tpu.memory_space<smem>>
    %c16_i32_196 = arith.constant 16 : i32
    %488 = arith.muli %arg2, %c16_i32_196 : i32
    %c14_i32_197 = arith.constant 14 : i32
    %489 = arith.addi %488, %c14_i32_197 : i32
    %490 = arith.index_cast %489 : i32 to index
    %491 = memref.load %arg8[%490] : memref<64xf32, #tpu.memory_space<smem>>
    %492 = vector.broadcast %487 : f32 to vector<48x128xf32>
    %493 = arith.mulf %483, %492 : vector<48x128xf32>
    %494 = arith.mulf %480, %480 : vector<48x128xf32>
    %495 = vector.broadcast %491 : f32 to vector<48x128xf32>
    %496 = arith.mulf %494, %495 : vector<48x128xf32>
    %497 = arith.subf %493, %496 : vector<48x128xf32>
    %498 = arith.addf %465, %497 : vector<48x128xf32>
    %c0_198 = arith.constant 0 : index
    %c15 = arith.constant 15 : index
    %c0_199 = arith.constant 0 : index
    %499 = vector.load %arg3[%c0_198, %c15, %c0_199] : memref<1x16x128xbf16, #tpu.memory_space<vmem>>, vector<1x1x128xbf16>
    %500 = vector.shape_cast %499 : vector<1x1x128xbf16> to vector<1x128xbf16>
    %501 = arith.extf %500 : vector<1x128xbf16> to vector<1x128xf32>
    %c0_200 = arith.constant 0 : index
    %c15_201 = arith.constant 15 : index
    %c0_202 = arith.constant 0 : index
    %c0_203 = arith.constant 0 : index
    %502 = vector.load %arg4[%c0_200, %c15_201, %c0_202, %c0_203] : memref<1x16x48x128xbf16, #tpu.memory_space<vmem>>, vector<1x1x48x128xbf16>
    %503 = vector.shape_cast %502 : vector<1x1x48x128xbf16> to vector<48x128xbf16>
    %504 = arith.extf %503 : vector<48x128xbf16> to vector<48x128xf32>
    %505 = arith.mulf %504, %504 : vector<48x128xf32>
    %c0_204 = arith.constant 0 : index
    %c15_205 = arith.constant 15 : index
    %c0_206 = arith.constant 0 : index
    %c0_207 = arith.constant 0 : index
    %506 = vector.load %arg5[%c0_204, %c15_205, %c0_206, %c0_207] : memref<1x16x48x128xbf16, #tpu.memory_space<vmem>>, vector<1x1x48x128xbf16>
    %507 = vector.shape_cast %506 : vector<1x1x48x128xbf16> to vector<48x128xbf16>
    %508 = arith.extf %507 : vector<48x128xbf16> to vector<48x128xf32>
    %509 = arith.addf %504, %508 : vector<48x128xf32>
    %510 = arith.mulf %508, %508 : vector<48x128xf32>
    %511 = arith.addf %505, %510 : vector<48x128xf32>
    %512 = vector.broadcast %501 : vector<1x128xf32> to vector<48x128xf32>
    %513 = arith.addf %509, %512 : vector<48x128xf32>
    %514 = arith.mulf %501, %501 : vector<1x128xf32>
    %515 = vector.broadcast %514 : vector<1x128xf32> to vector<48x128xf32>
    %516 = arith.addf %511, %515 : vector<48x128xf32>
    %c16_i32_208 = arith.constant 16 : i32
    %517 = arith.muli %arg2, %c16_i32_208 : i32
    %c15_i32 = arith.constant 15 : i32
    %518 = arith.addi %517, %c15_i32 : i32
    %519 = arith.index_cast %518 : i32 to index
    %520 = memref.load %arg7[%519] : memref<64xf32, #tpu.memory_space<smem>>
    %c16_i32_209 = arith.constant 16 : i32
    %521 = arith.muli %arg2, %c16_i32_209 : i32
    %c15_i32_210 = arith.constant 15 : i32
    %522 = arith.addi %521, %c15_i32_210 : i32
    %523 = arith.index_cast %522 : i32 to index
    %524 = memref.load %arg8[%523] : memref<64xf32, #tpu.memory_space<smem>>
    %525 = vector.broadcast %520 : f32 to vector<48x128xf32>
    %526 = arith.mulf %516, %525 : vector<48x128xf32>
    %527 = arith.mulf %513, %513 : vector<48x128xf32>
    %528 = vector.broadcast %524 : f32 to vector<48x128xf32>
    %529 = arith.mulf %527, %528 : vector<48x128xf32>
    %530 = arith.subf %526, %529 : vector<48x128xf32>
    %531 = arith.addf %498, %530 : vector<48x128xf32>
    %c0_211 = arith.constant 0 : index
    %c0_212 = arith.constant 0 : index
    %532 = vector.load %arg11[%c0_211, %c0_212] : memref<48x128xf32, #tpu.memory_space<vmem>>, vector<48x128xf32>
    tpu.vector_store %arg11[%c0_211, %c0_212], %531 {strides = array<i32>} : memref<48x128xf32, #tpu.memory_space<vmem>>, vector<48x128xf32>,
    %c3_i32_213 = arith.constant 3 : i32
    %533 = arith.cmpi eq, %arg2, %c3_i32_213 : i32
    %534 = arith.extui %533 : i1 to i32
    %c0_i32_214 = arith.constant 0 : i32
    %535 = arith.cmpi ne, %534, %c0_i32_214 : i32
    scf.if %535 {
      %c0_215 = arith.constant 0 : index
      %c0_216 = arith.constant 0 : index
      %536 = vector.load %arg11[%c0_215, %c0_216] : memref<48x128xf32, #tpu.memory_space<vmem>>, vector<48x128xf32>
      %cst = arith.constant dense<0xFF800000> : vector<128xf32>
      %537 = vector.multi_reduction <maximumf>, %536, %cst [0] : vector<48x128xf32> to vector<128xf32>
      %538 = vector.shape_cast %537 : vector<128xf32> to vector<1x128xf32>
      %539 = vector.broadcast %538 : vector<1x128xf32> to vector<48x128xf32>
      %540 = arith.subf %536, %539 : vector<48x128xf32>
      %541 = math.exp %540 : vector<48x128xf32>
      %cst_217 = arith.constant dense<0.000000e+00> : vector<128xf32>
      %542 = vector.multi_reduction <add>, %541, %cst_217 [0] : vector<48x128xf32> to vector<128xf32>
      %543 = vector.shape_cast %542 : vector<128xf32> to vector<1x128xf32>
      %c0_218 = arith.constant 0 : index
      %c0_219 = arith.constant 0 : index
      %c0_220 = arith.constant 0 : index
      %544 = vector.load %arg6[%c0_218, %c0_219, %c0_220] : memref<1x48x128xf32, #tpu.memory_space<vmem>>, vector<1x48x128xf32>
      %545 = vector.shape_cast %544 : vector<1x48x128xf32> to vector<48x128xf32>
      %546 = arith.mulf %541, %545 : vector<48x128xf32>
      %cst_221 = arith.constant dense<0.000000e+00> : vector<128xf32>
      %547 = vector.multi_reduction <add>, %546, %cst_221 [0] : vector<48x128xf32> to vector<128xf32>
      %548 = vector.shape_cast %547 : vector<128xf32> to vector<1x128xf32>
      %cst_222 = arith.constant dense<0xFF800000> : vector<128xf32>
      %549 = vector.multi_reduction <maximumf>, %541, %cst_222 [0] : vector<48x128xf32> to vector<128xf32>
      %550 = vector.shape_cast %549 : vector<128xf32> to vector<1x128xf32>
      %551 = tpu.reciprocal %543 {approx = true} : vector<1x128xf32> -> vector<1x128xf32>
      %552 = arith.mulf %548, %551 : vector<1x128xf32>
      %553 = vector.shape_cast %552 : vector<1x128xf32> to vector<1x1x128xf32>
      %c0_223 = arith.constant 0 : index
      %c0_224 = arith.constant 0 : index
      %c0_225 = arith.constant 0 : index
      %554 = vector.load %arg9[%c0_223, %c0_224, %c0_225] : memref<1x1x128xf32, #tpu.memory_space<vmem>>, vector<1x1x128xf32>
      tpu.vector_store %arg9[%c0_223, %c0_224, %c0_225], %553 {strides = array<i32>} : memref<1x1x128xf32, #tpu.memory_space<vmem>>, vector<1x1x128xf32>,
      %555 = arith.mulf %550, %551 : vector<1x128xf32>
      %556 = vector.shape_cast %555 : vector<1x128xf32> to vector<1x1x128xf32>
      %c0_226 = arith.constant 0 : index
      %c0_227 = arith.constant 0 : index
      %c0_228 = arith.constant 0 : index
      %557 = vector.load %arg10[%c0_226, %c0_227, %c0_228] : memref<1x1x128xf32, #tpu.memory_space<vmem>>, vector<1x1x128xf32>
      tpu.vector_store %arg10[%c0_226, %c0_227, %c0_228], %556 {strides = array<i32>} : memref<1x1x128xf32, #tpu.memory_space<vmem>>, vector<1x1x128xf32>,
    } else {
    }
    return
  }
  func.func @transform_0(%arg0: i32, %arg1: i32, %arg2: i32) -> (i32, i32, i32) {
    %c0_i32 = arith.constant 0 : i32
    return %arg0, %arg2, %arg1 : i32, i32, i32
  }
  func.func @transform_1(%arg0: i32, %arg1: i32, %arg2: i32) -> (i32, i32, i32, i32) {
    %c0_i32 = arith.constant 0 : i32
    %c0_i32_0 = arith.constant 0 : i32
    return %arg0, %arg2, %c0_i32, %arg1 : i32, i32, i32, i32
  }
  func.func @transform_2(%arg0: i32, %arg1: i32, %arg2: i32) -> (i32, i32, i32, i32) {
    %c0_i32 = arith.constant 0 : i32
    %c0_i32_0 = arith.constant 0 : i32
    return %arg0, %arg2, %c0_i32, %arg1 : i32, i32, i32, i32
  }
  func.func @transform_3(%arg0: i32, %arg1: i32, %arg2: i32) -> (i32, i32, i32) {
    %c0_i32 = arith.constant 0 : i32
    %c0_i32_0 = arith.constant 0 : i32
    return %arg0, %c0_i32, %arg1 : i32, i32, i32
  }
  func.func @transform_4(%arg0: i32, %arg1: i32, %arg2: i32) -> i32 {
    %c0_i32 = arith.constant 0 : i32
    %c0_i32_0 = arith.constant 0 : i32
    return %c0_i32 : i32
  }
  func.func @transform_5(%arg0: i32, %arg1: i32, %arg2: i32) -> i32 {
    %c0_i32 = arith.constant 0 : i32
    %c0_i32_0 = arith.constant 0 : i32
    return %c0_i32 : i32
  }
  func.func @transform_6(%arg0: i32, %arg1: i32, %arg2: i32) -> (i32, i32, i32) {
    %c0_i32 = arith.constant 0 : i32
    %c0_i32_0 = arith.constant 0 : i32
    return %arg0, %c0_i32, %arg1 : i32, i32, i32
  }
  func.func @transform_7(%arg0: i32, %arg1: i32, %arg2: i32) -> (i32, i32, i32) {
    %c0_i32 = arith.constant 0 : i32
    %c0_i32_0 = arith.constant 0 : i32
    return %arg0, %c0_i32, %arg1 : i32, i32, i32
  }
}

module attributes {stable_mosaic.version = 11 : i64} {
  func.func @_cost_volume_kernel(%arg0: i32, %arg1: i32, %arg2: i32, %arg3: memref<1x16x128xbf16, #tpu.memory_space<vmem>>, %arg4: memref<1x16x32x128xbf16, #tpu.memory_space<vmem>>, %arg5: memref<1x16x32x128xbf16, #tpu.memory_space<vmem>>, %arg6: memref<1x32x128xf32, #tpu.memory_space<vmem>>, %arg7: memref<32xf32, #tpu.memory_space<smem>>, %arg8: memref<32xf32, #tpu.memory_space<smem>>, %arg9: memref<1x1x128xf32, #tpu.memory_space<vmem>>, %arg10: memref<1x1x128xf32, #tpu.memory_space<vmem>>, %arg11: memref<32x128xf32, #tpu.memory_space<vmem>>) attributes {dimension_semantics = [#tpu.dimension_semantics<parallel>, #tpu.dimension_semantics<parallel>, #tpu.dimension_semantics<arbitrary>], iteration_bounds = array<i64: 2, 1, 2>, scalar_prefetch = 0 : i64, scratch_operands = 1 : i64, tpu.core_type = #tpu.core_type<tc>, window_params = [{transform_indices = @transform_0, window_bounds = array<i64: 1, 16, 128>}, {transform_indices = @transform_1, window_bounds = array<i64: 1, 16, 32, 128>}, {transform_indices = @transform_2, window_bounds = array<i64: 1, 16, 32, 128>}, {transform_indices = @transform_3, window_bounds = array<i64: 1, 32, 128>}, {transform_indices = @transform_4, window_bounds = array<i64: 32>}, {transform_indices = @transform_5, window_bounds = array<i64: 32>}, {transform_indices = @transform_6, window_bounds = array<i64: 1, 1, 128>}, {transform_indices = @transform_7, window_bounds = array<i64: 1, 1, 128>}]} {
    %c0_i32 = arith.constant 0 : i32
    %0 = arith.cmpi eq, %arg2, %c0_i32 : i32
    %1 = arith.extui %0 : i1 to i32
    %c0_i32_0 = arith.constant 0 : i32
    %2 = arith.cmpi ne, %1, %c0_i32_0 : i32
    scf.if %2 {
      %cst = arith.constant 0.000000e+00 : f32
      %536 = vector.broadcast %cst : f32 to vector<32x128xf32>
      %c0_215 = arith.constant 0 : index
      %c0_216 = arith.constant 0 : index
      %537 = vector.load %arg11[%c0_215, %c0_216] : memref<32x128xf32, #tpu.memory_space<vmem>>, vector<32x128xf32>
      tpu.vector_store %arg11[%c0_215, %c0_216], %536 {strides = array<i32>} : memref<32x128xf32, #tpu.memory_space<vmem>>, vector<32x128xf32>,
    } else {
    }
    %c0 = arith.constant 0 : index
    %c0_1 = arith.constant 0 : index
    %3 = vector.load %arg11[%c0, %c0_1] : memref<32x128xf32, #tpu.memory_space<vmem>>, vector<32x128xf32>
    %c0_2 = arith.constant 0 : index
    %c0_3 = arith.constant 0 : index
    %c0_4 = arith.constant 0 : index
    %4 = vector.load %arg3[%c0_2, %c0_3, %c0_4] : memref<1x16x128xbf16, #tpu.memory_space<vmem>>, vector<1x1x128xbf16>
    %5 = vector.shape_cast %4 : vector<1x1x128xbf16> to vector<1x128xbf16>
    %6 = arith.extf %5 : vector<1x128xbf16> to vector<1x128xf32>
    %c0_5 = arith.constant 0 : index
    %c0_6 = arith.constant 0 : index
    %c0_7 = arith.constant 0 : index
    %c0_8 = arith.constant 0 : index
    %7 = vector.load %arg4[%c0_5, %c0_6, %c0_7, %c0_8] : memref<1x16x32x128xbf16, #tpu.memory_space<vmem>>, vector<1x1x32x128xbf16>
    %8 = vector.shape_cast %7 : vector<1x1x32x128xbf16> to vector<32x128xbf16>
    %9 = arith.extf %8 : vector<32x128xbf16> to vector<32x128xf32>
    %10 = arith.mulf %9, %9 : vector<32x128xf32>
    %c0_9 = arith.constant 0 : index
    %c0_10 = arith.constant 0 : index
    %c0_11 = arith.constant 0 : index
    %c0_12 = arith.constant 0 : index
    %11 = vector.load %arg5[%c0_9, %c0_10, %c0_11, %c0_12] : memref<1x16x32x128xbf16, #tpu.memory_space<vmem>>, vector<1x1x32x128xbf16>
    %12 = vector.shape_cast %11 : vector<1x1x32x128xbf16> to vector<32x128xbf16>
    %13 = arith.extf %12 : vector<32x128xbf16> to vector<32x128xf32>
    %14 = arith.addf %9, %13 : vector<32x128xf32>
    %15 = arith.mulf %13, %13 : vector<32x128xf32>
    %16 = arith.addf %10, %15 : vector<32x128xf32>
    %17 = vector.broadcast %6 : vector<1x128xf32> to vector<32x128xf32>
    %18 = arith.addf %14, %17 : vector<32x128xf32>
    %19 = arith.mulf %6, %6 : vector<1x128xf32>
    %20 = vector.broadcast %19 : vector<1x128xf32> to vector<32x128xf32>
    %21 = arith.addf %16, %20 : vector<32x128xf32>
    %c16_i32 = arith.constant 16 : i32
    %22 = arith.muli %arg2, %c16_i32 : i32
    %c0_i32_13 = arith.constant 0 : i32
    %23 = arith.addi %22, %c0_i32_13 : i32
    %24 = arith.index_cast %23 : i32 to index
    %25 = memref.load %arg7[%24] : memref<32xf32, #tpu.memory_space<smem>>
    %c16_i32_14 = arith.constant 16 : i32
    %26 = arith.muli %arg2, %c16_i32_14 : i32
    %c0_i32_15 = arith.constant 0 : i32
    %27 = arith.addi %26, %c0_i32_15 : i32
    %28 = arith.index_cast %27 : i32 to index
    %29 = memref.load %arg8[%28] : memref<32xf32, #tpu.memory_space<smem>>
    %30 = vector.broadcast %25 : f32 to vector<32x128xf32>
    %31 = arith.mulf %21, %30 : vector<32x128xf32>
    %32 = arith.mulf %18, %18 : vector<32x128xf32>
    %33 = vector.broadcast %29 : f32 to vector<32x128xf32>
    %34 = arith.mulf %32, %33 : vector<32x128xf32>
    %35 = arith.subf %31, %34 : vector<32x128xf32>
    %36 = arith.addf %3, %35 : vector<32x128xf32>
    %c0_16 = arith.constant 0 : index
    %c1 = arith.constant 1 : index
    %c0_17 = arith.constant 0 : index
    %37 = vector.load %arg3[%c0_16, %c1, %c0_17] : memref<1x16x128xbf16, #tpu.memory_space<vmem>>, vector<1x1x128xbf16>
    %38 = vector.shape_cast %37 : vector<1x1x128xbf16> to vector<1x128xbf16>
    %39 = arith.extf %38 : vector<1x128xbf16> to vector<1x128xf32>
    %c0_18 = arith.constant 0 : index
    %c1_19 = arith.constant 1 : index
    %c0_20 = arith.constant 0 : index
    %c0_21 = arith.constant 0 : index
    %40 = vector.load %arg4[%c0_18, %c1_19, %c0_20, %c0_21] : memref<1x16x32x128xbf16, #tpu.memory_space<vmem>>, vector<1x1x32x128xbf16>
    %41 = vector.shape_cast %40 : vector<1x1x32x128xbf16> to vector<32x128xbf16>
    %42 = arith.extf %41 : vector<32x128xbf16> to vector<32x128xf32>
    %43 = arith.mulf %42, %42 : vector<32x128xf32>
    %c0_22 = arith.constant 0 : index
    %c1_23 = arith.constant 1 : index
    %c0_24 = arith.constant 0 : index
    %c0_25 = arith.constant 0 : index
    %44 = vector.load %arg5[%c0_22, %c1_23, %c0_24, %c0_25] : memref<1x16x32x128xbf16, #tpu.memory_space<vmem>>, vector<1x1x32x128xbf16>
    %45 = vector.shape_cast %44 : vector<1x1x32x128xbf16> to vector<32x128xbf16>
    %46 = arith.extf %45 : vector<32x128xbf16> to vector<32x128xf32>
    %47 = arith.addf %42, %46 : vector<32x128xf32>
    %48 = arith.mulf %46, %46 : vector<32x128xf32>
    %49 = arith.addf %43, %48 : vector<32x128xf32>
    %50 = vector.broadcast %39 : vector<1x128xf32> to vector<32x128xf32>
    %51 = arith.addf %47, %50 : vector<32x128xf32>
    %52 = arith.mulf %39, %39 : vector<1x128xf32>
    %53 = vector.broadcast %52 : vector<1x128xf32> to vector<32x128xf32>
    %54 = arith.addf %49, %53 : vector<32x128xf32>
    %c16_i32_26 = arith.constant 16 : i32
    %55 = arith.muli %arg2, %c16_i32_26 : i32
    %c1_i32 = arith.constant 1 : i32
    %56 = arith.addi %55, %c1_i32 : i32
    %57 = arith.index_cast %56 : i32 to index
    %58 = memref.load %arg7[%57] : memref<32xf32, #tpu.memory_space<smem>>
    %c16_i32_27 = arith.constant 16 : i32
    %59 = arith.muli %arg2, %c16_i32_27 : i32
    %c1_i32_28 = arith.constant 1 : i32
    %60 = arith.addi %59, %c1_i32_28 : i32
    %61 = arith.index_cast %60 : i32 to index
    %62 = memref.load %arg8[%61] : memref<32xf32, #tpu.memory_space<smem>>
    %63 = vector.broadcast %58 : f32 to vector<32x128xf32>
    %64 = arith.mulf %54, %63 : vector<32x128xf32>
    %65 = arith.mulf %51, %51 : vector<32x128xf32>
    %66 = vector.broadcast %62 : f32 to vector<32x128xf32>
    %67 = arith.mulf %65, %66 : vector<32x128xf32>
    %68 = arith.subf %64, %67 : vector<32x128xf32>
    %69 = arith.addf %36, %68 : vector<32x128xf32>
    %c0_29 = arith.constant 0 : index
    %c2 = arith.constant 2 : index
    %c0_30 = arith.constant 0 : index
    %70 = vector.load %arg3[%c0_29, %c2, %c0_30] : memref<1x16x128xbf16, #tpu.memory_space<vmem>>, vector<1x1x128xbf16>
    %71 = vector.shape_cast %70 : vector<1x1x128xbf16> to vector<1x128xbf16>
    %72 = arith.extf %71 : vector<1x128xbf16> to vector<1x128xf32>
    %c0_31 = arith.constant 0 : index
    %c2_32 = arith.constant 2 : index
    %c0_33 = arith.constant 0 : index
    %c0_34 = arith.constant 0 : index
    %73 = vector.load %arg4[%c0_31, %c2_32, %c0_33, %c0_34] : memref<1x16x32x128xbf16, #tpu.memory_space<vmem>>, vector<1x1x32x128xbf16>
    %74 = vector.shape_cast %73 : vector<1x1x32x128xbf16> to vector<32x128xbf16>
    %75 = arith.extf %74 : vector<32x128xbf16> to vector<32x128xf32>
    %76 = arith.mulf %75, %75 : vector<32x128xf32>
    %c0_35 = arith.constant 0 : index
    %c2_36 = arith.constant 2 : index
    %c0_37 = arith.constant 0 : index
    %c0_38 = arith.constant 0 : index
    %77 = vector.load %arg5[%c0_35, %c2_36, %c0_37, %c0_38] : memref<1x16x32x128xbf16, #tpu.memory_space<vmem>>, vector<1x1x32x128xbf16>
    %78 = vector.shape_cast %77 : vector<1x1x32x128xbf16> to vector<32x128xbf16>
    %79 = arith.extf %78 : vector<32x128xbf16> to vector<32x128xf32>
    %80 = arith.addf %75, %79 : vector<32x128xf32>
    %81 = arith.mulf %79, %79 : vector<32x128xf32>
    %82 = arith.addf %76, %81 : vector<32x128xf32>
    %83 = vector.broadcast %72 : vector<1x128xf32> to vector<32x128xf32>
    %84 = arith.addf %80, %83 : vector<32x128xf32>
    %85 = arith.mulf %72, %72 : vector<1x128xf32>
    %86 = vector.broadcast %85 : vector<1x128xf32> to vector<32x128xf32>
    %87 = arith.addf %82, %86 : vector<32x128xf32>
    %c16_i32_39 = arith.constant 16 : i32
    %88 = arith.muli %arg2, %c16_i32_39 : i32
    %c2_i32 = arith.constant 2 : i32
    %89 = arith.addi %88, %c2_i32 : i32
    %90 = arith.index_cast %89 : i32 to index
    %91 = memref.load %arg7[%90] : memref<32xf32, #tpu.memory_space<smem>>
    %c16_i32_40 = arith.constant 16 : i32
    %92 = arith.muli %arg2, %c16_i32_40 : i32
    %c2_i32_41 = arith.constant 2 : i32
    %93 = arith.addi %92, %c2_i32_41 : i32
    %94 = arith.index_cast %93 : i32 to index
    %95 = memref.load %arg8[%94] : memref<32xf32, #tpu.memory_space<smem>>
    %96 = vector.broadcast %91 : f32 to vector<32x128xf32>
    %97 = arith.mulf %87, %96 : vector<32x128xf32>
    %98 = arith.mulf %84, %84 : vector<32x128xf32>
    %99 = vector.broadcast %95 : f32 to vector<32x128xf32>
    %100 = arith.mulf %98, %99 : vector<32x128xf32>
    %101 = arith.subf %97, %100 : vector<32x128xf32>
    %102 = arith.addf %69, %101 : vector<32x128xf32>
    %c0_42 = arith.constant 0 : index
    %c3 = arith.constant 3 : index
    %c0_43 = arith.constant 0 : index
    %103 = vector.load %arg3[%c0_42, %c3, %c0_43] : memref<1x16x128xbf16, #tpu.memory_space<vmem>>, vector<1x1x128xbf16>
    %104 = vector.shape_cast %103 : vector<1x1x128xbf16> to vector<1x128xbf16>
    %105 = arith.extf %104 : vector<1x128xbf16> to vector<1x128xf32>
    %c0_44 = arith.constant 0 : index
    %c3_45 = arith.constant 3 : index
    %c0_46 = arith.constant 0 : index
    %c0_47 = arith.constant 0 : index
    %106 = vector.load %arg4[%c0_44, %c3_45, %c0_46, %c0_47] : memref<1x16x32x128xbf16, #tpu.memory_space<vmem>>, vector<1x1x32x128xbf16>
    %107 = vector.shape_cast %106 : vector<1x1x32x128xbf16> to vector<32x128xbf16>
    %108 = arith.extf %107 : vector<32x128xbf16> to vector<32x128xf32>
    %109 = arith.mulf %108, %108 : vector<32x128xf32>
    %c0_48 = arith.constant 0 : index
    %c3_49 = arith.constant 3 : index
    %c0_50 = arith.constant 0 : index
    %c0_51 = arith.constant 0 : index
    %110 = vector.load %arg5[%c0_48, %c3_49, %c0_50, %c0_51] : memref<1x16x32x128xbf16, #tpu.memory_space<vmem>>, vector<1x1x32x128xbf16>
    %111 = vector.shape_cast %110 : vector<1x1x32x128xbf16> to vector<32x128xbf16>
    %112 = arith.extf %111 : vector<32x128xbf16> to vector<32x128xf32>
    %113 = arith.addf %108, %112 : vector<32x128xf32>
    %114 = arith.mulf %112, %112 : vector<32x128xf32>
    %115 = arith.addf %109, %114 : vector<32x128xf32>
    %116 = vector.broadcast %105 : vector<1x128xf32> to vector<32x128xf32>
    %117 = arith.addf %113, %116 : vector<32x128xf32>
    %118 = arith.mulf %105, %105 : vector<1x128xf32>
    %119 = vector.broadcast %118 : vector<1x128xf32> to vector<32x128xf32>
    %120 = arith.addf %115, %119 : vector<32x128xf32>
    %c16_i32_52 = arith.constant 16 : i32
    %121 = arith.muli %arg2, %c16_i32_52 : i32
    %c3_i32 = arith.constant 3 : i32
    %122 = arith.addi %121, %c3_i32 : i32
    %123 = arith.index_cast %122 : i32 to index
    %124 = memref.load %arg7[%123] : memref<32xf32, #tpu.memory_space<smem>>
    %c16_i32_53 = arith.constant 16 : i32
    %125 = arith.muli %arg2, %c16_i32_53 : i32
    %c3_i32_54 = arith.constant 3 : i32
    %126 = arith.addi %125, %c3_i32_54 : i32
    %127 = arith.index_cast %126 : i32 to index
    %128 = memref.load %arg8[%127] : memref<32xf32, #tpu.memory_space<smem>>
    %129 = vector.broadcast %124 : f32 to vector<32x128xf32>
    %130 = arith.mulf %120, %129 : vector<32x128xf32>
    %131 = arith.mulf %117, %117 : vector<32x128xf32>
    %132 = vector.broadcast %128 : f32 to vector<32x128xf32>
    %133 = arith.mulf %131, %132 : vector<32x128xf32>
    %134 = arith.subf %130, %133 : vector<32x128xf32>
    %135 = arith.addf %102, %134 : vector<32x128xf32>
    %c0_55 = arith.constant 0 : index
    %c4 = arith.constant 4 : index
    %c0_56 = arith.constant 0 : index
    %136 = vector.load %arg3[%c0_55, %c4, %c0_56] : memref<1x16x128xbf16, #tpu.memory_space<vmem>>, vector<1x1x128xbf16>
    %137 = vector.shape_cast %136 : vector<1x1x128xbf16> to vector<1x128xbf16>
    %138 = arith.extf %137 : vector<1x128xbf16> to vector<1x128xf32>
    %c0_57 = arith.constant 0 : index
    %c4_58 = arith.constant 4 : index
    %c0_59 = arith.constant 0 : index
    %c0_60 = arith.constant 0 : index
    %139 = vector.load %arg4[%c0_57, %c4_58, %c0_59, %c0_60] : memref<1x16x32x128xbf16, #tpu.memory_space<vmem>>, vector<1x1x32x128xbf16>
    %140 = vector.shape_cast %139 : vector<1x1x32x128xbf16> to vector<32x128xbf16>
    %141 = arith.extf %140 : vector<32x128xbf16> to vector<32x128xf32>
    %142 = arith.mulf %141, %141 : vector<32x128xf32>
    %c0_61 = arith.constant 0 : index
    %c4_62 = arith.constant 4 : index
    %c0_63 = arith.constant 0 : index
    %c0_64 = arith.constant 0 : index
    %143 = vector.load %arg5[%c0_61, %c4_62, %c0_63, %c0_64] : memref<1x16x32x128xbf16, #tpu.memory_space<vmem>>, vector<1x1x32x128xbf16>
    %144 = vector.shape_cast %143 : vector<1x1x32x128xbf16> to vector<32x128xbf16>
    %145 = arith.extf %144 : vector<32x128xbf16> to vector<32x128xf32>
    %146 = arith.addf %141, %145 : vector<32x128xf32>
    %147 = arith.mulf %145, %145 : vector<32x128xf32>
    %148 = arith.addf %142, %147 : vector<32x128xf32>
    %149 = vector.broadcast %138 : vector<1x128xf32> to vector<32x128xf32>
    %150 = arith.addf %146, %149 : vector<32x128xf32>
    %151 = arith.mulf %138, %138 : vector<1x128xf32>
    %152 = vector.broadcast %151 : vector<1x128xf32> to vector<32x128xf32>
    %153 = arith.addf %148, %152 : vector<32x128xf32>
    %c16_i32_65 = arith.constant 16 : i32
    %154 = arith.muli %arg2, %c16_i32_65 : i32
    %c4_i32 = arith.constant 4 : i32
    %155 = arith.addi %154, %c4_i32 : i32
    %156 = arith.index_cast %155 : i32 to index
    %157 = memref.load %arg7[%156] : memref<32xf32, #tpu.memory_space<smem>>
    %c16_i32_66 = arith.constant 16 : i32
    %158 = arith.muli %arg2, %c16_i32_66 : i32
    %c4_i32_67 = arith.constant 4 : i32
    %159 = arith.addi %158, %c4_i32_67 : i32
    %160 = arith.index_cast %159 : i32 to index
    %161 = memref.load %arg8[%160] : memref<32xf32, #tpu.memory_space<smem>>
    %162 = vector.broadcast %157 : f32 to vector<32x128xf32>
    %163 = arith.mulf %153, %162 : vector<32x128xf32>
    %164 = arith.mulf %150, %150 : vector<32x128xf32>
    %165 = vector.broadcast %161 : f32 to vector<32x128xf32>
    %166 = arith.mulf %164, %165 : vector<32x128xf32>
    %167 = arith.subf %163, %166 : vector<32x128xf32>
    %168 = arith.addf %135, %167 : vector<32x128xf32>
    %c0_68 = arith.constant 0 : index
    %c5 = arith.constant 5 : index
    %c0_69 = arith.constant 0 : index
    %169 = vector.load %arg3[%c0_68, %c5, %c0_69] : memref<1x16x128xbf16, #tpu.memory_space<vmem>>, vector<1x1x128xbf16>
    %170 = vector.shape_cast %169 : vector<1x1x128xbf16> to vector<1x128xbf16>
    %171 = arith.extf %170 : vector<1x128xbf16> to vector<1x128xf32>
    %c0_70 = arith.constant 0 : index
    %c5_71 = arith.constant 5 : index
    %c0_72 = arith.constant 0 : index
    %c0_73 = arith.constant 0 : index
    %172 = vector.load %arg4[%c0_70, %c5_71, %c0_72, %c0_73] : memref<1x16x32x128xbf16, #tpu.memory_space<vmem>>, vector<1x1x32x128xbf16>
    %173 = vector.shape_cast %172 : vector<1x1x32x128xbf16> to vector<32x128xbf16>
    %174 = arith.extf %173 : vector<32x128xbf16> to vector<32x128xf32>
    %175 = arith.mulf %174, %174 : vector<32x128xf32>
    %c0_74 = arith.constant 0 : index
    %c5_75 = arith.constant 5 : index
    %c0_76 = arith.constant 0 : index
    %c0_77 = arith.constant 0 : index
    %176 = vector.load %arg5[%c0_74, %c5_75, %c0_76, %c0_77] : memref<1x16x32x128xbf16, #tpu.memory_space<vmem>>, vector<1x1x32x128xbf16>
    %177 = vector.shape_cast %176 : vector<1x1x32x128xbf16> to vector<32x128xbf16>
    %178 = arith.extf %177 : vector<32x128xbf16> to vector<32x128xf32>
    %179 = arith.addf %174, %178 : vector<32x128xf32>
    %180 = arith.mulf %178, %178 : vector<32x128xf32>
    %181 = arith.addf %175, %180 : vector<32x128xf32>
    %182 = vector.broadcast %171 : vector<1x128xf32> to vector<32x128xf32>
    %183 = arith.addf %179, %182 : vector<32x128xf32>
    %184 = arith.mulf %171, %171 : vector<1x128xf32>
    %185 = vector.broadcast %184 : vector<1x128xf32> to vector<32x128xf32>
    %186 = arith.addf %181, %185 : vector<32x128xf32>
    %c16_i32_78 = arith.constant 16 : i32
    %187 = arith.muli %arg2, %c16_i32_78 : i32
    %c5_i32 = arith.constant 5 : i32
    %188 = arith.addi %187, %c5_i32 : i32
    %189 = arith.index_cast %188 : i32 to index
    %190 = memref.load %arg7[%189] : memref<32xf32, #tpu.memory_space<smem>>
    %c16_i32_79 = arith.constant 16 : i32
    %191 = arith.muli %arg2, %c16_i32_79 : i32
    %c5_i32_80 = arith.constant 5 : i32
    %192 = arith.addi %191, %c5_i32_80 : i32
    %193 = arith.index_cast %192 : i32 to index
    %194 = memref.load %arg8[%193] : memref<32xf32, #tpu.memory_space<smem>>
    %195 = vector.broadcast %190 : f32 to vector<32x128xf32>
    %196 = arith.mulf %186, %195 : vector<32x128xf32>
    %197 = arith.mulf %183, %183 : vector<32x128xf32>
    %198 = vector.broadcast %194 : f32 to vector<32x128xf32>
    %199 = arith.mulf %197, %198 : vector<32x128xf32>
    %200 = arith.subf %196, %199 : vector<32x128xf32>
    %201 = arith.addf %168, %200 : vector<32x128xf32>
    %c0_81 = arith.constant 0 : index
    %c6 = arith.constant 6 : index
    %c0_82 = arith.constant 0 : index
    %202 = vector.load %arg3[%c0_81, %c6, %c0_82] : memref<1x16x128xbf16, #tpu.memory_space<vmem>>, vector<1x1x128xbf16>
    %203 = vector.shape_cast %202 : vector<1x1x128xbf16> to vector<1x128xbf16>
    %204 = arith.extf %203 : vector<1x128xbf16> to vector<1x128xf32>
    %c0_83 = arith.constant 0 : index
    %c6_84 = arith.constant 6 : index
    %c0_85 = arith.constant 0 : index
    %c0_86 = arith.constant 0 : index
    %205 = vector.load %arg4[%c0_83, %c6_84, %c0_85, %c0_86] : memref<1x16x32x128xbf16, #tpu.memory_space<vmem>>, vector<1x1x32x128xbf16>
    %206 = vector.shape_cast %205 : vector<1x1x32x128xbf16> to vector<32x128xbf16>
    %207 = arith.extf %206 : vector<32x128xbf16> to vector<32x128xf32>
    %208 = arith.mulf %207, %207 : vector<32x128xf32>
    %c0_87 = arith.constant 0 : index
    %c6_88 = arith.constant 6 : index
    %c0_89 = arith.constant 0 : index
    %c0_90 = arith.constant 0 : index
    %209 = vector.load %arg5[%c0_87, %c6_88, %c0_89, %c0_90] : memref<1x16x32x128xbf16, #tpu.memory_space<vmem>>, vector<1x1x32x128xbf16>
    %210 = vector.shape_cast %209 : vector<1x1x32x128xbf16> to vector<32x128xbf16>
    %211 = arith.extf %210 : vector<32x128xbf16> to vector<32x128xf32>
    %212 = arith.addf %207, %211 : vector<32x128xf32>
    %213 = arith.mulf %211, %211 : vector<32x128xf32>
    %214 = arith.addf %208, %213 : vector<32x128xf32>
    %215 = vector.broadcast %204 : vector<1x128xf32> to vector<32x128xf32>
    %216 = arith.addf %212, %215 : vector<32x128xf32>
    %217 = arith.mulf %204, %204 : vector<1x128xf32>
    %218 = vector.broadcast %217 : vector<1x128xf32> to vector<32x128xf32>
    %219 = arith.addf %214, %218 : vector<32x128xf32>
    %c16_i32_91 = arith.constant 16 : i32
    %220 = arith.muli %arg2, %c16_i32_91 : i32
    %c6_i32 = arith.constant 6 : i32
    %221 = arith.addi %220, %c6_i32 : i32
    %222 = arith.index_cast %221 : i32 to index
    %223 = memref.load %arg7[%222] : memref<32xf32, #tpu.memory_space<smem>>
    %c16_i32_92 = arith.constant 16 : i32
    %224 = arith.muli %arg2, %c16_i32_92 : i32
    %c6_i32_93 = arith.constant 6 : i32
    %225 = arith.addi %224, %c6_i32_93 : i32
    %226 = arith.index_cast %225 : i32 to index
    %227 = memref.load %arg8[%226] : memref<32xf32, #tpu.memory_space<smem>>
    %228 = vector.broadcast %223 : f32 to vector<32x128xf32>
    %229 = arith.mulf %219, %228 : vector<32x128xf32>
    %230 = arith.mulf %216, %216 : vector<32x128xf32>
    %231 = vector.broadcast %227 : f32 to vector<32x128xf32>
    %232 = arith.mulf %230, %231 : vector<32x128xf32>
    %233 = arith.subf %229, %232 : vector<32x128xf32>
    %234 = arith.addf %201, %233 : vector<32x128xf32>
    %c0_94 = arith.constant 0 : index
    %c7 = arith.constant 7 : index
    %c0_95 = arith.constant 0 : index
    %235 = vector.load %arg3[%c0_94, %c7, %c0_95] : memref<1x16x128xbf16, #tpu.memory_space<vmem>>, vector<1x1x128xbf16>
    %236 = vector.shape_cast %235 : vector<1x1x128xbf16> to vector<1x128xbf16>
    %237 = arith.extf %236 : vector<1x128xbf16> to vector<1x128xf32>
    %c0_96 = arith.constant 0 : index
    %c7_97 = arith.constant 7 : index
    %c0_98 = arith.constant 0 : index
    %c0_99 = arith.constant 0 : index
    %238 = vector.load %arg4[%c0_96, %c7_97, %c0_98, %c0_99] : memref<1x16x32x128xbf16, #tpu.memory_space<vmem>>, vector<1x1x32x128xbf16>
    %239 = vector.shape_cast %238 : vector<1x1x32x128xbf16> to vector<32x128xbf16>
    %240 = arith.extf %239 : vector<32x128xbf16> to vector<32x128xf32>
    %241 = arith.mulf %240, %240 : vector<32x128xf32>
    %c0_100 = arith.constant 0 : index
    %c7_101 = arith.constant 7 : index
    %c0_102 = arith.constant 0 : index
    %c0_103 = arith.constant 0 : index
    %242 = vector.load %arg5[%c0_100, %c7_101, %c0_102, %c0_103] : memref<1x16x32x128xbf16, #tpu.memory_space<vmem>>, vector<1x1x32x128xbf16>
    %243 = vector.shape_cast %242 : vector<1x1x32x128xbf16> to vector<32x128xbf16>
    %244 = arith.extf %243 : vector<32x128xbf16> to vector<32x128xf32>
    %245 = arith.addf %240, %244 : vector<32x128xf32>
    %246 = arith.mulf %244, %244 : vector<32x128xf32>
    %247 = arith.addf %241, %246 : vector<32x128xf32>
    %248 = vector.broadcast %237 : vector<1x128xf32> to vector<32x128xf32>
    %249 = arith.addf %245, %248 : vector<32x128xf32>
    %250 = arith.mulf %237, %237 : vector<1x128xf32>
    %251 = vector.broadcast %250 : vector<1x128xf32> to vector<32x128xf32>
    %252 = arith.addf %247, %251 : vector<32x128xf32>
    %c16_i32_104 = arith.constant 16 : i32
    %253 = arith.muli %arg2, %c16_i32_104 : i32
    %c7_i32 = arith.constant 7 : i32
    %254 = arith.addi %253, %c7_i32 : i32
    %255 = arith.index_cast %254 : i32 to index
    %256 = memref.load %arg7[%255] : memref<32xf32, #tpu.memory_space<smem>>
    %c16_i32_105 = arith.constant 16 : i32
    %257 = arith.muli %arg2, %c16_i32_105 : i32
    %c7_i32_106 = arith.constant 7 : i32
    %258 = arith.addi %257, %c7_i32_106 : i32
    %259 = arith.index_cast %258 : i32 to index
    %260 = memref.load %arg8[%259] : memref<32xf32, #tpu.memory_space<smem>>
    %261 = vector.broadcast %256 : f32 to vector<32x128xf32>
    %262 = arith.mulf %252, %261 : vector<32x128xf32>
    %263 = arith.mulf %249, %249 : vector<32x128xf32>
    %264 = vector.broadcast %260 : f32 to vector<32x128xf32>
    %265 = arith.mulf %263, %264 : vector<32x128xf32>
    %266 = arith.subf %262, %265 : vector<32x128xf32>
    %267 = arith.addf %234, %266 : vector<32x128xf32>
    %c0_107 = arith.constant 0 : index
    %c8 = arith.constant 8 : index
    %c0_108 = arith.constant 0 : index
    %268 = vector.load %arg3[%c0_107, %c8, %c0_108] : memref<1x16x128xbf16, #tpu.memory_space<vmem>>, vector<1x1x128xbf16>
    %269 = vector.shape_cast %268 : vector<1x1x128xbf16> to vector<1x128xbf16>
    %270 = arith.extf %269 : vector<1x128xbf16> to vector<1x128xf32>
    %c0_109 = arith.constant 0 : index
    %c8_110 = arith.constant 8 : index
    %c0_111 = arith.constant 0 : index
    %c0_112 = arith.constant 0 : index
    %271 = vector.load %arg4[%c0_109, %c8_110, %c0_111, %c0_112] : memref<1x16x32x128xbf16, #tpu.memory_space<vmem>>, vector<1x1x32x128xbf16>
    %272 = vector.shape_cast %271 : vector<1x1x32x128xbf16> to vector<32x128xbf16>
    %273 = arith.extf %272 : vector<32x128xbf16> to vector<32x128xf32>
    %274 = arith.mulf %273, %273 : vector<32x128xf32>
    %c0_113 = arith.constant 0 : index
    %c8_114 = arith.constant 8 : index
    %c0_115 = arith.constant 0 : index
    %c0_116 = arith.constant 0 : index
    %275 = vector.load %arg5[%c0_113, %c8_114, %c0_115, %c0_116] : memref<1x16x32x128xbf16, #tpu.memory_space<vmem>>, vector<1x1x32x128xbf16>
    %276 = vector.shape_cast %275 : vector<1x1x32x128xbf16> to vector<32x128xbf16>
    %277 = arith.extf %276 : vector<32x128xbf16> to vector<32x128xf32>
    %278 = arith.addf %273, %277 : vector<32x128xf32>
    %279 = arith.mulf %277, %277 : vector<32x128xf32>
    %280 = arith.addf %274, %279 : vector<32x128xf32>
    %281 = vector.broadcast %270 : vector<1x128xf32> to vector<32x128xf32>
    %282 = arith.addf %278, %281 : vector<32x128xf32>
    %283 = arith.mulf %270, %270 : vector<1x128xf32>
    %284 = vector.broadcast %283 : vector<1x128xf32> to vector<32x128xf32>
    %285 = arith.addf %280, %284 : vector<32x128xf32>
    %c16_i32_117 = arith.constant 16 : i32
    %286 = arith.muli %arg2, %c16_i32_117 : i32
    %c8_i32 = arith.constant 8 : i32
    %287 = arith.addi %286, %c8_i32 : i32
    %288 = arith.index_cast %287 : i32 to index
    %289 = memref.load %arg7[%288] : memref<32xf32, #tpu.memory_space<smem>>
    %c16_i32_118 = arith.constant 16 : i32
    %290 = arith.muli %arg2, %c16_i32_118 : i32
    %c8_i32_119 = arith.constant 8 : i32
    %291 = arith.addi %290, %c8_i32_119 : i32
    %292 = arith.index_cast %291 : i32 to index
    %293 = memref.load %arg8[%292] : memref<32xf32, #tpu.memory_space<smem>>
    %294 = vector.broadcast %289 : f32 to vector<32x128xf32>
    %295 = arith.mulf %285, %294 : vector<32x128xf32>
    %296 = arith.mulf %282, %282 : vector<32x128xf32>
    %297 = vector.broadcast %293 : f32 to vector<32x128xf32>
    %298 = arith.mulf %296, %297 : vector<32x128xf32>
    %299 = arith.subf %295, %298 : vector<32x128xf32>
    %300 = arith.addf %267, %299 : vector<32x128xf32>
    %c0_120 = arith.constant 0 : index
    %c9 = arith.constant 9 : index
    %c0_121 = arith.constant 0 : index
    %301 = vector.load %arg3[%c0_120, %c9, %c0_121] : memref<1x16x128xbf16, #tpu.memory_space<vmem>>, vector<1x1x128xbf16>
    %302 = vector.shape_cast %301 : vector<1x1x128xbf16> to vector<1x128xbf16>
    %303 = arith.extf %302 : vector<1x128xbf16> to vector<1x128xf32>
    %c0_122 = arith.constant 0 : index
    %c9_123 = arith.constant 9 : index
    %c0_124 = arith.constant 0 : index
    %c0_125 = arith.constant 0 : index
    %304 = vector.load %arg4[%c0_122, %c9_123, %c0_124, %c0_125] : memref<1x16x32x128xbf16, #tpu.memory_space<vmem>>, vector<1x1x32x128xbf16>
    %305 = vector.shape_cast %304 : vector<1x1x32x128xbf16> to vector<32x128xbf16>
    %306 = arith.extf %305 : vector<32x128xbf16> to vector<32x128xf32>
    %307 = arith.mulf %306, %306 : vector<32x128xf32>
    %c0_126 = arith.constant 0 : index
    %c9_127 = arith.constant 9 : index
    %c0_128 = arith.constant 0 : index
    %c0_129 = arith.constant 0 : index
    %308 = vector.load %arg5[%c0_126, %c9_127, %c0_128, %c0_129] : memref<1x16x32x128xbf16, #tpu.memory_space<vmem>>, vector<1x1x32x128xbf16>
    %309 = vector.shape_cast %308 : vector<1x1x32x128xbf16> to vector<32x128xbf16>
    %310 = arith.extf %309 : vector<32x128xbf16> to vector<32x128xf32>
    %311 = arith.addf %306, %310 : vector<32x128xf32>
    %312 = arith.mulf %310, %310 : vector<32x128xf32>
    %313 = arith.addf %307, %312 : vector<32x128xf32>
    %314 = vector.broadcast %303 : vector<1x128xf32> to vector<32x128xf32>
    %315 = arith.addf %311, %314 : vector<32x128xf32>
    %316 = arith.mulf %303, %303 : vector<1x128xf32>
    %317 = vector.broadcast %316 : vector<1x128xf32> to vector<32x128xf32>
    %318 = arith.addf %313, %317 : vector<32x128xf32>
    %c16_i32_130 = arith.constant 16 : i32
    %319 = arith.muli %arg2, %c16_i32_130 : i32
    %c9_i32 = arith.constant 9 : i32
    %320 = arith.addi %319, %c9_i32 : i32
    %321 = arith.index_cast %320 : i32 to index
    %322 = memref.load %arg7[%321] : memref<32xf32, #tpu.memory_space<smem>>
    %c16_i32_131 = arith.constant 16 : i32
    %323 = arith.muli %arg2, %c16_i32_131 : i32
    %c9_i32_132 = arith.constant 9 : i32
    %324 = arith.addi %323, %c9_i32_132 : i32
    %325 = arith.index_cast %324 : i32 to index
    %326 = memref.load %arg8[%325] : memref<32xf32, #tpu.memory_space<smem>>
    %327 = vector.broadcast %322 : f32 to vector<32x128xf32>
    %328 = arith.mulf %318, %327 : vector<32x128xf32>
    %329 = arith.mulf %315, %315 : vector<32x128xf32>
    %330 = vector.broadcast %326 : f32 to vector<32x128xf32>
    %331 = arith.mulf %329, %330 : vector<32x128xf32>
    %332 = arith.subf %328, %331 : vector<32x128xf32>
    %333 = arith.addf %300, %332 : vector<32x128xf32>
    %c0_133 = arith.constant 0 : index
    %c10 = arith.constant 10 : index
    %c0_134 = arith.constant 0 : index
    %334 = vector.load %arg3[%c0_133, %c10, %c0_134] : memref<1x16x128xbf16, #tpu.memory_space<vmem>>, vector<1x1x128xbf16>
    %335 = vector.shape_cast %334 : vector<1x1x128xbf16> to vector<1x128xbf16>
    %336 = arith.extf %335 : vector<1x128xbf16> to vector<1x128xf32>
    %c0_135 = arith.constant 0 : index
    %c10_136 = arith.constant 10 : index
    %c0_137 = arith.constant 0 : index
    %c0_138 = arith.constant 0 : index
    %337 = vector.load %arg4[%c0_135, %c10_136, %c0_137, %c0_138] : memref<1x16x32x128xbf16, #tpu.memory_space<vmem>>, vector<1x1x32x128xbf16>
    %338 = vector.shape_cast %337 : vector<1x1x32x128xbf16> to vector<32x128xbf16>
    %339 = arith.extf %338 : vector<32x128xbf16> to vector<32x128xf32>
    %340 = arith.mulf %339, %339 : vector<32x128xf32>
    %c0_139 = arith.constant 0 : index
    %c10_140 = arith.constant 10 : index
    %c0_141 = arith.constant 0 : index
    %c0_142 = arith.constant 0 : index
    %341 = vector.load %arg5[%c0_139, %c10_140, %c0_141, %c0_142] : memref<1x16x32x128xbf16, #tpu.memory_space<vmem>>, vector<1x1x32x128xbf16>
    %342 = vector.shape_cast %341 : vector<1x1x32x128xbf16> to vector<32x128xbf16>
    %343 = arith.extf %342 : vector<32x128xbf16> to vector<32x128xf32>
    %344 = arith.addf %339, %343 : vector<32x128xf32>
    %345 = arith.mulf %343, %343 : vector<32x128xf32>
    %346 = arith.addf %340, %345 : vector<32x128xf32>
    %347 = vector.broadcast %336 : vector<1x128xf32> to vector<32x128xf32>
    %348 = arith.addf %344, %347 : vector<32x128xf32>
    %349 = arith.mulf %336, %336 : vector<1x128xf32>
    %350 = vector.broadcast %349 : vector<1x128xf32> to vector<32x128xf32>
    %351 = arith.addf %346, %350 : vector<32x128xf32>
    %c16_i32_143 = arith.constant 16 : i32
    %352 = arith.muli %arg2, %c16_i32_143 : i32
    %c10_i32 = arith.constant 10 : i32
    %353 = arith.addi %352, %c10_i32 : i32
    %354 = arith.index_cast %353 : i32 to index
    %355 = memref.load %arg7[%354] : memref<32xf32, #tpu.memory_space<smem>>
    %c16_i32_144 = arith.constant 16 : i32
    %356 = arith.muli %arg2, %c16_i32_144 : i32
    %c10_i32_145 = arith.constant 10 : i32
    %357 = arith.addi %356, %c10_i32_145 : i32
    %358 = arith.index_cast %357 : i32 to index
    %359 = memref.load %arg8[%358] : memref<32xf32, #tpu.memory_space<smem>>
    %360 = vector.broadcast %355 : f32 to vector<32x128xf32>
    %361 = arith.mulf %351, %360 : vector<32x128xf32>
    %362 = arith.mulf %348, %348 : vector<32x128xf32>
    %363 = vector.broadcast %359 : f32 to vector<32x128xf32>
    %364 = arith.mulf %362, %363 : vector<32x128xf32>
    %365 = arith.subf %361, %364 : vector<32x128xf32>
    %366 = arith.addf %333, %365 : vector<32x128xf32>
    %c0_146 = arith.constant 0 : index
    %c11 = arith.constant 11 : index
    %c0_147 = arith.constant 0 : index
    %367 = vector.load %arg3[%c0_146, %c11, %c0_147] : memref<1x16x128xbf16, #tpu.memory_space<vmem>>, vector<1x1x128xbf16>
    %368 = vector.shape_cast %367 : vector<1x1x128xbf16> to vector<1x128xbf16>
    %369 = arith.extf %368 : vector<1x128xbf16> to vector<1x128xf32>
    %c0_148 = arith.constant 0 : index
    %c11_149 = arith.constant 11 : index
    %c0_150 = arith.constant 0 : index
    %c0_151 = arith.constant 0 : index
    %370 = vector.load %arg4[%c0_148, %c11_149, %c0_150, %c0_151] : memref<1x16x32x128xbf16, #tpu.memory_space<vmem>>, vector<1x1x32x128xbf16>
    %371 = vector.shape_cast %370 : vector<1x1x32x128xbf16> to vector<32x128xbf16>
    %372 = arith.extf %371 : vector<32x128xbf16> to vector<32x128xf32>
    %373 = arith.mulf %372, %372 : vector<32x128xf32>
    %c0_152 = arith.constant 0 : index
    %c11_153 = arith.constant 11 : index
    %c0_154 = arith.constant 0 : index
    %c0_155 = arith.constant 0 : index
    %374 = vector.load %arg5[%c0_152, %c11_153, %c0_154, %c0_155] : memref<1x16x32x128xbf16, #tpu.memory_space<vmem>>, vector<1x1x32x128xbf16>
    %375 = vector.shape_cast %374 : vector<1x1x32x128xbf16> to vector<32x128xbf16>
    %376 = arith.extf %375 : vector<32x128xbf16> to vector<32x128xf32>
    %377 = arith.addf %372, %376 : vector<32x128xf32>
    %378 = arith.mulf %376, %376 : vector<32x128xf32>
    %379 = arith.addf %373, %378 : vector<32x128xf32>
    %380 = vector.broadcast %369 : vector<1x128xf32> to vector<32x128xf32>
    %381 = arith.addf %377, %380 : vector<32x128xf32>
    %382 = arith.mulf %369, %369 : vector<1x128xf32>
    %383 = vector.broadcast %382 : vector<1x128xf32> to vector<32x128xf32>
    %384 = arith.addf %379, %383 : vector<32x128xf32>
    %c16_i32_156 = arith.constant 16 : i32
    %385 = arith.muli %arg2, %c16_i32_156 : i32
    %c11_i32 = arith.constant 11 : i32
    %386 = arith.addi %385, %c11_i32 : i32
    %387 = arith.index_cast %386 : i32 to index
    %388 = memref.load %arg7[%387] : memref<32xf32, #tpu.memory_space<smem>>
    %c16_i32_157 = arith.constant 16 : i32
    %389 = arith.muli %arg2, %c16_i32_157 : i32
    %c11_i32_158 = arith.constant 11 : i32
    %390 = arith.addi %389, %c11_i32_158 : i32
    %391 = arith.index_cast %390 : i32 to index
    %392 = memref.load %arg8[%391] : memref<32xf32, #tpu.memory_space<smem>>
    %393 = vector.broadcast %388 : f32 to vector<32x128xf32>
    %394 = arith.mulf %384, %393 : vector<32x128xf32>
    %395 = arith.mulf %381, %381 : vector<32x128xf32>
    %396 = vector.broadcast %392 : f32 to vector<32x128xf32>
    %397 = arith.mulf %395, %396 : vector<32x128xf32>
    %398 = arith.subf %394, %397 : vector<32x128xf32>
    %399 = arith.addf %366, %398 : vector<32x128xf32>
    %c0_159 = arith.constant 0 : index
    %c12 = arith.constant 12 : index
    %c0_160 = arith.constant 0 : index
    %400 = vector.load %arg3[%c0_159, %c12, %c0_160] : memref<1x16x128xbf16, #tpu.memory_space<vmem>>, vector<1x1x128xbf16>
    %401 = vector.shape_cast %400 : vector<1x1x128xbf16> to vector<1x128xbf16>
    %402 = arith.extf %401 : vector<1x128xbf16> to vector<1x128xf32>
    %c0_161 = arith.constant 0 : index
    %c12_162 = arith.constant 12 : index
    %c0_163 = arith.constant 0 : index
    %c0_164 = arith.constant 0 : index
    %403 = vector.load %arg4[%c0_161, %c12_162, %c0_163, %c0_164] : memref<1x16x32x128xbf16, #tpu.memory_space<vmem>>, vector<1x1x32x128xbf16>
    %404 = vector.shape_cast %403 : vector<1x1x32x128xbf16> to vector<32x128xbf16>
    %405 = arith.extf %404 : vector<32x128xbf16> to vector<32x128xf32>
    %406 = arith.mulf %405, %405 : vector<32x128xf32>
    %c0_165 = arith.constant 0 : index
    %c12_166 = arith.constant 12 : index
    %c0_167 = arith.constant 0 : index
    %c0_168 = arith.constant 0 : index
    %407 = vector.load %arg5[%c0_165, %c12_166, %c0_167, %c0_168] : memref<1x16x32x128xbf16, #tpu.memory_space<vmem>>, vector<1x1x32x128xbf16>
    %408 = vector.shape_cast %407 : vector<1x1x32x128xbf16> to vector<32x128xbf16>
    %409 = arith.extf %408 : vector<32x128xbf16> to vector<32x128xf32>
    %410 = arith.addf %405, %409 : vector<32x128xf32>
    %411 = arith.mulf %409, %409 : vector<32x128xf32>
    %412 = arith.addf %406, %411 : vector<32x128xf32>
    %413 = vector.broadcast %402 : vector<1x128xf32> to vector<32x128xf32>
    %414 = arith.addf %410, %413 : vector<32x128xf32>
    %415 = arith.mulf %402, %402 : vector<1x128xf32>
    %416 = vector.broadcast %415 : vector<1x128xf32> to vector<32x128xf32>
    %417 = arith.addf %412, %416 : vector<32x128xf32>
    %c16_i32_169 = arith.constant 16 : i32
    %418 = arith.muli %arg2, %c16_i32_169 : i32
    %c12_i32 = arith.constant 12 : i32
    %419 = arith.addi %418, %c12_i32 : i32
    %420 = arith.index_cast %419 : i32 to index
    %421 = memref.load %arg7[%420] : memref<32xf32, #tpu.memory_space<smem>>
    %c16_i32_170 = arith.constant 16 : i32
    %422 = arith.muli %arg2, %c16_i32_170 : i32
    %c12_i32_171 = arith.constant 12 : i32
    %423 = arith.addi %422, %c12_i32_171 : i32
    %424 = arith.index_cast %423 : i32 to index
    %425 = memref.load %arg8[%424] : memref<32xf32, #tpu.memory_space<smem>>
    %426 = vector.broadcast %421 : f32 to vector<32x128xf32>
    %427 = arith.mulf %417, %426 : vector<32x128xf32>
    %428 = arith.mulf %414, %414 : vector<32x128xf32>
    %429 = vector.broadcast %425 : f32 to vector<32x128xf32>
    %430 = arith.mulf %428, %429 : vector<32x128xf32>
    %431 = arith.subf %427, %430 : vector<32x128xf32>
    %432 = arith.addf %399, %431 : vector<32x128xf32>
    %c0_172 = arith.constant 0 : index
    %c13 = arith.constant 13 : index
    %c0_173 = arith.constant 0 : index
    %433 = vector.load %arg3[%c0_172, %c13, %c0_173] : memref<1x16x128xbf16, #tpu.memory_space<vmem>>, vector<1x1x128xbf16>
    %434 = vector.shape_cast %433 : vector<1x1x128xbf16> to vector<1x128xbf16>
    %435 = arith.extf %434 : vector<1x128xbf16> to vector<1x128xf32>
    %c0_174 = arith.constant 0 : index
    %c13_175 = arith.constant 13 : index
    %c0_176 = arith.constant 0 : index
    %c0_177 = arith.constant 0 : index
    %436 = vector.load %arg4[%c0_174, %c13_175, %c0_176, %c0_177] : memref<1x16x32x128xbf16, #tpu.memory_space<vmem>>, vector<1x1x32x128xbf16>
    %437 = vector.shape_cast %436 : vector<1x1x32x128xbf16> to vector<32x128xbf16>
    %438 = arith.extf %437 : vector<32x128xbf16> to vector<32x128xf32>
    %439 = arith.mulf %438, %438 : vector<32x128xf32>
    %c0_178 = arith.constant 0 : index
    %c13_179 = arith.constant 13 : index
    %c0_180 = arith.constant 0 : index
    %c0_181 = arith.constant 0 : index
    %440 = vector.load %arg5[%c0_178, %c13_179, %c0_180, %c0_181] : memref<1x16x32x128xbf16, #tpu.memory_space<vmem>>, vector<1x1x32x128xbf16>
    %441 = vector.shape_cast %440 : vector<1x1x32x128xbf16> to vector<32x128xbf16>
    %442 = arith.extf %441 : vector<32x128xbf16> to vector<32x128xf32>
    %443 = arith.addf %438, %442 : vector<32x128xf32>
    %444 = arith.mulf %442, %442 : vector<32x128xf32>
    %445 = arith.addf %439, %444 : vector<32x128xf32>
    %446 = vector.broadcast %435 : vector<1x128xf32> to vector<32x128xf32>
    %447 = arith.addf %443, %446 : vector<32x128xf32>
    %448 = arith.mulf %435, %435 : vector<1x128xf32>
    %449 = vector.broadcast %448 : vector<1x128xf32> to vector<32x128xf32>
    %450 = arith.addf %445, %449 : vector<32x128xf32>
    %c16_i32_182 = arith.constant 16 : i32
    %451 = arith.muli %arg2, %c16_i32_182 : i32
    %c13_i32 = arith.constant 13 : i32
    %452 = arith.addi %451, %c13_i32 : i32
    %453 = arith.index_cast %452 : i32 to index
    %454 = memref.load %arg7[%453] : memref<32xf32, #tpu.memory_space<smem>>
    %c16_i32_183 = arith.constant 16 : i32
    %455 = arith.muli %arg2, %c16_i32_183 : i32
    %c13_i32_184 = arith.constant 13 : i32
    %456 = arith.addi %455, %c13_i32_184 : i32
    %457 = arith.index_cast %456 : i32 to index
    %458 = memref.load %arg8[%457] : memref<32xf32, #tpu.memory_space<smem>>
    %459 = vector.broadcast %454 : f32 to vector<32x128xf32>
    %460 = arith.mulf %450, %459 : vector<32x128xf32>
    %461 = arith.mulf %447, %447 : vector<32x128xf32>
    %462 = vector.broadcast %458 : f32 to vector<32x128xf32>
    %463 = arith.mulf %461, %462 : vector<32x128xf32>
    %464 = arith.subf %460, %463 : vector<32x128xf32>
    %465 = arith.addf %432, %464 : vector<32x128xf32>
    %c0_185 = arith.constant 0 : index
    %c14 = arith.constant 14 : index
    %c0_186 = arith.constant 0 : index
    %466 = vector.load %arg3[%c0_185, %c14, %c0_186] : memref<1x16x128xbf16, #tpu.memory_space<vmem>>, vector<1x1x128xbf16>
    %467 = vector.shape_cast %466 : vector<1x1x128xbf16> to vector<1x128xbf16>
    %468 = arith.extf %467 : vector<1x128xbf16> to vector<1x128xf32>
    %c0_187 = arith.constant 0 : index
    %c14_188 = arith.constant 14 : index
    %c0_189 = arith.constant 0 : index
    %c0_190 = arith.constant 0 : index
    %469 = vector.load %arg4[%c0_187, %c14_188, %c0_189, %c0_190] : memref<1x16x32x128xbf16, #tpu.memory_space<vmem>>, vector<1x1x32x128xbf16>
    %470 = vector.shape_cast %469 : vector<1x1x32x128xbf16> to vector<32x128xbf16>
    %471 = arith.extf %470 : vector<32x128xbf16> to vector<32x128xf32>
    %472 = arith.mulf %471, %471 : vector<32x128xf32>
    %c0_191 = arith.constant 0 : index
    %c14_192 = arith.constant 14 : index
    %c0_193 = arith.constant 0 : index
    %c0_194 = arith.constant 0 : index
    %473 = vector.load %arg5[%c0_191, %c14_192, %c0_193, %c0_194] : memref<1x16x32x128xbf16, #tpu.memory_space<vmem>>, vector<1x1x32x128xbf16>
    %474 = vector.shape_cast %473 : vector<1x1x32x128xbf16> to vector<32x128xbf16>
    %475 = arith.extf %474 : vector<32x128xbf16> to vector<32x128xf32>
    %476 = arith.addf %471, %475 : vector<32x128xf32>
    %477 = arith.mulf %475, %475 : vector<32x128xf32>
    %478 = arith.addf %472, %477 : vector<32x128xf32>
    %479 = vector.broadcast %468 : vector<1x128xf32> to vector<32x128xf32>
    %480 = arith.addf %476, %479 : vector<32x128xf32>
    %481 = arith.mulf %468, %468 : vector<1x128xf32>
    %482 = vector.broadcast %481 : vector<1x128xf32> to vector<32x128xf32>
    %483 = arith.addf %478, %482 : vector<32x128xf32>
    %c16_i32_195 = arith.constant 16 : i32
    %484 = arith.muli %arg2, %c16_i32_195 : i32
    %c14_i32 = arith.constant 14 : i32
    %485 = arith.addi %484, %c14_i32 : i32
    %486 = arith.index_cast %485 : i32 to index
    %487 = memref.load %arg7[%486] : memref<32xf32, #tpu.memory_space<smem>>
    %c16_i32_196 = arith.constant 16 : i32
    %488 = arith.muli %arg2, %c16_i32_196 : i32
    %c14_i32_197 = arith.constant 14 : i32
    %489 = arith.addi %488, %c14_i32_197 : i32
    %490 = arith.index_cast %489 : i32 to index
    %491 = memref.load %arg8[%490] : memref<32xf32, #tpu.memory_space<smem>>
    %492 = vector.broadcast %487 : f32 to vector<32x128xf32>
    %493 = arith.mulf %483, %492 : vector<32x128xf32>
    %494 = arith.mulf %480, %480 : vector<32x128xf32>
    %495 = vector.broadcast %491 : f32 to vector<32x128xf32>
    %496 = arith.mulf %494, %495 : vector<32x128xf32>
    %497 = arith.subf %493, %496 : vector<32x128xf32>
    %498 = arith.addf %465, %497 : vector<32x128xf32>
    %c0_198 = arith.constant 0 : index
    %c15 = arith.constant 15 : index
    %c0_199 = arith.constant 0 : index
    %499 = vector.load %arg3[%c0_198, %c15, %c0_199] : memref<1x16x128xbf16, #tpu.memory_space<vmem>>, vector<1x1x128xbf16>
    %500 = vector.shape_cast %499 : vector<1x1x128xbf16> to vector<1x128xbf16>
    %501 = arith.extf %500 : vector<1x128xbf16> to vector<1x128xf32>
    %c0_200 = arith.constant 0 : index
    %c15_201 = arith.constant 15 : index
    %c0_202 = arith.constant 0 : index
    %c0_203 = arith.constant 0 : index
    %502 = vector.load %arg4[%c0_200, %c15_201, %c0_202, %c0_203] : memref<1x16x32x128xbf16, #tpu.memory_space<vmem>>, vector<1x1x32x128xbf16>
    %503 = vector.shape_cast %502 : vector<1x1x32x128xbf16> to vector<32x128xbf16>
    %504 = arith.extf %503 : vector<32x128xbf16> to vector<32x128xf32>
    %505 = arith.mulf %504, %504 : vector<32x128xf32>
    %c0_204 = arith.constant 0 : index
    %c15_205 = arith.constant 15 : index
    %c0_206 = arith.constant 0 : index
    %c0_207 = arith.constant 0 : index
    %506 = vector.load %arg5[%c0_204, %c15_205, %c0_206, %c0_207] : memref<1x16x32x128xbf16, #tpu.memory_space<vmem>>, vector<1x1x32x128xbf16>
    %507 = vector.shape_cast %506 : vector<1x1x32x128xbf16> to vector<32x128xbf16>
    %508 = arith.extf %507 : vector<32x128xbf16> to vector<32x128xf32>
    %509 = arith.addf %504, %508 : vector<32x128xf32>
    %510 = arith.mulf %508, %508 : vector<32x128xf32>
    %511 = arith.addf %505, %510 : vector<32x128xf32>
    %512 = vector.broadcast %501 : vector<1x128xf32> to vector<32x128xf32>
    %513 = arith.addf %509, %512 : vector<32x128xf32>
    %514 = arith.mulf %501, %501 : vector<1x128xf32>
    %515 = vector.broadcast %514 : vector<1x128xf32> to vector<32x128xf32>
    %516 = arith.addf %511, %515 : vector<32x128xf32>
    %c16_i32_208 = arith.constant 16 : i32
    %517 = arith.muli %arg2, %c16_i32_208 : i32
    %c15_i32 = arith.constant 15 : i32
    %518 = arith.addi %517, %c15_i32 : i32
    %519 = arith.index_cast %518 : i32 to index
    %520 = memref.load %arg7[%519] : memref<32xf32, #tpu.memory_space<smem>>
    %c16_i32_209 = arith.constant 16 : i32
    %521 = arith.muli %arg2, %c16_i32_209 : i32
    %c15_i32_210 = arith.constant 15 : i32
    %522 = arith.addi %521, %c15_i32_210 : i32
    %523 = arith.index_cast %522 : i32 to index
    %524 = memref.load %arg8[%523] : memref<32xf32, #tpu.memory_space<smem>>
    %525 = vector.broadcast %520 : f32 to vector<32x128xf32>
    %526 = arith.mulf %516, %525 : vector<32x128xf32>
    %527 = arith.mulf %513, %513 : vector<32x128xf32>
    %528 = vector.broadcast %524 : f32 to vector<32x128xf32>
    %529 = arith.mulf %527, %528 : vector<32x128xf32>
    %530 = arith.subf %526, %529 : vector<32x128xf32>
    %531 = arith.addf %498, %530 : vector<32x128xf32>
    %c0_211 = arith.constant 0 : index
    %c0_212 = arith.constant 0 : index
    %532 = vector.load %arg11[%c0_211, %c0_212] : memref<32x128xf32, #tpu.memory_space<vmem>>, vector<32x128xf32>
    tpu.vector_store %arg11[%c0_211, %c0_212], %531 {strides = array<i32>} : memref<32x128xf32, #tpu.memory_space<vmem>>, vector<32x128xf32>,
    %c1_i32_213 = arith.constant 1 : i32
    %533 = arith.cmpi eq, %arg2, %c1_i32_213 : i32
    %534 = arith.extui %533 : i1 to i32
    %c0_i32_214 = arith.constant 0 : i32
    %535 = arith.cmpi ne, %534, %c0_i32_214 : i32
    scf.if %535 {
      %c0_215 = arith.constant 0 : index
      %c0_216 = arith.constant 0 : index
      %536 = vector.load %arg11[%c0_215, %c0_216] : memref<32x128xf32, #tpu.memory_space<vmem>>, vector<32x128xf32>
      %cst = arith.constant dense<0xFF800000> : vector<128xf32>
      %537 = vector.multi_reduction <maximumf>, %536, %cst [0] : vector<32x128xf32> to vector<128xf32>
      %538 = vector.shape_cast %537 : vector<128xf32> to vector<1x128xf32>
      %539 = vector.broadcast %538 : vector<1x128xf32> to vector<32x128xf32>
      %540 = arith.subf %536, %539 : vector<32x128xf32>
      %541 = math.exp %540 : vector<32x128xf32>
      %cst_217 = arith.constant dense<0.000000e+00> : vector<128xf32>
      %542 = vector.multi_reduction <add>, %541, %cst_217 [0] : vector<32x128xf32> to vector<128xf32>
      %543 = vector.shape_cast %542 : vector<128xf32> to vector<1x128xf32>
      %c0_218 = arith.constant 0 : index
      %c0_219 = arith.constant 0 : index
      %c0_220 = arith.constant 0 : index
      %544 = vector.load %arg6[%c0_218, %c0_219, %c0_220] : memref<1x32x128xf32, #tpu.memory_space<vmem>>, vector<1x32x128xf32>
      %545 = vector.shape_cast %544 : vector<1x32x128xf32> to vector<32x128xf32>
      %546 = arith.mulf %541, %545 : vector<32x128xf32>
      %cst_221 = arith.constant dense<0.000000e+00> : vector<128xf32>
      %547 = vector.multi_reduction <add>, %546, %cst_221 [0] : vector<32x128xf32> to vector<128xf32>
      %548 = vector.shape_cast %547 : vector<128xf32> to vector<1x128xf32>
      %cst_222 = arith.constant dense<0xFF800000> : vector<128xf32>
      %549 = vector.multi_reduction <maximumf>, %541, %cst_222 [0] : vector<32x128xf32> to vector<128xf32>
      %550 = vector.shape_cast %549 : vector<128xf32> to vector<1x128xf32>
      %551 = tpu.reciprocal %543 {approx = true} : vector<1x128xf32> -> vector<1x128xf32>
      %552 = arith.mulf %548, %551 : vector<1x128xf32>
      %553 = vector.shape_cast %552 : vector<1x128xf32> to vector<1x1x128xf32>
      %c0_223 = arith.constant 0 : index
      %c0_224 = arith.constant 0 : index
      %c0_225 = arith.constant 0 : index
      %554 = vector.load %arg9[%c0_223, %c0_224, %c0_225] : memref<1x1x128xf32, #tpu.memory_space<vmem>>, vector<1x1x128xf32>
      tpu.vector_store %arg9[%c0_223, %c0_224, %c0_225], %553 {strides = array<i32>} : memref<1x1x128xf32, #tpu.memory_space<vmem>>, vector<1x1x128xf32>,
      %555 = arith.mulf %550, %551 : vector<1x128xf32>
      %556 = vector.shape_cast %555 : vector<1x128xf32> to vector<1x1x128xf32>
      %c0_226 = arith.constant 0 : index
      %c0_227 = arith.constant 0 : index
      %c0_228 = arith.constant 0 : index
      %557 = vector.load %arg10[%c0_226, %c0_227, %c0_228] : memref<1x1x128xf32, #tpu.memory_space<vmem>>, vector<1x1x128xf32>
      tpu.vector_store %arg10[%c0_226, %c0_227, %c0_228], %556 {strides = array<i32>} : memref<1x1x128xf32, #tpu.memory_space<vmem>>, vector<1x1x128xf32>,
    } else {
    }
    return
  }
  func.func @transform_0(%arg0: i32, %arg1: i32, %arg2: i32) -> (i32, i32, i32) {
    %c0_i32 = arith.constant 0 : i32
    return %arg0, %arg2, %arg1 : i32, i32, i32
  }
  func.func @transform_1(%arg0: i32, %arg1: i32, %arg2: i32) -> (i32, i32, i32, i32) {
    %c0_i32 = arith.constant 0 : i32
    %c0_i32_0 = arith.constant 0 : i32
    return %arg0, %arg2, %c0_i32, %arg1 : i32, i32, i32, i32
  }
  func.func @transform_2(%arg0: i32, %arg1: i32, %arg2: i32) -> (i32, i32, i32, i32) {
    %c0_i32 = arith.constant 0 : i32
    %c0_i32_0 = arith.constant 0 : i32
    return %arg0, %arg2, %c0_i32, %arg1 : i32, i32, i32, i32
  }
  func.func @transform_3(%arg0: i32, %arg1: i32, %arg2: i32) -> (i32, i32, i32) {
    %c0_i32 = arith.constant 0 : i32
    %c0_i32_0 = arith.constant 0 : i32
    return %arg0, %c0_i32, %arg1 : i32, i32, i32
  }
  func.func @transform_4(%arg0: i32, %arg1: i32, %arg2: i32) -> i32 {
    %c0_i32 = arith.constant 0 : i32
    %c0_i32_0 = arith.constant 0 : i32
    return %c0_i32 : i32
  }
  func.func @transform_5(%arg0: i32, %arg1: i32, %arg2: i32) -> i32 {
    %c0_i32 = arith.constant 0 : i32
    %c0_i32_0 = arith.constant 0 : i32
    return %c0_i32 : i32
  }
  func.func @transform_6(%arg0: i32, %arg1: i32, %arg2: i32) -> (i32, i32, i32) {
    %c0_i32 = arith.constant 0 : i32
    %c0_i32_0 = arith.constant 0 : i32
    return %arg0, %c0_i32, %arg1 : i32, i32, i32
  }
  func.func @transform_7(%arg0: i32, %arg1: i32, %arg2: i32) -> (i32, i32, i32) {
    %c0_i32 = arith.constant 0 : i32
    %c0_i32_0 = arith.constant 0 : i32
    return %arg0, %c0_i32, %arg1 : i32, i32, i32
  }
}

module attributes {stable_mosaic.version = 11 : i64} {
  func.func @_cost_volume_kernel(%arg0: i32, %arg1: i32, %arg2: i32, %arg3: memref<1x16x256xbf16, #tpu.memory_space<vmem>>, %arg4: memref<1x16x8x256xbf16, #tpu.memory_space<vmem>>, %arg5: memref<1x16x8x256xbf16, #tpu.memory_space<vmem>>, %arg6: memref<1x8x256xf32, #tpu.memory_space<vmem>>, %arg7: memref<16xf32, #tpu.memory_space<smem>>, %arg8: memref<16xf32, #tpu.memory_space<smem>>, %arg9: memref<1x1x256xf32, #tpu.memory_space<vmem>>, %arg10: memref<1x1x256xf32, #tpu.memory_space<vmem>>, %arg11: memref<8x256xf32, #tpu.memory_space<vmem>>) attributes {dimension_semantics = [#tpu.dimension_semantics<parallel>, #tpu.dimension_semantics<parallel>, #tpu.dimension_semantics<arbitrary>], iteration_bounds = array<i64: 2, 1, 1>, scalar_prefetch = 0 : i64, scratch_operands = 1 : i64, tpu.core_type = #tpu.core_type<tc>, window_params = [{transform_indices = @transform_0, window_bounds = array<i64: 1, 16, 256>}, {transform_indices = @transform_1, window_bounds = array<i64: 1, 16, 8, 256>}, {transform_indices = @transform_2, window_bounds = array<i64: 1, 16, 8, 256>}, {transform_indices = @transform_3, window_bounds = array<i64: 1, 8, 256>}, {transform_indices = @transform_4, window_bounds = array<i64: 16>}, {transform_indices = @transform_5, window_bounds = array<i64: 16>}, {transform_indices = @transform_6, window_bounds = array<i64: 1, 1, 256>}, {transform_indices = @transform_7, window_bounds = array<i64: 1, 1, 256>}]} {
    %c0_i32 = arith.constant 0 : i32
    %0 = arith.cmpi eq, %arg2, %c0_i32 : i32
    %1 = arith.extui %0 : i1 to i32
    %c0_i32_0 = arith.constant 0 : i32
    %2 = arith.cmpi ne, %1, %c0_i32_0 : i32
    scf.if %2 {
      %cst = arith.constant 0.000000e+00 : f32
      %536 = vector.broadcast %cst : f32 to vector<8x256xf32>
      %c0_215 = arith.constant 0 : index
      %c0_216 = arith.constant 0 : index
      %537 = vector.load %arg11[%c0_215, %c0_216] : memref<8x256xf32, #tpu.memory_space<vmem>>, vector<8x256xf32>
      tpu.vector_store %arg11[%c0_215, %c0_216], %536 {strides = array<i32>} : memref<8x256xf32, #tpu.memory_space<vmem>>, vector<8x256xf32>,
    } else {
    }
    %c0 = arith.constant 0 : index
    %c0_1 = arith.constant 0 : index
    %3 = vector.load %arg11[%c0, %c0_1] : memref<8x256xf32, #tpu.memory_space<vmem>>, vector<8x256xf32>
    %c0_2 = arith.constant 0 : index
    %c0_3 = arith.constant 0 : index
    %c0_4 = arith.constant 0 : index
    %4 = vector.load %arg3[%c0_2, %c0_3, %c0_4] : memref<1x16x256xbf16, #tpu.memory_space<vmem>>, vector<1x1x256xbf16>
    %5 = vector.shape_cast %4 : vector<1x1x256xbf16> to vector<1x256xbf16>
    %6 = arith.extf %5 : vector<1x256xbf16> to vector<1x256xf32>
    %c0_5 = arith.constant 0 : index
    %c0_6 = arith.constant 0 : index
    %c0_7 = arith.constant 0 : index
    %c0_8 = arith.constant 0 : index
    %7 = vector.load %arg4[%c0_5, %c0_6, %c0_7, %c0_8] : memref<1x16x8x256xbf16, #tpu.memory_space<vmem>>, vector<1x1x8x256xbf16>
    %8 = vector.shape_cast %7 : vector<1x1x8x256xbf16> to vector<8x256xbf16>
    %9 = arith.extf %8 : vector<8x256xbf16> to vector<8x256xf32>
    %10 = arith.mulf %9, %9 : vector<8x256xf32>
    %c0_9 = arith.constant 0 : index
    %c0_10 = arith.constant 0 : index
    %c0_11 = arith.constant 0 : index
    %c0_12 = arith.constant 0 : index
    %11 = vector.load %arg5[%c0_9, %c0_10, %c0_11, %c0_12] : memref<1x16x8x256xbf16, #tpu.memory_space<vmem>>, vector<1x1x8x256xbf16>
    %12 = vector.shape_cast %11 : vector<1x1x8x256xbf16> to vector<8x256xbf16>
    %13 = arith.extf %12 : vector<8x256xbf16> to vector<8x256xf32>
    %14 = arith.addf %9, %13 : vector<8x256xf32>
    %15 = arith.mulf %13, %13 : vector<8x256xf32>
    %16 = arith.addf %10, %15 : vector<8x256xf32>
    %17 = vector.broadcast %6 : vector<1x256xf32> to vector<8x256xf32>
    %18 = arith.addf %14, %17 : vector<8x256xf32>
    %19 = arith.mulf %6, %6 : vector<1x256xf32>
    %20 = vector.broadcast %19 : vector<1x256xf32> to vector<8x256xf32>
    %21 = arith.addf %16, %20 : vector<8x256xf32>
    %c16_i32 = arith.constant 16 : i32
    %22 = arith.muli %arg2, %c16_i32 : i32
    %c0_i32_13 = arith.constant 0 : i32
    %23 = arith.addi %22, %c0_i32_13 : i32
    %24 = arith.index_cast %23 : i32 to index
    %25 = memref.load %arg7[%24] : memref<16xf32, #tpu.memory_space<smem>>
    %c16_i32_14 = arith.constant 16 : i32
    %26 = arith.muli %arg2, %c16_i32_14 : i32
    %c0_i32_15 = arith.constant 0 : i32
    %27 = arith.addi %26, %c0_i32_15 : i32
    %28 = arith.index_cast %27 : i32 to index
    %29 = memref.load %arg8[%28] : memref<16xf32, #tpu.memory_space<smem>>
    %30 = vector.broadcast %25 : f32 to vector<8x256xf32>
    %31 = arith.mulf %21, %30 : vector<8x256xf32>
    %32 = arith.mulf %18, %18 : vector<8x256xf32>
    %33 = vector.broadcast %29 : f32 to vector<8x256xf32>
    %34 = arith.mulf %32, %33 : vector<8x256xf32>
    %35 = arith.subf %31, %34 : vector<8x256xf32>
    %36 = arith.addf %3, %35 : vector<8x256xf32>
    %c0_16 = arith.constant 0 : index
    %c1 = arith.constant 1 : index
    %c0_17 = arith.constant 0 : index
    %37 = vector.load %arg3[%c0_16, %c1, %c0_17] : memref<1x16x256xbf16, #tpu.memory_space<vmem>>, vector<1x1x256xbf16>
    %38 = vector.shape_cast %37 : vector<1x1x256xbf16> to vector<1x256xbf16>
    %39 = arith.extf %38 : vector<1x256xbf16> to vector<1x256xf32>
    %c0_18 = arith.constant 0 : index
    %c1_19 = arith.constant 1 : index
    %c0_20 = arith.constant 0 : index
    %c0_21 = arith.constant 0 : index
    %40 = vector.load %arg4[%c0_18, %c1_19, %c0_20, %c0_21] : memref<1x16x8x256xbf16, #tpu.memory_space<vmem>>, vector<1x1x8x256xbf16>
    %41 = vector.shape_cast %40 : vector<1x1x8x256xbf16> to vector<8x256xbf16>
    %42 = arith.extf %41 : vector<8x256xbf16> to vector<8x256xf32>
    %43 = arith.mulf %42, %42 : vector<8x256xf32>
    %c0_22 = arith.constant 0 : index
    %c1_23 = arith.constant 1 : index
    %c0_24 = arith.constant 0 : index
    %c0_25 = arith.constant 0 : index
    %44 = vector.load %arg5[%c0_22, %c1_23, %c0_24, %c0_25] : memref<1x16x8x256xbf16, #tpu.memory_space<vmem>>, vector<1x1x8x256xbf16>
    %45 = vector.shape_cast %44 : vector<1x1x8x256xbf16> to vector<8x256xbf16>
    %46 = arith.extf %45 : vector<8x256xbf16> to vector<8x256xf32>
    %47 = arith.addf %42, %46 : vector<8x256xf32>
    %48 = arith.mulf %46, %46 : vector<8x256xf32>
    %49 = arith.addf %43, %48 : vector<8x256xf32>
    %50 = vector.broadcast %39 : vector<1x256xf32> to vector<8x256xf32>
    %51 = arith.addf %47, %50 : vector<8x256xf32>
    %52 = arith.mulf %39, %39 : vector<1x256xf32>
    %53 = vector.broadcast %52 : vector<1x256xf32> to vector<8x256xf32>
    %54 = arith.addf %49, %53 : vector<8x256xf32>
    %c16_i32_26 = arith.constant 16 : i32
    %55 = arith.muli %arg2, %c16_i32_26 : i32
    %c1_i32 = arith.constant 1 : i32
    %56 = arith.addi %55, %c1_i32 : i32
    %57 = arith.index_cast %56 : i32 to index
    %58 = memref.load %arg7[%57] : memref<16xf32, #tpu.memory_space<smem>>
    %c16_i32_27 = arith.constant 16 : i32
    %59 = arith.muli %arg2, %c16_i32_27 : i32
    %c1_i32_28 = arith.constant 1 : i32
    %60 = arith.addi %59, %c1_i32_28 : i32
    %61 = arith.index_cast %60 : i32 to index
    %62 = memref.load %arg8[%61] : memref<16xf32, #tpu.memory_space<smem>>
    %63 = vector.broadcast %58 : f32 to vector<8x256xf32>
    %64 = arith.mulf %54, %63 : vector<8x256xf32>
    %65 = arith.mulf %51, %51 : vector<8x256xf32>
    %66 = vector.broadcast %62 : f32 to vector<8x256xf32>
    %67 = arith.mulf %65, %66 : vector<8x256xf32>
    %68 = arith.subf %64, %67 : vector<8x256xf32>
    %69 = arith.addf %36, %68 : vector<8x256xf32>
    %c0_29 = arith.constant 0 : index
    %c2 = arith.constant 2 : index
    %c0_30 = arith.constant 0 : index
    %70 = vector.load %arg3[%c0_29, %c2, %c0_30] : memref<1x16x256xbf16, #tpu.memory_space<vmem>>, vector<1x1x256xbf16>
    %71 = vector.shape_cast %70 : vector<1x1x256xbf16> to vector<1x256xbf16>
    %72 = arith.extf %71 : vector<1x256xbf16> to vector<1x256xf32>
    %c0_31 = arith.constant 0 : index
    %c2_32 = arith.constant 2 : index
    %c0_33 = arith.constant 0 : index
    %c0_34 = arith.constant 0 : index
    %73 = vector.load %arg4[%c0_31, %c2_32, %c0_33, %c0_34] : memref<1x16x8x256xbf16, #tpu.memory_space<vmem>>, vector<1x1x8x256xbf16>
    %74 = vector.shape_cast %73 : vector<1x1x8x256xbf16> to vector<8x256xbf16>
    %75 = arith.extf %74 : vector<8x256xbf16> to vector<8x256xf32>
    %76 = arith.mulf %75, %75 : vector<8x256xf32>
    %c0_35 = arith.constant 0 : index
    %c2_36 = arith.constant 2 : index
    %c0_37 = arith.constant 0 : index
    %c0_38 = arith.constant 0 : index
    %77 = vector.load %arg5[%c0_35, %c2_36, %c0_37, %c0_38] : memref<1x16x8x256xbf16, #tpu.memory_space<vmem>>, vector<1x1x8x256xbf16>
    %78 = vector.shape_cast %77 : vector<1x1x8x256xbf16> to vector<8x256xbf16>
    %79 = arith.extf %78 : vector<8x256xbf16> to vector<8x256xf32>
    %80 = arith.addf %75, %79 : vector<8x256xf32>
    %81 = arith.mulf %79, %79 : vector<8x256xf32>
    %82 = arith.addf %76, %81 : vector<8x256xf32>
    %83 = vector.broadcast %72 : vector<1x256xf32> to vector<8x256xf32>
    %84 = arith.addf %80, %83 : vector<8x256xf32>
    %85 = arith.mulf %72, %72 : vector<1x256xf32>
    %86 = vector.broadcast %85 : vector<1x256xf32> to vector<8x256xf32>
    %87 = arith.addf %82, %86 : vector<8x256xf32>
    %c16_i32_39 = arith.constant 16 : i32
    %88 = arith.muli %arg2, %c16_i32_39 : i32
    %c2_i32 = arith.constant 2 : i32
    %89 = arith.addi %88, %c2_i32 : i32
    %90 = arith.index_cast %89 : i32 to index
    %91 = memref.load %arg7[%90] : memref<16xf32, #tpu.memory_space<smem>>
    %c16_i32_40 = arith.constant 16 : i32
    %92 = arith.muli %arg2, %c16_i32_40 : i32
    %c2_i32_41 = arith.constant 2 : i32
    %93 = arith.addi %92, %c2_i32_41 : i32
    %94 = arith.index_cast %93 : i32 to index
    %95 = memref.load %arg8[%94] : memref<16xf32, #tpu.memory_space<smem>>
    %96 = vector.broadcast %91 : f32 to vector<8x256xf32>
    %97 = arith.mulf %87, %96 : vector<8x256xf32>
    %98 = arith.mulf %84, %84 : vector<8x256xf32>
    %99 = vector.broadcast %95 : f32 to vector<8x256xf32>
    %100 = arith.mulf %98, %99 : vector<8x256xf32>
    %101 = arith.subf %97, %100 : vector<8x256xf32>
    %102 = arith.addf %69, %101 : vector<8x256xf32>
    %c0_42 = arith.constant 0 : index
    %c3 = arith.constant 3 : index
    %c0_43 = arith.constant 0 : index
    %103 = vector.load %arg3[%c0_42, %c3, %c0_43] : memref<1x16x256xbf16, #tpu.memory_space<vmem>>, vector<1x1x256xbf16>
    %104 = vector.shape_cast %103 : vector<1x1x256xbf16> to vector<1x256xbf16>
    %105 = arith.extf %104 : vector<1x256xbf16> to vector<1x256xf32>
    %c0_44 = arith.constant 0 : index
    %c3_45 = arith.constant 3 : index
    %c0_46 = arith.constant 0 : index
    %c0_47 = arith.constant 0 : index
    %106 = vector.load %arg4[%c0_44, %c3_45, %c0_46, %c0_47] : memref<1x16x8x256xbf16, #tpu.memory_space<vmem>>, vector<1x1x8x256xbf16>
    %107 = vector.shape_cast %106 : vector<1x1x8x256xbf16> to vector<8x256xbf16>
    %108 = arith.extf %107 : vector<8x256xbf16> to vector<8x256xf32>
    %109 = arith.mulf %108, %108 : vector<8x256xf32>
    %c0_48 = arith.constant 0 : index
    %c3_49 = arith.constant 3 : index
    %c0_50 = arith.constant 0 : index
    %c0_51 = arith.constant 0 : index
    %110 = vector.load %arg5[%c0_48, %c3_49, %c0_50, %c0_51] : memref<1x16x8x256xbf16, #tpu.memory_space<vmem>>, vector<1x1x8x256xbf16>
    %111 = vector.shape_cast %110 : vector<1x1x8x256xbf16> to vector<8x256xbf16>
    %112 = arith.extf %111 : vector<8x256xbf16> to vector<8x256xf32>
    %113 = arith.addf %108, %112 : vector<8x256xf32>
    %114 = arith.mulf %112, %112 : vector<8x256xf32>
    %115 = arith.addf %109, %114 : vector<8x256xf32>
    %116 = vector.broadcast %105 : vector<1x256xf32> to vector<8x256xf32>
    %117 = arith.addf %113, %116 : vector<8x256xf32>
    %118 = arith.mulf %105, %105 : vector<1x256xf32>
    %119 = vector.broadcast %118 : vector<1x256xf32> to vector<8x256xf32>
    %120 = arith.addf %115, %119 : vector<8x256xf32>
    %c16_i32_52 = arith.constant 16 : i32
    %121 = arith.muli %arg2, %c16_i32_52 : i32
    %c3_i32 = arith.constant 3 : i32
    %122 = arith.addi %121, %c3_i32 : i32
    %123 = arith.index_cast %122 : i32 to index
    %124 = memref.load %arg7[%123] : memref<16xf32, #tpu.memory_space<smem>>
    %c16_i32_53 = arith.constant 16 : i32
    %125 = arith.muli %arg2, %c16_i32_53 : i32
    %c3_i32_54 = arith.constant 3 : i32
    %126 = arith.addi %125, %c3_i32_54 : i32
    %127 = arith.index_cast %126 : i32 to index
    %128 = memref.load %arg8[%127] : memref<16xf32, #tpu.memory_space<smem>>
    %129 = vector.broadcast %124 : f32 to vector<8x256xf32>
    %130 = arith.mulf %120, %129 : vector<8x256xf32>
    %131 = arith.mulf %117, %117 : vector<8x256xf32>
    %132 = vector.broadcast %128 : f32 to vector<8x256xf32>
    %133 = arith.mulf %131, %132 : vector<8x256xf32>
    %134 = arith.subf %130, %133 : vector<8x256xf32>
    %135 = arith.addf %102, %134 : vector<8x256xf32>
    %c0_55 = arith.constant 0 : index
    %c4 = arith.constant 4 : index
    %c0_56 = arith.constant 0 : index
    %136 = vector.load %arg3[%c0_55, %c4, %c0_56] : memref<1x16x256xbf16, #tpu.memory_space<vmem>>, vector<1x1x256xbf16>
    %137 = vector.shape_cast %136 : vector<1x1x256xbf16> to vector<1x256xbf16>
    %138 = arith.extf %137 : vector<1x256xbf16> to vector<1x256xf32>
    %c0_57 = arith.constant 0 : index
    %c4_58 = arith.constant 4 : index
    %c0_59 = arith.constant 0 : index
    %c0_60 = arith.constant 0 : index
    %139 = vector.load %arg4[%c0_57, %c4_58, %c0_59, %c0_60] : memref<1x16x8x256xbf16, #tpu.memory_space<vmem>>, vector<1x1x8x256xbf16>
    %140 = vector.shape_cast %139 : vector<1x1x8x256xbf16> to vector<8x256xbf16>
    %141 = arith.extf %140 : vector<8x256xbf16> to vector<8x256xf32>
    %142 = arith.mulf %141, %141 : vector<8x256xf32>
    %c0_61 = arith.constant 0 : index
    %c4_62 = arith.constant 4 : index
    %c0_63 = arith.constant 0 : index
    %c0_64 = arith.constant 0 : index
    %143 = vector.load %arg5[%c0_61, %c4_62, %c0_63, %c0_64] : memref<1x16x8x256xbf16, #tpu.memory_space<vmem>>, vector<1x1x8x256xbf16>
    %144 = vector.shape_cast %143 : vector<1x1x8x256xbf16> to vector<8x256xbf16>
    %145 = arith.extf %144 : vector<8x256xbf16> to vector<8x256xf32>
    %146 = arith.addf %141, %145 : vector<8x256xf32>
    %147 = arith.mulf %145, %145 : vector<8x256xf32>
    %148 = arith.addf %142, %147 : vector<8x256xf32>
    %149 = vector.broadcast %138 : vector<1x256xf32> to vector<8x256xf32>
    %150 = arith.addf %146, %149 : vector<8x256xf32>
    %151 = arith.mulf %138, %138 : vector<1x256xf32>
    %152 = vector.broadcast %151 : vector<1x256xf32> to vector<8x256xf32>
    %153 = arith.addf %148, %152 : vector<8x256xf32>
    %c16_i32_65 = arith.constant 16 : i32
    %154 = arith.muli %arg2, %c16_i32_65 : i32
    %c4_i32 = arith.constant 4 : i32
    %155 = arith.addi %154, %c4_i32 : i32
    %156 = arith.index_cast %155 : i32 to index
    %157 = memref.load %arg7[%156] : memref<16xf32, #tpu.memory_space<smem>>
    %c16_i32_66 = arith.constant 16 : i32
    %158 = arith.muli %arg2, %c16_i32_66 : i32
    %c4_i32_67 = arith.constant 4 : i32
    %159 = arith.addi %158, %c4_i32_67 : i32
    %160 = arith.index_cast %159 : i32 to index
    %161 = memref.load %arg8[%160] : memref<16xf32, #tpu.memory_space<smem>>
    %162 = vector.broadcast %157 : f32 to vector<8x256xf32>
    %163 = arith.mulf %153, %162 : vector<8x256xf32>
    %164 = arith.mulf %150, %150 : vector<8x256xf32>
    %165 = vector.broadcast %161 : f32 to vector<8x256xf32>
    %166 = arith.mulf %164, %165 : vector<8x256xf32>
    %167 = arith.subf %163, %166 : vector<8x256xf32>
    %168 = arith.addf %135, %167 : vector<8x256xf32>
    %c0_68 = arith.constant 0 : index
    %c5 = arith.constant 5 : index
    %c0_69 = arith.constant 0 : index
    %169 = vector.load %arg3[%c0_68, %c5, %c0_69] : memref<1x16x256xbf16, #tpu.memory_space<vmem>>, vector<1x1x256xbf16>
    %170 = vector.shape_cast %169 : vector<1x1x256xbf16> to vector<1x256xbf16>
    %171 = arith.extf %170 : vector<1x256xbf16> to vector<1x256xf32>
    %c0_70 = arith.constant 0 : index
    %c5_71 = arith.constant 5 : index
    %c0_72 = arith.constant 0 : index
    %c0_73 = arith.constant 0 : index
    %172 = vector.load %arg4[%c0_70, %c5_71, %c0_72, %c0_73] : memref<1x16x8x256xbf16, #tpu.memory_space<vmem>>, vector<1x1x8x256xbf16>
    %173 = vector.shape_cast %172 : vector<1x1x8x256xbf16> to vector<8x256xbf16>
    %174 = arith.extf %173 : vector<8x256xbf16> to vector<8x256xf32>
    %175 = arith.mulf %174, %174 : vector<8x256xf32>
    %c0_74 = arith.constant 0 : index
    %c5_75 = arith.constant 5 : index
    %c0_76 = arith.constant 0 : index
    %c0_77 = arith.constant 0 : index
    %176 = vector.load %arg5[%c0_74, %c5_75, %c0_76, %c0_77] : memref<1x16x8x256xbf16, #tpu.memory_space<vmem>>, vector<1x1x8x256xbf16>
    %177 = vector.shape_cast %176 : vector<1x1x8x256xbf16> to vector<8x256xbf16>
    %178 = arith.extf %177 : vector<8x256xbf16> to vector<8x256xf32>
    %179 = arith.addf %174, %178 : vector<8x256xf32>
    %180 = arith.mulf %178, %178 : vector<8x256xf32>
    %181 = arith.addf %175, %180 : vector<8x256xf32>
    %182 = vector.broadcast %171 : vector<1x256xf32> to vector<8x256xf32>
    %183 = arith.addf %179, %182 : vector<8x256xf32>
    %184 = arith.mulf %171, %171 : vector<1x256xf32>
    %185 = vector.broadcast %184 : vector<1x256xf32> to vector<8x256xf32>
    %186 = arith.addf %181, %185 : vector<8x256xf32>
    %c16_i32_78 = arith.constant 16 : i32
    %187 = arith.muli %arg2, %c16_i32_78 : i32
    %c5_i32 = arith.constant 5 : i32
    %188 = arith.addi %187, %c5_i32 : i32
    %189 = arith.index_cast %188 : i32 to index
    %190 = memref.load %arg7[%189] : memref<16xf32, #tpu.memory_space<smem>>
    %c16_i32_79 = arith.constant 16 : i32
    %191 = arith.muli %arg2, %c16_i32_79 : i32
    %c5_i32_80 = arith.constant 5 : i32
    %192 = arith.addi %191, %c5_i32_80 : i32
    %193 = arith.index_cast %192 : i32 to index
    %194 = memref.load %arg8[%193] : memref<16xf32, #tpu.memory_space<smem>>
    %195 = vector.broadcast %190 : f32 to vector<8x256xf32>
    %196 = arith.mulf %186, %195 : vector<8x256xf32>
    %197 = arith.mulf %183, %183 : vector<8x256xf32>
    %198 = vector.broadcast %194 : f32 to vector<8x256xf32>
    %199 = arith.mulf %197, %198 : vector<8x256xf32>
    %200 = arith.subf %196, %199 : vector<8x256xf32>
    %201 = arith.addf %168, %200 : vector<8x256xf32>
    %c0_81 = arith.constant 0 : index
    %c6 = arith.constant 6 : index
    %c0_82 = arith.constant 0 : index
    %202 = vector.load %arg3[%c0_81, %c6, %c0_82] : memref<1x16x256xbf16, #tpu.memory_space<vmem>>, vector<1x1x256xbf16>
    %203 = vector.shape_cast %202 : vector<1x1x256xbf16> to vector<1x256xbf16>
    %204 = arith.extf %203 : vector<1x256xbf16> to vector<1x256xf32>
    %c0_83 = arith.constant 0 : index
    %c6_84 = arith.constant 6 : index
    %c0_85 = arith.constant 0 : index
    %c0_86 = arith.constant 0 : index
    %205 = vector.load %arg4[%c0_83, %c6_84, %c0_85, %c0_86] : memref<1x16x8x256xbf16, #tpu.memory_space<vmem>>, vector<1x1x8x256xbf16>
    %206 = vector.shape_cast %205 : vector<1x1x8x256xbf16> to vector<8x256xbf16>
    %207 = arith.extf %206 : vector<8x256xbf16> to vector<8x256xf32>
    %208 = arith.mulf %207, %207 : vector<8x256xf32>
    %c0_87 = arith.constant 0 : index
    %c6_88 = arith.constant 6 : index
    %c0_89 = arith.constant 0 : index
    %c0_90 = arith.constant 0 : index
    %209 = vector.load %arg5[%c0_87, %c6_88, %c0_89, %c0_90] : memref<1x16x8x256xbf16, #tpu.memory_space<vmem>>, vector<1x1x8x256xbf16>
    %210 = vector.shape_cast %209 : vector<1x1x8x256xbf16> to vector<8x256xbf16>
    %211 = arith.extf %210 : vector<8x256xbf16> to vector<8x256xf32>
    %212 = arith.addf %207, %211 : vector<8x256xf32>
    %213 = arith.mulf %211, %211 : vector<8x256xf32>
    %214 = arith.addf %208, %213 : vector<8x256xf32>
    %215 = vector.broadcast %204 : vector<1x256xf32> to vector<8x256xf32>
    %216 = arith.addf %212, %215 : vector<8x256xf32>
    %217 = arith.mulf %204, %204 : vector<1x256xf32>
    %218 = vector.broadcast %217 : vector<1x256xf32> to vector<8x256xf32>
    %219 = arith.addf %214, %218 : vector<8x256xf32>
    %c16_i32_91 = arith.constant 16 : i32
    %220 = arith.muli %arg2, %c16_i32_91 : i32
    %c6_i32 = arith.constant 6 : i32
    %221 = arith.addi %220, %c6_i32 : i32
    %222 = arith.index_cast %221 : i32 to index
    %223 = memref.load %arg7[%222] : memref<16xf32, #tpu.memory_space<smem>>
    %c16_i32_92 = arith.constant 16 : i32
    %224 = arith.muli %arg2, %c16_i32_92 : i32
    %c6_i32_93 = arith.constant 6 : i32
    %225 = arith.addi %224, %c6_i32_93 : i32
    %226 = arith.index_cast %225 : i32 to index
    %227 = memref.load %arg8[%226] : memref<16xf32, #tpu.memory_space<smem>>
    %228 = vector.broadcast %223 : f32 to vector<8x256xf32>
    %229 = arith.mulf %219, %228 : vector<8x256xf32>
    %230 = arith.mulf %216, %216 : vector<8x256xf32>
    %231 = vector.broadcast %227 : f32 to vector<8x256xf32>
    %232 = arith.mulf %230, %231 : vector<8x256xf32>
    %233 = arith.subf %229, %232 : vector<8x256xf32>
    %234 = arith.addf %201, %233 : vector<8x256xf32>
    %c0_94 = arith.constant 0 : index
    %c7 = arith.constant 7 : index
    %c0_95 = arith.constant 0 : index
    %235 = vector.load %arg3[%c0_94, %c7, %c0_95] : memref<1x16x256xbf16, #tpu.memory_space<vmem>>, vector<1x1x256xbf16>
    %236 = vector.shape_cast %235 : vector<1x1x256xbf16> to vector<1x256xbf16>
    %237 = arith.extf %236 : vector<1x256xbf16> to vector<1x256xf32>
    %c0_96 = arith.constant 0 : index
    %c7_97 = arith.constant 7 : index
    %c0_98 = arith.constant 0 : index
    %c0_99 = arith.constant 0 : index
    %238 = vector.load %arg4[%c0_96, %c7_97, %c0_98, %c0_99] : memref<1x16x8x256xbf16, #tpu.memory_space<vmem>>, vector<1x1x8x256xbf16>
    %239 = vector.shape_cast %238 : vector<1x1x8x256xbf16> to vector<8x256xbf16>
    %240 = arith.extf %239 : vector<8x256xbf16> to vector<8x256xf32>
    %241 = arith.mulf %240, %240 : vector<8x256xf32>
    %c0_100 = arith.constant 0 : index
    %c7_101 = arith.constant 7 : index
    %c0_102 = arith.constant 0 : index
    %c0_103 = arith.constant 0 : index
    %242 = vector.load %arg5[%c0_100, %c7_101, %c0_102, %c0_103] : memref<1x16x8x256xbf16, #tpu.memory_space<vmem>>, vector<1x1x8x256xbf16>
    %243 = vector.shape_cast %242 : vector<1x1x8x256xbf16> to vector<8x256xbf16>
    %244 = arith.extf %243 : vector<8x256xbf16> to vector<8x256xf32>
    %245 = arith.addf %240, %244 : vector<8x256xf32>
    %246 = arith.mulf %244, %244 : vector<8x256xf32>
    %247 = arith.addf %241, %246 : vector<8x256xf32>
    %248 = vector.broadcast %237 : vector<1x256xf32> to vector<8x256xf32>
    %249 = arith.addf %245, %248 : vector<8x256xf32>
    %250 = arith.mulf %237, %237 : vector<1x256xf32>
    %251 = vector.broadcast %250 : vector<1x256xf32> to vector<8x256xf32>
    %252 = arith.addf %247, %251 : vector<8x256xf32>
    %c16_i32_104 = arith.constant 16 : i32
    %253 = arith.muli %arg2, %c16_i32_104 : i32
    %c7_i32 = arith.constant 7 : i32
    %254 = arith.addi %253, %c7_i32 : i32
    %255 = arith.index_cast %254 : i32 to index
    %256 = memref.load %arg7[%255] : memref<16xf32, #tpu.memory_space<smem>>
    %c16_i32_105 = arith.constant 16 : i32
    %257 = arith.muli %arg2, %c16_i32_105 : i32
    %c7_i32_106 = arith.constant 7 : i32
    %258 = arith.addi %257, %c7_i32_106 : i32
    %259 = arith.index_cast %258 : i32 to index
    %260 = memref.load %arg8[%259] : memref<16xf32, #tpu.memory_space<smem>>
    %261 = vector.broadcast %256 : f32 to vector<8x256xf32>
    %262 = arith.mulf %252, %261 : vector<8x256xf32>
    %263 = arith.mulf %249, %249 : vector<8x256xf32>
    %264 = vector.broadcast %260 : f32 to vector<8x256xf32>
    %265 = arith.mulf %263, %264 : vector<8x256xf32>
    %266 = arith.subf %262, %265 : vector<8x256xf32>
    %267 = arith.addf %234, %266 : vector<8x256xf32>
    %c0_107 = arith.constant 0 : index
    %c8 = arith.constant 8 : index
    %c0_108 = arith.constant 0 : index
    %268 = vector.load %arg3[%c0_107, %c8, %c0_108] : memref<1x16x256xbf16, #tpu.memory_space<vmem>>, vector<1x1x256xbf16>
    %269 = vector.shape_cast %268 : vector<1x1x256xbf16> to vector<1x256xbf16>
    %270 = arith.extf %269 : vector<1x256xbf16> to vector<1x256xf32>
    %c0_109 = arith.constant 0 : index
    %c8_110 = arith.constant 8 : index
    %c0_111 = arith.constant 0 : index
    %c0_112 = arith.constant 0 : index
    %271 = vector.load %arg4[%c0_109, %c8_110, %c0_111, %c0_112] : memref<1x16x8x256xbf16, #tpu.memory_space<vmem>>, vector<1x1x8x256xbf16>
    %272 = vector.shape_cast %271 : vector<1x1x8x256xbf16> to vector<8x256xbf16>
    %273 = arith.extf %272 : vector<8x256xbf16> to vector<8x256xf32>
    %274 = arith.mulf %273, %273 : vector<8x256xf32>
    %c0_113 = arith.constant 0 : index
    %c8_114 = arith.constant 8 : index
    %c0_115 = arith.constant 0 : index
    %c0_116 = arith.constant 0 : index
    %275 = vector.load %arg5[%c0_113, %c8_114, %c0_115, %c0_116] : memref<1x16x8x256xbf16, #tpu.memory_space<vmem>>, vector<1x1x8x256xbf16>
    %276 = vector.shape_cast %275 : vector<1x1x8x256xbf16> to vector<8x256xbf16>
    %277 = arith.extf %276 : vector<8x256xbf16> to vector<8x256xf32>
    %278 = arith.addf %273, %277 : vector<8x256xf32>
    %279 = arith.mulf %277, %277 : vector<8x256xf32>
    %280 = arith.addf %274, %279 : vector<8x256xf32>
    %281 = vector.broadcast %270 : vector<1x256xf32> to vector<8x256xf32>
    %282 = arith.addf %278, %281 : vector<8x256xf32>
    %283 = arith.mulf %270, %270 : vector<1x256xf32>
    %284 = vector.broadcast %283 : vector<1x256xf32> to vector<8x256xf32>
    %285 = arith.addf %280, %284 : vector<8x256xf32>
    %c16_i32_117 = arith.constant 16 : i32
    %286 = arith.muli %arg2, %c16_i32_117 : i32
    %c8_i32 = arith.constant 8 : i32
    %287 = arith.addi %286, %c8_i32 : i32
    %288 = arith.index_cast %287 : i32 to index
    %289 = memref.load %arg7[%288] : memref<16xf32, #tpu.memory_space<smem>>
    %c16_i32_118 = arith.constant 16 : i32
    %290 = arith.muli %arg2, %c16_i32_118 : i32
    %c8_i32_119 = arith.constant 8 : i32
    %291 = arith.addi %290, %c8_i32_119 : i32
    %292 = arith.index_cast %291 : i32 to index
    %293 = memref.load %arg8[%292] : memref<16xf32, #tpu.memory_space<smem>>
    %294 = vector.broadcast %289 : f32 to vector<8x256xf32>
    %295 = arith.mulf %285, %294 : vector<8x256xf32>
    %296 = arith.mulf %282, %282 : vector<8x256xf32>
    %297 = vector.broadcast %293 : f32 to vector<8x256xf32>
    %298 = arith.mulf %296, %297 : vector<8x256xf32>
    %299 = arith.subf %295, %298 : vector<8x256xf32>
    %300 = arith.addf %267, %299 : vector<8x256xf32>
    %c0_120 = arith.constant 0 : index
    %c9 = arith.constant 9 : index
    %c0_121 = arith.constant 0 : index
    %301 = vector.load %arg3[%c0_120, %c9, %c0_121] : memref<1x16x256xbf16, #tpu.memory_space<vmem>>, vector<1x1x256xbf16>
    %302 = vector.shape_cast %301 : vector<1x1x256xbf16> to vector<1x256xbf16>
    %303 = arith.extf %302 : vector<1x256xbf16> to vector<1x256xf32>
    %c0_122 = arith.constant 0 : index
    %c9_123 = arith.constant 9 : index
    %c0_124 = arith.constant 0 : index
    %c0_125 = arith.constant 0 : index
    %304 = vector.load %arg4[%c0_122, %c9_123, %c0_124, %c0_125] : memref<1x16x8x256xbf16, #tpu.memory_space<vmem>>, vector<1x1x8x256xbf16>
    %305 = vector.shape_cast %304 : vector<1x1x8x256xbf16> to vector<8x256xbf16>
    %306 = arith.extf %305 : vector<8x256xbf16> to vector<8x256xf32>
    %307 = arith.mulf %306, %306 : vector<8x256xf32>
    %c0_126 = arith.constant 0 : index
    %c9_127 = arith.constant 9 : index
    %c0_128 = arith.constant 0 : index
    %c0_129 = arith.constant 0 : index
    %308 = vector.load %arg5[%c0_126, %c9_127, %c0_128, %c0_129] : memref<1x16x8x256xbf16, #tpu.memory_space<vmem>>, vector<1x1x8x256xbf16>
    %309 = vector.shape_cast %308 : vector<1x1x8x256xbf16> to vector<8x256xbf16>
    %310 = arith.extf %309 : vector<8x256xbf16> to vector<8x256xf32>
    %311 = arith.addf %306, %310 : vector<8x256xf32>
    %312 = arith.mulf %310, %310 : vector<8x256xf32>
    %313 = arith.addf %307, %312 : vector<8x256xf32>
    %314 = vector.broadcast %303 : vector<1x256xf32> to vector<8x256xf32>
    %315 = arith.addf %311, %314 : vector<8x256xf32>
    %316 = arith.mulf %303, %303 : vector<1x256xf32>
    %317 = vector.broadcast %316 : vector<1x256xf32> to vector<8x256xf32>
    %318 = arith.addf %313, %317 : vector<8x256xf32>
    %c16_i32_130 = arith.constant 16 : i32
    %319 = arith.muli %arg2, %c16_i32_130 : i32
    %c9_i32 = arith.constant 9 : i32
    %320 = arith.addi %319, %c9_i32 : i32
    %321 = arith.index_cast %320 : i32 to index
    %322 = memref.load %arg7[%321] : memref<16xf32, #tpu.memory_space<smem>>
    %c16_i32_131 = arith.constant 16 : i32
    %323 = arith.muli %arg2, %c16_i32_131 : i32
    %c9_i32_132 = arith.constant 9 : i32
    %324 = arith.addi %323, %c9_i32_132 : i32
    %325 = arith.index_cast %324 : i32 to index
    %326 = memref.load %arg8[%325] : memref<16xf32, #tpu.memory_space<smem>>
    %327 = vector.broadcast %322 : f32 to vector<8x256xf32>
    %328 = arith.mulf %318, %327 : vector<8x256xf32>
    %329 = arith.mulf %315, %315 : vector<8x256xf32>
    %330 = vector.broadcast %326 : f32 to vector<8x256xf32>
    %331 = arith.mulf %329, %330 : vector<8x256xf32>
    %332 = arith.subf %328, %331 : vector<8x256xf32>
    %333 = arith.addf %300, %332 : vector<8x256xf32>
    %c0_133 = arith.constant 0 : index
    %c10 = arith.constant 10 : index
    %c0_134 = arith.constant 0 : index
    %334 = vector.load %arg3[%c0_133, %c10, %c0_134] : memref<1x16x256xbf16, #tpu.memory_space<vmem>>, vector<1x1x256xbf16>
    %335 = vector.shape_cast %334 : vector<1x1x256xbf16> to vector<1x256xbf16>
    %336 = arith.extf %335 : vector<1x256xbf16> to vector<1x256xf32>
    %c0_135 = arith.constant 0 : index
    %c10_136 = arith.constant 10 : index
    %c0_137 = arith.constant 0 : index
    %c0_138 = arith.constant 0 : index
    %337 = vector.load %arg4[%c0_135, %c10_136, %c0_137, %c0_138] : memref<1x16x8x256xbf16, #tpu.memory_space<vmem>>, vector<1x1x8x256xbf16>
    %338 = vector.shape_cast %337 : vector<1x1x8x256xbf16> to vector<8x256xbf16>
    %339 = arith.extf %338 : vector<8x256xbf16> to vector<8x256xf32>
    %340 = arith.mulf %339, %339 : vector<8x256xf32>
    %c0_139 = arith.constant 0 : index
    %c10_140 = arith.constant 10 : index
    %c0_141 = arith.constant 0 : index
    %c0_142 = arith.constant 0 : index
    %341 = vector.load %arg5[%c0_139, %c10_140, %c0_141, %c0_142] : memref<1x16x8x256xbf16, #tpu.memory_space<vmem>>, vector<1x1x8x256xbf16>
    %342 = vector.shape_cast %341 : vector<1x1x8x256xbf16> to vector<8x256xbf16>
    %343 = arith.extf %342 : vector<8x256xbf16> to vector<8x256xf32>
    %344 = arith.addf %339, %343 : vector<8x256xf32>
    %345 = arith.mulf %343, %343 : vector<8x256xf32>
    %346 = arith.addf %340, %345 : vector<8x256xf32>
    %347 = vector.broadcast %336 : vector<1x256xf32> to vector<8x256xf32>
    %348 = arith.addf %344, %347 : vector<8x256xf32>
    %349 = arith.mulf %336, %336 : vector<1x256xf32>
    %350 = vector.broadcast %349 : vector<1x256xf32> to vector<8x256xf32>
    %351 = arith.addf %346, %350 : vector<8x256xf32>
    %c16_i32_143 = arith.constant 16 : i32
    %352 = arith.muli %arg2, %c16_i32_143 : i32
    %c10_i32 = arith.constant 10 : i32
    %353 = arith.addi %352, %c10_i32 : i32
    %354 = arith.index_cast %353 : i32 to index
    %355 = memref.load %arg7[%354] : memref<16xf32, #tpu.memory_space<smem>>
    %c16_i32_144 = arith.constant 16 : i32
    %356 = arith.muli %arg2, %c16_i32_144 : i32
    %c10_i32_145 = arith.constant 10 : i32
    %357 = arith.addi %356, %c10_i32_145 : i32
    %358 = arith.index_cast %357 : i32 to index
    %359 = memref.load %arg8[%358] : memref<16xf32, #tpu.memory_space<smem>>
    %360 = vector.broadcast %355 : f32 to vector<8x256xf32>
    %361 = arith.mulf %351, %360 : vector<8x256xf32>
    %362 = arith.mulf %348, %348 : vector<8x256xf32>
    %363 = vector.broadcast %359 : f32 to vector<8x256xf32>
    %364 = arith.mulf %362, %363 : vector<8x256xf32>
    %365 = arith.subf %361, %364 : vector<8x256xf32>
    %366 = arith.addf %333, %365 : vector<8x256xf32>
    %c0_146 = arith.constant 0 : index
    %c11 = arith.constant 11 : index
    %c0_147 = arith.constant 0 : index
    %367 = vector.load %arg3[%c0_146, %c11, %c0_147] : memref<1x16x256xbf16, #tpu.memory_space<vmem>>, vector<1x1x256xbf16>
    %368 = vector.shape_cast %367 : vector<1x1x256xbf16> to vector<1x256xbf16>
    %369 = arith.extf %368 : vector<1x256xbf16> to vector<1x256xf32>
    %c0_148 = arith.constant 0 : index
    %c11_149 = arith.constant 11 : index
    %c0_150 = arith.constant 0 : index
    %c0_151 = arith.constant 0 : index
    %370 = vector.load %arg4[%c0_148, %c11_149, %c0_150, %c0_151] : memref<1x16x8x256xbf16, #tpu.memory_space<vmem>>, vector<1x1x8x256xbf16>
    %371 = vector.shape_cast %370 : vector<1x1x8x256xbf16> to vector<8x256xbf16>
    %372 = arith.extf %371 : vector<8x256xbf16> to vector<8x256xf32>
    %373 = arith.mulf %372, %372 : vector<8x256xf32>
    %c0_152 = arith.constant 0 : index
    %c11_153 = arith.constant 11 : index
    %c0_154 = arith.constant 0 : index
    %c0_155 = arith.constant 0 : index
    %374 = vector.load %arg5[%c0_152, %c11_153, %c0_154, %c0_155] : memref<1x16x8x256xbf16, #tpu.memory_space<vmem>>, vector<1x1x8x256xbf16>
    %375 = vector.shape_cast %374 : vector<1x1x8x256xbf16> to vector<8x256xbf16>
    %376 = arith.extf %375 : vector<8x256xbf16> to vector<8x256xf32>
    %377 = arith.addf %372, %376 : vector<8x256xf32>
    %378 = arith.mulf %376, %376 : vector<8x256xf32>
    %379 = arith.addf %373, %378 : vector<8x256xf32>
    %380 = vector.broadcast %369 : vector<1x256xf32> to vector<8x256xf32>
    %381 = arith.addf %377, %380 : vector<8x256xf32>
    %382 = arith.mulf %369, %369 : vector<1x256xf32>
    %383 = vector.broadcast %382 : vector<1x256xf32> to vector<8x256xf32>
    %384 = arith.addf %379, %383 : vector<8x256xf32>
    %c16_i32_156 = arith.constant 16 : i32
    %385 = arith.muli %arg2, %c16_i32_156 : i32
    %c11_i32 = arith.constant 11 : i32
    %386 = arith.addi %385, %c11_i32 : i32
    %387 = arith.index_cast %386 : i32 to index
    %388 = memref.load %arg7[%387] : memref<16xf32, #tpu.memory_space<smem>>
    %c16_i32_157 = arith.constant 16 : i32
    %389 = arith.muli %arg2, %c16_i32_157 : i32
    %c11_i32_158 = arith.constant 11 : i32
    %390 = arith.addi %389, %c11_i32_158 : i32
    %391 = arith.index_cast %390 : i32 to index
    %392 = memref.load %arg8[%391] : memref<16xf32, #tpu.memory_space<smem>>
    %393 = vector.broadcast %388 : f32 to vector<8x256xf32>
    %394 = arith.mulf %384, %393 : vector<8x256xf32>
    %395 = arith.mulf %381, %381 : vector<8x256xf32>
    %396 = vector.broadcast %392 : f32 to vector<8x256xf32>
    %397 = arith.mulf %395, %396 : vector<8x256xf32>
    %398 = arith.subf %394, %397 : vector<8x256xf32>
    %399 = arith.addf %366, %398 : vector<8x256xf32>
    %c0_159 = arith.constant 0 : index
    %c12 = arith.constant 12 : index
    %c0_160 = arith.constant 0 : index
    %400 = vector.load %arg3[%c0_159, %c12, %c0_160] : memref<1x16x256xbf16, #tpu.memory_space<vmem>>, vector<1x1x256xbf16>
    %401 = vector.shape_cast %400 : vector<1x1x256xbf16> to vector<1x256xbf16>
    %402 = arith.extf %401 : vector<1x256xbf16> to vector<1x256xf32>
    %c0_161 = arith.constant 0 : index
    %c12_162 = arith.constant 12 : index
    %c0_163 = arith.constant 0 : index
    %c0_164 = arith.constant 0 : index
    %403 = vector.load %arg4[%c0_161, %c12_162, %c0_163, %c0_164] : memref<1x16x8x256xbf16, #tpu.memory_space<vmem>>, vector<1x1x8x256xbf16>
    %404 = vector.shape_cast %403 : vector<1x1x8x256xbf16> to vector<8x256xbf16>
    %405 = arith.extf %404 : vector<8x256xbf16> to vector<8x256xf32>
    %406 = arith.mulf %405, %405 : vector<8x256xf32>
    %c0_165 = arith.constant 0 : index
    %c12_166 = arith.constant 12 : index
    %c0_167 = arith.constant 0 : index
    %c0_168 = arith.constant 0 : index
    %407 = vector.load %arg5[%c0_165, %c12_166, %c0_167, %c0_168] : memref<1x16x8x256xbf16, #tpu.memory_space<vmem>>, vector<1x1x8x256xbf16>
    %408 = vector.shape_cast %407 : vector<1x1x8x256xbf16> to vector<8x256xbf16>
    %409 = arith.extf %408 : vector<8x256xbf16> to vector<8x256xf32>
    %410 = arith.addf %405, %409 : vector<8x256xf32>
    %411 = arith.mulf %409, %409 : vector<8x256xf32>
    %412 = arith.addf %406, %411 : vector<8x256xf32>
    %413 = vector.broadcast %402 : vector<1x256xf32> to vector<8x256xf32>
    %414 = arith.addf %410, %413 : vector<8x256xf32>
    %415 = arith.mulf %402, %402 : vector<1x256xf32>
    %416 = vector.broadcast %415 : vector<1x256xf32> to vector<8x256xf32>
    %417 = arith.addf %412, %416 : vector<8x256xf32>
    %c16_i32_169 = arith.constant 16 : i32
    %418 = arith.muli %arg2, %c16_i32_169 : i32
    %c12_i32 = arith.constant 12 : i32
    %419 = arith.addi %418, %c12_i32 : i32
    %420 = arith.index_cast %419 : i32 to index
    %421 = memref.load %arg7[%420] : memref<16xf32, #tpu.memory_space<smem>>
    %c16_i32_170 = arith.constant 16 : i32
    %422 = arith.muli %arg2, %c16_i32_170 : i32
    %c12_i32_171 = arith.constant 12 : i32
    %423 = arith.addi %422, %c12_i32_171 : i32
    %424 = arith.index_cast %423 : i32 to index
    %425 = memref.load %arg8[%424] : memref<16xf32, #tpu.memory_space<smem>>
    %426 = vector.broadcast %421 : f32 to vector<8x256xf32>
    %427 = arith.mulf %417, %426 : vector<8x256xf32>
    %428 = arith.mulf %414, %414 : vector<8x256xf32>
    %429 = vector.broadcast %425 : f32 to vector<8x256xf32>
    %430 = arith.mulf %428, %429 : vector<8x256xf32>
    %431 = arith.subf %427, %430 : vector<8x256xf32>
    %432 = arith.addf %399, %431 : vector<8x256xf32>
    %c0_172 = arith.constant 0 : index
    %c13 = arith.constant 13 : index
    %c0_173 = arith.constant 0 : index
    %433 = vector.load %arg3[%c0_172, %c13, %c0_173] : memref<1x16x256xbf16, #tpu.memory_space<vmem>>, vector<1x1x256xbf16>
    %434 = vector.shape_cast %433 : vector<1x1x256xbf16> to vector<1x256xbf16>
    %435 = arith.extf %434 : vector<1x256xbf16> to vector<1x256xf32>
    %c0_174 = arith.constant 0 : index
    %c13_175 = arith.constant 13 : index
    %c0_176 = arith.constant 0 : index
    %c0_177 = arith.constant 0 : index
    %436 = vector.load %arg4[%c0_174, %c13_175, %c0_176, %c0_177] : memref<1x16x8x256xbf16, #tpu.memory_space<vmem>>, vector<1x1x8x256xbf16>
    %437 = vector.shape_cast %436 : vector<1x1x8x256xbf16> to vector<8x256xbf16>
    %438 = arith.extf %437 : vector<8x256xbf16> to vector<8x256xf32>
    %439 = arith.mulf %438, %438 : vector<8x256xf32>
    %c0_178 = arith.constant 0 : index
    %c13_179 = arith.constant 13 : index
    %c0_180 = arith.constant 0 : index
    %c0_181 = arith.constant 0 : index
    %440 = vector.load %arg5[%c0_178, %c13_179, %c0_180, %c0_181] : memref<1x16x8x256xbf16, #tpu.memory_space<vmem>>, vector<1x1x8x256xbf16>
    %441 = vector.shape_cast %440 : vector<1x1x8x256xbf16> to vector<8x256xbf16>
    %442 = arith.extf %441 : vector<8x256xbf16> to vector<8x256xf32>
    %443 = arith.addf %438, %442 : vector<8x256xf32>
    %444 = arith.mulf %442, %442 : vector<8x256xf32>
    %445 = arith.addf %439, %444 : vector<8x256xf32>
    %446 = vector.broadcast %435 : vector<1x256xf32> to vector<8x256xf32>
    %447 = arith.addf %443, %446 : vector<8x256xf32>
    %448 = arith.mulf %435, %435 : vector<1x256xf32>
    %449 = vector.broadcast %448 : vector<1x256xf32> to vector<8x256xf32>
    %450 = arith.addf %445, %449 : vector<8x256xf32>
    %c16_i32_182 = arith.constant 16 : i32
    %451 = arith.muli %arg2, %c16_i32_182 : i32
    %c13_i32 = arith.constant 13 : i32
    %452 = arith.addi %451, %c13_i32 : i32
    %453 = arith.index_cast %452 : i32 to index
    %454 = memref.load %arg7[%453] : memref<16xf32, #tpu.memory_space<smem>>
    %c16_i32_183 = arith.constant 16 : i32
    %455 = arith.muli %arg2, %c16_i32_183 : i32
    %c13_i32_184 = arith.constant 13 : i32
    %456 = arith.addi %455, %c13_i32_184 : i32
    %457 = arith.index_cast %456 : i32 to index
    %458 = memref.load %arg8[%457] : memref<16xf32, #tpu.memory_space<smem>>
    %459 = vector.broadcast %454 : f32 to vector<8x256xf32>
    %460 = arith.mulf %450, %459 : vector<8x256xf32>
    %461 = arith.mulf %447, %447 : vector<8x256xf32>
    %462 = vector.broadcast %458 : f32 to vector<8x256xf32>
    %463 = arith.mulf %461, %462 : vector<8x256xf32>
    %464 = arith.subf %460, %463 : vector<8x256xf32>
    %465 = arith.addf %432, %464 : vector<8x256xf32>
    %c0_185 = arith.constant 0 : index
    %c14 = arith.constant 14 : index
    %c0_186 = arith.constant 0 : index
    %466 = vector.load %arg3[%c0_185, %c14, %c0_186] : memref<1x16x256xbf16, #tpu.memory_space<vmem>>, vector<1x1x256xbf16>
    %467 = vector.shape_cast %466 : vector<1x1x256xbf16> to vector<1x256xbf16>
    %468 = arith.extf %467 : vector<1x256xbf16> to vector<1x256xf32>
    %c0_187 = arith.constant 0 : index
    %c14_188 = arith.constant 14 : index
    %c0_189 = arith.constant 0 : index
    %c0_190 = arith.constant 0 : index
    %469 = vector.load %arg4[%c0_187, %c14_188, %c0_189, %c0_190] : memref<1x16x8x256xbf16, #tpu.memory_space<vmem>>, vector<1x1x8x256xbf16>
    %470 = vector.shape_cast %469 : vector<1x1x8x256xbf16> to vector<8x256xbf16>
    %471 = arith.extf %470 : vector<8x256xbf16> to vector<8x256xf32>
    %472 = arith.mulf %471, %471 : vector<8x256xf32>
    %c0_191 = arith.constant 0 : index
    %c14_192 = arith.constant 14 : index
    %c0_193 = arith.constant 0 : index
    %c0_194 = arith.constant 0 : index
    %473 = vector.load %arg5[%c0_191, %c14_192, %c0_193, %c0_194] : memref<1x16x8x256xbf16, #tpu.memory_space<vmem>>, vector<1x1x8x256xbf16>
    %474 = vector.shape_cast %473 : vector<1x1x8x256xbf16> to vector<8x256xbf16>
    %475 = arith.extf %474 : vector<8x256xbf16> to vector<8x256xf32>
    %476 = arith.addf %471, %475 : vector<8x256xf32>
    %477 = arith.mulf %475, %475 : vector<8x256xf32>
    %478 = arith.addf %472, %477 : vector<8x256xf32>
    %479 = vector.broadcast %468 : vector<1x256xf32> to vector<8x256xf32>
    %480 = arith.addf %476, %479 : vector<8x256xf32>
    %481 = arith.mulf %468, %468 : vector<1x256xf32>
    %482 = vector.broadcast %481 : vector<1x256xf32> to vector<8x256xf32>
    %483 = arith.addf %478, %482 : vector<8x256xf32>
    %c16_i32_195 = arith.constant 16 : i32
    %484 = arith.muli %arg2, %c16_i32_195 : i32
    %c14_i32 = arith.constant 14 : i32
    %485 = arith.addi %484, %c14_i32 : i32
    %486 = arith.index_cast %485 : i32 to index
    %487 = memref.load %arg7[%486] : memref<16xf32, #tpu.memory_space<smem>>
    %c16_i32_196 = arith.constant 16 : i32
    %488 = arith.muli %arg2, %c16_i32_196 : i32
    %c14_i32_197 = arith.constant 14 : i32
    %489 = arith.addi %488, %c14_i32_197 : i32
    %490 = arith.index_cast %489 : i32 to index
    %491 = memref.load %arg8[%490] : memref<16xf32, #tpu.memory_space<smem>>
    %492 = vector.broadcast %487 : f32 to vector<8x256xf32>
    %493 = arith.mulf %483, %492 : vector<8x256xf32>
    %494 = arith.mulf %480, %480 : vector<8x256xf32>
    %495 = vector.broadcast %491 : f32 to vector<8x256xf32>
    %496 = arith.mulf %494, %495 : vector<8x256xf32>
    %497 = arith.subf %493, %496 : vector<8x256xf32>
    %498 = arith.addf %465, %497 : vector<8x256xf32>
    %c0_198 = arith.constant 0 : index
    %c15 = arith.constant 15 : index
    %c0_199 = arith.constant 0 : index
    %499 = vector.load %arg3[%c0_198, %c15, %c0_199] : memref<1x16x256xbf16, #tpu.memory_space<vmem>>, vector<1x1x256xbf16>
    %500 = vector.shape_cast %499 : vector<1x1x256xbf16> to vector<1x256xbf16>
    %501 = arith.extf %500 : vector<1x256xbf16> to vector<1x256xf32>
    %c0_200 = arith.constant 0 : index
    %c15_201 = arith.constant 15 : index
    %c0_202 = arith.constant 0 : index
    %c0_203 = arith.constant 0 : index
    %502 = vector.load %arg4[%c0_200, %c15_201, %c0_202, %c0_203] : memref<1x16x8x256xbf16, #tpu.memory_space<vmem>>, vector<1x1x8x256xbf16>
    %503 = vector.shape_cast %502 : vector<1x1x8x256xbf16> to vector<8x256xbf16>
    %504 = arith.extf %503 : vector<8x256xbf16> to vector<8x256xf32>
    %505 = arith.mulf %504, %504 : vector<8x256xf32>
    %c0_204 = arith.constant 0 : index
    %c15_205 = arith.constant 15 : index
    %c0_206 = arith.constant 0 : index
    %c0_207 = arith.constant 0 : index
    %506 = vector.load %arg5[%c0_204, %c15_205, %c0_206, %c0_207] : memref<1x16x8x256xbf16, #tpu.memory_space<vmem>>, vector<1x1x8x256xbf16>
    %507 = vector.shape_cast %506 : vector<1x1x8x256xbf16> to vector<8x256xbf16>
    %508 = arith.extf %507 : vector<8x256xbf16> to vector<8x256xf32>
    %509 = arith.addf %504, %508 : vector<8x256xf32>
    %510 = arith.mulf %508, %508 : vector<8x256xf32>
    %511 = arith.addf %505, %510 : vector<8x256xf32>
    %512 = vector.broadcast %501 : vector<1x256xf32> to vector<8x256xf32>
    %513 = arith.addf %509, %512 : vector<8x256xf32>
    %514 = arith.mulf %501, %501 : vector<1x256xf32>
    %515 = vector.broadcast %514 : vector<1x256xf32> to vector<8x256xf32>
    %516 = arith.addf %511, %515 : vector<8x256xf32>
    %c16_i32_208 = arith.constant 16 : i32
    %517 = arith.muli %arg2, %c16_i32_208 : i32
    %c15_i32 = arith.constant 15 : i32
    %518 = arith.addi %517, %c15_i32 : i32
    %519 = arith.index_cast %518 : i32 to index
    %520 = memref.load %arg7[%519] : memref<16xf32, #tpu.memory_space<smem>>
    %c16_i32_209 = arith.constant 16 : i32
    %521 = arith.muli %arg2, %c16_i32_209 : i32
    %c15_i32_210 = arith.constant 15 : i32
    %522 = arith.addi %521, %c15_i32_210 : i32
    %523 = arith.index_cast %522 : i32 to index
    %524 = memref.load %arg8[%523] : memref<16xf32, #tpu.memory_space<smem>>
    %525 = vector.broadcast %520 : f32 to vector<8x256xf32>
    %526 = arith.mulf %516, %525 : vector<8x256xf32>
    %527 = arith.mulf %513, %513 : vector<8x256xf32>
    %528 = vector.broadcast %524 : f32 to vector<8x256xf32>
    %529 = arith.mulf %527, %528 : vector<8x256xf32>
    %530 = arith.subf %526, %529 : vector<8x256xf32>
    %531 = arith.addf %498, %530 : vector<8x256xf32>
    %c0_211 = arith.constant 0 : index
    %c0_212 = arith.constant 0 : index
    %532 = vector.load %arg11[%c0_211, %c0_212] : memref<8x256xf32, #tpu.memory_space<vmem>>, vector<8x256xf32>
    tpu.vector_store %arg11[%c0_211, %c0_212], %531 {strides = array<i32>} : memref<8x256xf32, #tpu.memory_space<vmem>>, vector<8x256xf32>,
    %c0_i32_213 = arith.constant 0 : i32
    %533 = arith.cmpi eq, %arg2, %c0_i32_213 : i32
    %534 = arith.extui %533 : i1 to i32
    %c0_i32_214 = arith.constant 0 : i32
    %535 = arith.cmpi ne, %534, %c0_i32_214 : i32
    scf.if %535 {
      %c0_215 = arith.constant 0 : index
      %c0_216 = arith.constant 0 : index
      %536 = vector.load %arg11[%c0_215, %c0_216] : memref<8x256xf32, #tpu.memory_space<vmem>>, vector<8x256xf32>
      %cst = arith.constant dense<0xFF800000> : vector<256xf32>
      %537 = vector.multi_reduction <maximumf>, %536, %cst [0] : vector<8x256xf32> to vector<256xf32>
      %538 = vector.shape_cast %537 : vector<256xf32> to vector<1x256xf32>
      %539 = vector.broadcast %538 : vector<1x256xf32> to vector<8x256xf32>
      %540 = arith.subf %536, %539 : vector<8x256xf32>
      %541 = math.exp %540 : vector<8x256xf32>
      %cst_217 = arith.constant dense<0.000000e+00> : vector<256xf32>
      %542 = vector.multi_reduction <add>, %541, %cst_217 [0] : vector<8x256xf32> to vector<256xf32>
      %543 = vector.shape_cast %542 : vector<256xf32> to vector<1x256xf32>
      %c0_218 = arith.constant 0 : index
      %c0_219 = arith.constant 0 : index
      %c0_220 = arith.constant 0 : index
      %544 = vector.load %arg6[%c0_218, %c0_219, %c0_220] : memref<1x8x256xf32, #tpu.memory_space<vmem>>, vector<1x8x256xf32>
      %545 = vector.shape_cast %544 : vector<1x8x256xf32> to vector<8x256xf32>
      %546 = arith.mulf %541, %545 : vector<8x256xf32>
      %cst_221 = arith.constant dense<0.000000e+00> : vector<256xf32>
      %547 = vector.multi_reduction <add>, %546, %cst_221 [0] : vector<8x256xf32> to vector<256xf32>
      %548 = vector.shape_cast %547 : vector<256xf32> to vector<1x256xf32>
      %cst_222 = arith.constant dense<0xFF800000> : vector<256xf32>
      %549 = vector.multi_reduction <maximumf>, %541, %cst_222 [0] : vector<8x256xf32> to vector<256xf32>
      %550 = vector.shape_cast %549 : vector<256xf32> to vector<1x256xf32>
      %551 = tpu.reciprocal %543 {approx = true} : vector<1x256xf32> -> vector<1x256xf32>
      %552 = arith.mulf %548, %551 : vector<1x256xf32>
      %553 = vector.shape_cast %552 : vector<1x256xf32> to vector<1x1x256xf32>
      %c0_223 = arith.constant 0 : index
      %c0_224 = arith.constant 0 : index
      %c0_225 = arith.constant 0 : index
      %554 = vector.load %arg9[%c0_223, %c0_224, %c0_225] : memref<1x1x256xf32, #tpu.memory_space<vmem>>, vector<1x1x256xf32>
      tpu.vector_store %arg9[%c0_223, %c0_224, %c0_225], %553 {strides = array<i32>} : memref<1x1x256xf32, #tpu.memory_space<vmem>>, vector<1x1x256xf32>,
      %555 = arith.mulf %550, %551 : vector<1x256xf32>
      %556 = vector.shape_cast %555 : vector<1x256xf32> to vector<1x1x256xf32>
      %c0_226 = arith.constant 0 : index
      %c0_227 = arith.constant 0 : index
      %c0_228 = arith.constant 0 : index
      %557 = vector.load %arg10[%c0_226, %c0_227, %c0_228] : memref<1x1x256xf32, #tpu.memory_space<vmem>>, vector<1x1x256xf32>
      tpu.vector_store %arg10[%c0_226, %c0_227, %c0_228], %556 {strides = array<i32>} : memref<1x1x256xf32, #tpu.memory_space<vmem>>, vector<1x1x256xf32>,
    } else {
    }
    return
  }
  func.func @transform_0(%arg0: i32, %arg1: i32, %arg2: i32) -> (i32, i32, i32) {
    %c0_i32 = arith.constant 0 : i32
    return %arg0, %arg2, %arg1 : i32, i32, i32
  }
  func.func @transform_1(%arg0: i32, %arg1: i32, %arg2: i32) -> (i32, i32, i32, i32) {
    %c0_i32 = arith.constant 0 : i32
    %c0_i32_0 = arith.constant 0 : i32
    return %arg0, %arg2, %c0_i32, %arg1 : i32, i32, i32, i32
  }
  func.func @transform_2(%arg0: i32, %arg1: i32, %arg2: i32) -> (i32, i32, i32, i32) {
    %c0_i32 = arith.constant 0 : i32
    %c0_i32_0 = arith.constant 0 : i32
    return %arg0, %arg2, %c0_i32, %arg1 : i32, i32, i32, i32
  }
  func.func @transform_3(%arg0: i32, %arg1: i32, %arg2: i32) -> (i32, i32, i32) {
    %c0_i32 = arith.constant 0 : i32
    %c0_i32_0 = arith.constant 0 : i32
    return %arg0, %c0_i32, %arg1 : i32, i32, i32
  }
  func.func @transform_4(%arg0: i32, %arg1: i32, %arg2: i32) -> i32 {
    %c0_i32 = arith.constant 0 : i32
    %c0_i32_0 = arith.constant 0 : i32
    return %c0_i32 : i32
  }
  func.func @transform_5(%arg0: i32, %arg1: i32, %arg2: i32) -> i32 {
    %c0_i32 = arith.constant 0 : i32
    %c0_i32_0 = arith.constant 0 : i32
    return %c0_i32 : i32
  }
  func.func @transform_6(%arg0: i32, %arg1: i32, %arg2: i32) -> (i32, i32, i32) {
    %c0_i32 = arith.constant 0 : i32
    %c0_i32_0 = arith.constant 0 : i32
    return %arg0, %c0_i32, %arg1 : i32, i32, i32
  }
  func.func @transform_7(%arg0: i32, %arg1: i32, %arg2: i32) -> (i32, i32, i32) {
    %c0_i32 = arith.constant 0 : i32
    %c0_i32_0 = arith.constant 0 : i32
    return %arg0, %c0_i32, %arg1 : i32, i32, i32
  }
}

</mosaic_0001>

<bundles_post_ra>
// kernel: custom-call.77
= control target key start
LH: loop header
LB: loop body
LE: loop exit
PB: predicated region body
PF: predicated region fallthrough
CT: control target
= control target key end

     0   :  { %5 = vsyncpa [#allocation6], 0  ;;  %s909_s0 = inlined_call_operand.vmem [shape: f32[2,4,4], index: 0, kind: input, shape index: {}]   ;;  %s910_s1 = inlined_call_operand.vmem [shape: f32[2,4,4], index: 1, kind: output, shape index: {0}]   ;;  %s911_s2 = inlined_call_operand.hbm [shape: s32[2,4], index: 2, kind: output, shape index: {1}]   ;;  %s912_s3 = inlined_call_operand.vmem [shape: s32[2,4], index: 3, kind: output, shape index: {2}]  }
   0x1   :  { %7 = vsyncpa [#allocation6 + $0x1], 0  ;;  %s726_s12 = smov 0   ;;  %s728_s13 = smov 0  }
   0x2   :  { %s730_s14 = smov 0   ;;  %s732_s15 = smov 0  }
   0x3 LB: > { %s747_s16 = sadd.s32 4294967295, %s698_s15   ;;  %s563_s17 = sadd.s32 4294967294, %s698_s15   ;;  %s698_s15 = sphi %s732_s15, %s920_s15   ;;  %s694_s14 = sphi %s730_s14, %s919_s14   ;;  %s690_s13 = sphi %s728_s13, %s918_s13   ;;  %s686_s12 = sphi %s726_s12, %s917_s12  }
   0x4   : > { %s751_s18 = sadd.s32 1, %s698_s15   ;;  %s17_s19 = sshrl.u32 %s698_s15, 3 }
   0x5   : > { %s18_s20 = sshrl.u32 %s751_s18, 3  ;;  %s22_s21 = sadd.s32 1, %s694_s14 }
   0x6   : > { %s19_s22 = ssub.s32 %s17_s19, %s18_s20  ;;  %p32_p0 = scmp.ne.s32.totalorder %s694_s14, %s690_s13 }
   0x7   : > { %p20_p1 = scmp.eq.s32.totalorder %s19_s22, 0  ;;  %p33_p2 = scmp.eq.s32.totalorder %s747_s16, 1 }
   0x8   : > { %p38_p3 = scmp.ne.s32.totalorder %s690_s13, %s686_s12  ;;  %p39_p4 = scmp.eq.s32.totalorder %s563_s17, 1 }
   0x9   : > { %s762_s23 = scalar_select %p20_p1, %s694_s14, %s22_s21  }
   0xa   : > { %p764_p5 = por %p33_p2, %p32_p0  ;;  %p768_p6 = por %p39_p4, %p38_p3 }
   0xb   : > { %p565_p7 = scmp.ge.s32.totalorder %s698_s15, 2 }
   0xc   : > { %s85_s26 = sand.u32 (!%p565_p7), 1, %s698_s15   ;;  %s567_s27 = sshll.u32 (!%p565_p7), %s698_s15, 2 }
   0xd   : > { %83 = sbr.rel (%p565_p7) target bundleno = 20 (0x14), region = 16  ;;  %s566_s28 = sshll.u32 (!%p565_p7), %s85_s26, 2 }
   0xe   : > { %s89_s4 = scalar_lea.vmem (!%p565_p7), %s909_s0, %s567_s27  ;;  %s87_s5 = scalar_lea.vmem (!%p565_p7), [#allocation1], %s566_s28 }
  0x12   : > { %v106_v0 = vld [vmem:[%s89_s4] sm:$0xf] }
  0x13   : > { %107 = vst [vmem:[%s87_s5] sm:$0xf] %v106_v0 }
  0x14 PF: > { %p568_p8 = scmp.ge.s32.totalorder %s698_s15, 1  ;;  %p124_p9 = scmp.lt.s32.totalorder %s698_s15, 3 }
  0x16   : > { %p125_p10 = pnand %p568_p8, %p124_p9 }
  0x18   : > { %128 = sbr.rel (%p125_p10) target bundleno = 446 (0x1be), region = 50 }
  0x1d   : > { %s135_s6 = sand.u32 1, %s747_s16   ;;  %s146_s7 = sand.u32 1, %s690_s13   ;;  %v169_v1 = vlaneseq  ;;  %v704_v4 = vmov 0  }
  0x1e   : > { %s784_s8 = sshll.u32 %s135_s6, 2  ;;  %s788_s9 = sshll.u32 %s146_s7, 1 }
  0x1f   : > { %v791_v2 = vshrl.u32 %v169_v1, 7  ;;  %s137_s10 = scalar_lea.vmem [#allocation1], %s784_s8  ;;  %s164_s11 = sand.u32 7, %s747_s16  }
  0x20   : > { %v158_v3 = vld [vmem:[%s137_s10] sm:$0xf]  ;;  %s796_s17 = scalar_lea.vmem [#allocation4], %s164_s11  ;;  %s141_s19 = scalar_lea.vmem [#allocation3], %s784_s8 }
  0x21   : > { %159 = vst [vmem:[#allocation0] sm:$0xf] %v158_v3  ;;  %173 = vst [vmem:[#allocation9] sm:$0xff] %v791_v2  ;;  %s148_s20 = scalar_lea.vmem [#allocation5], %s788_s9  ;;  %s154_s21 = scalar_lea.vmem [#allocation8], %s788_s9 }
  0x22   : > { %168 = vst [vmem:[%s796_s17] sm:$0x1] %v704_v4  ;;  %s802_s22 = scalar_lea.vmem [#allocation7], %s164_s11  ;;  %s804_s26 = smov 0  }
  0x28   : > { %v162_v5 = vld [vmem:[#allocation0] sm:$0xff] }
  0x29   : > { %163 = vst [vmem:[#allocation2] sm:$0xff] %v162_v5 }
  0x2a LB: >> { %vm189_vm0 = vcmp.lt.s32.totalorder %v791_v2, 4  ;;  %v811_v8 = vstv %s702_s26  ;;  %s230_s27 = ssub.s32 128, %s702_s26  ;;  %v236_v38 = vand.u32 127, %v169_v1  ;;  %v239_v40 = vld [vmem:[%s796_s17] ss:$0 sm:$0xff]  ;;  %s242_s28 = scalar_lea.vmem [#allocation2], %s702_s26  ;;  %s702_s26 = sphi %s804_s26, %s179_s26  }
  0x2b   : >> { %vm188_vm1 = vcmp.ge.s32.totalorder %v791_v2, %v811_v8  ;;  %s248_s30 = scalar_lea.vmem [#allocation9], %s702_s26  ;;  %vm268_vm15 = vcmp.gt.s32.totalorder %v791_v2, %v811_v8  ;;  %s179_s26 = sadd.s32 1, %s702_s26  }
  0x2c   : >> { %vm190_vm3 = vmand %vm188_vm1, %vm189_vm0  ;;  %vm260_vm12 = vcmp.gt.s32.totalorder %v236_v38, %v811_v8  ;;  %vm237_vm13 = vcmp.eq.s32.totalorder %v236_v38, %v811_v8  ;;  %v250_v42 = vld [vmem:[%s248_s30] ss:$0 sm:$0xff]  ;;  %p176_p11 = scmp.ge.s32.totalorder %s179_s26, 4  }
  0x2d   : >> { %vm272_vm1 = vmand %vm268_vm15, %vm237_vm13  ;;  %s913_s6 = sshrl.u32 (%p176_p11), %s747_s16, 3  ;;  %s577_s10 = sshll.u32 (%p176_p11), %s747_s16, 2 }
  0x2e   : > { %s578_s11 = sshll.u32 (%p176_p11), %s913_s6, 5 }
  0x30   : >> { %v184_v6 = vld [vmem:[#allocation2] sm:$0xff]  ;;  %v244_v41 = vld [vmem:[%s242_s28] ss:$0 sm:$0xff] }
  0x31   : >> { %v185_v7 = vand.u32 2147483647, %v184_v6 }
  0x33   : >> { %vm573_vm2 = vcmp.gt.f32.partialorder %v185_v7, -inf }
  0x34   : >> { %vm192_vm4 = vmand %vm190_vm3, %vm573_vm2 }
  0x35   : >> { %v193_v9 = vsel %vm192_vm4, %v791_v2, %v811_v8  ;;  %v194_v10 = vsel %vm192_vm4, %v185_v7, -inf }
  0x36   : >> { %v195_v11 = vrot.slane %v194_v10, 1  ;;  %v196_v12 = vrot.slane %v193_v9, 1 }
  0x38   : >> { %vm197_vm5 = vcmp.ge.f32.partialorder %v195_v11, %v194_v10  ;;  %v200_v13 = vrot.slane %v195_v11, 1  ;;  %v201_v14 = vrot.slane %v196_v12, 1 }
  0x39   : >> { %v198_v15 = vsel %vm197_vm5, %v195_v11, %v194_v10  ;;  %v199_v16 = vsel %vm197_vm5, %v196_v12, %v193_v9 }
  0x3a   : >> { %vm202_vm6 = vcmp.ge.f32.partialorder %v200_v13, %v198_v15  ;;  %v205_v17 = vrot.slane %v200_v13, 1  ;;  %v206_v18 = vrot.slane %v201_v14, 1 }
  0x3b   : >> { %v203_v19 = vsel %vm202_vm6, %v200_v13, %v198_v15  ;;  %v204_v20 = vsel %vm202_vm6, %v201_v14, %v199_v16 }
  0x3c   : >> { %vm207_vm7 = vcmp.ge.f32.partialorder %v205_v17, %v203_v19  ;;  %v210_v21 = vrot.slane %v205_v17, 1  ;;  %v211_v22 = vrot.slane %v206_v18, 1 }
  0x3d   : >> { %v208_v23 = vsel %vm207_vm7, %v205_v17, %v203_v19  ;;  %v209_v24 = vsel %vm207_vm7, %v206_v18, %v204_v20 }
  0x3e   : >> { %vm212_vm8 = vcmp.ge.f32.partialorder %v210_v21, %v208_v23  ;;  %v215_v25 = vrot.slane %v210_v21, 1  ;;  %v216_v26 = vrot.slane %v211_v22, 1 }
  0x3f   : >> { %v213_v27 = vsel %vm212_vm8, %v210_v21, %v208_v23  ;;  %v214_v28 = vsel %vm212_vm8, %v211_v22, %v209_v24 }
  0x40   : >> { %vm217_vm9 = vcmp.ge.f32.partialorder %v215_v25, %v213_v27  ;;  %v220_v29 = vrot.slane %v215_v25, 1  ;;  %v221_v30 = vrot.slane %v216_v26, 1 }
  0x41   : >> { %v218_v31 = vsel %vm217_vm9, %v215_v25, %v213_v27  ;;  %v219_v32 = vsel %vm217_vm9, %v216_v26, %v214_v28 }
  0x42   : >> { %vm222_vm10 = vcmp.ge.f32.partialorder %v220_v29, %v218_v31  ;;  %v225_v33 = vrot.slane %v220_v29, 1  ;;  %v226_v34 = vrot.slane %v221_v30, 1 }
  0x43   : >> { %v223_v35 = vsel %vm222_vm10, %v220_v29, %v218_v31  ;;  %v224_v36 = vsel %vm222_vm10, %v221_v30, %v219_v32 }
  0x44   : >> { %vm227_vm11 = vcmp.ge.f32.partialorder %v225_v33, %v223_v35 }
  0x45   : >> { %v229_v37 = vsel %vm227_vm11, %v226_v34, %v224_v36 }
  0x46   : >> { %231 = vrot.lane.b32.xlu0 %v229_v37, %s230_s27  ;;  %s849_s27 = scalar_lea.vmem (%p176_p11), %s910_s1, %s577_s10 }
  0xb8   : >> { %v232_v39 = vpop.permute.xlu0 %231 }
  0xb9   : >> { %582 = vpush %v232_v39 }
  0xea   : >> { %s583_s29 = spop %582 }
  0xeb   : >> { %v238_v43 = vstv %s583_s29  ;;  %s243_s4 = scalar_lea.vmem [#allocation2], %s583_s29  ;;  %s249_s5 = scalar_lea.vmem [#allocation9], %s583_s29 }
  0xec   : >> { %v245_v44 = vld [vmem:[%s243_s4] ss:$0 sm:$0xff]  ;;  %v240_v46 = vsel %vm237_vm13, %v238_v43, %v239_v40 }
  0xed   : >> { %v251_v45 = vld [vmem:[%s249_s5] ss:$0 sm:$0xff]  ;;  %246 = vst [vmem:[%s243_s4] sm:$0x1] %v244_v41  ;;  %vm254_vm14 = vcmp.ne.f32.partialorder %v245_v44, 0.0  ;;  %241 = vst [vmem:[%s796_s17] sm:$0x1] %v240_v46  ;;  %v261_v53 = vsel %vm260_vm12, %v245_v44, 0.0 }
  0xee   : >> { %252 = vst [vmem:[%s249_s5] sm:$0x1] %v250_v42  ;;  %247 = vst [vmem:[%s242_s28] sm:$0x1] %v245_v44  ;;  %s410_s4 = sshll.u32 (%p176_p11), %s148_s20, 4  ;;  %s357_s5 = scalar_lea.sflag (%p176_p11), [#allocation6], %s146_s7  ;;  %s411_s4 = int_to_ptr.vmem [resolvable:$true] %s410_s4 }
  0xef   : >> { %253 = vst [vmem:[%s248_s30] sm:$0x1] %v251_v45  ;;  %vm255_vm0 = vmand %vm237_vm13, %vm254_vm14  ;;  %s854_s30 = scalar_lea.hbm (%p176_p11), %s911_s2, %s578_s11  ;;  %s634_s6 = scalar_lea.vmem (%p176_p11), %s411_s4, 32 }
  0xf0   : >> { %v256_v47 = vsel %vm255_vm0, %v245_v44, 1.0  ;;  %p635_p12 = scmp.ne.s32.totalorder (%p176_p11), %s411_s4, %s634_s6  ;;  %s705_s17 = smov (%p176_p11), [#allocation5]  }
  0xf1   : >> { %v269_v48 = vsel %vm268_vm15, %v256_v47, 1.0  ;;  %s638_s10 = sshll.u32 (%p176_p11), %s705_s17, 4  ;;  %s639_s10 = int_to_ptr.vmem [resolvable:$false] %s638_s10 }
  0xf2   : >> { %632 = vrcp.f32 %v269_v48  ;;  %p636_p13 = pnand (%p176_p11), %p635_p12, %p764_p5  ;;  %s640_s26 = scalar_lea.vmem (%p176_p11), %s639_s10, 64 }
  0xf3   : > { %p641_p1 = scmp.lt.s32.totalorder (%p176_p11), %s411_s4, %s639_s10  ;;  %p642_p2 = scmp.lt.s32.totalorder (%p176_p11), %s640_s26, %s634_s6 }
  0xf4   : > { %v340_v59 = vld [vmem:[#allocation4] sm:$0x3] (%p176_p11)  ;;  %p637_p0 = pneg (%p176_p11), %p636_p13 }
  0xf5   : >> { %v265_v50 = vld [vmem:[#allocation2] sm:$0xff]  ;;  %343 = vst [vmem:[%s148_s20] sm:$0x3] (%p176_p11), %v340_v59  ;;  %p643_p3 = por (%p176_p11), %p642_p2, %p641_p1 }
  0xf6   : > { %v279_v57 = vld [vmem:[#allocation9] sm:$0xff] (%p176_p11) }
  0xf7   : > { %p644_p4 = pnand (%p176_p11), %p643_p3, %p637_p0 }
  0xff   : >> { %v633_v49 = vpop.eup %632 }
 0x100   : >> { %v271_v51 = vmul.f32 %v633_v49, %v265_v50 }
 0x102   : >> { %v273_v52 = vsel %vm272_vm1, %v271_v51, 0.0 }
 0x103   : >> { %274 = vadd.xlane.f32.xlu0 %v273_v52 }
 0x130   : > { %295 = vxpose.xlu0.b32.start.end [1/1] (short) (narrow) (%p176_p11), %v279_v57, 8 }
 0x18c   : >> { %v275_v54 = vpop.xlane.xlu0 %274 }
 0x18d   : >> { %v276_v55 = vmul.f32 %v275_v54, %v261_v53  ;;  %178 = sbr.rel (!%p176_p11) target bundleno = 42 (0x2a), region = 202 }
 0x18f   : >> { %v277_v56 = vsub.f32 %v271_v51, %v276_v55 }
 0x191   : >> { %278 = vst [vmem:[#allocation2] sm:$0xff] %v277_v56 }
 0x198   : > { %v332_v58 = vld [vmem:[#allocation2] sm:$0xf] }
 0x199   : > { %335 = vst [vmem:[%s141_s19] sm:$0xf] %v332_v58 }
 0x1a0   : > { %v383_v60 = vld [vmem:[%s141_s19] sm:$0xf] }
 0x1a1   : > { %647 = shalt.err (!%p644_p4)
}
 0x1a2   : > { %s648_s8 = scalar_lea.hbm %s854_s30, 32  ;;  %s652_s20 = scalar_lea.hbm %s911_s2, 32 }
 0x1a3   : > { %p649_p8 = scmp.ne.s32.totalorder %s854_s30, %s648_s8  ;;  %p653_p11 = scmp.lt.s32.totalorder %s854_s30, %s911_s2 }
 0x1a4   : > { %p654_p12 = scmp.lt.s32.totalorder %s652_s20, %s648_s8 }
 0x1a5   : > { %p650_p9 = pnand %p649_p8, %p764_p5 }
 0x1a6   : > { %p655_p13 = por %p654_p12, %p653_p11 }
 0x1a7   : > { %p651_p10 = pneg %p650_p9 }
 0x1a9   : > { %p656_p0 = pnand %p655_p13, %p651_p10 }
 0x1ab   : > { %659 = shalt.err (!%p656_p0)
}
 0x1ac   : > { %584 = dma.vmem_to_hbm [thread:$0]  (%p764_p5), %s411_s4, 32, %s854_s30, %s357_s5   ;;  %384 = vst [vmem:[%s849_s27] sm:$0xf] %v383_v60  ;;  %v311_v61 = vpop.trf.xlu0 }
 0x1ad   : > { %327 = vst [vmem:[%s802_s22] sm:$0x1] %v311_v61  ;;  %s916_s6 = sshrl.u32 (%p764_p5), %s747_s16, 3 }
 0x1ae   : > { %s579_s29 = sshll.u32 (%p764_p5), %s916_s6, 1 }
 0x1af   : > { %s419_s26 = scalar_lea.vmem (%p764_p5), %s912_s3, %s579_s29 }
 0x1b1   : > { %416 = sbr.rel (!%p764_p5) target bundleno = 446 (0x1be), region = 96 }
 0x1b4   : > { %v348_v62 = vld [vmem:[#allocation7] sm:$0x3] }
 0x1b5   : > { %351 = vst [vmem:[%s154_s21] sm:$0x3] %v348_v62 }
 0x1bc   : > { %v436_v63 = vld [vmem:[%s154_s21] sm:$0x3] }
 0x1bd   : > { %437 = vst [vmem:[%s419_s26] sm:$0x3] %v436_v63 }
 0x1be PF: > { %s465_s22 = sand.u32 1, %s686_s12   ;;  %p587_p5 = pnand %p565_p7, %p768_p6 }
 0x1bf   : > { %s466_s16 = scalar_lea.sflag [#allocation6], %s465_s22 }
 0x1c0   : > { %p588_p1 = pneg %p587_p5 }
 0x1c2   : > { %681 = dma.done.wait (%p588_p1), %s466_s16, 32  }
 0x1c3   : > { %683 = vsyncadd (%p588_p1), %s466_s16, 4294967264  ;;  %p10_p2 = scmp.ge.s32.totalorder %s751_s18, 4   ;;  %s917_s12 = smov %s690_s13 }
 0x1c4   : > { %s918_s13 = smov %s694_s14  ;;  %s919_s14 = smov %s762_s23 }
 0x1c5   : > { %s920_s15 = smov %s751_s18  ;;  %12 = sbr.rel (!%p10_p2) target bundleno = 3 (0x3), region = 213 }
 0x1ca   :  { %478 = vsyncpa [#allocation6], 1 }
 0x1cb   :  { %480 = vsyncpa [#allocation6 + $0x1], 1 }

// kernel: custom-call.89
= control target key start
LH: loop header
LB: loop body
LE: loop exit
PB: predicated region body
PF: predicated region fallthrough
CT: control target
= control target key end

     0   :  { %s360_s6 = smov 0   ;;  %s362_s7 = smov 0   ;;  %s407_s0 = inlined_call_operand.vmem [shape: f32[2,1,4,4], index: 0, kind: input, shape index: {}]   ;;  %s408_s1 = inlined_call_operand.vmem [shape: f32[2,1,4,4], index: 1, kind: output, shape index: {}]  }
   0x1   :  { %s364_s8 = smov 0  }
   0x2 LB: > { %s286_s9 = sadd.s32 4294967295, %s347_s8   ;;  %s33_s10 = sadd.s32 1, %s343_s7  ;;  %s347_s8 = sphi %s364_s8, %s7_s8   ;;  %s343_s7 = sphi %s362_s7, %s410_s7   ;;  %s339_s6 = sphi %s360_s6, %s409_s6  }
   0x3   : > { %p35_p0 = scmp.ge.s32.totalorder %s33_s10, 2  ;;  %p288_p1 = scmp.ge.s32.totalorder %s347_s8, 2 }
   0x4   : > { %s49_s11 = sand.u32 (!%p288_p1), 1, %s347_s8   ;;  %s290_s12 = sshll.u32 (!%p288_p1), %s343_s7, 2 }
   0x5   : > { %s412_s10 = smov (%p35_p0, %s33_s10), 0  ;;  %47 = sbr.rel (%p288_p1) target bundleno = 12 (0xc), region = 16 }
   0x6   : > { %s289_s13 = sshll.u32 (!%p288_p1), %s49_s11, 2  ;;  %s56_s16 = scalar_lea.vmem (!%p288_p1), %s407_s0, %s290_s12 }
   0x7   : > { %s51_s17 = scalar_lea.vmem (!%p288_p1), [#allocation1], %s289_s13 }
   0xa   : > { %v73_v0 = vld [vmem:[%s56_s16] sm:$0xf] }
   0xb   : > { %74 = vst [vmem:[%s51_s17] sm:$0xf] %v73_v0 }
   0xc PF: > { %p291_p2 = scmp.ge.s32.totalorder %s347_s8, 1  ;;  %p91_p3 = scmp.lt.s32.totalorder %s347_s8, 3 }
   0xe   : > { %p92_p4 = pnand %p291_p2, %p91_p3 }
  0x10   : > { %95 = sbr.rel (%p92_p4) target bundleno = 641 (0x281), region = 50 }
  0x15   : > { %s387_s18 = sand.u32 1, %s286_s9   ;;  %v114_v1 = vlaneseq  ;;  %v349_v11 = vmov -1.0   ;;  %s295_s22 = sshll.u32 %s339_s6, 2 }
  0x16   : > { %s292_s19 = sshll.u32 %s387_s18, 2  ;;  %s193_s25 = scalar_lea.vmem %s408_s1, %s295_s22 }
  0x17   : > { %s104_s20 = scalar_lea.vmem [#allocation1], %s292_s19  ;;  %v115_v3 = vand.u32 127, %v114_v1  ;;  %v118_v4 = vshrl.u32 %v114_v1, 7  ;;  %s108_s21 = scalar_lea.vmem [#allocation3], %s292_s19 }
  0x18   : > { %v112_v2 = vld [vmem:[%s104_s20] sm:$0xf] }
  0x19   : > { %113 = vst [vmem:[#allocation0] sm:$0xf] %v112_v2  ;;  %vm116_vm0 = vcmp.lt.s32.totalorder %v115_v3, 4  ;;  %vm125_vm1 = vcmp.ge.s32.totalorder %v118_v4, %v115_v3  ;;  %vm120_vm2 = vcmp.eq.s32.totalorder %v118_v4, %v115_v3  ;;  %vm139_vm4 = vcmp.eq.s32.totalorder %v115_v3, 0 }
  0x1a   : > { %vm126_vm3 = vmand %vm125_vm1, %vm116_vm0  ;;  %vm136_vm5 = vcmp.eq.s32.totalorder %v115_v3, %v118_v4  ;;  %v140_v12 = vsel %vm139_vm4, 1.0, %v349_v11  ;;  %vm147_vm6 = vcmp.eq.s32.totalorder %v115_v3, 1  ;;  %vm157_vm7 = vcmp.eq.s32.totalorder %v115_v3, 2 }
  0x1b   : > { %v141_v13 = vsel %vm136_vm5, %v140_v12, 0.0  ;;  %vm167_vm8 = vcmp.eq.s32.totalorder %v115_v3, 3 }
  0x20   : > { %v121_v5 = vld [vmem:[#allocation0] sm:$0xff] }
  0x21   : > { %v122_v6 = vsel %vm120_vm2, %v121_v5, 0.0  ;;  %v127_v7 = vsel %vm126_vm3, %v121_v5, 0.0 }
  0x22   : > { %123 = vadd.xlane.f32.xlu0 %v122_v6 }
  0xab   : > { %v124_v8 = vpop.xlane.xlu0 %123 }
  0xac   : > { %323 = vrcp.f32 %v124_v8  ;;  %vm174_vm9 = vweird.f32 %v124_v8 }
  0xb9   : > { %v324_v9 = vpop.eup %323 }
  0xba   : > { %v129_v10 = vmul.f32 %v324_v9, %v127_v7 }
  0xbc   : > { %130 = vst [vmem:[#allocation4] sm:$0xff] %v129_v10 }
  0xc3   : > { %v143_v14 = vld [vmem:[#allocation4 + $0x1] ss:$0 sm:$0xff]  ;;  %v153_v17 = vld [vmem:[#allocation4 + $0x2] ss:$0 sm:$0xff]  ;;  %v163_v22 = vld [vmem:[#allocation4 + $0x3] ss:$0 sm:$0xff] }
  0xc4   : > { %v144_v15 = vxor.u32 2147483648, %v143_v14  ;;  %v154_v19 = vxor.u32 2147483648, %v153_v17  ;;  %v164_v24 = vxor.u32 2147483648, %v163_v22 }
  0xc6   : > { %v148_v16 = vmul.f32 %v144_v15, %v141_v13 }
  0xc8   : > { %149 = vadd.xlane.f32.xlu0 %v148_v16 }
 0x151   : > { %v150_v18 = vpop.xlane.xlu0 %149 }
 0x152   : > { %v151_v20 = vsel %vm147_vm6, %v150_v18, %v141_v13 }
 0x153   : > { %v158_v21 = vmul.f32 %v154_v19, %v151_v20 }
 0x155   : > { %159 = vadd.xlane.f32.xlu1 %v158_v21 }
 0x1de   : > { %v160_v23 = vpop.xlane.xlu1 %159 }
 0x1df   : > { %v161_v25 = vsel %vm157_vm7, %v160_v23, %v151_v20 }
 0x1e0   : > { %v168_v26 = vmul.f32 %v164_v24, %v161_v25 }
 0x1e2   : > { %169 = vadd.xlane.f32.xlu1 %v168_v26 }
 0x26b   : > { %v170_v27 = vpop.xlane.xlu1 %169 }
 0x26c   : > { %v171_v28 = vsel %vm167_vm8, %v170_v27, %v161_v25 }
 0x26d   : > { %v173_v29 = vmul.f32 %v324_v9, %v171_v28 }
 0x26f   : > { %v175_v30 = vsel %vm174_vm9, %v171_v28, %v173_v29 }
 0x270   : > { %176 = vst [vmem:[#allocation2] sm:$0xff] %v175_v30 }
 0x277   : > { %v181_v31 = vld [vmem:[#allocation2] sm:$0xf] }
 0x278   : > { %184 = vst [vmem:[%s108_s21] sm:$0xf] %v181_v31 }
 0x27f   : > { %v210_v32 = vld [vmem:[%s108_s21] sm:$0xf] }
 0x280   : > { %211 = vst [vmem:[%s193_s25] sm:$0xf] %v210_v32 }
 0x281 PF: > { %s7_s8 = sadd.s32 1, %s347_s8   ;;  %s409_s6 = smov %s343_s7 }
 0x282   : > { %p4_p5 = scmp.ge.s32.totalorder %s7_s8, 4   ;;  %s410_s7 = smov %s412_s10 }
 0x284   :  { %6 = sbr.rel (!%p4_p5) target bundleno = 2 (0x2), region = 113 }

// kernel: custom-call.88
= control target key start
LH: loop header
LB: loop body
LE: loop exit
PB: predicated region body
PF: predicated region fallthrough
CT: control target
= control target key end

     0   :  { %s359_s6 = smov 0   ;;  %s361_s7 = smov 0   ;;  %s406_s0 = inlined_call_operand.vmem [shape: f32[2,1,4,4], index: 0, kind: input, shape index: {}]   ;;  %s407_s1 = inlined_call_operand.vmem [shape: f32[2,1,4,4], index: 1, kind: output, shape index: {}]  }
   0x1   :  { %s363_s8 = smov 0  }
   0x2 LB: > { %s285_s9 = sadd.s32 4294967295, %s346_s8   ;;  %s33_s10 = sadd.s32 1, %s342_s7  ;;  %s346_s8 = sphi %s363_s8, %s7_s8   ;;  %s342_s7 = sphi %s361_s7, %s409_s7   ;;  %s338_s6 = sphi %s359_s6, %s408_s6  }
   0x3   : > { %p35_p0 = scmp.ge.s32.totalorder %s33_s10, 2  ;;  %p287_p1 = scmp.ge.s32.totalorder %s346_s8, 2 }
   0x4   : > { %s49_s11 = sand.u32 (!%p287_p1), 1, %s346_s8   ;;  %s289_s12 = sshll.u32 (!%p287_p1), %s342_s7, 2 }
   0x5   : > { %s411_s10 = smov (%p35_p0, %s33_s10), 0  ;;  %47 = sbr.rel (%p287_p1) target bundleno = 12 (0xc), region = 16 }
   0x6   : > { %s288_s13 = sshll.u32 (!%p287_p1), %s49_s11, 2  ;;  %s56_s16 = scalar_lea.vmem (!%p287_p1), %s406_s0, %s289_s12 }
   0x7   : > { %s51_s17 = scalar_lea.vmem (!%p287_p1), [#allocation1], %s288_s13 }
   0xa   : > { %v73_v0 = vld [vmem:[%s56_s16] sm:$0xf] }
   0xb   : > { %74 = vst [vmem:[%s51_s17] sm:$0xf] %v73_v0 }
   0xc PF: > { %p290_p2 = scmp.ge.s32.totalorder %s346_s8, 1  ;;  %p91_p3 = scmp.lt.s32.totalorder %s346_s8, 3 }
   0xe   : > { %p92_p4 = pnand %p290_p2, %p91_p3 }
  0x10   : > { %95 = sbr.rel (%p92_p4) target bundleno = 641 (0x281), region = 50 }
  0x15   : > { %s386_s18 = sand.u32 1, %s285_s9   ;;  %v114_v1 = vlaneseq  ;;  %v348_v11 = vmov -1.0   ;;  %s294_s22 = sshll.u32 %s338_s6, 2 }
  0x16   : > { %s291_s19 = sshll.u32 %s386_s18, 2  ;;  %s192_s25 = scalar_lea.vmem %s407_s1, %s294_s22 }
  0x17   : > { %s104_s20 = scalar_lea.vmem [#allocation1], %s291_s19  ;;  %v115_v3 = vand.u32 127, %v114_v1  ;;  %v118_v4 = vshrl.u32 %v114_v1, 7  ;;  %s108_s21 = scalar_lea.vmem [#allocation3], %s291_s19 }
  0x18   : > { %v112_v2 = vld [vmem:[%s104_s20] sm:$0xf] }
  0x19   : > { %113 = vst [vmem:[#allocation0] sm:$0xf] %v112_v2  ;;  %vm116_vm0 = vcmp.lt.s32.totalorder %v115_v3, 4  ;;  %vm125_vm1 = vcmp.le.s32.totalorder %v118_v4, %v115_v3  ;;  %vm120_vm2 = vcmp.eq.s32.totalorder %v118_v4, %v115_v3  ;;  %vm139_vm4 = vcmp.eq.s32.totalorder %v115_v3, 3 }
  0x1a   : > { %vm126_vm3 = vmand %vm125_vm1, %vm116_vm0  ;;  %vm136_vm5 = vcmp.eq.s32.totalorder %v115_v3, %v118_v4  ;;  %v140_v12 = vsel %vm139_vm4, 1.0, %v348_v11  ;;  %vm147_vm6 = vcmp.eq.s32.totalorder %v115_v3, 2  ;;  %vm157_vm7 = vcmp.eq.s32.totalorder %v115_v3, 1 }
  0x1b   : > { %v141_v13 = vsel %vm136_vm5, %v140_v12, 0.0  ;;  %vm166_vm8 = vcmp.eq.s32.totalorder %v115_v3, 0 }
  0x20   : > { %v121_v5 = vld [vmem:[#allocation0] sm:$0xff] }
  0x21   : > { %v122_v6 = vsel %vm120_vm2, %v121_v5, 0.0  ;;  %v127_v7 = vsel %vm126_vm3, %v121_v5, 0.0 }
  0x22   : > { %123 = vadd.xlane.f32.xlu0 %v122_v6 }
  0xab   : > { %v124_v8 = vpop.xlane.xlu0 %123 }
  0xac   : > { %322 = vrcp.f32 %v124_v8  ;;  %vm173_vm9 = vweird.f32 %v124_v8 }
  0xb9   : > { %v323_v9 = vpop.eup %322 }
  0xba   : > { %v129_v10 = vmul.f32 %v323_v9, %v127_v7 }
  0xbc   : > { %130 = vst [vmem:[#allocation4] sm:$0xff] %v129_v10 }
  0xc3   : > { %v143_v14 = vld [vmem:[#allocation4 + $0x2] ss:$0 sm:$0xff]  ;;  %v153_v17 = vld [vmem:[#allocation4 + $0x1] ss:$0 sm:$0xff]  ;;  %v162_v22 = vld [vmem:[#allocation4] ss:$0 sm:$0xff] }
  0xc4   : > { %v144_v15 = vxor.u32 2147483648, %v143_v14  ;;  %v154_v19 = vxor.u32 2147483648, %v153_v17  ;;  %v163_v24 = vxor.u32 2147483648, %v162_v22 }
  0xc6   : > { %v148_v16 = vmul.f32 %v144_v15, %v141_v13 }
  0xc8   : > { %149 = vadd.xlane.f32.xlu0 %v148_v16 }
 0x151   : > { %v150_v18 = vpop.xlane.xlu0 %149 }
 0x152   : > { %v151_v20 = vsel %vm147_vm6, %v150_v18, %v141_v13 }
 0x153   : > { %v158_v21 = vmul.f32 %v154_v19, %v151_v20 }
 0x155   : > { %159 = vadd.xlane.f32.xlu1 %v158_v21 }
 0x1de   : > { %v160_v23 = vpop.xlane.xlu1 %159 }
 0x1df   : > { %v161_v25 = vsel %vm157_vm7, %v160_v23, %v151_v20 }
 0x1e0   : > { %v167_v26 = vmul.f32 %v163_v24, %v161_v25 }
 0x1e2   : > { %168 = vadd.xlane.f32.xlu1 %v167_v26 }
 0x26b   : > { %v169_v27 = vpop.xlane.xlu1 %168 }
 0x26c   : > { %v170_v28 = vsel %vm166_vm8, %v169_v27, %v161_v25 }
 0x26d   : > { %v172_v29 = vmul.f32 %v323_v9, %v170_v28 }
 0x26f   : > { %v174_v30 = vsel %vm173_vm9, %v170_v28, %v172_v29 }
 0x270   : > { %175 = vst [vmem:[#allocation2] sm:$0xff] %v174_v30 }
 0x277   : > { %v180_v31 = vld [vmem:[#allocation2] sm:$0xf] }
 0x278   : > { %183 = vst [vmem:[%s108_s21] sm:$0xf] %v180_v31 }
 0x27f   : > { %v209_v32 = vld [vmem:[%s108_s21] sm:$0xf] }
 0x280   : > { %210 = vst [vmem:[%s192_s25] sm:$0xf] %v209_v32 }
 0x281 PF: > { %s7_s8 = sadd.s32 1, %s346_s8   ;;  %s408_s6 = smov %s342_s7 }
 0x282   : > { %p4_p5 = scmp.ge.s32.totalorder %s7_s8, 4   ;;  %s409_s7 = smov %s411_s10 }
 0x284   :  { %6 = sbr.rel (!%p4_p5) target bundleno = 2 (0x2), region = 112 }

// kernel: squeeze.60
= control target key start
LH: loop header
LB: loop body
LE: loop exit
PB: predicated region body
PF: predicated region fallthrough
CT: control target
= control target key end

     0   :  { %s47_s8 = smov 116   ;;  %vm8_vm0 = vcmask 31744   ;;  %s48_s9 = smov 120   ;;  %s68_s0 = inlined_call_operand.vmem [shape: f32[2,16], index: 0, kind: input, shape index: {}]   ;;  %s69_s1 = inlined_call_operand.vmem [shape: f32[2,4,4], index: 1, kind: output, shape index: {}]  }
   0x1   :  { %v5_v0 = vld [vmem:[%s68_s0] sm:$0x3]  ;;  %s46_s0 = smov 124  }
   0x2   :  { %6 = vst [vmem:[#allocation1] sm:$0x3] %v5_v0 }
   0x9   :  { %v10_v1 = vld [vmem:[#allocation1] sm:$0x3]  }
   0xa   :  { %v22_v2 = vld [vmem:[#allocation1] sm:$0x3]   ;;  %11 = vrot.lane.b32.xlu0 %v10_v1, %s46_s0 }
   0xb   :  { %23 = vrot.lane.b32.xlu1 %v22_v2, %s47_s8  ;;  %v7_v3 = vld [vmem:[#allocation1] sm:$0x3]  }
   0xc   :  { %v16_v4 = vld [vmem:[#allocation1] sm:$0x3]   ;;  %9 = vst.msk [vmem:[#allocation0] ss:$8 sm:$0x3] %vm8_vm0, %v7_v3  }
   0xe   :  { %17 = vrot.lane.b32.xlu0 %v16_v4, %s48_s9 }
  0x7c   :  { %v12_v5 = vpop.permute.xlu0 %11  }
  0x7d   :  { %v24_v6 = vpop.permute.xlu1 %23   ;;  %15 = vst.msk [vmem:[#allocation0 + $0x1] ss:$8 sm:$0x3] %vm8_vm0, %v12_v5  }
  0x7e   :  { %27 = vst.msk [vmem:[#allocation0 + $0x3] ss:$8 sm:$0x3] %vm8_vm0, %v24_v6  }
  0x80   :  { %v18_v7 = vpop.permute.xlu0 %17  }
  0x81   :  { %21 = vst.msk [vmem:[#allocation0 + $0x2] ss:$8 sm:$0x3] %vm8_vm0, %v18_v7  }
  0x88   :  { %v32_v8 = vld [vmem:[#allocation0] sm:$0xf]  ;;  %v37_v9 = vld [vmem:[#allocation0 + $0x8] sm:$0xf] }
  0x89   :  { %35 = vst [vmem:[%s69_s1] sm:$0xf] %v32_v8  ;;  %42 = vst [vmem:[%s69_s1 + $0x4] sm:$0xf] %v37_v9 }

// kernel: cascade_rednet_forward.3
= control target key start
LH: loop header
LB: loop body
LE: loop exit
PB: predicated region body
PF: predicated region fallthrough
CT: control target
= control target key end

     0   :  { %s4641_s0 = inlined_call_operand.vmem [shape: bf16[2,64,128], index: 0, kind: input, shape index: {}]   ;;  %s4642_s1 = inlined_call_operand.vmem [shape: bf16[2,64,48,128], index: 1, kind: input, shape index: {}]   ;;  %s4643_s2 = inlined_call_operand.vmem [shape: bf16[2,64,48,128], index: 2, kind: input, shape index: {}]   ;;  %s4644_s3 = inlined_call_operand.vmem [shape: f32[2,48,128], index: 3, kind: input, shape index: {}]   ;;  %s4645_s4 = inlined_call_operand.vmem [shape: f32[64], index: 4, kind: input, shape index: {}]   ;;  %s4646_s5 = inlined_call_operand.vmem [shape: f32[64], index: 5, kind: input, shape index: {}]   ;;  %s4647_s6 = inlined_call_operand.vmem [shape: f32[2,1,128], index: 6, kind: output, shape index: {0}]   ;;  %s4648_s7 = inlined_call_operand.vmem [shape: f32[2,1,128], index: 7, kind: output, shape index: {1}]  }
   0x1   :  { %4652 = sst [smem:[#allocation11_spill]] %s4645_s4 }
   0x2   :  { %4653 = sst [smem:[#allocation12_spill]] %s4646_s5 }
   0x3   :  { %13 = vsyncpa [#allocation4], 0 }
   0x4   :  { %14 = vsyncpa [#allocation6], 0  ;;  %s3401_s24 = smov 0   ;;  %s3403_s25 = smov 0  }
   0x5   :  { %s3405_s26 = smov 0   ;;  %s3407_s27 = smov 0  }
   0x6   :  { %s3409_s28 = smov 0  }
   0x7 LB: > { %s2521_s29 = sadd.s32 4294967295, %s3356_s28   ;;  %s32_s30 = sadd.s32 1, %s3348_s26  ;;  %s3356_s28 = sphi %s3409_s28, %s20_s28   ;;  %s3352_s27 = sphi %s3407_s27, %s4669_s27   ;;  %s3348_s26 = sphi %s3405_s26, %s4668_s26   ;;  %s3344_s25 = sphi %s3403_s25, %s4667_s25   ;;  %s3340_s24 = sphi %s3401_s24, %s4666_s24  }
   0x8   : > { %p33_p0 = scmp.ge.s32.totalorder %s32_s30, 4  ;;  %s39_s8 = sadd.s32 1, %s3352_s27 }
   0x9   : > { %p2523_p1 = scmp.ge.s32.totalorder %s3356_s28, 1  ;;  %p260_p2 = scmp.lt.s32.totalorder %s3356_s28, 9 }
   0xa   : > { %s4671_s30 = smov (%p33_p0, %s32_s30), 0  ;;  %s4673_s8 = smov (!%p33_p0, %s39_s8), %s3352_s27 }
   0xb   : > { %4654 = sst [smem:[#allocation9_spill]] %s4671_s30  ;;  %p3434_p3 = pnand %p2523_p1, %p260_p2 }
   0xc   : > { %p41_p4 = scmp.ge.s32.totalorder %s4673_s8, 2  ;;  %p3438_p5 = scmp.eq.s32.totalorder %s2521_s29, 0 }
   0xd   : > { %s4655_s9 = scalar_select %p3434_p3, 1, 0 }
   0xe   : > { %s4656_s10 = scalar_select %p3438_p5, 1, 0 }
   0xf   : > { %p3212_p6 = pneg %p3434_p3  ;;  %s4657_s4 = sld [smem:[#allocation11_spill]] }
  0x10   : > { %s4675_s8 = smov (%p41_p4, %s4673_s8), 0  ;;  %s4660_s5 = sld [smem:[#allocation12_spill]] }
  0x11   : > { %4658 = sst [smem:[#allocation10_spill]] %s4675_s8  ;;  %p3451_p7 = pnand %p3438_p5, %p3212_p6 }
  0x13   : > { %p3282_p9 = pneg %p3451_p7 }
  0x15   : > { %s273_s13 = sshll.u32 %s4657_s4, 4  ;;  %s274_s13 = int_to_ptr.vmem [resolvable:$true] %s273_s13 }
  0x16   : > { %s284_s17 = sshll.u32 %s4660_s5, 4  ;;  %s3280_s18 = scalar_lea.vmem %s274_s13, 16  ;;  %s285_s17 = int_to_ptr.vmem [resolvable:$true] %s284_s17 }
  0x17   : > { %p3281_p8 = scmp.ne.s32.totalorder %s274_s13, %s3280_s18  ;;  %p3288_p12 = scmp.lt.s32.totalorder %s274_s13, %s274_s13 }
  0x18   : > { %p3289_p13 = scmp.lt.s32.totalorder %s3280_s18, %s3280_s18 }
  0x19   : > { %p3283_p10 = pnand %p3282_p9, %p3281_p8 }
  0x1a   : > { %p3290_p0 = por %p3289_p13, %p3288_p12 }
  0x1b   : > { %p3284_p11 = pneg %p3283_p10 }
  0x1d   : > { %p3291_p1 = pnand %p3290_p0, %p3284_p11 }
  0x1f   : > { %3294 = shalt.err (!%p3291_p1)
}
  0x20   : > { %s3358_s19 = smov [#allocation3]   ;;  %s3295_s20 = scalar_lea.vmem %s285_s17, 16 }
  0x21   : > { %3215 = dma.vmem_to_smem (!%p3451_p7), %s274_s13, 16, %s3358_s19, [#allocation4]  }
  0x22   : > { %p3296_p2 = scmp.ne.s32.totalorder %s285_s17, %s3295_s20  ;;  %p3303_p5 = scmp.lt.s32.totalorder %s285_s17, %s285_s17 }
  0x23   : > { %p3304_p3 = scmp.lt.s32.totalorder %s3295_s20, %s3295_s20 }
  0x24   : > { %p3298_p4 = pnand %p3296_p2, %p3282_p9 }
  0x25   : > { %p3305_p8 = por %p3304_p3, %p3303_p5 }
  0x26   : > { %p3299_p6 = pneg %p3298_p4 }
  0x28   : > { %p3306_p10 = pnand %p3305_p8, %p3299_p6 }
  0x2a   : > { %3309 = shalt.err (!%p3306_p10)
}
  0x2b   : > { %s3359_s21 = smov [#allocation5]   ;;  %p4661_p11 = scmp.ne.s32.totalorder %s4655_s9, 0 }
  0x2c   : > { %3218 = dma.vmem_to_smem (!%p3451_p7), %s285_s17, 16, %s3359_s21, [#allocation6]  }
  0x2d   : > { %358 = sbr.rel (%p4661_p11) target bundleno = 497 (0x1f1), region = 44  ;;  %p4662_p12 = scmp.ne.s32.totalorder (!%p4661_p11), %s4656_s10, 0 }
  0x32   : > { %3331 = dma.done.wait (%p4662_p12), [#allocation4], 16  }
  0x33   : > { %3333 = vsyncadd (%p4662_p12), [#allocation4], 4294967280 }
  0x34   : > { %3335 = dma.done.wait (%p4662_p12), [#allocation6], 16  }
  0x35   : > { %3337 = vsyncadd (%p4662_p12), [#allocation6], 4294967280 }
  0x36   : > { %368 = sfence }
  0x37   : > { %s2530_s22 = sshll.u32 %s3340_s24, 1  ;;  %p444_p3 = scmp.lt.s32.totalorder %s3344_s25, 1 }
  0x38   : > { %p446_p5 = scmp.lt.s32.totalorder %s2530_s22, 7  ;;  %s3477_s23 = sshll.u32 %s3340_s24, 4 }
  0x39   : > { %s4677_s25 = smov (!%p444_p3, %s3344_s25), 1  ;;  %p459_p7 = scmp.lt.s32.totalorder %s3477_s23, 63 }
  0x3a   : > { %s4679_s22 = smov (!%p446_p5, %s2530_s22), 7  ;;  %s2531_s29 = sshll.u32 %s4677_s25, 3 }
  0x3b   : > { %s452_s9 = sadd.s32 %s2531_s29, %s4679_s22  ;;  %s3202_s10 = smul.u32 384, %s4677_s25 }
  0x3c   : > { %s2532_s11 = sshll.u32 %s452_s9, 2  ;;  %s3203_s12 = smul.u32 48, %s4677_s25 }
  0x3d   : > { %s3489_s15 = scalar_lea.vmem %s4641_s0, %s2532_s11  ;;  %s503_s29 = scalar_lea.vmem %s4648_s7, %s4677_s25 }
  0x3e   : > { %s460_s19 = scalar_select %p459_p7, %s3477_s23, 63 }
  0x3f   : > { %s3499_s4 = scalar_lea.vmem %s4644_s3, %s3203_s12  ;;  %p2538_p9 = scmp.ne.s32.totalorder %s3340_s24, 0 }
  0x40   : > { %s3201_s9 = smul.u32 6, %s460_s19 }
  0x41   : > { %507 = sbr.rel (%p2538_p9) target bundleno = 74 (0x4a), region = 56 }
  0x42   : > { %s466_s8 = sadd.s32 %s3202_s10, %s3201_s9 }
  0x43   : > { %s2534_s30 = sshll.u32 %s466_s8, 2 }
  0x44   : > { %s3508_s14 = scalar_lea.vmem %s4642_s1, %s2534_s30  ;;  %s3513_s18 = scalar_lea.vmem %s4643_s2, %s2534_s30 }
  0x46   : > { %v3360_v0 = vmov 0.0  }
  0x47   : > { %508 = vst [vmem:[#allocation2 + $0x28] sm:$0xff] %v3360_v0  ;;  %509 = vst [vmem:[#allocation2 + $0x10] sm:$0xff] %v3360_v0 }
  0x48   : > { %510 = vst [vmem:[#allocation2 + $0x8] sm:$0xff] %v3360_v0  ;;  %511 = vst [vmem:[#allocation2] sm:$0xff] %v3360_v0 }
  0x49   : > { %512 = vst [vmem:[#allocation2 + $0x18] sm:$0xff] %v3360_v0  ;;  %513 = vst [vmem:[#allocation2 + $0x20] sm:$0xff] %v3360_v0 }
  0x4a PF: > { %v570_v1 = vlaneseq  ;;  %v520_v2 = vld [vmem:[%s3489_s15] sm:$0x1]  ;;  %v3107_v4 = vld [vmem:[%s3508_s14 + $0x8] sm:$0xff]   ;;  %v3108_v8 = vld [vmem:[%s3508_s14 + $0x10] sm:$0xff]   ;;  %s3528_s5 = sld [smem:[#allocation3 + %s3477_s23]]  ;;  %s696_s8 = sadd.s32 1, %s3477_s23 }
  0x4b   : > { %v2724_v3 = vld [vmem:[%s3508_s14] sm:$0xff]   ;;  %v2729_v7 = vunpack.c.l.bf16 %v3107_v4  ;;  %v3109_v10 = vld [vmem:[%s3513_s18 + $0x8] sm:$0xff]   ;;  %v2730_v11 = vunpack.c.h.bf16 %v3107_v4  ;;  %v2733_v12 = vunpack.c.l.bf16 %v3108_v8  ;;  %v2734_v13 = vunpack.c.h.bf16 %v3108_v8  ;;  %v3110_v15 = vld [vmem:[%s3513_s18 + $0x10] sm:$0xff]   ;;  %s3531_s30 = sld [smem:[#allocation5 + %s3477_s23]]  ;;  %s804_s19 = sadd.s32 2, %s3477_s23 }
  0x4c   : > { %v2725_v5 = vunpack.c.l.bf16 %v2724_v3  ;;  %v2726_v6 = vunpack.c.h.bf16 %v2724_v3  ;;  %v2736_v9 = vld [vmem:[%s3513_s18] sm:$0xff]   ;;  %v3523_v16 = vunpack.c.l.bf16 %v520_v2  ;;  %v3525_v19 = vshrl.u32 %v570_v1, 7  ;;  %v3111_v44 = vld [vmem:[%s3508_s14 + $0x18] sm:$0xff]   ;;  %v3113_v62 = vld [vmem:[%s3508_s14 + $0x28] sm:$0xff]   ;;  %s3599_s10 = sld [smem:[#allocation3 + %s696_s8]]  ;;  %s909_s22 = sadd.s32 3, %s3477_s23 }
  0x4d   : > { %v2737_v14 = vunpack.c.l.bf16 %v2736_v9  ;;  %v2738_v18 = vunpack.c.h.bf16 %v2736_v9  ;;  %v536_v21 = vmul.f32 %v2729_v7, %v2729_v7  ;;  %v537_v22 = vmul.f32 %v2730_v11, %v2730_v11  ;;  %v3112_v45 = vld [vmem:[%s3508_s14 + $0x20] sm:$0xff]   ;;  %s3605_s12 = sld [smem:[#allocation5 + %s696_s8]]  ;;  %s1017_s11 = sadd.s32 4, %s3477_s23 }
  0x4e   : > { %v534_v17 = vmul.f32 %v2725_v5, %v2725_v5  ;;  %v535_v20 = vmul.f32 %v2726_v6, %v2726_v6  ;;  %v2741_v23 = vunpack.c.l.bf16 %v3109_v10  ;;  %v538_v24 = vmul.f32 %v2733_v12, %v2733_v12  ;;  %s3665_s20 = sld [smem:[#allocation3 + %s804_s19]]  ;;  %p2720_p13 = scmp.ne.s32.totalorder %s3340_s24, 3 }
  0x4f   : > { %v2742_v25 = vunpack.c.h.bf16 %v3109_v10  ;;  %v2745_v26 = vunpack.c.l.bf16 %v3110_v15  ;;  %v2746_v27 = vunpack.c.h.bf16 %v3110_v15  ;;  %v539_v28 = vmul.f32 %v2734_v13, %v2734_v13  ;;  %s3678_s21 = sld [smem:[#allocation5 + %s804_s19]] }
  0x50   : > { %v552_v29 = vadd.f32 %v2737_v14, %v2725_v5  ;;  %v558_v30 = vmul.f32 %v2737_v14, %v2737_v14  ;;  %v559_v31 = vmul.f32 %v2738_v18, %v2738_v18  ;;  %v553_v32 = vadd.f32 %v2738_v18, %v2726_v6  ;;  %s910_s9 = sld [smem:[#allocation3 + %s909_s22]] }
  0x51   : > { %v554_v33 = vadd.f32 %v2741_v23, %v2729_v7  ;;  %v555_v34 = vadd.f32 %v2742_v25, %v2730_v11  ;;  %v560_v35 = vmul.f32 %v2741_v23, %v2741_v23  ;;  %v556_v36 = vadd.f32 %v2745_v26, %v2733_v12  ;;  %s3752_s13 = sld [smem:[#allocation5 + %s909_s22]] }
  0x52   : > { %v561_v37 = vmul.f32 %v2742_v25, %v2742_v25  ;;  %v562_v38 = vmul.f32 %v2745_v26, %v2745_v26  ;;  %v563_v39 = vmul.f32 %v2746_v27, %v2746_v27  ;;  %v557_v40 = vadd.f32 %v2746_v27, %v2734_v13  ;;  %s3815_s16 = sld [smem:[#allocation3 + %s1017_s11]] }
  0x53   : > { %v564_v41 = vadd.f32 %v558_v30, %v534_v17  ;;  %v3534_v42 = vsub.s32 0, %v3525_v19  ;;  %v3538_v43 = vmul.f32 %v3523_v16, %v3523_v16  ;;  %v565_v46 = vadd.f32 %v559_v31, %v535_v20  ;;  %v515_v30 = vld [vmem:[#allocation2 + $0x10] sm:$0xff]  ;;  %s3828_s17 = sld [smem:[#allocation5 + %s1017_s11]] }
  0x54   : > { %v566_v47 = vadd.f32 %v560_v35, %v536_v21  ;;  %v567_v48 = vadd.f32 %v561_v37, %v537_v22  ;;  %v568_v49 = vadd.f32 %v562_v38, %v538_v24  ;;  %v569_v50 = vadd.f32 %v563_v39, %v539_v28  ;;  %v3114_v37 = vld [vmem:[%s3513_s18 + $0x18] sm:$0xff]   ;;  %v3115_v38 = vld [vmem:[%s3513_s18 + $0x20] sm:$0xff]  }
  0x55   : > { %v573_v51 = vrot.slane %v3523_v16, %v3534_v42  ;;  %v584_v52 = vrot.slane %v3538_v43, %v3534_v42  ;;  %v594_v53 = vstv %s3528_s5  ;;  %v607_v54 = vstv %s3531_s30  ;;  %s1122_s5 = sadd.s32 5, %s3477_s23 }
  0x56   : > { %v3548_v55 = vunpack.c.l.bf16 %v3111_v44  ;;  %v3550_v56 = vunpack.c.h.bf16 %v3111_v44  ;;  %v3552_v57 = vunpack.c.l.bf16 %v3112_v45  ;;  %v2754_v9 = vunpack.c.h.bf16 %v3112_v45  ;;  %v3116_v45 = vld [vmem:[%s3513_s18 + $0x28] sm:$0xff]   ;;  %s1123_s30 = sld [smem:[#allocation3 + %s1122_s5]] }
  0x57   : > { %v574_v58 = vadd.f32 %v573_v51, %v552_v29  ;;  %v575_v59 = vadd.f32 %v573_v51, %v553_v32  ;;  %v576_v60 = vadd.f32 %v573_v51, %v554_v33  ;;  %v577_v61 = vadd.f32 %v573_v51, %v555_v34  ;;  %v514_v29 = vld [vmem:[#allocation2 + $0x28] sm:$0xff]  ;;  %s3902_s8 = sld [smem:[#allocation5 + %s1122_s5]] }
  0x58   : > { %v578_v63 = vadd.f32 %v573_v51, %v556_v36  ;;  %v579_v0 = vadd.f32 %v573_v51, %v557_v40  ;;  %v585_v1 = vadd.f32 %v584_v52, %v564_v41  ;;  %v586_v2 = vadd.f32 %v584_v52, %v565_v46 }
  0x59   : > { %v587_v3 = vadd.f32 %v584_v52, %v566_v47  ;;  %v588_v4 = vadd.f32 %v584_v52, %v567_v48  ;;  %v589_v5 = vadd.f32 %v584_v52, %v568_v49  ;;  %v590_v6 = vadd.f32 %v584_v52, %v569_v50 }
  0x5a   : > { %v601_v7 = vmul.f32 %v574_v58, %v574_v58  ;;  %v602_v8 = vmul.f32 %v575_v59, %v575_v59  ;;  %v2757_v10 = vunpack.c.l.bf16 %v3113_v62  ;;  %v595_v11 = vmul.f32 %v594_v53, %v585_v1 }
  0x5b   : > { %v596_v12 = vmul.f32 %v594_v53, %v586_v2  ;;  %v3555_v13 = vmul.f32 %v594_v53, %v587_v3  ;;  %v3557_v14 = vmul.f32 %v594_v53, %v588_v4  ;;  %v603_v15 = vmul.f32 %v576_v60, %v576_v60 }
  0x5c   : > { %v604_v17 = vmul.f32 %v577_v61, %v577_v61  ;;  %v605_v18 = vmul.f32 %v578_v63, %v578_v63  ;;  %v606_v20 = vmul.f32 %v579_v0, %v579_v0  ;;  %v3559_v21 = vmul.f32 %v594_v53, %v589_v5 }
  0x5d   : > { %v3561_v22 = vmul.f32 %v594_v53, %v590_v6  ;;  %v608_v23 = vmul.f32 %v607_v54, %v601_v7  ;;  %v609_v24 = vmul.f32 %v607_v54, %v602_v8  ;;  %v3563_v25 = vmul.f32 %v607_v54, %v603_v15 }
  0x5e   : > { %v3565_v26 = vmul.f32 %v607_v54, %v604_v17  ;;  %v3567_v27 = vmul.f32 %v607_v54, %v605_v18  ;;  %v3569_v28 = vmul.f32 %v607_v54, %v606_v20  ;;  %v2758_v33 = vunpack.c.h.bf16 %v3113_v62  ;;  %v516_v20 = vld [vmem:[#allocation2 + $0x8] sm:$0xff] }
  0x5f   : > { %v614_v31 = vsub.f32 %v595_v11, %v608_v23  ;;  %v615_v32 = vsub.f32 %v596_v12, %v609_v24  ;;  %v639_v34 = vmul.f32 %v3548_v55, %v3548_v55  ;;  %v640_v35 = vmul.f32 %v3550_v56, %v3550_v56  ;;  %v517_v23 = vld [vmem:[#allocation2] sm:$0xff] }
  0x60   : > { %v641_v36 = vmul.f32 %v3552_v57, %v3552_v57  ;;  %v616_v39 = vsub.f32 %v3555_v13, %v3563_v25  ;;  %v617_v40 = vsub.f32 %v3557_v14, %v3565_v26  ;;  %v618_v41 = vsub.f32 %v3559_v21, %v3567_v27 }
  0x61   : > { %v619_v44 = vsub.f32 %v3561_v22, %v3569_v28  ;;  %v3588_v46 = vadd.f32 %v614_v31, %v514_v29  ;;  %v3590_v47 = vadd.f32 %v615_v32, %v515_v30  ;;  %v642_v48 = vmul.f32 %v2754_v9, %v2754_v9  ;;  %v3120_v22 = vld [vmem:[%s3513_s18 + $0x30] sm:$0xff]   ;;  %v3121_v28 = vld [vmem:[%s3513_s18 + $0x38] sm:$0xff]  }
  0x62   : > { %v643_v49 = vmul.f32 %v2757_v10, %v2757_v10  ;;  %v644_v50 = vmul.f32 %v2758_v33, %v2758_v33  ;;  %v2761_v51 = vunpack.c.l.bf16 %v3114_v37  ;;  %v2762_v52 = vunpack.c.h.bf16 %v3114_v37 }
  0x63   : > { %v2765_v53 = vunpack.c.l.bf16 %v3115_v38  ;;  %v2766_v54 = vunpack.c.h.bf16 %v3115_v38  ;;  %v2769_v58 = vunpack.c.l.bf16 %v3116_v45  ;;  %v2770_v59 = vunpack.c.h.bf16 %v3116_v45 }
  0x64   : > { %v3594_v60 = vsub.s32 1, %v3525_v19  ;;  %v658_v61 = vadd.f32 %v2761_v51, %v3548_v55  ;;  %v659_v62 = vadd.f32 %v2762_v52, %v3550_v56  ;;  %v664_v0 = vmul.f32 %v2761_v51, %v2761_v51 }
  0x65   : > { %v660_v63 = vadd.f32 %v2765_v53, %v3552_v57  ;;  %v661_v1 = vadd.f32 %v2766_v54, %v2754_v9  ;;  %v662_v2 = vadd.f32 %v2769_v58, %v2757_v10  ;;  %v663_v3 = vadd.f32 %v2770_v59, %v2758_v33 }
  0x66   : > { %v665_v4 = vmul.f32 %v2762_v52, %v2762_v52  ;;  %v666_v5 = vmul.f32 %v2765_v53, %v2765_v53  ;;  %v667_v6 = vmul.f32 %v2766_v54, %v2766_v54  ;;  %v668_v7 = vmul.f32 %v2769_v58, %v2769_v58  ;;  %v3117_v53 = vld [vmem:[%s3508_s14 + $0x30] sm:$0xff]  }
  0x67   : > { %v669_v8 = vmul.f32 %v2770_v59, %v2770_v59  ;;  %v670_v11 = vadd.f32 %v664_v0, %v639_v34  ;;  %v679_v55 = vrot.slane %v3523_v16, %v3594_v60  ;;  %v689_v56 = vrot.slane %v3538_v43, %v3594_v60 }
  0x68   : > { %v671_v12 = vadd.f32 %v665_v4, %v640_v35  ;;  %v672_v57 = vadd.f32 %v666_v5, %v641_v36  ;;  %v673_v13 = vadd.f32 %v667_v6, %v642_v48  ;;  %v674_v9 = vadd.f32 %v668_v7, %v643_v49  ;;  %v518_v48 = vld [vmem:[#allocation2 + $0x18] sm:$0xff] }
  0x69   : > { %v675_v10 = vadd.f32 %v669_v8, %v644_v50  ;;  %v680_v14 = vadd.f32 %v679_v55, %v658_v61  ;;  %v681_v15 = vadd.f32 %v679_v55, %v659_v62  ;;  %v682_v17 = vadd.f32 %v679_v55, %v660_v63  ;;  %v519_v61 = vld [vmem:[#allocation2 + $0x20] sm:$0xff] }
  0x6a   : > { %v683_v18 = vadd.f32 %v679_v55, %v661_v1  ;;  %v684_v24 = vadd.f32 %v679_v55, %v662_v2  ;;  %v685_v25 = vadd.f32 %v679_v55, %v663_v3  ;;  %v690_v26 = vadd.f32 %v689_v56, %v670_v11  ;;  %v731_v2 = vld [vmem:[%s3489_s15] sm:$0x2] }
  0x6b   : > { %v691_v16 = vadd.f32 %v689_v56, %v671_v12  ;;  %v692_v29 = vadd.f32 %v689_v56, %v672_v57  ;;  %v693_v30 = vadd.f32 %v689_v56, %v673_v13  ;;  %v694_v43 = vadd.f32 %v689_v56, %v674_v9  ;;  %v3119_v3 = vld [vmem:[%s3508_s14 + $0x40] sm:$0xff]  }
  0x6c   : > { %v695_v31 = vadd.f32 %v689_v56, %v675_v10  ;;  %v699_v32 = vstv %s3599_s10  ;;  %v706_v33 = vmul.f32 %v680_v14, %v680_v14  ;;  %v707_v34 = vmul.f32 %v681_v15, %v681_v15  ;;  %s1230_s10 = sadd.s32 6, %s3477_s23 }
  0x6d   : > { %v708_v35 = vmul.f32 %v682_v17, %v682_v17  ;;  %v3608_v36 = vadd.f32 %v616_v39, %v516_v20  ;;  %v3610_v37 = vadd.f32 %v617_v40, %v517_v23  ;;  %v700_v38 = vmul.f32 %v699_v32, %v690_v26  ;;  %v3118_v40 = vld [vmem:[%s3508_s14 + $0x38] sm:$0xff]   ;;  %s3978_s19 = sld [smem:[#allocation5 + %s1230_s10]] }
  0x6e   : > { %v701_v45 = vmul.f32 %v699_v32, %v691_v16  ;;  %v3612_v49 = vmul.f32 %v699_v32, %v692_v29  ;;  %v3614_v50 = vmul.f32 %v699_v32, %v693_v30  ;;  %v709_v51 = vmul.f32 %v683_v18, %v683_v18  ;;  %v3122_v18 = vld [vmem:[%s3513_s18 + $0x40] sm:$0xff]  }
  0x6f   : > { %v710_v52 = vmul.f32 %v684_v24, %v684_v24  ;;  %v3617_v54 = vmul.f32 %v699_v32, %v694_v43  ;;  %v3619_v58 = vmul.f32 %v699_v32, %v695_v31  ;;  %v711_v39 = vmul.f32 %v685_v25, %v685_v25 }
  0x70   : > { %v712_v59 = vstv %s3605_s12  ;;  %v3632_v4 = vadd.f32 %v618_v41, %v518_v48  ;;  %v2773_v7 = vunpack.c.l.bf16 %v3117_v53  ;;  %v2774_v12 = vunpack.c.h.bf16 %v3117_v53  ;;  %s3965_s12 = sld [smem:[#allocation3 + %s1230_s10]] }
  0x71   : > { %v713_v62 = vmul.f32 %v712_v59, %v706_v33  ;;  %v714_v63 = vmul.f32 %v712_v59, %v707_v34  ;;  %v3623_v0 = vmul.f32 %v712_v59, %v708_v35  ;;  %v3625_v1 = vmul.f32 %v712_v59, %v709_v51 }
  0x72   : > { %v3634_v5 = vmul.f32 %v712_v59, %v710_v52  ;;  %v3636_v6 = vmul.f32 %v712_v59, %v711_v39  ;;  %v2777_v55 = vunpack.c.l.bf16 %v3118_v40  ;;  %v3641_v56 = vadd.f32 %v619_v44, %v519_v61 }
  0x73   : > { %v719_v8 = vsub.f32 %v700_v38, %v713_v62  ;;  %v720_v11 = vsub.f32 %v701_v45, %v714_v63  ;;  %v3643_v21 = vunpack.c.l.bf16 %v731_v2  ;;  %v2778_v27 = vunpack.c.h.bf16 %v3118_v40 }
  0x74   : > { %v2781_v41 = vunpack.c.l.bf16 %v3119_v3  ;;  %v721_v57 = vsub.f32 %v3612_v49, %v3623_v0  ;;  %v722_v13 = vsub.f32 %v3614_v50, %v3625_v1  ;;  %v723_v9 = vsub.f32 %v3617_v54, %v3634_v5  ;;  %v3126_v5 = vld [vmem:[%s3513_s18 + $0x48] sm:$0xff]  }
  0x75   : > { %v724_v10 = vsub.f32 %v3619_v58, %v3636_v6  ;;  %v3657_v44 = vadd.f32 %v719_v8, %v3588_v46  ;;  %v3660_v14 = vadd.f32 %v720_v11, %v3590_v47  ;;  %v2782_v15 = vunpack.c.h.bf16 %v3119_v3 }
  0x76   : > { %v746_v17 = vmul.f32 %v2773_v7, %v2773_v7  ;;  %v747_v20 = vmul.f32 %v2774_v12, %v2774_v12  ;;  %v748_v23 = vmul.f32 %v2777_v55, %v2777_v55  ;;  %v749_v24 = vmul.f32 %v2778_v27, %v2778_v27 }
  0x77   : > { %v750_v25 = vmul.f32 %v2781_v41, %v2781_v41  ;;  %v751_v26 = vmul.f32 %v2782_v15, %v2782_v15  ;;  %v2785_v16 = vunpack.c.l.bf16 %v3120_v22  ;;  %v2786_v29 = vunpack.c.h.bf16 %v3120_v22 }
  0x78   : > { %v2789_v30 = vunpack.c.l.bf16 %v3121_v28  ;;  %v2790_v43 = vunpack.c.h.bf16 %v3121_v28  ;;  %v2793_v46 = vunpack.c.l.bf16 %v3122_v18  ;;  %v2794_v31 = vunpack.c.h.bf16 %v3122_v18 }
  0x79   : > { %v3668_v47 = vsub.s32 2, %v3525_v19  ;;  %v765_v32 = vadd.f32 %v2785_v16, %v2773_v7  ;;  %v766_v33 = vadd.f32 %v2786_v29, %v2774_v12  ;;  %v771_v35 = vmul.f32 %v2785_v16, %v2785_v16 }
  0x7a   : > { %v767_v34 = vadd.f32 %v2789_v30, %v2777_v55  ;;  %v768_v38 = vadd.f32 %v2790_v43, %v2778_v27  ;;  %v769_v45 = vadd.f32 %v2793_v46, %v2781_v41  ;;  %v770_v48 = vadd.f32 %v2794_v31, %v2782_v15 }
  0x7b   : > { %v772_v51 = vmul.f32 %v2786_v29, %v2786_v29  ;;  %v773_v52 = vmul.f32 %v2789_v30, %v2789_v30  ;;  %v774_v53 = vmul.f32 %v2790_v43, %v2790_v43  ;;  %v775_v39 = vmul.f32 %v2793_v46, %v2793_v46 }
  0x7c   : > { %v776_v59 = vmul.f32 %v2794_v31, %v2794_v31  ;;  %v777_v40 = vadd.f32 %v771_v35, %v746_v17  ;;  %v786_v62 = vrot.slane %v3643_v21, %v3668_v47  ;;  %v3674_v63 = vmul.f32 %v3643_v21, %v3643_v21  ;;  %v3123_v35 = vld [vmem:[%s3508_s14 + $0x48] sm:$0xff]  }
  0x7d   : > { %v778_v61 = vadd.f32 %v772_v51, %v747_v20  ;;  %v779_v2 = vadd.f32 %v773_v52, %v748_v23  ;;  %v780_v3 = vadd.f32 %v774_v53, %v749_v24  ;;  %v781_v7 = vadd.f32 %v775_v39, %v750_v25  ;;  %v3124_v52 = vld [vmem:[%s3508_s14 + $0x50] sm:$0xff]  }
  0x7e   : > { %v782_v8 = vadd.f32 %v776_v59, %v751_v26  ;;  %v787_v11 = vadd.f32 %v786_v62, %v765_v32  ;;  %v788_v12 = vadd.f32 %v786_v62, %v766_v33  ;;  %v789_v55 = vadd.f32 %v786_v62, %v767_v34 }
  0x7f   : > { %v790_v27 = vadd.f32 %v786_v62, %v768_v38  ;;  %v791_v41 = vadd.f32 %v786_v62, %v769_v45  ;;  %v792_v22 = vadd.f32 %v786_v62, %v770_v48  ;;  %v797_v28 = vrot.slane %v3674_v63, %v3668_v47 }
  0x80   : > { %v807_v15 = vstv %s3665_s20  ;;  %v814_v17 = vmul.f32 %v787_v11, %v787_v11  ;;  %v815_v18 = vmul.f32 %v788_v12, %v788_v12  ;;  %v816_v20 = vmul.f32 %v789_v55, %v789_v55  ;;  %v3128_v12 = vld [vmem:[%s3513_s18 + $0x58] sm:$0xff]   ;;  %s1335_s20 = sadd.s32 7, %s3477_s23 }
  0x81   : > { %v817_v16 = vmul.f32 %v790_v27, %v790_v27  ;;  %v798_v29 = vadd.f32 %v797_v28, %v777_v40  ;;  %v799_v23 = vadd.f32 %v797_v28, %v778_v61  ;;  %v800_v24 = vadd.f32 %v797_v28, %v779_v2  ;;  %s4052_s22 = sld [smem:[#allocation5 + %s1335_s20]] }
  0x82   : > { %v801_v25 = vadd.f32 %v797_v28, %v780_v3  ;;  %v802_v26 = vadd.f32 %v797_v28, %v781_v7  ;;  %v803_v30 = vadd.f32 %v797_v28, %v782_v8  ;;  %v818_v43 = vmul.f32 %v791_v41, %v791_v41 }
  0x83   : > { %v819_v46 = vmul.f32 %v792_v22, %v792_v22  ;;  %v3687_v31 = vadd.f32 %v721_v57, %v3608_v36  ;;  %v808_v32 = vmul.f32 %v807_v15, %v798_v29  ;;  %v809_v33 = vmul.f32 %v807_v15, %v799_v23  ;;  %v3125_v36 = vld [vmem:[%s3508_s14 + $0x58] sm:$0xff]  }
  0x84   : > { %v3689_v34 = vmul.f32 %v807_v15, %v800_v24  ;;  %v3692_v38 = vmul.f32 %v807_v15, %v801_v25  ;;  %v3694_v45 = vmul.f32 %v807_v15, %v802_v26  ;;  %v3696_v48 = vmul.f32 %v807_v15, %v803_v30 }
  0x85   : > { %v820_v51 = vstv %s3678_s21  ;;  %v3709_v0 = vadd.f32 %v722_v13, %v3610_v37  ;;  %v2797_v61 = vunpack.c.l.bf16 %v3123_v35  ;;  %v2798_v3 = vunpack.c.h.bf16 %v3123_v35  ;;  %s1336_s21 = sld [smem:[#allocation3 + %s1335_s20]] }
  0x86   : > { %v821_v53 = vmul.f32 %v820_v51, %v814_v17  ;;  %v822_v39 = vmul.f32 %v820_v51, %v815_v18  ;;  %v3700_v59 = vmul.f32 %v820_v51, %v816_v20  ;;  %v3702_v49 = vmul.f32 %v820_v51, %v817_v16 }
  0x87   : > { %v3711_v57 = vmul.f32 %v820_v51, %v818_v43  ;;  %v3713_v40 = vmul.f32 %v820_v51, %v819_v46  ;;  %v2801_v7 = vunpack.c.l.bf16 %v3124_v52  ;;  %v3719_v8 = vadd.f32 %v723_v9, %v3632_v4  ;;  %v3127_v9 = vld [vmem:[%s3513_s18 + $0x50] sm:$0xff]  }
  0x88   : > { %v827_v62 = vsub.f32 %v808_v32, %v821_v53  ;;  %v828_v2 = vsub.f32 %v809_v33, %v822_v39  ;;  %v3725_v37 = vadd.f32 %v724_v10, %v3641_v56  ;;  %v2802_v50 = vunpack.c.h.bf16 %v3124_v52 }
  0x89   : > { %v2805_v1 = vunpack.c.l.bf16 %v3125_v36  ;;  %v829_v13 = vsub.f32 %v3689_v34, %v3700_v59  ;;  %v830_v11 = vsub.f32 %v3692_v38, %v3702_v49  ;;  %v831_v54 = vsub.f32 %v3694_v45, %v3711_v57 }
  0x8a   : > { %v832_v4 = vsub.f32 %v3696_v48, %v3713_v40  ;;  %v3738_v58 = vadd.f32 %v827_v62, %v3657_v44  ;;  %v3741_v6 = vadd.f32 %v828_v2, %v3660_v14  ;;  %v2806_v56 = vunpack.c.h.bf16 %v3125_v36  ;;  %v3132_v48 = vld [vmem:[%s3513_s18 + $0x60] sm:$0xff]   ;;  %v3133_v40 = vld [vmem:[%s3513_s18 + $0x68] sm:$0xff]  }
  0x8b   : > { %v852_v10 = vmul.f32 %v2797_v61, %v2797_v61  ;;  %v853_v55 = vmul.f32 %v2798_v3, %v2798_v3  ;;  %v854_v27 = vmul.f32 %v2801_v7, %v2801_v7  ;;  %v855_v41 = vmul.f32 %v2802_v50, %v2802_v50 }
  0x8c   : > { %v856_v22 = vmul.f32 %v2805_v1, %v2805_v1  ;;  %v857_v28 = vmul.f32 %v2806_v56, %v2806_v56  ;;  %v2809_v15 = vunpack.c.l.bf16 %v3126_v5  ;;  %v2810_v17 = vunpack.c.h.bf16 %v3126_v5 }
  0x8d   : > { %v2813_v18 = vunpack.c.l.bf16 %v3127_v9  ;;  %v2814_v20 = vunpack.c.h.bf16 %v3127_v9  ;;  %v2817_v16 = vunpack.c.l.bf16 %v3128_v12  ;;  %v2818_v29 = vunpack.c.h.bf16 %v3128_v12 }
  0x8e   : > { %v3746_v44 = vsub.s32 3, %v3525_v19  ;;  %v871_v14 = vadd.f32 %v2809_v15, %v2797_v61  ;;  %v872_v23 = vadd.f32 %v2810_v17, %v2798_v3  ;;  %v877_v25 = vmul.f32 %v2809_v15, %v2809_v15 }
  0x8f   : > { %v873_v24 = vadd.f32 %v2813_v18, %v2801_v7  ;;  %v874_v26 = vadd.f32 %v2814_v20, %v2802_v50  ;;  %v875_v30 = vadd.f32 %v2817_v16, %v2805_v1  ;;  %v876_v43 = vadd.f32 %v2818_v29, %v2806_v56 }
  0x90   : > { %v878_v46 = vmul.f32 %v2810_v17, %v2810_v17  ;;  %v879_v32 = vmul.f32 %v2813_v18, %v2813_v18  ;;  %v880_v33 = vmul.f32 %v2814_v20, %v2814_v20  ;;  %v881_v34 = vmul.f32 %v2817_v16, %v2817_v16 }
  0x91   : > { %v882_v35 = vmul.f32 %v2818_v29, %v2818_v29  ;;  %v883_v38 = vadd.f32 %v877_v25, %v852_v10  ;;  %v892_v52 = vrot.slane %v3643_v21, %v3746_v44  ;;  %v902_v53 = vrot.slane %v3674_v63, %v3746_v44  ;;  %v3129_v29 = vld [vmem:[%s3508_s14 + $0x60] sm:$0xff]  }
  0x92   : > { %v884_v51 = vadd.f32 %v878_v46, %v853_v55  ;;  %v885_v39 = vadd.f32 %v879_v32, %v854_v27  ;;  %v886_v59 = vadd.f32 %v880_v33, %v855_v41  ;;  %v887_v49 = vadd.f32 %v881_v34, %v856_v22 }
  0x93   : > { %v888_v36 = vadd.f32 %v882_v35, %v857_v28  ;;  %v893_v61 = vadd.f32 %v892_v52, %v871_v14  ;;  %v894_v62 = vadd.f32 %v892_v52, %v872_v23  ;;  %v895_v2 = vadd.f32 %v892_v52, %v873_v24  ;;  %v3130_v24 = vld [vmem:[%s3508_s14 + $0x68] sm:$0xff]  }
  0x94   : > { %v896_v3 = vadd.f32 %v892_v52, %v874_v26  ;;  %v897_v7 = vadd.f32 %v892_v52, %v875_v30  ;;  %v898_v50 = vadd.f32 %v892_v52, %v876_v43  ;;  %v903_v1 = vadd.f32 %v902_v53, %v883_v38  ;;  %v944_v30 = vld [vmem:[%s3489_s15] sm:$0x4]  ;;  %v3131_v43 = vld [vmem:[%s3508_s14 + $0x70] sm:$0xff]  }
  0x95   : > { %v904_v5 = vadd.f32 %v902_v53, %v884_v51  ;;  %v905_v9 = vadd.f32 %v902_v53, %v885_v39  ;;  %v906_v21 = vadd.f32 %v902_v53, %v886_v59  ;;  %v907_v56 = vadd.f32 %v902_v53, %v887_v49 }
  0x96   : > { %v908_v10 = vadd.f32 %v902_v53, %v888_v36  ;;  %v912_v63 = vstv %s910_s9  ;;  %v919_v12 = vmul.f32 %v893_v61, %v893_v61  ;;  %v920_v55 = vmul.f32 %v894_v62, %v894_v62  ;;  %v3134_v62 = vld [vmem:[%s3513_s18 + $0x70] sm:$0xff]   ;;  %s1443_s9 = sadd.s32 8, %s3477_s23 }
  0x97   : > { %v921_v27 = vmul.f32 %v895_v2, %v895_v2  ;;  %v3755_v41 = vadd.f32 %v829_v13, %v3687_v31  ;;  %v3758_v22 = vadd.f32 %v830_v11, %v3709_v0  ;;  %v913_v28 = vmul.f32 %v912_v63, %v903_v1  ;;  %s4114_s11 = sld [smem:[#allocation5 + %s1443_s9]] }
  0x98   : > { %v914_v15 = vmul.f32 %v912_v63, %v904_v5  ;;  %v3760_v17 = vmul.f32 %v912_v63, %v905_v9  ;;  %v3762_v18 = vmul.f32 %v912_v63, %v906_v21  ;;  %v922_v20 = vmul.f32 %v896_v3, %v896_v3 }
  0x99   : > { %v923_v16 = vmul.f32 %v897_v7, %v897_v7  ;;  %v3765_v14 = vmul.f32 %v912_v63, %v907_v56  ;;  %v3767_v23 = vmul.f32 %v912_v63, %v908_v10  ;;  %v924_v31 = vmul.f32 %v898_v50, %v898_v50 }
  0x9a   : > { %v925_v13 = vstv %s3752_s13  ;;  %v3781_v46 = vadd.f32 %v831_v54, %v3719_v8  ;;  %v2821_v34 = vunpack.c.l.bf16 %v3129_v29  ;;  %v2822_v51 = vunpack.c.h.bf16 %v3129_v29  ;;  %s4112_s13 = sld [smem:[#allocation3 + %s1443_s9]] }
  0x9b   : > { %v926_v0 = vmul.f32 %v925_v13, %v919_v12  ;;  %v927_v11 = vmul.f32 %v925_v13, %v920_v55  ;;  %v3771_v25 = vmul.f32 %v925_v13, %v921_v27  ;;  %v3773_v26 = vmul.f32 %v925_v13, %v922_v20 }
  0x9c   : > { %v3783_v32 = vmul.f32 %v925_v13, %v923_v16  ;;  %v3785_v33 = vmul.f32 %v925_v13, %v924_v31  ;;  %v2825_v52 = vunpack.c.l.bf16 %v3130_v24  ;;  %v3791_v45 = vadd.f32 %v832_v4, %v3725_v37 }
  0x9d   : > { %v932_v35 = vsub.f32 %v913_v28, %v926_v0  ;;  %v933_v38 = vsub.f32 %v914_v15, %v927_v11  ;;  %v3793_v57 = vunpack.c.l.bf16 %v944_v30  ;;  %v2826_v8 = vunpack.c.h.bf16 %v3130_v24 }
  0x9e   : > { %v2829_v54 = vunpack.c.l.bf16 %v3131_v43  ;;  %v934_v53 = vsub.f32 %v3760_v17, %v3771_v25  ;;  %v935_v39 = vsub.f32 %v3762_v18, %v3773_v26  ;;  %v936_v59 = vsub.f32 %v3765_v14, %v3783_v32  ;;  %v3138_v32 = vld [vmem:[%s3513_s18 + $0x78] sm:$0xff]  }
  0x9f   : > { %v937_v49 = vsub.f32 %v3767_v23, %v3785_v33  ;;  %v3807_v37 = vadd.f32 %v932_v35, %v3738_v58  ;;  %v3810_v4 = vadd.f32 %v933_v38, %v3741_v6  ;;  %v2830_v36 = vunpack.c.h.bf16 %v3131_v43 }
  0xa0   : > { %v959_v61 = vmul.f32 %v2821_v34, %v2821_v34  ;;  %v960_v2 = vmul.f32 %v2822_v51, %v2822_v51  ;;  %v961_v3 = vmul.f32 %v2825_v52, %v2825_v52  ;;  %v962_v7 = vmul.f32 %v2826_v8, %v2826_v8 }
  0xa1   : > { %v963_v50 = vmul.f32 %v2829_v54, %v2829_v54  ;;  %v964_v1 = vmul.f32 %v2830_v36, %v2830_v36  ;;  %v2833_v5 = vunpack.c.l.bf16 %v3132_v48  ;;  %v2834_v9 = vunpack.c.h.bf16 %v3132_v48 }
  0xa2   : > { %v2837_v21 = vunpack.c.l.bf16 %v3133_v40  ;;  %v2838_v56 = vunpack.c.h.bf16 %v3133_v40  ;;  %v2841_v58 = vunpack.c.l.bf16 %v3134_v62  ;;  %v2842_v10 = vunpack.c.h.bf16 %v3134_v62 }
  0xa3   : > { %v3818_v6 = vsub.s32 4, %v3525_v19  ;;  %v978_v63 = vadd.f32 %v2833_v5, %v2821_v34  ;;  %v979_v12 = vadd.f32 %v2834_v9, %v2822_v51  ;;  %v984_v27 = vmul.f32 %v2833_v5, %v2833_v5 }
  0xa4   : > { %v980_v55 = vadd.f32 %v2837_v21, %v2825_v52  ;;  %v981_v28 = vadd.f32 %v2838_v56, %v2826_v8  ;;  %v982_v15 = vadd.f32 %v2841_v58, %v2829_v54  ;;  %v983_v20 = vadd.f32 %v2842_v10, %v2830_v36 }
  0xa5   : > { %v985_v16 = vmul.f32 %v2834_v9, %v2834_v9  ;;  %v986_v29 = vmul.f32 %v2837_v21, %v2837_v21  ;;  %v987_v31 = vmul.f32 %v2838_v56, %v2838_v56  ;;  %v988_v13 = vmul.f32 %v2841_v58, %v2841_v58 }
  0xa6   : > { %v989_v24 = vmul.f32 %v2842_v10, %v2842_v10  ;;  %v990_v0 = vadd.f32 %v984_v27, %v959_v61  ;;  %v999_v30 = vrot.slane %v3793_v57, %v3818_v6  ;;  %v3824_v43 = vmul.f32 %v3793_v57, %v3793_v57 }
  0xa7   : > { %v991_v11 = vadd.f32 %v985_v16, %v960_v2  ;;  %v992_v34 = vadd.f32 %v986_v29, %v961_v3  ;;  %v993_v35 = vadd.f32 %v987_v31, %v962_v7  ;;  %v994_v38 = vadd.f32 %v988_v13, %v963_v50  ;;  %v3136_v13 = vld [vmem:[%s3508_s14 + $0x80] sm:$0xff]  }
  0xa8   : > { %v995_v51 = vadd.f32 %v989_v24, %v964_v1  ;;  %v1000_v52 = vadd.f32 %v999_v30, %v978_v63  ;;  %v1001_v8 = vadd.f32 %v999_v30, %v979_v12  ;;  %v1002_v54 = vadd.f32 %v999_v30, %v980_v55 }
  0xa9   : > { %v1003_v48 = vadd.f32 %v999_v30, %v981_v28  ;;  %v1004_v40 = vadd.f32 %v999_v30, %v982_v15  ;;  %v1005_v36 = vadd.f32 %v999_v30, %v983_v20  ;;  %v1010_v61 = vrot.slane %v3824_v43, %v3818_v6  ;;  %v3135_v15 = vld [vmem:[%s3508_s14 + $0x78] sm:$0xff]  }
  0xaa   : > { %v1020_v62 = vstv %s3815_s16  ;;  %v1027_v2 = vmul.f32 %v1000_v52, %v1000_v52  ;;  %v1028_v5 = vmul.f32 %v1001_v8, %v1001_v8  ;;  %v1029_v9 = vmul.f32 %v1002_v54, %v1002_v54  ;;  %s1548_s16 = sadd.s32 9, %s3477_s23 }
  0xab   : > { %v1030_v21 = vmul.f32 %v1003_v48, %v1003_v48  ;;  %v1011_v56 = vadd.f32 %v1010_v61, %v990_v0  ;;  %v1012_v3 = vadd.f32 %v1010_v61, %v991_v11  ;;  %v1013_v7 = vadd.f32 %v1010_v61, %v992_v34  ;;  %v3140_v48 = vld [vmem:[%s3513_s18 + $0x88] sm:$0xff]   ;;  %s4185_s5 = sld [smem:[#allocation5 + %s1548_s16]] }
  0xac   : > { %v1014_v50 = vadd.f32 %v1010_v61, %v993_v35  ;;  %v1015_v1 = vadd.f32 %v1010_v61, %v994_v38  ;;  %v1016_v58 = vadd.f32 %v1010_v61, %v995_v51  ;;  %v1031_v10 = vmul.f32 %v1004_v40, %v1004_v40 }
  0xad   : > { %v1032_v63 = vmul.f32 %v1005_v36, %v1005_v36  ;;  %v3837_v12 = vadd.f32 %v934_v53, %v3755_v41  ;;  %v1021_v55 = vmul.f32 %v1020_v62, %v1011_v56  ;;  %v1022_v27 = vmul.f32 %v1020_v62, %v1012_v3  ;;  %v3137_v41 = vld [vmem:[%s3508_s14 + $0x88] sm:$0xff]  }
  0xae   : > { %v3839_v28 = vmul.f32 %v1020_v62, %v1013_v7  ;;  %v3842_v20 = vmul.f32 %v1020_v62, %v1014_v50  ;;  %v3844_v16 = vmul.f32 %v1020_v62, %v1015_v1  ;;  %v3846_v29 = vmul.f32 %v1020_v62, %v1016_v58 }
  0xaf   : > { %v1033_v31 = vstv %s3828_s17  ;;  %v3859_v25 = vadd.f32 %v935_v39, %v3758_v22  ;;  %v2845_v34 = vunpack.c.l.bf16 %v3135_v15  ;;  %v2846_v51 = vunpack.c.h.bf16 %v3135_v15  ;;  %s4183_s17 = sld [smem:[#allocation3 + %s1548_s16]] }
  0xb0   : > { %v1034_v24 = vmul.f32 %v1033_v31, %v1027_v2  ;;  %v1035_v0 = vmul.f32 %v1033_v31, %v1028_v5  ;;  %v3850_v11 = vmul.f32 %v1033_v31, %v1029_v9  ;;  %v3852_v17 = vmul.f32 %v1033_v31, %v1030_v21 }
  0xb1   : > { %v3861_v53 = vmul.f32 %v1033_v31, %v1031_v10  ;;  %v3863_v30 = vmul.f32 %v1033_v31, %v1032_v63  ;;  %v2849_v52 = vunpack.c.l.bf16 %v3136_v13  ;;  %v3869_v8 = vadd.f32 %v936_v59, %v3781_v46  ;;  %v3139_v59 = vld [vmem:[%s3513_s18 + $0x80] sm:$0xff]  }
  0xb2   : > { %v1040_v35 = vsub.f32 %v1021_v55, %v1034_v24  ;;  %v1041_v38 = vsub.f32 %v1022_v27, %v1035_v0  ;;  %v3875_v22 = vadd.f32 %v937_v49, %v3791_v45  ;;  %v2850_v18 = vunpack.c.h.bf16 %v3136_v13 }
  0xb3   : > { %v2853_v26 = vunpack.c.l.bf16 %v3137_v41  ;;  %v1042_v39 = vsub.f32 %v3839_v28, %v3850_v11  ;;  %v1043_v54 = vsub.f32 %v3842_v20, %v3852_v17  ;;  %v1044_v14 = vsub.f32 %v3844_v16, %v3861_v53 }
  0xb4   : > { %v1045_v46 = vsub.f32 %v3846_v29, %v3863_v30  ;;  %v3888_v23 = vadd.f32 %v1040_v35, %v3807_v37  ;;  %v3891_v33 = vadd.f32 %v1041_v38, %v3810_v4  ;;  %v2854_v45 = vunpack.c.h.bf16 %v3137_v41  ;;  %v3144_v29 = vld [vmem:[%s3513_s18 + $0x90] sm:$0xff]   ;;  %v3145_v30 = vld [vmem:[%s3513_s18 + $0x98] sm:$0xff]  }
  0xb5   : > { %v1065_v49 = vmul.f32 %v2845_v34, %v2845_v34  ;;  %v1066_v40 = vmul.f32 %v2846_v51, %v2846_v51  ;;  %v1067_v36 = vmul.f32 %v2849_v52, %v2849_v52  ;;  %v1068_v61 = vmul.f32 %v2850_v18, %v2850_v18 }
  0xb6   : > { %v1069_v62 = vmul.f32 %v2853_v26, %v2853_v26  ;;  %v1070_v2 = vmul.f32 %v2854_v45, %v2854_v45  ;;  %v2857_v5 = vunpack.c.l.bf16 %v3138_v32  ;;  %v2858_v9 = vunpack.c.h.bf16 %v3138_v32 }
  0xb7   : > { %v2861_v21 = vunpack.c.l.bf16 %v3139_v59  ;;  %v2862_v56 = vunpack.c.h.bf16 %v3139_v59  ;;  %v2865_v3 = vunpack.c.l.bf16 %v3140_v48  ;;  %v2866_v7 = vunpack.c.h.bf16 %v3140_v48 }
  0xb8   : > { %v3896_v37 = vsub.s32 5, %v3525_v19  ;;  %v1084_v4 = vadd.f32 %v2857_v5, %v2845_v34  ;;  %v1085_v50 = vadd.f32 %v2858_v9, %v2846_v51  ;;  %v1090_v58 = vmul.f32 %v2857_v5, %v2857_v5 }
  0xb9   : > { %v1086_v1 = vadd.f32 %v2861_v21, %v2849_v52  ;;  %v1087_v10 = vadd.f32 %v2862_v56, %v2850_v18  ;;  %v1088_v63 = vadd.f32 %v2865_v3, %v2853_v26  ;;  %v1089_v55 = vadd.f32 %v2866_v7, %v2854_v45 }
  0xba   : > { %v1091_v27 = vmul.f32 %v2858_v9, %v2858_v9  ;;  %v1092_v28 = vmul.f32 %v2861_v21, %v2861_v21  ;;  %v1093_v15 = vmul.f32 %v2862_v56, %v2862_v56  ;;  %v1094_v20 = vmul.f32 %v2865_v3, %v2865_v3 }
  0xbb   : > { %v1095_v31 = vmul.f32 %v2866_v7, %v2866_v7  ;;  %v1096_v13 = vadd.f32 %v1090_v58, %v1065_v49  ;;  %v1105_v0 = vrot.slane %v3793_v57, %v3896_v37  ;;  %v1115_v11 = vrot.slane %v3824_v43, %v3896_v37 }
  0xbc   : > { %v1097_v24 = vadd.f32 %v1091_v27, %v1066_v40  ;;  %v1098_v17 = vadd.f32 %v1092_v28, %v1067_v36  ;;  %v1099_v41 = vadd.f32 %v1093_v15, %v1068_v61  ;;  %v1100_v34 = vadd.f32 %v1094_v20, %v1069_v62  ;;  %v1157_v27 = vld [vmem:[%s3489_s15] sm:$0x8] }
  0xbd   : > { %v1101_v35 = vadd.f32 %v1095_v31, %v1070_v2  ;;  %v1106_v38 = vadd.f32 %v1105_v0, %v1084_v4  ;;  %v1107_v51 = vadd.f32 %v1105_v0, %v1085_v50  ;;  %v1108_v52 = vadd.f32 %v1105_v0, %v1086_v1  ;;  %v3141_v50 = vld [vmem:[%s3508_s14 + $0x90] sm:$0xff]   ;;  %v3143_v28 = vld [vmem:[%s3508_s14 + $0xa0] sm:$0xff]  }
  0xbe   : > { %v1109_v18 = vadd.f32 %v1105_v0, %v1087_v10  ;;  %v1110_v26 = vadd.f32 %v1105_v0, %v1088_v63  ;;  %v1111_v32 = vadd.f32 %v1105_v0, %v1089_v55  ;;  %v1116_v59 = vadd.f32 %v1115_v11, %v1096_v13  ;;  %v3142_v10 = vld [vmem:[%s3508_s14 + $0x98] sm:$0xff]  }
  0xbf   : > { %v1117_v45 = vadd.f32 %v1115_v11, %v1097_v24  ;;  %v1118_v49 = vadd.f32 %v1115_v11, %v1098_v17  ;;  %v1119_v57 = vadd.f32 %v1115_v11, %v1099_v41  ;;  %v1120_v48 = vadd.f32 %v1115_v11, %v1100_v34 }
  0xc0   : > { %v1121_v40 = vadd.f32 %v1115_v11, %v1101_v35  ;;  %v1125_v43 = vstv %s1123_s30  ;;  %v1132_v5 = vmul.f32 %v1106_v38, %v1106_v38  ;;  %v1133_v36 = vmul.f32 %v1107_v51, %v1107_v51  ;;  %s1656_s30 = sadd.s32 10, %s3477_s23 }
  0xc1   : > { %v1134_v61 = vmul.f32 %v1108_v52, %v1108_v52  ;;  %v3905_v62 = vadd.f32 %v1042_v39, %v3837_v12  ;;  %v3908_v2 = vadd.f32 %v1043_v54, %v3859_v25  ;;  %v1126_v9 = vmul.f32 %v1125_v43, %v1116_v59  ;;  %s4249_s10 = sld [smem:[#allocation5 + %s1656_s30]] }
  0xc2   : > { %v1127_v21 = vmul.f32 %v1125_v43, %v1117_v45  ;;  %v3910_v56 = vmul.f32 %v1125_v43, %v1118_v49  ;;  %v3912_v3 = vmul.f32 %v1125_v43, %v1119_v57  ;;  %v1135_v7 = vmul.f32 %v1109_v18, %v1109_v18  ;;  %v3146_v18 = vld [vmem:[%s3513_s18 + $0xa0] sm:$0xff]  }
  0xc3   : > { %v1136_v4 = vmul.f32 %v1110_v26, %v1110_v26  ;;  %v3915_v1 = vmul.f32 %v1125_v43, %v1120_v48  ;;  %v3917_v58 = vmul.f32 %v1125_v43, %v1121_v40  ;;  %v1137_v12 = vmul.f32 %v1111_v32, %v1111_v32 }
  0xc4   : > { %v1138_v39 = vstv %s3902_s8  ;;  %v3931_v15 = vadd.f32 %v1044_v14, %v3869_v8  ;;  %v2869_v13 = vunpack.c.l.bf16 %v3141_v50  ;;  %v2870_v11 = vunpack.c.h.bf16 %v3141_v50  ;;  %s1657_s8 = sld [smem:[#allocation3 + %s1656_s30]] }
  0xc5   : > { %v1139_v25 = vmul.f32 %v1138_v39, %v1132_v5  ;;  %v1140_v54 = vmul.f32 %v1138_v39, %v1133_v36  ;;  %v3921_v63 = vmul.f32 %v1138_v39, %v1134_v61  ;;  %v3923_v55 = vmul.f32 %v1138_v39, %v1135_v7 }
  0xc6   : > { %v3933_v20 = vmul.f32 %v1138_v39, %v1136_v4  ;;  %v3935_v31 = vmul.f32 %v1138_v39, %v1137_v12  ;;  %v2873_v17 = vunpack.c.l.bf16 %v3142_v10  ;;  %v3941_v16 = vadd.f32 %v1045_v46, %v3875_v22 }
  0xc7   : > { %v1145_v24 = vsub.f32 %v1126_v9, %v1139_v25  ;;  %v1146_v0 = vsub.f32 %v1127_v21, %v1140_v54  ;;  %v3943_v53 = vunpack.c.l.bf16 %v1157_v27  ;;  %v2874_v8 = vunpack.c.h.bf16 %v3142_v10 }
  0xc8   : > { %v2877_v14 = vunpack.c.l.bf16 %v3143_v28  ;;  %v1147_v41 = vsub.f32 %v3910_v56, %v3921_v63  ;;  %v1148_v34 = vsub.f32 %v3912_v3, %v3923_v55  ;;  %v1149_v35 = vsub.f32 %v3915_v1, %v3933_v20  ;;  %v3150_v20 = vld [vmem:[%s3513_s18 + $0xa8] sm:$0xff]  }
  0xc9   : > { %v1150_v38 = vsub.f32 %v3917_v58, %v3935_v31  ;;  %v3957_v22 = vadd.f32 %v1145_v24, %v3888_v23  ;;  %v3960_v46 = vadd.f32 %v1146_v0, %v3891_v33  ;;  %v2878_v51 = vunpack.c.h.bf16 %v3143_v28 }
  0xca   : > { %v1172_v52 = vmul.f32 %v2869_v13, %v2869_v13  ;;  %v1173_v26 = vmul.f32 %v2870_v11, %v2870_v11  ;;  %v1174_v32 = vmul.f32 %v2873_v17, %v2873_v17  ;;  %v1175_v59 = vmul.f32 %v2874_v8, %v2874_v8 }
  0xcb   : > { %v1176_v45 = vmul.f32 %v2877_v14, %v2877_v14  ;;  %v1177_v49 = vmul.f32 %v2878_v51, %v2878_v51  ;;  %v2881_v57 = vunpack.c.l.bf16 %v3144_v29  ;;  %v2882_v48 = vunpack.c.h.bf16 %v3144_v29 }
  0xcc   : > { %v2885_v40 = vunpack.c.l.bf16 %v3145_v30  ;;  %v2886_v43 = vunpack.c.h.bf16 %v3145_v30  ;;  %v2889_v23 = vunpack.c.l.bf16 %v3146_v18  ;;  %v2890_v5 = vunpack.c.h.bf16 %v3146_v18 }
  0xcd   : > { %v3968_v33 = vsub.s32 6, %v3525_v19  ;;  %v1191_v36 = vadd.f32 %v2881_v57, %v2869_v13  ;;  %v1192_v61 = vadd.f32 %v2882_v48, %v2870_v11  ;;  %v1197_v21 = vmul.f32 %v2881_v57, %v2881_v57 }
  0xce   : > { %v1193_v9 = vadd.f32 %v2885_v40, %v2873_v17  ;;  %v1194_v7 = vadd.f32 %v2886_v43, %v2874_v8  ;;  %v1195_v4 = vadd.f32 %v2889_v23, %v2877_v14  ;;  %v1196_v50 = vadd.f32 %v2890_v5, %v2878_v51 }
  0xcf   : > { %v1198_v12 = vmul.f32 %v2882_v48, %v2882_v48  ;;  %v1199_v39 = vmul.f32 %v2885_v40, %v2885_v40  ;;  %v1200_v10 = vmul.f32 %v2886_v43, %v2886_v43  ;;  %v1201_v25 = vmul.f32 %v2889_v23, %v2889_v23 }
  0xd0   : > { %v1202_v54 = vmul.f32 %v2890_v5, %v2890_v5  ;;  %v1203_v27 = vadd.f32 %v1197_v21, %v1172_v52  ;;  %v1212_v24 = vrot.slane %v3943_v53, %v3968_v33  ;;  %v3974_v13 = vmul.f32 %v3943_v53, %v3943_v53 }
  0xd1   : > { %v1204_v28 = vadd.f32 %v1198_v12, %v1173_v26  ;;  %v1205_v0 = vadd.f32 %v1199_v39, %v1174_v32  ;;  %v1206_v11 = vadd.f32 %v1200_v10, %v1175_v59  ;;  %v1207_v17 = vadd.f32 %v1201_v25, %v1176_v45  ;;  %v3147_v12 = vld [vmem:[%s3508_s14 + $0xa8] sm:$0xff]  }
  0xd2   : > { %v1208_v8 = vadd.f32 %v1202_v54, %v1177_v49  ;;  %v1213_v14 = vadd.f32 %v1212_v24, %v1191_v36  ;;  %v1214_v29 = vadd.f32 %v1212_v24, %v1192_v61  ;;  %v1215_v30 = vadd.f32 %v1212_v24, %v1193_v9 }
  0xd3   : > { %v1216_v51 = vadd.f32 %v1212_v24, %v1194_v7  ;;  %v1217_v52 = vadd.f32 %v1212_v24, %v1195_v4  ;;  %v1218_v18 = vadd.f32 %v1212_v24, %v1196_v50  ;;  %v1223_v26 = vrot.slane %v3974_v13, %v3968_v33 }
  0xd4   : > { %v1233_v57 = vstv %s3965_s12  ;;  %v1240_v48 = vmul.f32 %v1213_v14, %v1213_v14  ;;  %v1241_v40 = vmul.f32 %v1214_v29, %v1214_v29  ;;  %v1242_v43 = vmul.f32 %v1215_v30, %v1215_v30  ;;  %s1761_s12 = sadd.s32 11, %s3477_s23 }
  0xd5   : > { %v1243_v23 = vmul.f32 %v1216_v51, %v1216_v51  ;;  %v1224_v5 = vadd.f32 %v1223_v26, %v1203_v27  ;;  %v1225_v32 = vadd.f32 %v1223_v26, %v1204_v28  ;;  %v1226_v59 = vadd.f32 %v1223_v26, %v1205_v0  ;;  %v3148_v27 = vld [vmem:[%s3508_s14 + $0xb0] sm:$0xff]   ;;  %s4323_s20 = sld [smem:[#allocation5 + %s1761_s12]] }
  0xd6   : > { %v1227_v45 = vadd.f32 %v1223_v26, %v1206_v11  ;;  %v1228_v49 = vadd.f32 %v1223_v26, %v1207_v17  ;;  %v1229_v36 = vadd.f32 %v1223_v26, %v1208_v8  ;;  %v1244_v61 = vmul.f32 %v1217_v52, %v1217_v52 }
  0xd7   : > { %v1245_v9 = vmul.f32 %v1218_v18, %v1218_v18  ;;  %v3987_v21 = vadd.f32 %v1147_v41, %v3905_v62  ;;  %v1234_v7 = vmul.f32 %v1233_v57, %v1224_v5  ;;  %v1235_v4 = vmul.f32 %v1233_v57, %v1225_v32  ;;  %v3149_v62 = vld [vmem:[%s3508_s14 + $0xb8] sm:$0xff]  }
  0xd8   : > { %v3989_v50 = vmul.f32 %v1233_v57, %v1226_v59  ;;  %v3992_v39 = vmul.f32 %v1233_v57, %v1227_v45  ;;  %v3994_v10 = vmul.f32 %v1233_v57, %v1228_v49  ;;  %v3996_v25 = vmul.f32 %v1233_v57, %v1229_v36  ;;  %v3152_v18 = vld [vmem:[%s3513_s18 + $0xb8] sm:$0xff]  }
  0xd9   : > { %v1246_v54 = vstv %s3978_s19  ;;  %v4009_v63 = vadd.f32 %v1148_v34, %v3908_v2  ;;  %v2893_v17 = vunpack.c.l.bf16 %v3147_v12  ;;  %v2894_v29 = vunpack.c.h.bf16 %v3147_v12  ;;  %s1762_s19 = sld [smem:[#allocation3 + %s1761_s12]] }
  0xda   : > { %v1247_v28 = vmul.f32 %v1246_v54, %v1240_v48  ;;  %v1248_v24 = vmul.f32 %v1246_v54, %v1241_v40  ;;  %v4000_v0 = vmul.f32 %v1246_v54, %v1242_v43  ;;  %v4002_v56 = vmul.f32 %v1246_v54, %v1243_v23 }
  0xdb   : > { %v4011_v41 = vmul.f32 %v1246_v54, %v1244_v61  ;;  %v4013_v11 = vmul.f32 %v1246_v54, %v1245_v9  ;;  %v2897_v30 = vunpack.c.l.bf16 %v3148_v27  ;;  %v4019_v51 = vadd.f32 %v1149_v35, %v3931_v15  ;;  %v3151_v35 = vld [vmem:[%s3513_s18 + $0xb0] sm:$0xff]  }
  0xdc   : > { %v1253_v8 = vsub.f32 %v1234_v7, %v1247_v28  ;;  %v1254_v14 = vsub.f32 %v1235_v4, %v1248_v24  ;;  %v4025_v2 = vadd.f32 %v1150_v38, %v3941_v16  ;;  %v2898_v3 = vunpack.c.h.bf16 %v3148_v27 }
  0xdd   : > { %v2901_v55 = vunpack.c.l.bf16 %v3149_v62  ;;  %v1255_v34 = vsub.f32 %v3989_v50, %v4000_v0  ;;  %v1256_v52 = vsub.f32 %v3992_v39, %v4002_v56  ;;  %v1257_v1 = vsub.f32 %v3994_v10, %v4011_v41 }
  0xde   : > { %v1258_v15 = vsub.f32 %v3996_v25, %v4013_v11  ;;  %v4038_v58 = vadd.f32 %v1253_v8, %v3957_v22  ;;  %v4041_v31 = vadd.f32 %v1254_v14, %v3960_v46  ;;  %v2902_v16 = vunpack.c.h.bf16 %v3149_v62  ;;  %v3157_v25 = vld [vmem:[%s3513_s18 + $0xc8] sm:$0xff]  }
  0xdf   : > { %v1278_v38 = vmul.f32 %v2893_v17, %v2893_v17  ;;  %v1279_v26 = vmul.f32 %v2894_v29, %v2894_v29  ;;  %v1280_v57 = vmul.f32 %v2897_v30, %v2897_v30  ;;  %v1281_v48 = vmul.f32 %v2898_v3, %v2898_v3 }
  0xe0   : > { %v1282_v40 = vmul.f32 %v2901_v55, %v2901_v55  ;;  %v1283_v43 = vmul.f32 %v2902_v16, %v2902_v16  ;;  %v2905_v23 = vunpack.c.l.bf16 %v3150_v20  ;;  %v2906_v5 = vunpack.c.h.bf16 %v3150_v20 }
  0xe1   : > { %v2909_v32 = vunpack.c.l.bf16 %v3151_v35  ;;  %v2910_v59 = vunpack.c.h.bf16 %v3151_v35  ;;  %v2913_v45 = vunpack.c.l.bf16 %v3152_v18  ;;  %v2914_v49 = vunpack.c.h.bf16 %v3152_v18 }
  0xe2   : > { %v4046_v22 = vsub.s32 7, %v3525_v19  ;;  %v1297_v46 = vadd.f32 %v2905_v23, %v2893_v17  ;;  %v1298_v36 = vadd.f32 %v2906_v5, %v2894_v29  ;;  %v1303_v9 = vmul.f32 %v2905_v23, %v2905_v23 }
  0xe3   : > { %v1299_v61 = vadd.f32 %v2909_v32, %v2897_v30  ;;  %v1300_v7 = vadd.f32 %v2910_v59, %v2898_v3  ;;  %v1301_v4 = vadd.f32 %v2913_v45, %v2901_v55  ;;  %v1302_v50 = vadd.f32 %v2914_v49, %v2902_v16 }
  0xe4   : > { %v1304_v12 = vmul.f32 %v2906_v5, %v2906_v5  ;;  %v1305_v39 = vmul.f32 %v2909_v32, %v2909_v32  ;;  %v1306_v54 = vmul.f32 %v2910_v59, %v2910_v59  ;;  %v1307_v27 = vmul.f32 %v2913_v45, %v2913_v45 }
  0xe5   : > { %v1308_v28 = vmul.f32 %v2914_v49, %v2914_v49  ;;  %v1309_v24 = vadd.f32 %v1303_v9, %v1278_v38  ;;  %v1318_v56 = vrot.slane %v3943_v53, %v4046_v22  ;;  %v1328_v19 = vrot.slane %v3974_v13, %v4046_v22 }
  0xe6   : > { %v1310_v0 = vadd.f32 %v1304_v12, %v1279_v26  ;;  %v1311_v62 = vadd.f32 %v1305_v39, %v1280_v57  ;;  %v1312_v17 = vadd.f32 %v1306_v54, %v1281_v48  ;;  %v1313_v8 = vadd.f32 %v1307_v27, %v1282_v40  ;;  %v1370_v39 = vld [vmem:[%s3489_s15 + $0x4] sm:$0x1]  ;;  %v3155_v54 = vld [vmem:[%s3508_s14 + $0xd0] sm:$0xff]  }
  0xe7   : > { %v1314_v14 = vadd.f32 %v1308_v28, %v1283_v43  ;;  %v1319_v29 = vadd.f32 %v1318_v56, %v1297_v46  ;;  %v1320_v30 = vadd.f32 %v1318_v56, %v1298_v36  ;;  %v1321_v3 = vadd.f32 %v1318_v56, %v1299_v61  ;;  %v3153_v61 = vld [vmem:[%s3508_s14 + $0xc0] sm:$0xff]  }
  0xe8   : > { %v1322_v55 = vadd.f32 %v1318_v56, %v1300_v7  ;;  %v1323_v20 = vadd.f32 %v1318_v56, %v1301_v4  ;;  %v1324_v35 = vadd.f32 %v1318_v56, %v1302_v50  ;;  %v1329_v16 = vadd.f32 %v1328_v19, %v1309_v24  ;;  %v3154_v4 = vld [vmem:[%s3508_s14 + $0xc8] sm:$0xff]  }
  0xe9   : > { %v1330_v38 = vadd.f32 %v1328_v19, %v1310_v0  ;;  %v1331_v18 = vadd.f32 %v1328_v19, %v1311_v62  ;;  %v1332_v53 = vadd.f32 %v1328_v19, %v1312_v17  ;;  %v1333_v26 = vadd.f32 %v1328_v19, %v1313_v8 }
  0xea   : > { %v1334_v23 = vadd.f32 %v1328_v19, %v1314_v14  ;;  %v1338_v13 = vstv %s1336_s21  ;;  %v1345_v5 = vmul.f32 %v1319_v29, %v1319_v29  ;;  %v1346_v57 = vmul.f32 %v1320_v30, %v1320_v30  ;;  %s1869_s21 = sadd.s32 12, %s3477_s23 }
  0xeb   : > { %v1347_v48 = vmul.f32 %v1321_v3, %v1321_v3  ;;  %v4055_v40 = vadd.f32 %v1255_v34, %v3987_v21  ;;  %v4058_v43 = vadd.f32 %v1256_v52, %v4009_v63  ;;  %v1339_v32 = vmul.f32 %v1338_v13, %v1329_v16  ;;  %v3156_v3 = vld [vmem:[%s3513_s18 + $0xc0] sm:$0xff]   ;;  %s4385_s9 = sld [smem:[#allocation5 + %s1869_s21]] }
  0xec   : > { %v1340_v59 = vmul.f32 %v1338_v13, %v1330_v38  ;;  %v4060_v45 = vmul.f32 %v1338_v13, %v1331_v18  ;;  %v4062_v49 = vmul.f32 %v1338_v13, %v1332_v53  ;;  %v1348_v46 = vmul.f32 %v1322_v55, %v1322_v55 }
  0xed   : > { %v1349_v36 = vmul.f32 %v1323_v20, %v1323_v20  ;;  %v4065_v9 = vmul.f32 %v1338_v13, %v1333_v26  ;;  %v4067_v7 = vmul.f32 %v1338_v13, %v1334_v23  ;;  %v1350_v21 = vmul.f32 %v1324_v35, %v1324_v35  ;;  %v3158_v20 = vld [vmem:[%s3513_s18 + $0xd0] sm:$0xff]  }
  0xee   : > { %v1351_v34 = vstv %s4052_s22  ;;  %v4079_v27 = vadd.f32 %v1257_v1, %v4019_v51  ;;  %v2917_v0 = vunpack.c.l.bf16 %v3153_v61  ;;  %v2918_v62 = vunpack.c.h.bf16 %v3153_v61  ;;  %s4383_s22 = sld [smem:[#allocation3 + %s1869_s21]] }
  0xef   : > { %v1352_v63 = vmul.f32 %v1351_v34, %v1345_v5  ;;  %v1353_v52 = vmul.f32 %v1351_v34, %v1346_v57  ;;  %v1354_v50 = vmul.f32 %v1351_v34, %v1347_v48  ;;  %v4071_v12 = vmul.f32 %v1351_v34, %v1348_v46 }
  0xf0   : > { %v4081_v28 = vmul.f32 %v1351_v34, %v1349_v36  ;;  %v4083_v24 = vmul.f32 %v1351_v34, %v1350_v21  ;;  %v2921_v17 = vunpack.c.l.bf16 %v3154_v4  ;;  %v4089_v10 = vadd.f32 %v1258_v15, %v4025_v2 }
  0xf1   : > { %v1358_v56 = vsub.f32 %v1339_v32, %v1352_v63  ;;  %v1359_v19 = vsub.f32 %v1340_v59, %v1353_v52  ;;  %v4091_v41 = vunpack.c.l.bf16 %v1370_v39  ;;  %v2922_v51 = vunpack.c.h.bf16 %v3154_v4 }
  0xf2   : > { %v2925_v1 = vunpack.c.l.bf16 %v3155_v54  ;;  %v1360_v8 = vsub.f32 %v4060_v45, %v1354_v50  ;;  %v1361_v14 = vsub.f32 %v4062_v49, %v4071_v12  ;;  %v1362_v29 = vsub.f32 %v4065_v9, %v4081_v28  ;;  %v3162_v28 = vld [vmem:[%s3513_s18 + $0xd8] sm:$0xff]  }
  0xf3   : > { %v1363_v30 = vsub.f32 %v4067_v7, %v4083_v24  ;;  %v4103_v11 = vadd.f32 %v1358_v56, %v4038_v58  ;;  %v4106_v2 = vadd.f32 %v1359_v19, %v4041_v31  ;;  %v2926_v15 = vunpack.c.h.bf16 %v3155_v54 }
  0xf4   : > { %v1385_v55 = vmul.f32 %v2917_v0, %v2917_v0  ;;  %v1386_v35 = vmul.f32 %v2918_v62, %v2918_v62  ;;  %v1387_v16 = vmul.f32 %v2921_v17, %v2921_v17  ;;  %v1388_v38 = vmul.f32 %v2922_v51, %v2922_v51 }
  0xf5   : > { %v1389_v18 = vmul.f32 %v2925_v1, %v2925_v1  ;;  %v1390_v53 = vmul.f32 %v2926_v15, %v2926_v15  ;;  %v2929_v26 = vunpack.c.l.bf16 %v3156_v3  ;;  %v2930_v23 = vunpack.c.h.bf16 %v3156_v3 }
  0xf6   : > { %v2933_v13 = vunpack.c.l.bf16 %v3157_v25  ;;  %v2934_v5 = vunpack.c.h.bf16 %v3157_v25  ;;  %v2937_v57 = vunpack.c.l.bf16 %v3158_v20  ;;  %v2938_v48 = vunpack.c.h.bf16 %v3158_v20 }
  0xf7   : > { %v1425_v58 = vrot.slane %v4091_v41, %v3534_v42  ;;  %v1404_v31 = vadd.f32 %v2929_v26, %v2917_v0  ;;  %v1405_v32 = vadd.f32 %v2930_v23, %v2918_v62  ;;  %v1410_v45 = vmul.f32 %v2929_v26, %v2929_v26 }
  0xf8   : > { %v1406_v59 = vadd.f32 %v2933_v13, %v2921_v17  ;;  %v1407_v49 = vadd.f32 %v2934_v5, %v2922_v51  ;;  %v1408_v46 = vadd.f32 %v2937_v57, %v2925_v1  ;;  %v1409_v36 = vadd.f32 %v2938_v48, %v2926_v15 }
  0xf9   : > { %v1411_v61 = vmul.f32 %v2930_v23, %v2930_v23  ;;  %v1412_v21 = vmul.f32 %v2933_v13, %v2933_v13  ;;  %v1413_v34 = vmul.f32 %v2934_v5, %v2934_v5  ;;  %v1414_v4 = vmul.f32 %v2937_v57, %v2937_v57 }
  0xfa   : > { %v1415_v63 = vmul.f32 %v2938_v48, %v2938_v48  ;;  %v4117_v52 = vadd.f32 %v1360_v8, %v4055_v40  ;;  %v1416_v50 = vadd.f32 %v1410_v45, %v1385_v55  ;;  %v1426_v12 = vadd.f32 %v1425_v58, %v1404_v31  ;;  %v3160_v45 = vld [vmem:[%s3508_s14 + $0xe0] sm:$0xff]  }
  0xfb   : > { %v1427_v39 = vadd.f32 %v1425_v58, %v1405_v32  ;;  %v1417_v54 = vadd.f32 %v1411_v61, %v1386_v35  ;;  %v1418_v0 = vadd.f32 %v1412_v21, %v1387_v16  ;;  %v1419_v56 = vadd.f32 %v1413_v34, %v1388_v38  ;;  %v3159_v32 = vld [vmem:[%s3508_s14 + $0xd8] sm:$0xff]   ;;  %v3161_v21 = vld [vmem:[%s3508_s14 + $0xe8] sm:$0xff]  }
  0xfc   : > { %v1420_v19 = vadd.f32 %v1414_v4, %v1389_v18  ;;  %v1428_v62 = vadd.f32 %v1425_v58, %v1406_v59  ;;  %v1429_v17 = vadd.f32 %v1425_v58, %v1407_v49  ;;  %v1430_v51 = vadd.f32 %v1425_v58, %v1408_v46 }
  0xfd   : > { %v1431_v1 = vadd.f32 %v1425_v58, %v1409_v36  ;;  %v1421_v3 = vadd.f32 %v1415_v63, %v1390_v53  ;;  %v4121_v25 = vmul.f32 %v4091_v41, %v4091_v41  ;;  %v1453_v40 = vmul.f32 %v1426_v12, %v1426_v12 }
  0xfe   : > { %v1454_v8 = vmul.f32 %v1427_v39, %v1427_v39  ;;  %v1455_v15 = vmul.f32 %v1428_v62, %v1428_v62  ;;  %v1456_v55 = vmul.f32 %v1429_v17, %v1429_v17  ;;  %v1457_v20 = vmul.f32 %v1430_v51, %v1430_v51 }
  0xff   : > { %v1458_v35 = vmul.f32 %v1431_v1, %v1431_v1  ;;  %v4124_v16 = vadd.f32 %v1361_v14, %v4058_v43  ;;  %v1436_v38 = vrot.slane %v4121_v25, %v3534_v42  ;;  %v1446_v18 = vstv %s4112_s13  ;;  %s1974_s13 = sadd.s32 13, %s3477_s23 }
 0x100   : > { %v1459_v53 = vstv %s4114_s11  ;;  %v2941_v63 = vunpack.c.l.bf16 %v3159_v32  ;;  %v2949_v62 = vunpack.c.l.bf16 %v3161_v21  ;;  %v2950_v17 = vunpack.c.h.bf16 %v3161_v21  ;;  %s4454_s11 = sld [smem:[#allocation3 + %s1974_s13]] }
 0x101   : > { %v1460_v26 = vmul.f32 %v1459_v53, %v1453_v40  ;;  %v1461_v23 = vmul.f32 %v1459_v53, %v1454_v8  ;;  %v4130_v13 = vmul.f32 %v1459_v53, %v1455_v15  ;;  %v4132_v5 = vmul.f32 %v1459_v53, %v1456_v55  ;;  %s4456_s16 = sld [smem:[#allocation5 + %s1974_s13]] }
 0x102   : > { %v1437_v57 = vadd.f32 %v1436_v38, %v1416_v50  ;;  %v1438_v48 = vadd.f32 %v1436_v38, %v1417_v54  ;;  %v1439_v58 = vadd.f32 %v1436_v38, %v1418_v0  ;;  %v1440_v31 = vadd.f32 %v1436_v38, %v1419_v56 }
 0x103   : > { %v1441_v43 = vadd.f32 %v1436_v38, %v1420_v19  ;;  %v1442_v14 = vadd.f32 %v1436_v38, %v1421_v3  ;;  %v4135_v59 = vmul.f32 %v1459_v53, %v1457_v20  ;;  %v4137_v42 = vmul.f32 %v1459_v53, %v1458_v35  ;;  %v3164_v3 = vld [vmem:[%s3513_s18 + $0xe8] sm:$0xff]  }
 0x104   : > { %v1447_v49 = vmul.f32 %v1446_v18, %v1437_v57  ;;  %v1448_v46 = vmul.f32 %v1446_v18, %v1438_v48  ;;  %v4140_v36 = vmul.f32 %v1446_v18, %v1439_v58  ;;  %v4142_v61 = vmul.f32 %v1446_v18, %v1440_v31 }
 0x105   : > { %v4145_v34 = vmul.f32 %v1446_v18, %v1441_v43  ;;  %v4147_v4 = vmul.f32 %v1446_v18, %v1442_v14  ;;  %v2942_v50 = vunpack.c.h.bf16 %v3159_v32  ;;  %v2945_v54 = vunpack.c.l.bf16 %v3160_v45 }
 0x106   : > { %v1466_v12 = vsub.f32 %v1447_v49, %v1460_v26  ;;  %v1467_v39 = vsub.f32 %v1448_v46, %v1461_v23  ;;  %v2946_v0 = vunpack.c.h.bf16 %v3160_v45  ;;  %v4153_v56 = vadd.f32 %v1362_v29, %v4079_v27  ;;  %v3163_v29 = vld [vmem:[%s3513_s18 + $0xe0] sm:$0xff]  }
 0x107   : > { %v4159_v19 = vadd.f32 %v1363_v30, %v4089_v10  ;;  %v1468_v51 = vsub.f32 %v4140_v36, %v4130_v13  ;;  %v1469_v1 = vsub.f32 %v4142_v61, %v4132_v5  ;;  %v1470_v9 = vsub.f32 %v4145_v34, %v4135_v59 }
 0x108   : > { %v1471_v27 = vsub.f32 %v4147_v4, %v4137_v42  ;;  %v4172_v7 = vadd.f32 %v1466_v12, %v4103_v11  ;;  %v4175_v24 = vadd.f32 %v1467_v39, %v4106_v2  ;;  %v1491_v10 = vmul.f32 %v2941_v63, %v2941_v63 }
 0x109   : > { %v1492_v30 = vmul.f32 %v2942_v50, %v2942_v50  ;;  %v1493_v40 = vmul.f32 %v2945_v54, %v2945_v54  ;;  %v1494_v8 = vmul.f32 %v2946_v0, %v2946_v0  ;;  %v1495_v15 = vmul.f32 %v2949_v62, %v2949_v62 }
 0x10a   : > { %v1496_v55 = vmul.f32 %v2950_v17, %v2950_v17  ;;  %v2953_v20 = vunpack.c.l.bf16 %v3162_v28  ;;  %v2954_v35 = vunpack.c.h.bf16 %v3162_v28  ;;  %v2957_v38 = vunpack.c.l.bf16 %v3163_v29 }
 0x10b   : > { %v2958_v18 = vunpack.c.h.bf16 %v3163_v29  ;;  %v2961_v53 = vunpack.c.l.bf16 %v3164_v3  ;;  %v2962_v26 = vunpack.c.h.bf16 %v3164_v3  ;;  %v1531_v11 = vrot.slane %v4091_v41, %v3594_v60 }
 0x10c   : > { %v1541_v2 = vrot.slane %v4121_v25, %v3594_v60  ;;  %v1510_v23 = vadd.f32 %v2953_v20, %v2941_v63  ;;  %v1511_v13 = vadd.f32 %v2954_v35, %v2942_v50  ;;  %v1512_v5 = vadd.f32 %v2957_v38, %v2945_v54 }
 0x10d   : > { %v1513_v57 = vadd.f32 %v2958_v18, %v2946_v0  ;;  %v1514_v48 = vadd.f32 %v2961_v53, %v2949_v62  ;;  %v1515_v58 = vadd.f32 %v2962_v26, %v2950_v17  ;;  %v1516_v31 = vmul.f32 %v2953_v20, %v2953_v20 }
 0x10e   : > { %v1517_v32 = vmul.f32 %v2954_v35, %v2954_v35  ;;  %v1518_v43 = vmul.f32 %v2957_v38, %v2957_v38  ;;  %v1519_v14 = vmul.f32 %v2958_v18, %v2958_v18  ;;  %v1520_v45 = vmul.f32 %v2961_v53, %v2961_v53 }
 0x10f   : > { %v1521_v49 = vmul.f32 %v2962_v26, %v2962_v26  ;;  %v1522_v41 = vadd.f32 %v1516_v31, %v1491_v10  ;;  %v1532_v36 = vadd.f32 %v1531_v11, %v1510_v23  ;;  %v1533_v60 = vadd.f32 %v1531_v11, %v1511_v13  ;;  %v1583_v13 = vld [vmem:[%s3489_s15 + $0x4] sm:$0x2] }
 0x110   : > { %v1523_v46 = vadd.f32 %v1517_v32, %v1492_v30  ;;  %v1524_v25 = vadd.f32 %v1518_v43, %v1493_v40  ;;  %v1525_v61 = vadd.f32 %v1519_v14, %v1494_v8  ;;  %v1526_v21 = vadd.f32 %v1520_v45, %v1495_v15 }
 0x111   : > { %v1527_v63 = vadd.f32 %v1521_v49, %v1496_v55  ;;  %v1534_v50 = vadd.f32 %v1531_v11, %v1512_v5  ;;  %v1535_v12 = vadd.f32 %v1531_v11, %v1513_v57  ;;  %v1536_v39 = vadd.f32 %v1531_v11, %v1514_v48  ;;  %v3166_v5 = vld [vmem:[%s3508_s14 + $0xf8] sm:$0xff]   ;;  %v3167_v49 = vld [vmem:[%s3508_s14 + $0x100] sm:$0xff]  }
 0x112   : > { %v1537_v54 = vadd.f32 %v1531_v11, %v1515_v58  ;;  %v1542_v0 = vadd.f32 %v1541_v2, %v1522_v41  ;;  %v1543_v62 = vadd.f32 %v1541_v2, %v1523_v46  ;;  %v1544_v17 = vadd.f32 %v1541_v2, %v1524_v25  ;;  %v3165_v11 = vld [vmem:[%s3508_s14 + $0xf0] sm:$0xff]  }
 0x113   : > { %v1545_v28 = vadd.f32 %v1541_v2, %v1525_v61  ;;  %v4188_v29 = vadd.f32 %v1468_v51, %v4117_v52  ;;  %v1546_v10 = vadd.f32 %v1541_v2, %v1526_v21  ;;  %v1551_v30 = vstv %s4183_s17  ;;  %v3170_v21 = vld [vmem:[%s3513_s18 + $0x100] sm:$0xff]  }
 0x114   : > { %v1558_v3 = vmul.f32 %v1532_v36, %v1532_v36  ;;  %v4192_v40 = vadd.f32 %v1469_v1, %v4124_v16  ;;  %v1547_v8 = vadd.f32 %v1541_v2, %v1527_v63  ;;  %v1552_v15 = vmul.f32 %v1551_v30, %v1542_v0 }
 0x115   : > { %v1553_v55 = vmul.f32 %v1551_v30, %v1543_v62  ;;  %v4194_v20 = vmul.f32 %v1551_v30, %v1544_v17  ;;  %v4196_v35 = vmul.f32 %v1551_v30, %v1545_v28  ;;  %v1559_v38 = vmul.f32 %v1533_v60, %v1533_v60 }
 0x116   : > { %v1560_v18 = vmul.f32 %v1534_v50, %v1534_v50  ;;  %v1561_v52 = vmul.f32 %v1535_v12, %v1535_v12  ;;  %v1562_v51 = vmul.f32 %v1536_v39, %v1536_v39  ;;  %v1563_v53 = vmul.f32 %v1537_v54, %v1537_v54 }
 0x117   : > { %v1564_v26 = vstv %s4185_s5  ;;  %v4200_v23 = vmul.f32 %v1551_v30, %v1546_v10  ;;  %v4206_v57 = vmul.f32 %v1551_v30, %v1547_v8  ;;  %v2965_v14 = vunpack.c.l.bf16 %v3165_v11 }
 0x118   : > { %v1565_v16 = vmul.f32 %v1564_v26, %v1558_v3  ;;  %v1566_v1 = vmul.f32 %v1564_v26, %v1559_v38  ;;  %v4202_v2 = vmul.f32 %v1564_v26, %v1560_v18  ;;  %v4208_v48 = vmul.f32 %v1564_v26, %v1561_v52 }
 0x119   : > { %v4210_v58 = vmul.f32 %v1564_v26, %v1562_v51  ;;  %v4212_v31 = vmul.f32 %v1564_v26, %v1563_v53  ;;  %v2966_v45 = vunpack.c.h.bf16 %v3165_v11  ;;  %v4219_v41 = vadd.f32 %v1470_v9, %v4153_v56  ;;  %v3168_v56 = vld [vmem:[%s3513_s18 + $0xf0] sm:$0xff]  }
 0x11a   : > { %v1571_v32 = vsub.f32 %v1552_v15, %v1565_v16  ;;  %v1572_v43 = vsub.f32 %v1553_v55, %v1566_v1  ;;  %v4225_v46 = vadd.f32 %v1471_v27, %v4159_v19  ;;  %v4227_v36 = vunpack.c.l.bf16 %v1583_v13  ;;  %v3169_v27 = vld [vmem:[%s3513_s18 + $0xf8] sm:$0xff]  }
 0x11b   : > { %v2969_v60 = vunpack.c.l.bf16 %v3166_v5  ;;  %v1573_v25 = vsub.f32 %v4194_v20, %v4202_v2  ;;  %v1574_v61 = vsub.f32 %v4196_v35, %v4208_v48  ;;  %v1575_v59 = vsub.f32 %v4200_v23, %v4210_v58  ;;  %v3173_v20 = vld [vmem:[%s3508_s14 + $0x118] sm:$0xff]  }
 0x11c   : > { %v2970_v34 = vunpack.c.h.bf16 %v3166_v5  ;;  %v1576_v9 = vsub.f32 %v4206_v57, %v4212_v31  ;;  %v4239_v42 = vadd.f32 %v1571_v32, %v4172_v7  ;;  %v4242_v4 = vadd.f32 %v1572_v43, %v4175_v24 }
 0x11d   : > { %v2973_v19 = vunpack.c.l.bf16 %v3167_v49  ;;  %v2974_v63 = vunpack.c.h.bf16 %v3167_v49  ;;  %v1598_v50 = vmul.f32 %v2965_v14, %v2965_v14  ;;  %v1599_v12 = vmul.f32 %v2966_v45, %v2966_v45 }
 0x11e   : > { %v1600_v39 = vmul.f32 %v2969_v60, %v2969_v60  ;;  %v1601_v54 = vmul.f32 %v2970_v34, %v2970_v34  ;;  %v2977_v62 = vunpack.c.l.bf16 %v3168_v56  ;;  %v2978_v17 = vunpack.c.h.bf16 %v3168_v56 }
 0x11f   : > { %v1602_v0 = vmul.f32 %v2973_v19, %v2973_v19  ;;  %v1603_v28 = vmul.f32 %v2974_v63, %v2974_v63  ;;  %v2981_v10 = vunpack.c.l.bf16 %v3169_v27  ;;  %v2982_v30 = vunpack.c.h.bf16 %v3169_v27 }
 0x120   : > { %v2985_v7 = vunpack.c.l.bf16 %v3170_v21  ;;  %v2986_v3 = vunpack.c.h.bf16 %v3170_v21  ;;  %v1617_v24 = vadd.f32 %v2977_v62, %v2965_v14  ;;  %v1618_v8 = vadd.f32 %v2978_v17, %v2966_v45 }
 0x121   : > { %v1623_v15 = vmul.f32 %v2977_v62, %v2977_v62  ;;  %v1619_v55 = vadd.f32 %v2981_v10, %v2969_v60  ;;  %v1620_v38 = vadd.f32 %v2982_v30, %v2970_v34  ;;  %v1624_v52 = vmul.f32 %v2978_v17, %v2978_v17 }
 0x122   : > { %v1621_v18 = vadd.f32 %v2985_v7, %v2973_v19  ;;  %v1622_v51 = vadd.f32 %v2986_v3, %v2974_v63  ;;  %v1625_v53 = vmul.f32 %v2981_v10, %v2981_v10  ;;  %v1626_v26 = vmul.f32 %v2982_v30, %v2982_v30 }
 0x123   : > { %v1627_v11 = vmul.f32 %v2985_v7, %v2985_v7  ;;  %v1628_v16 = vmul.f32 %v2986_v3, %v2986_v3  ;;  %v1629_v1 = vadd.f32 %v1623_v15, %v1598_v50  ;;  %v1630_v13 = vadd.f32 %v1624_v52, %v1599_v12 }
 0x124   : > { %v1638_v5 = vrot.slane %v4227_v36, %v3668_v47  ;;  %v1631_v32 = vadd.f32 %v1625_v53, %v1600_v39  ;;  %v1632_v43 = vadd.f32 %v1626_v26, %v1601_v54  ;;  %v4253_v45 = vmul.f32 %v4227_v36, %v4227_v36 }
 0x125   : > { %v1633_v14 = vadd.f32 %v1627_v11, %v1602_v0  ;;  %v1634_v49 = vadd.f32 %v1628_v16, %v1603_v28  ;;  %v1659_v50 = vstv %s1657_s8  ;;  %v1672_v52 = vstv %s4249_s10 }
 0x126   : > { %v1639_v60 = vadd.f32 %v1638_v5, %v1617_v24  ;;  %v1640_v34 = vadd.f32 %v1638_v5, %v1618_v8  ;;  %v1641_v56 = vadd.f32 %v1638_v5, %v1619_v55  ;;  %v1642_v19 = vadd.f32 %v1638_v5, %v1620_v38 }
 0x127   : > { %v1643_v27 = vadd.f32 %v1638_v5, %v1621_v18  ;;  %v1644_v21 = vadd.f32 %v1638_v5, %v1622_v51  ;;  %v1649_v63 = vrot.slane %v4253_v45, %v3668_v47  ;;  %v3171_v51 = vld [vmem:[%s3508_s14 + $0x108] sm:$0xff]   ;;  %v4282_v5 = vadd.f32 %v1574_v61, %v4192_v40 }
 0x128   : > { %v1666_v12 = vmul.f32 %v1639_v60, %v1639_v60  ;;  %v1667_v62 = vmul.f32 %v1640_v34, %v1640_v34  ;;  %v1668_v39 = vmul.f32 %v1641_v56, %v1641_v56  ;;  %v1669_v7 = vmul.f32 %v1642_v19, %v1642_v19 }
 0x129   : > { %v1650_v54 = vadd.f32 %v1649_v63, %v1629_v1  ;;  %v1651_v0 = vadd.f32 %v1649_v63, %v1630_v13  ;;  %v1652_v17 = vadd.f32 %v1649_v63, %v1631_v32  ;;  %v1653_v10 = vadd.f32 %v1649_v63, %v1632_v43  ;;  %v3172_v1 = vld [vmem:[%s3508_s14 + $0x110] sm:$0xff]  }
 0x12a   : > { %v1654_v28 = vadd.f32 %v1649_v63, %v1633_v14  ;;  %v1655_v30 = vadd.f32 %v1649_v63, %v1634_v49  ;;  %v1670_v3 = vmul.f32 %v1643_v27, %v1643_v27  ;;  %v1671_v18 = vmul.f32 %v1644_v21, %v1644_v21 }
 0x12b   : > { %v1660_v24 = vmul.f32 %v1659_v50, %v1650_v54  ;;  %v1661_v8 = vmul.f32 %v1659_v50, %v1651_v0  ;;  %v4257_v15 = vmul.f32 %v1659_v50, %v1652_v17  ;;  %v4259_v47 = vmul.f32 %v1659_v50, %v1653_v10 }
 0x12c   : > { %v4261_v55 = vmul.f32 %v1659_v50, %v1654_v28  ;;  %v4263_v38 = vmul.f32 %v1659_v50, %v1655_v30  ;;  %v1673_v53 = vmul.f32 %v1672_v52, %v1666_v12  ;;  %v1674_v26 = vmul.f32 %v1672_v52, %v1667_v62 }
 0x12d   : > { %v4267_v11 = vmul.f32 %v1672_v52, %v1668_v39  ;;  %v4269_v16 = vmul.f32 %v1672_v52, %v1669_v7  ;;  %v4276_v13 = vadd.f32 %v1573_v25, %v4188_v29  ;;  %v4284_v32 = vmul.f32 %v1672_v52, %v1670_v3 }
 0x12e   : > { %v4286_v43 = vmul.f32 %v1672_v52, %v1671_v18  ;;  %v1679_v14 = vsub.f32 %v1660_v24, %v1673_v53  ;;  %v1680_v49 = vsub.f32 %v1661_v8, %v1674_v26  ;;  %v2989_v60 = vunpack.c.l.bf16 %v3171_v51 }
 0x12f   : > { %v2990_v34 = vunpack.c.h.bf16 %v3171_v51  ;;  %v4293_v29 = vadd.f32 %v1575_v59, %v4219_v41  ;;  %v4299_v40 = vadd.f32 %v1576_v9, %v4225_v46  ;;  %v2993_v35 = vunpack.c.l.bf16 %v3172_v1  ;;  %v3174_v41 = vld [vmem:[%s3513_s18 + $0x108] sm:$0xff]   ;;  %v3175_v59 = vld [vmem:[%s3513_s18 + $0x110] sm:$0xff]   ;;  %v3176_v9 = vld [vmem:[%s3513_s18 + $0x118] sm:$0xff]  }
 0x130   : > { %v2994_v2 = vunpack.c.h.bf16 %v3172_v1  ;;  %v1681_v48 = vsub.f32 %v4257_v15, %v4267_v11  ;;  %v1682_v25 = vsub.f32 %v4259_v47, %v4269_v16  ;;  %v1683_v23 = vsub.f32 %v4261_v55, %v4284_v32 }
 0x131   : > { %v1684_v58 = vsub.f32 %v4263_v38, %v4286_v43  ;;  %v4311_v57 = vadd.f32 %v1679_v14, %v4239_v42  ;;  %v4314_v31 = vadd.f32 %v1680_v49, %v4242_v4  ;;  %v2997_v46 = vunpack.c.l.bf16 %v3173_v20  ;;  %v3181_v38 = vld [vmem:[%s3513_s18 + $0x128] sm:$0xff]  }
 0x132   : > { %v2998_v61 = vunpack.c.h.bf16 %v3173_v20  ;;  %v1704_v56 = vmul.f32 %v2989_v60, %v2989_v60  ;;  %v1705_v19 = vmul.f32 %v2990_v34, %v2990_v34  ;;  %v1706_v27 = vmul.f32 %v2993_v35, %v2993_v35 }
 0x133   : > { %v1707_v21 = vmul.f32 %v2994_v2, %v2994_v2  ;;  %v1708_v63 = vmul.f32 %v2997_v46, %v2997_v46  ;;  %v3001_v12 = vunpack.c.l.bf16 %v3174_v41  ;;  %v3002_v62 = vunpack.c.h.bf16 %v3174_v41 }
 0x134   : > { %v1709_v50 = vmul.f32 %v2998_v61, %v2998_v61  ;;  %v3005_v39 = vunpack.c.l.bf16 %v3175_v59  ;;  %v3006_v54 = vunpack.c.h.bf16 %v3175_v59  ;;  %v3009_v42 = vunpack.c.l.bf16 %v3176_v9 }
 0x135   : > { %v3010_v0 = vunpack.c.h.bf16 %v3176_v9  ;;  %v1723_v17 = vadd.f32 %v3001_v12, %v2989_v60  ;;  %v1724_v4 = vadd.f32 %v3002_v62, %v2990_v34  ;;  %v1729_v10 = vmul.f32 %v3001_v12, %v3001_v12 }
 0x136   : > { %v1730_v28 = vmul.f32 %v3002_v62, %v3002_v62  ;;  %v1725_v30 = vadd.f32 %v3005_v39, %v2993_v35  ;;  %v1726_v7 = vadd.f32 %v3006_v54, %v2994_v2  ;;  %v1727_v3 = vadd.f32 %v3009_v42, %v2997_v46 }
 0x137   : > { %v1728_v24 = vadd.f32 %v3010_v0, %v2998_v61  ;;  %v1731_v8 = vmul.f32 %v3005_v39, %v3005_v39  ;;  %v1732_v15 = vmul.f32 %v3006_v54, %v3006_v54  ;;  %v1733_v47 = vmul.f32 %v3009_v42, %v3009_v42  ;;  %v3177_v42 = vld [vmem:[%s3508_s14 + $0x120] sm:$0xff]  }
 0x138   : > { %v1734_v18 = vmul.f32 %v3010_v0, %v3010_v0  ;;  %v1735_v52 = vadd.f32 %v1729_v10, %v1704_v56  ;;  %v1736_v51 = vadd.f32 %v1730_v28, %v1705_v19  ;;  %v1744_v53 = vrot.slane %v4227_v36, %v3746_v44 }
 0x139   : > { %v1754_v26 = vrot.slane %v4253_v45, %v3746_v44  ;;  %v1737_v11 = vadd.f32 %v1731_v8, %v1706_v27  ;;  %v1738_v16 = vadd.f32 %v1732_v15, %v1707_v21  ;;  %v1739_v1 = vadd.f32 %v1733_v47, %v1708_v63 }
 0x13a   : > { %v1740_v14 = vadd.f32 %v1734_v18, %v1709_v50  ;;  %v1745_v49 = vadd.f32 %v1744_v53, %v1723_v17  ;;  %v1746_v60 = vadd.f32 %v1744_v53, %v1724_v4  ;;  %v1747_v34 = vadd.f32 %v1744_v53, %v1725_v30  ;;  %v3178_v4 = vld [vmem:[%s3508_s14 + $0x128] sm:$0xff]   ;;  %v1796_v30 = vld [vmem:[%s3489_s15 + $0x4] sm:$0x4] }
 0x13b   : > { %v1748_v20 = vadd.f32 %v1744_v53, %v1726_v7  ;;  %v1749_v35 = vadd.f32 %v1744_v53, %v1727_v3  ;;  %v1750_v2 = vadd.f32 %v1744_v53, %v1728_v24  ;;  %v1755_v41 = vadd.f32 %v1754_v26, %v1735_v52  ;;  %v3179_v7 = vld [vmem:[%s3508_s14 + $0x130] sm:$0xff]  }
 0x13c   : > { %v1756_v46 = vadd.f32 %v1754_v26, %v1736_v51  ;;  %v1757_v61 = vadd.f32 %v1754_v26, %v1737_v11  ;;  %v1758_v36 = vadd.f32 %v1754_v26, %v1738_v16  ;;  %v1759_v59 = vadd.f32 %v1754_v26, %v1739_v1  ;;  %v3180_v1 = vld [vmem:[%s3513_s18 + $0x120] sm:$0xff]  }
 0x13d   : > { %v1760_v9 = vadd.f32 %v1754_v26, %v1740_v14  ;;  %v1764_v44 = vstv %s1762_s19  ;;  %v1771_v45 = vmul.f32 %v1745_v49, %v1745_v49  ;;  %v1772_v56 = vmul.f32 %v1746_v60, %v1746_v60  ;;  %v3182_v49 = vld [vmem:[%s3513_s18 + $0x130] sm:$0xff]  }
 0x13e   : > { %v1773_v19 = vmul.f32 %v1747_v34, %v1747_v34  ;;  %v4326_v27 = vadd.f32 %v1681_v48, %v4276_v13  ;;  %v4329_v21 = vadd.f32 %v1682_v25, %v4282_v5  ;;  %v1765_v63 = vmul.f32 %v1764_v44, %v1755_v41 }
 0x13f   : > { %v1766_v50 = vmul.f32 %v1764_v44, %v1756_v46  ;;  %v4331_v12 = vmul.f32 %v1764_v44, %v1757_v61  ;;  %v4333_v62 = vmul.f32 %v1764_v44, %v1758_v36  ;;  %v1774_v39 = vmul.f32 %v1748_v20, %v1748_v20 }
 0x140   : > { %v1775_v54 = vmul.f32 %v1749_v35, %v1749_v35  ;;  %v4336_v0 = vmul.f32 %v1764_v44, %v1759_v59  ;;  %v4338_v17 = vmul.f32 %v1764_v44, %v1760_v9  ;;  %v1776_v13 = vmul.f32 %v1750_v2, %v1750_v2 }
 0x141   : > { %v1777_v48 = vstv %s4323_s20  ;;  %v4350_v3 = vadd.f32 %v1683_v23, %v4293_v29  ;;  %v3013_v15 = vunpack.c.l.bf16 %v3177_v42  ;;  %v3014_v52 = vunpack.c.h.bf16 %v3177_v42 }
 0x142   : > { %v1778_v5 = vmul.f32 %v1777_v48, %v1771_v45  ;;  %v1779_v25 = vmul.f32 %v1777_v48, %v1772_v56  ;;  %v1780_v10 = vmul.f32 %v1777_v48, %v1773_v19  ;;  %v4342_v28 = vmul.f32 %v1777_v48, %v1774_v39 }
 0x143   : > { %v4352_v24 = vmul.f32 %v1777_v48, %v1775_v54  ;;  %v4354_v8 = vmul.f32 %v1777_v48, %v1776_v13  ;;  %v3017_v51 = vunpack.c.l.bf16 %v3178_v4  ;;  %v4360_v55 = vadd.f32 %v1684_v58, %v4299_v40 }
 0x144   : > { %v1784_v47 = vsub.f32 %v1765_v63, %v1778_v5  ;;  %v1785_v18 = vsub.f32 %v1766_v50, %v1779_v25  ;;  %v4362_v32 = vunpack.c.l.bf16 %v1796_v30  ;;  %v3018_v29 = vunpack.c.h.bf16 %v3178_v4 }
 0x145   : > { %v3021_v23 = vunpack.c.l.bf16 %v3179_v7  ;;  %v1786_v53 = vsub.f32 %v4331_v12, %v1780_v10  ;;  %v1787_v26 = vsub.f32 %v4333_v62, %v4342_v28  ;;  %v1788_v11 = vsub.f32 %v4336_v0, %v4352_v24  ;;  %v3186_v24 = vld [vmem:[%s3513_s18 + $0x138] sm:$0xff]  }
 0x146   : > { %v1789_v16 = vsub.f32 %v4338_v17, %v4354_v8  ;;  %v4374_v43 = vadd.f32 %v1784_v47, %v4311_v57  ;;  %v4377_v40 = vadd.f32 %v1785_v18, %v4314_v31  ;;  %v3022_v58 = vunpack.c.h.bf16 %v3179_v7 }
 0x147   : > { %v1811_v14 = vmul.f32 %v3013_v15, %v3013_v15  ;;  %v1812_v60 = vmul.f32 %v3014_v52, %v3014_v52  ;;  %v1813_v34 = vmul.f32 %v3017_v51, %v3017_v51  ;;  %v1814_v20 = vmul.f32 %v3018_v29, %v3018_v29 }
 0x148   : > { %v1815_v35 = vmul.f32 %v3021_v23, %v3021_v23  ;;  %v1816_v2 = vmul.f32 %v3022_v58, %v3022_v58  ;;  %v3025_v41 = vunpack.c.l.bf16 %v3180_v1  ;;  %v3026_v46 = vunpack.c.h.bf16 %v3180_v1 }
 0x149   : > { %v3029_v61 = vunpack.c.l.bf16 %v3181_v38  ;;  %v3030_v36 = vunpack.c.h.bf16 %v3181_v38  ;;  %v3033_v59 = vunpack.c.l.bf16 %v3182_v49  ;;  %v3034_v9 = vunpack.c.h.bf16 %v3182_v49 }
 0x14a   : > { %v1851_v57 = vrot.slane %v4362_v32, %v3818_v6  ;;  %v1830_v31 = vadd.f32 %v3025_v41, %v3013_v15  ;;  %v1831_v44 = vadd.f32 %v3026_v46, %v3014_v52  ;;  %v1836_v56 = vmul.f32 %v3025_v41, %v3025_v41 }
 0x14b   : > { %v1832_v45 = vadd.f32 %v3029_v61, %v3017_v51  ;;  %v1833_v19 = vadd.f32 %v3030_v36, %v3018_v29  ;;  %v1834_v63 = vadd.f32 %v3033_v59, %v3021_v23  ;;  %v1835_v50 = vadd.f32 %v3034_v9, %v3022_v58 }
 0x14c   : > { %v1837_v12 = vmul.f32 %v3026_v46, %v3026_v46  ;;  %v1838_v62 = vmul.f32 %v3029_v61, %v3029_v61  ;;  %v1839_v39 = vmul.f32 %v3030_v36, %v3030_v36  ;;  %v1840_v54 = vmul.f32 %v3033_v59, %v3033_v59  ;;  %v3183_v59 = vld [vmem:[%s3508_s14 + $0x138] sm:$0xff]  }
 0x14d   : > { %v1841_v42 = vmul.f32 %v3034_v9, %v3034_v9  ;;  %v4388_v13 = vadd.f32 %v1786_v53, %v4326_v27  ;;  %v1842_v48 = vadd.f32 %v1836_v56, %v1811_v14  ;;  %v1852_v4 = vadd.f32 %v1851_v57, %v1830_v31 }
 0x14e   : > { %v1853_v5 = vadd.f32 %v1851_v57, %v1831_v44  ;;  %v1843_v25 = vadd.f32 %v1837_v12, %v1812_v60  ;;  %v1844_v10 = vadd.f32 %v1838_v62, %v1813_v34  ;;  %v1845_v28 = vadd.f32 %v1839_v39, %v1814_v20 }
 0x14f   : > { %v1846_v30 = vadd.f32 %v1840_v54, %v1815_v35  ;;  %v1854_v7 = vadd.f32 %v1851_v57, %v1832_v45  ;;  %v1855_v15 = vadd.f32 %v1851_v57, %v1833_v19  ;;  %v1856_v47 = vadd.f32 %v1851_v57, %v1834_v63  ;;  %v3185_v19 = vld [vmem:[%s3508_s14 + $0x148] sm:$0xff]  }
 0x150   : > { %v1857_v18 = vadd.f32 %v1851_v57, %v1835_v50  ;;  %v1847_v52 = vadd.f32 %v1841_v42, %v1816_v2  ;;  %v4392_v51 = vmul.f32 %v4362_v32, %v4362_v32  ;;  %v1879_v27 = vmul.f32 %v1852_v4, %v1852_v4  ;;  %v3184_v57 = vld [vmem:[%s3508_s14 + $0x140] sm:$0xff]  }
 0x151   : > { %v1880_v29 = vmul.f32 %v1853_v5, %v1853_v5  ;;  %v1881_v23 = vmul.f32 %v1854_v7, %v1854_v7  ;;  %v1882_v53 = vmul.f32 %v1855_v15, %v1855_v15  ;;  %v1883_v1 = vmul.f32 %v1856_v47, %v1856_v47  ;;  %v3188_v7 = vld [vmem:[%s3513_s18 + $0x148] sm:$0xff]  }
 0x152   : > { %v1884_v38 = vmul.f32 %v1857_v18, %v1857_v18  ;;  %v4395_v58 = vadd.f32 %v1787_v26, %v4329_v21  ;;  %v1862_v14 = vrot.slane %v4392_v51, %v3818_v6  ;;  %v1872_v49 = vstv %s4383_s22 }
 0x153   : > { %v1885_v60 = vstv %s4385_s9  ;;  %v3037_v12 = vunpack.c.l.bf16 %v3183_v59  ;;  %v3038_v62 = vunpack.c.h.bf16 %v3183_v59  ;;  %v3041_v42 = vunpack.c.l.bf16 %v3184_v57 }
 0x154   : > { %v1886_v34 = vmul.f32 %v1885_v60, %v1879_v27  ;;  %v1887_v20 = vmul.f32 %v1885_v60, %v1880_v29  ;;  %v4401_v35 = vmul.f32 %v1885_v60, %v1881_v23  ;;  %v4403_v2 = vmul.f32 %v1885_v60, %v1882_v53 }
 0x155   : > { %v1863_v41 = vadd.f32 %v1862_v14, %v1842_v48  ;;  %v1864_v46 = vadd.f32 %v1862_v14, %v1843_v25  ;;  %v1865_v61 = vadd.f32 %v1862_v14, %v1844_v10  ;;  %v1866_v36 = vadd.f32 %v1862_v14, %v1845_v28 }
 0x156   : > { %v1867_v21 = vadd.f32 %v1862_v14, %v1846_v30  ;;  %v1868_v26 = vadd.f32 %v1862_v14, %v1847_v52  ;;  %v4406_v9 = vmul.f32 %v1885_v60, %v1883_v1  ;;  %v4408_v6 = vmul.f32 %v1885_v60, %v1884_v38 }
 0x157   : > { %v1873_v31 = vmul.f32 %v1872_v49, %v1863_v41  ;;  %v1874_v44 = vmul.f32 %v1872_v49, %v1864_v46  ;;  %v4411_v45 = vmul.f32 %v1872_v49, %v1865_v61  ;;  %v4413_v56 = vmul.f32 %v1872_v49, %v1866_v36 }
 0x158   : > { %v4416_v63 = vmul.f32 %v1872_v49, %v1867_v21  ;;  %v4418_v50 = vmul.f32 %v1872_v49, %v1868_v26  ;;  %v3042_v48 = vunpack.c.h.bf16 %v3184_v57  ;;  %v4424_v4 = vadd.f32 %v1788_v11, %v4350_v3  ;;  %v3187_v11 = vld [vmem:[%s3513_s18 + $0x140] sm:$0xff]  }
 0x159   : > { %v1892_v39 = vsub.f32 %v1873_v31, %v1886_v34  ;;  %v1893_v54 = vsub.f32 %v1874_v44, %v1887_v20  ;;  %v4430_v5 = vadd.f32 %v1789_v16, %v4360_v55  ;;  %v3045_v25 = vunpack.c.l.bf16 %v3185_v19 }
 0x15a   : > { %v3046_v10 = vunpack.c.h.bf16 %v3185_v19  ;;  %v1894_v28 = vsub.f32 %v4411_v45, %v4401_v35  ;;  %v1895_v30 = vsub.f32 %v4413_v56, %v4403_v2  ;;  %v1896_v0 = vsub.f32 %v4416_v63, %v4406_v9 }
 0x15b   : > { %v1897_v3 = vsub.f32 %v4418_v50, %v4408_v6  ;;  %v4443_v17 = vadd.f32 %v1892_v39, %v4374_v43  ;;  %v4446_v8 = vadd.f32 %v1893_v54, %v4377_v40  ;;  %v1917_v55 = vmul.f32 %v3037_v12, %v3037_v12 }
 0x15c   : > { %v1918_v16 = vmul.f32 %v3038_v62, %v3038_v62  ;;  %v1919_v15 = vmul.f32 %v3041_v42, %v3041_v42  ;;  %v1920_v47 = vmul.f32 %v3042_v48, %v3042_v48  ;;  %v1921_v18 = vmul.f32 %v3045_v25, %v3045_v25 }
 0x15d   : > { %v1922_v52 = vmul.f32 %v3046_v10, %v3046_v10  ;;  %v3049_v27 = vunpack.c.l.bf16 %v3186_v24  ;;  %v3050_v29 = vunpack.c.h.bf16 %v3186_v24  ;;  %v3053_v23 = vunpack.c.l.bf16 %v3187_v11 }
 0x15e   : > { %v3054_v53 = vunpack.c.h.bf16 %v3187_v11  ;;  %v3057_v1 = vunpack.c.l.bf16 %v3188_v7  ;;  %v3058_v38 = vunpack.c.h.bf16 %v3188_v7  ;;  %v1957_v43 = vrot.slane %v4362_v32, %v3896_v37 }
 0x15f   : > { %v1967_v40 = vrot.slane %v4392_v51, %v3896_v37  ;;  %v1936_v14 = vadd.f32 %v3049_v27, %v3037_v12  ;;  %v1937_v49 = vadd.f32 %v3050_v29, %v3038_v62  ;;  %v1938_v60 = vadd.f32 %v3053_v23, %v3041_v42 }
 0x160   : > { %v1939_v34 = vadd.f32 %v3054_v53, %v3042_v48  ;;  %v1940_v20 = vadd.f32 %v3057_v1, %v3045_v25  ;;  %v1941_v35 = vadd.f32 %v3058_v38, %v3046_v10  ;;  %v1942_v2 = vmul.f32 %v3049_v27, %v3049_v27 }
 0x161   : > { %v1943_v41 = vmul.f32 %v3050_v29, %v3050_v29  ;;  %v1944_v46 = vmul.f32 %v3053_v23, %v3053_v23  ;;  %v1945_v61 = vmul.f32 %v3054_v53, %v3054_v53  ;;  %v1946_v36 = vmul.f32 %v3057_v1, %v3057_v1  ;;  %v3189_v23 = vld [vmem:[%s3508_s14 + $0x150] sm:$0xff]  }
 0x162   : > { %v1947_v59 = vmul.f32 %v3058_v38, %v3058_v38  ;;  %v1948_v32 = vadd.f32 %v1942_v2, %v1917_v55  ;;  %v1958_v26 = vadd.f32 %v1957_v43, %v1936_v14  ;;  %v1959_v37 = vadd.f32 %v1957_v43, %v1937_v49  ;;  %v2009_v38 = vld [vmem:[%s3489_s15 + $0x4] sm:$0x8]  ;;  %s2082_s15 = sadd.s32 14, %s3477_s23 }
 0x163   : > { %v1949_v21 = vadd.f32 %v1943_v41, %v1918_v16  ;;  %v1950_v51 = vadd.f32 %v1944_v46, %v1919_v15  ;;  %v1951_v57 = vadd.f32 %v1945_v61, %v1920_v47  ;;  %v1952_v31 = vadd.f32 %v1946_v36, %v1921_v18  ;;  %v3191_v41 = vld [vmem:[%s3508_s14 + $0x160] sm:$0xff]   ;;  %s2083_s17 = sld [smem:[#allocation3 + %s2082_s15]] }
 0x164   : > { %v1953_v44 = vadd.f32 %v1947_v59, %v1922_v52  ;;  %v1960_v45 = vadd.f32 %v1957_v43, %v1938_v60  ;;  %v1961_v56 = vadd.f32 %v1957_v43, %v1939_v34  ;;  %v1962_v19 = vadd.f32 %v1957_v43, %v1940_v20  ;;  %s4520_s5 = sld [smem:[#allocation5 + %s2082_s15]] }
 0x165   : > { %v1963_v12 = vadd.f32 %v1957_v43, %v1941_v35  ;;  %v1968_v62 = vadd.f32 %v1967_v40, %v1948_v32  ;;  %v1969_v39 = vadd.f32 %v1967_v40, %v1949_v21  ;;  %v1970_v54 = vadd.f32 %v1967_v40, %v1950_v51  ;;  %v3190_v43 = vld [vmem:[%s3508_s14 + $0x158] sm:$0xff]  }
 0x166   : > { %v1971_v42 = vadd.f32 %v1967_v40, %v1951_v57  ;;  %v4459_v48 = vadd.f32 %v1894_v28, %v4388_v13  ;;  %v1972_v25 = vadd.f32 %v1967_v40, %v1952_v31  ;;  %v1977_v10 = vstv %s4454_s11 }
 0x167   : > { %v1984_v24 = vmul.f32 %v1958_v26, %v1958_v26  ;;  %v4463_v11 = vadd.f32 %v1895_v30, %v4395_v58  ;;  %v1973_v55 = vadd.f32 %v1967_v40, %v1953_v44  ;;  %v1978_v16 = vmul.f32 %v1977_v10, %v1968_v62  ;;  %v3194_v26 = vld [vmem:[%s3513_s18 + $0x160] sm:$0xff]  }
 0x168   : > { %v1979_v7 = vmul.f32 %v1977_v10, %v1969_v39  ;;  %v4465_v15 = vmul.f32 %v1977_v10, %v1970_v54  ;;  %v4467_v47 = vmul.f32 %v1977_v10, %v1971_v42  ;;  %v1985_v18 = vmul.f32 %v1959_v37, %v1959_v37 }
 0x169   : > { %v1986_v52 = vmul.f32 %v1960_v45, %v1960_v45  ;;  %v1987_v13 = vmul.f32 %v1961_v56, %v1961_v56  ;;  %v1988_v28 = vmul.f32 %v1962_v19, %v1962_v19  ;;  %v1989_v27 = vmul.f32 %v1963_v12, %v1963_v12 }
 0x16a   : > { %v1990_v29 = vstv %s4456_s16  ;;  %v4471_v53 = vmul.f32 %v1977_v10, %v1972_v25  ;;  %v4477_v40 = vmul.f32 %v1977_v10, %v1973_v55  ;;  %v3061_v35 = vunpack.c.l.bf16 %v3189_v23 }
 0x16b   : > { %v1991_v58 = vmul.f32 %v1990_v29, %v1984_v24  ;;  %v1992_v30 = vmul.f32 %v1990_v29, %v1985_v18  ;;  %v4473_v1 = vmul.f32 %v1990_v29, %v1986_v52  ;;  %v4479_v14 = vmul.f32 %v1990_v29, %v1987_v13 }
 0x16c   : > { %v4481_v49 = vmul.f32 %v1990_v29, %v1988_v28  ;;  %v4483_v60 = vmul.f32 %v1990_v29, %v1989_v27  ;;  %v3062_v2 = vunpack.c.h.bf16 %v3189_v23  ;;  %v4490_v46 = vadd.f32 %v1896_v0, %v4424_v4  ;;  %v3192_v4 = vld [vmem:[%s3513_s18 + $0x150] sm:$0xff]  }
 0x16d   : > { %v1997_v34 = vsub.f32 %v1978_v16, %v1991_v58  ;;  %v1998_v20 = vsub.f32 %v1979_v7, %v1992_v30  ;;  %v4496_v61 = vadd.f32 %v1897_v3, %v4430_v5  ;;  %v4498_v36 = vunpack.c.l.bf16 %v2009_v38  ;;  %v3193_v3 = vld [vmem:[%s3513_s18 + $0x158] sm:$0xff]  }
 0x16e   : > { %v3065_v59 = vunpack.c.l.bf16 %v3190_v43  ;;  %v1999_v32 = vsub.f32 %v4465_v15, %v4473_v1  ;;  %v2000_v21 = vsub.f32 %v4467_v47, %v4479_v14  ;;  %v2001_v9 = vsub.f32 %v4471_v53, %v4481_v49  ;;  %v3197_v15 = vld [vmem:[%s3508_s14 + $0x178] sm:$0xff]  }
 0x16f   : > { %v3066_v63 = vunpack.c.h.bf16 %v3190_v43  ;;  %v2002_v0 = vsub.f32 %v4477_v40, %v4483_v60  ;;  %v4510_v6 = vadd.f32 %v1997_v34, %v4443_v17  ;;  %v4513_v50 = vadd.f32 %v1998_v20, %v4446_v8 }
 0x170   : > { %v3069_v5 = vunpack.c.l.bf16 %v3191_v41  ;;  %v3070_v37 = vunpack.c.h.bf16 %v3191_v41  ;;  %v2024_v51 = vmul.f32 %v3061_v35, %v3061_v35  ;;  %v2025_v57 = vmul.f32 %v3062_v2, %v3062_v2 }
 0x171   : > { %v2026_v31 = vmul.f32 %v3065_v59, %v3065_v59  ;;  %v2027_v44 = vmul.f32 %v3066_v63, %v3066_v63  ;;  %v3073_v56 = vunpack.c.l.bf16 %v3192_v4  ;;  %v3074_v19 = vunpack.c.h.bf16 %v3192_v4 }
 0x172   : > { %v2028_v45 = vmul.f32 %v3069_v5, %v3069_v5  ;;  %v2029_v12 = vmul.f32 %v3070_v37, %v3070_v37  ;;  %v3077_v62 = vunpack.c.l.bf16 %v3193_v3  ;;  %v3078_v39 = vunpack.c.h.bf16 %v3193_v3 }
 0x173   : > { %v3081_v17 = vunpack.c.l.bf16 %v3194_v26  ;;  %v3082_v54 = vunpack.c.h.bf16 %v3194_v26  ;;  %v2043_v8 = vadd.f32 %v3073_v56, %v3061_v35  ;;  %v2044_v42 = vadd.f32 %v3074_v19, %v3062_v2 }
 0x174   : > { %v2049_v25 = vmul.f32 %v3073_v56, %v3073_v56  ;;  %v2045_v10 = vadd.f32 %v3077_v62, %v3065_v59  ;;  %v2046_v24 = vadd.f32 %v3078_v39, %v3066_v63  ;;  %v2050_v16 = vmul.f32 %v3074_v19, %v3074_v19 }
 0x175   : > { %v2047_v55 = vadd.f32 %v3081_v17, %v3069_v5  ;;  %v2048_v7 = vadd.f32 %v3082_v54, %v3070_v37  ;;  %v2051_v18 = vmul.f32 %v3077_v62, %v3077_v62  ;;  %v2052_v52 = vmul.f32 %v3078_v39, %v3078_v39 }
 0x176   : > { %v2053_v13 = vmul.f32 %v3081_v17, %v3081_v17  ;;  %v2054_v28 = vmul.f32 %v3082_v54, %v3082_v54  ;;  %v2055_v27 = vadd.f32 %v2049_v25, %v2024_v51  ;;  %v2056_v29 = vadd.f32 %v2050_v16, %v2025_v57 }
 0x177   : > { %v2064_v23 = vrot.slane %v4498_v36, %v3968_v33  ;;  %v2057_v58 = vadd.f32 %v2051_v18, %v2026_v31  ;;  %v2058_v30 = vadd.f32 %v2052_v52, %v2027_v44  ;;  %v4524_v43 = vmul.f32 %v4498_v36, %v4498_v36  ;;  %v3196_v18 = vld [vmem:[%s3508_s14 + $0x170] sm:$0xff]  }
 0x178   : > { %v2059_v38 = vadd.f32 %v2053_v13, %v2028_v45  ;;  %v2060_v34 = vadd.f32 %v2054_v28, %v2029_v12  ;;  %v2085_v5 = vstv %s2083_s17  ;;  %v2098_v25 = vstv %s4520_s5 }
 0x179   : > { %v2065_v20 = vadd.f32 %v2064_v23, %v2043_v8  ;;  %v2066_v35 = vadd.f32 %v2064_v23, %v2044_v42  ;;  %v2067_v2 = vadd.f32 %v2064_v23, %v2045_v10  ;;  %v2068_v41 = vadd.f32 %v2064_v23, %v2046_v24  ;;  %v3195_v10 = vld [vmem:[%s3508_s14 + $0x168] sm:$0xff]   ;;  %s2187_s14 = sadd.s32 15, %s3477_s23 }
 0x17a   : > { %v2069_v59 = vadd.f32 %v2064_v23, %v2047_v55  ;;  %v2070_v63 = vadd.f32 %v2064_v23, %v2048_v7  ;;  %v2075_v4 = vrot.slane %v4524_v43, %v3968_v33  ;;  %v4547_v52 = vadd.f32 %v1999_v32, %v4459_v48  ;;  %s2188_s30 = sld [smem:[#allocation3 + %s2187_s14]] }
 0x17b   : > { %v2092_v3 = vmul.f32 %v2065_v20, %v2065_v20  ;;  %v2093_v26 = vmul.f32 %v2066_v35, %v2066_v35  ;;  %v2094_v37 = vmul.f32 %v2067_v2, %v2067_v2  ;;  %v2095_v19 = vmul.f32 %v2068_v41, %v2068_v41  ;;  %s4594_s23 = sld [smem:[#allocation5 + %s2187_s14]] }
 0x17c   : > { %v2076_v51 = vadd.f32 %v2075_v4, %v2055_v27  ;;  %v2077_v57 = vadd.f32 %v2075_v4, %v2056_v29  ;;  %v2078_v31 = vadd.f32 %v2075_v4, %v2057_v58  ;;  %v2079_v44 = vadd.f32 %v2075_v4, %v2058_v30 }
 0x17d   : > { %v2080_v45 = vadd.f32 %v2075_v4, %v2059_v38  ;;  %v2081_v56 = vadd.f32 %v2075_v4, %v2060_v34  ;;  %v2096_v12 = vmul.f32 %v2069_v59, %v2069_v59  ;;  %v2097_v42 = vmul.f32 %v2070_v63, %v2070_v63 }
 0x17e   : > { %v2086_v62 = vmul.f32 %v2085_v5, %v2076_v51  ;;  %v2087_v39 = vmul.f32 %v2085_v5, %v2077_v57  ;;  %v4528_v17 = vmul.f32 %v2085_v5, %v2078_v31  ;;  %v4530_v33 = vmul.f32 %v2085_v5, %v2079_v44 }
 0x17f   : > { %v4532_v54 = vmul.f32 %v2085_v5, %v2080_v45  ;;  %v4534_v8 = vmul.f32 %v2085_v5, %v2081_v56  ;;  %v2099_v24 = vmul.f32 %v2098_v25, %v2092_v3  ;;  %v2100_v55 = vmul.f32 %v2098_v25, %v2093_v26 }
 0x180   : > { %v4538_v16 = vmul.f32 %v2098_v25, %v2094_v37  ;;  %v4540_v7 = vmul.f32 %v2098_v25, %v2095_v19  ;;  %v4553_v13 = vadd.f32 %v2000_v21, %v4463_v11  ;;  %v4555_v28 = vmul.f32 %v2098_v25, %v2096_v12 }
 0x181   : > { %v4557_v27 = vmul.f32 %v2098_v25, %v2097_v42  ;;  %v2105_v29 = vsub.f32 %v2086_v62, %v2099_v24  ;;  %v2106_v23 = vsub.f32 %v2087_v39, %v2100_v55  ;;  %v3085_v58 = vunpack.c.l.bf16 %v3195_v10 }
 0x182   : > { %v3086_v30 = vunpack.c.h.bf16 %v3195_v10  ;;  %v4564_v48 = vadd.f32 %v2001_v9, %v4490_v46  ;;  %v4570_v11 = vadd.f32 %v2002_v0, %v4496_v61  ;;  %v3089_v47 = vunpack.c.l.bf16 %v3196_v18  ;;  %v3198_v46 = vld [vmem:[%s3513_s18 + $0x168] sm:$0xff]   ;;  %v3199_v9 = vld [vmem:[%s3513_s18 + $0x170] sm:$0xff]   ;;  %v3200_v0 = vld [vmem:[%s3513_s18 + $0x178] sm:$0xff]   ;;  %s4663_s18 = scalar_lea.vmem (!%p2720_p13), %s4647_s6, %s4677_s25 }
 0x183   : > { %v3090_v1 = vunpack.c.h.bf16 %v3196_v18  ;;  %v2107_v14 = vsub.f32 %v4528_v17, %v4538_v16  ;;  %v2108_v32 = vsub.f32 %v4530_v33, %v4540_v7  ;;  %v2109_v53 = vsub.f32 %v4532_v54, %v4555_v28 }
 0x184   : > { %v2110_v49 = vsub.f32 %v4534_v8, %v4557_v27  ;;  %v4582_v40 = vadd.f32 %v2105_v29, %v4510_v6  ;;  %v4585_v60 = vadd.f32 %v2106_v23, %v4513_v50  ;;  %v3093_v61 = vunpack.c.l.bf16 %v3197_v15 }
 0x185   : > { %v3094_v21 = vunpack.c.h.bf16 %v3197_v15  ;;  %v2130_v38 = vmul.f32 %v3085_v58, %v3085_v58  ;;  %v2131_v34 = vmul.f32 %v3086_v30, %v3086_v30  ;;  %v2132_v20 = vmul.f32 %v3089_v47, %v3089_v47 }
 0x186   : > { %v2133_v35 = vmul.f32 %v3090_v1, %v3090_v1  ;;  %v2134_v2 = vmul.f32 %v3093_v61, %v3093_v61  ;;  %v3097_v59 = vunpack.c.l.bf16 %v3198_v46  ;;  %v3098_v63 = vunpack.c.h.bf16 %v3198_v46 }
 0x187   : > { %v2135_v41 = vmul.f32 %v3094_v21, %v3094_v21  ;;  %v3101_v4 = vunpack.c.l.bf16 %v3199_v9  ;;  %v3102_v5 = vunpack.c.h.bf16 %v3199_v9  ;;  %v3105_v6 = vunpack.c.l.bf16 %v3200_v0 }
 0x188   : > { %v3106_v3 = vunpack.c.h.bf16 %v3200_v0  ;;  %v2149_v26 = vadd.f32 %v3097_v59, %v3085_v58  ;;  %v2150_v50 = vadd.f32 %v3098_v63, %v3086_v30  ;;  %v2155_v37 = vmul.f32 %v3097_v59, %v3097_v59 }
 0x189   : > { %v2156_v51 = vmul.f32 %v3098_v63, %v3098_v63  ;;  %v2151_v57 = vadd.f32 %v3101_v4, %v3089_v47  ;;  %v2152_v31 = vadd.f32 %v3102_v5, %v3090_v1  ;;  %v2153_v44 = vadd.f32 %v3105_v6, %v3093_v61 }
 0x18a   : > { %v2154_v45 = vadd.f32 %v3106_v3, %v3094_v21  ;;  %v2157_v56 = vmul.f32 %v3101_v4, %v3101_v4  ;;  %v2158_v19 = vmul.f32 %v3102_v5, %v3102_v5  ;;  %v2159_v12 = vmul.f32 %v3105_v6, %v3105_v6 }
 0x18b   : > { %v2160_v62 = vmul.f32 %v3106_v3, %v3106_v3  ;;  %v2161_v39 = vadd.f32 %v2155_v37, %v2130_v38  ;;  %v2162_v17 = vadd.f32 %v2156_v51, %v2131_v34  ;;  %v2170_v33 = vrot.slane %v4498_v36, %v4046_v22 }
 0x18c   : > { %v2180_v42 = vrot.slane %v4524_v43, %v4046_v22  ;;  %v2163_v25 = vadd.f32 %v2157_v56, %v2132_v20  ;;  %v2164_v10 = vadd.f32 %v2158_v19, %v2133_v35  ;;  %v2165_v24 = vadd.f32 %v2159_v12, %v2134_v2 }
 0x18d   : > { %v2166_v55 = vadd.f32 %v2160_v62, %v2135_v41  ;;  %v2171_v16 = vadd.f32 %v2170_v33, %v2149_v26  ;;  %v2172_v7 = vadd.f32 %v2170_v33, %v2150_v50  ;;  %v2173_v18 = vadd.f32 %v2170_v33, %v2151_v57 }
 0x18e   : > { %v2174_v29 = vadd.f32 %v2170_v33, %v2152_v31  ;;  %v2175_v23 = vadd.f32 %v2170_v33, %v2153_v44  ;;  %v2176_v58 = vadd.f32 %v2170_v33, %v2154_v45  ;;  %v2181_v30 = vadd.f32 %v2180_v42, %v2161_v39 }
 0x18f   : > { %v2182_v15 = vadd.f32 %v2180_v42, %v2162_v17  ;;  %v2183_v47 = vadd.f32 %v2180_v42, %v2163_v25  ;;  %v2184_v1 = vadd.f32 %v2180_v42, %v2164_v10  ;;  %v2185_v36 = vadd.f32 %v2180_v42, %v2165_v24 }
 0x190   : > { %v2186_v46 = vadd.f32 %v2180_v42, %v2166_v55  ;;  %v2190_v22 = vstv %s2188_s30  ;;  %v2197_v43 = vmul.f32 %v2171_v16, %v2171_v16  ;;  %v2198_v61 = vmul.f32 %v2172_v7, %v2172_v7 }
 0x191   : > { %v2199_v21 = vmul.f32 %v2173_v18, %v2173_v18  ;;  %v2113_v9 = vadd.f32 %v2107_v14, %v4547_v52  ;;  %v2114_v0 = vadd.f32 %v2108_v32, %v4553_v13  ;;  %v2191_v38 = vmul.f32 %v2190_v22, %v2181_v30 }
 0x192   : > { %v2192_v34 = vmul.f32 %v2190_v22, %v2182_v15  ;;  %v2193_v20 = vmul.f32 %v2190_v22, %v2183_v47  ;;  %v2194_v35 = vmul.f32 %v2190_v22, %v2184_v1  ;;  %v2200_v2 = vmul.f32 %v2174_v29, %v2174_v29 }
 0x193   : > { %v2201_v41 = vmul.f32 %v2175_v23, %v2175_v23  ;;  %v2195_v59 = vmul.f32 %v2190_v22, %v2185_v36  ;;  %v2196_v63 = vmul.f32 %v2190_v22, %v2186_v46  ;;  %v2202_v4 = vmul.f32 %v2176_v58, %v2176_v58 }
 0x194   : > { %v2203_v5 = vstv %s4594_s23  ;;  %v2115_v52 = vadd.f32 %v2109_v53, %v4564_v48  ;;  %v2116_v13 = vadd.f32 %v2110_v49, %v4570_v11 }
 0x195   : > { %v2204_v6 = vmul.f32 %v2203_v5, %v2197_v43  ;;  %v2205_v3 = vmul.f32 %v2203_v5, %v2198_v61  ;;  %v2206_v26 = vmul.f32 %v2203_v5, %v2199_v21  ;;  %v2207_v50 = vmul.f32 %v2203_v5, %v2200_v2 }
 0x196   : > { %v2208_v14 = vmul.f32 %v2203_v5, %v2201_v41  ;;  %v2209_v32 = vmul.f32 %v2203_v5, %v2202_v4 }
 0x197   : > { %v2210_v37 = vsub.f32 %v2191_v38, %v2204_v6  ;;  %v2211_v51 = vsub.f32 %v2192_v34, %v2205_v3  ;;  %v2212_v57 = vsub.f32 %v2193_v20, %v2206_v26  ;;  %v2213_v31 = vsub.f32 %v2194_v35, %v2207_v50 }
 0x198   : > { %v2214_v44 = vsub.f32 %v2195_v59, %v2208_v14  ;;  %v2215_v45 = vsub.f32 %v2196_v63, %v2209_v32 }
 0x199   : > { %v2216_v56 = vadd.f32 %v2210_v37, %v4582_v40  ;;  %v2217_v19 = vadd.f32 %v2211_v51, %v4585_v60  ;;  %v2218_v12 = vadd.f32 %v2212_v57, %v2113_v9  ;;  %v2219_v54 = vadd.f32 %v2213_v31, %v2114_v0  ;;  %2231 = sbr.rel (%p2720_p13) target bundleno = 497 (0x1f1), region = 60 }
 0x19a   : > { %v2220_v28 = vadd.f32 %v2214_v44, %v2115_v52  ;;  %v2221_v48 = vadd.f32 %v2215_v45, %v2116_v13 }
 0x19b   : > { %2222 = vst [vmem:[#allocation2 + $0x28] sm:$0xff] %v2216_v56  ;;  %2223 = vst [vmem:[#allocation2 + $0x10] sm:$0xff] %v2217_v19 }
 0x19c   : > { %2224 = vst [vmem:[#allocation2 + $0x8] sm:$0xff] %v2218_v12  ;;  %2225 = vst [vmem:[#allocation2] sm:$0xff] %v2219_v54 }
 0x19d   : > { %2226 = vst [vmem:[#allocation2 + $0x18] sm:$0xff] %v2220_v28  ;;  %2227 = vst [vmem:[#allocation2 + $0x20] sm:$0xff] %v2221_v48 }
 0x19e   : > { %v2278_v43 = vld [vmem:[%s3499_s4] sm:$0xff]  ;;  %v2279_v61 = vld [vmem:[%s3499_s4 + $0x8] sm:$0xff]  ;;  %v2280_v9 = vld [vmem:[%s3499_s4 + $0x10] sm:$0xff] }
 0x19f   : > { %v2281_v38 = vld [vmem:[%s3499_s4 + $0x18] sm:$0xff]  ;;  %v2282_v59 = vld [vmem:[%s3499_s4 + $0x20] sm:$0xff]  ;;  %v2283_v50 = vld [vmem:[%s3499_s4 + $0x28] sm:$0xff] }
 0x1a2   : > { %v2232_v8 = vld [vmem:[#allocation2 + $0x28] sm:$0xff]  ;;  %v2233_v27 = vld [vmem:[#allocation2 + $0x10] sm:$0xff] }
 0x1a3   : > { %v2234_v11 = vld [vmem:[#allocation2 + $0x8] sm:$0xff]  ;;  %v2235_v53 = vld [vmem:[#allocation2] sm:$0xff] }
 0x1a4   : > { %v2236_v49 = vld [vmem:[#allocation2 + $0x18] sm:$0xff]  ;;  %v2237_v40 = vld [vmem:[#allocation2 + $0x20] sm:$0xff]  ;;  %v2241_v39 = vmax.f32 %v2234_v11, %v2235_v53 }
 0x1a5   : > { %v2238_v60 = vmax.f32 %v2232_v8, %v2236_v49  ;;  %v2239_v62 = vmax.f32 %v2233_v27, %v2237_v40 }
 0x1a7   : > { %v2240_v17 = vmax.f32 %v2238_v60, %v2239_v62 }
 0x1a9   : > { %v2242_v33 = vmax.f32 %v2240_v17, %v2241_v39 }
 0x1ab   : > { %v2243_v42 = vrot.slane %v2242_v33, 4 }
 0x1ad   : > { %v2244_v25 = vmax.f32 %v2242_v33, %v2243_v42 }
 0x1af   : > { %v2245_v10 = vrot.slane %v2244_v25, 2 }
 0x1b1   : > { %v2246_v24 = vmax.f32 %v2244_v25, %v2245_v10 }
 0x1b3   : > { %v2247_v55 = vrot.slane %v2246_v24, 1 }
 0x1b5   : > { %v2248_v16 = vmax.f32 %v2246_v24, %v2247_v55 }
 0x1b7   : > { %v2249_v7 = vsub.f32 %v2232_v8, %v2248_v16  ;;  %v2250_v18 = vsub.f32 %v2233_v27, %v2248_v16  ;;  %v2251_v29 = vsub.f32 %v2234_v11, %v2248_v16  ;;  %v2252_v23 = vsub.f32 %v2235_v53, %v2248_v16 }
 0x1b8   : > { %v2253_v58 = vsub.f32 %v2236_v49, %v2248_v16  ;;  %v2254_v30 = vsub.f32 %v2237_v40, %v2248_v16 }
 0x1b9   : > { %v2255_v15 = vmul.f32 1.442695, %v2249_v7  ;;  %v2257_v47 = vmul.f32 1.442695, %v2250_v18  ;;  %v2259_v1 = vmul.f32 1.442695, %v2251_v29 }
 0x1ba   : > { %v2261_v36 = vmul.f32 1.442695, %v2252_v23  ;;  %v2263_v46 = vmul.f32 1.442695, %v2253_v58  ;;  %v2265_v22 = vmul.f32 1.442695, %v2254_v30 }
 0x1bb   : > { %3266 = vpow2.f32 %v2255_v15 }
 0x1bc   : > { %3268 = vpow2.f32 %v2257_v47 }
 0x1bd   : > { %3270 = vpow2.f32 %v2259_v1 }
 0x1be   : > { %3272 = vpow2.f32 %v2261_v36 }
 0x1bf   : > { %3274 = vpow2.f32 %v2263_v46 }
 0x1c0   : > { %3276 = vpow2.f32 %v2265_v22 }
 0x1c8   : > { %v3267_v21 = vpop.eup %3266 }
 0x1c9   : > { %v3269_v0 = vpop.eup %3268  ;;  %v2284_v34 = vmul.f32 %v3267_v21, %v2278_v43 }
 0x1ca   : > { %v3271_v20 = vpop.eup %3270  ;;  %v2267_v35 = vadd.f32 %v3269_v0, %v3267_v21  ;;  %v2285_v2 = vmul.f32 %v3269_v0, %v2279_v61 }
 0x1cb   : > { %v3273_v41 = vpop.eup %3272  ;;  %v2286_v63 = vmul.f32 %v3271_v20, %v2280_v9 }
 0x1cc   : > { %v3275_v4 = vpop.eup %3274  ;;  %v2268_v5 = vadd.f32 %v3271_v20, %v2267_v35  ;;  %v2287_v6 = vmul.f32 %v3273_v41, %v2281_v38  ;;  %v2290_v3 = vadd.f32 %v2285_v2, %v2284_v34  ;;  %v2304_v13 = vmax.f32 %v3271_v20, %v3273_v41 }
 0x1cd   : > { %v3277_v26 = vpop.eup %3276  ;;  %v2301_v52 = vmax.f32 %v3267_v21, %v3275_v4  ;;  %v2288_v32 = vmul.f32 %v3275_v4, %v2282_v59 }
 0x1ce   : > { %v2269_v14 = vadd.f32 %v3273_v41, %v2268_v5  ;;  %v2291_v37 = vadd.f32 %v2290_v3, %v2286_v63  ;;  %v2302_v51 = vmax.f32 %v3269_v0, %v3277_v26  ;;  %v2289_v31 = vmul.f32 %v3277_v26, %v2283_v50 }
 0x1d0   : > { %v2270_v57 = vadd.f32 %v3275_v4, %v2269_v14  ;;  %v2292_v44 = vadd.f32 %v2291_v37, %v2287_v6  ;;  %v2303_v45 = vmax.f32 %v2301_v52, %v2302_v51 }
 0x1d2   : > { %v2271_v56 = vadd.f32 %v3277_v26, %v2270_v57  ;;  %v2293_v19 = vadd.f32 %v2292_v44, %v2288_v32  ;;  %v2305_v12 = vmax.f32 %v2303_v45, %v2304_v13 }
 0x1d4   : > { %v2272_v54 = vrot.slane %v2271_v56, 4  ;;  %v2294_v28 = vadd.f32 %v2293_v19, %v2289_v31  ;;  %v2306_v27 = vrot.slane %v2305_v12, 4 }
 0x1d6   : > { %v2273_v48 = vadd.f32 %v2272_v54, %v2271_v56  ;;  %v2295_v8 = vrot.slane %v2294_v28, 4  ;;  %v2307_v40 = vmax.f32 %v2305_v12, %v2306_v27 }
 0x1d8   : > { %v2274_v11 = vrot.slane %v2273_v48, 2  ;;  %v2296_v49 = vadd.f32 %v2295_v8, %v2294_v28  ;;  %v2308_v17 = vrot.slane %v2307_v40, 2 }
 0x1da   : > { %v2275_v53 = vadd.f32 %v2274_v11, %v2273_v48  ;;  %v2297_v39 = vrot.slane %v2296_v49, 2  ;;  %v2309_v42 = vmax.f32 %v2307_v40, %v2308_v17 }
 0x1dc   : > { %v2276_v60 = vrot.slane %v2275_v53, 1  ;;  %v2298_v33 = vadd.f32 %v2297_v39, %v2296_v49  ;;  %v2310_v10 = vrot.slane %v2309_v42, 1 }
 0x1de   : > { %v2277_v62 = vadd.f32 %v2276_v60, %v2275_v53  ;;  %v2299_v25 = vrot.slane %v2298_v33, 1  ;;  %v2311_v55 = vmax.f32 %v2309_v42, %v2310_v10 }
 0x1e0   : > { %3278 = vrcp.f32 %v2277_v62  ;;  %v2300_v24 = vadd.f32 %v2299_v25, %v2298_v33 }
 0x1ed   : > { %v3279_v16 = vpop.eup %3278 }
 0x1ee   : > { %v2313_v7 = vmul.f32 %v3279_v16, %v2300_v24  ;;  %v2315_v18 = vmul.f32 %v3279_v16, %v2311_v55 }
 0x1f0   : > { %2314 = vst [vmem:[%s4663_s18] sm:$0x1] %v2313_v7  ;;  %2316 = vst [vmem:[%s503_s29] sm:$0x1] %v2315_v18 }
 0x1f1 PF: > { %s20_s28 = sadd.s32 1, %s3356_s28   ;;  %s4664_s12 = sld [smem:[#allocation9_spill]] }
 0x1f2   : > { %p17_p0 = scmp.ge.s32.totalorder %s20_s28, 10   ;;  %s4665_s19 = sld [smem:[#allocation10_spill]] }
 0x1f3   : > { %s4666_s24 = smov %s3348_s26  ;;  %s4667_s25 = smov %s3352_s27 }
 0x1f4   :  { %19 = sbr.rel (!%p17_p0) target bundleno = 7 (0x7), region = 142 }
 0x1f7   : > { %s4668_s26 = smov %s4664_s12 }
 0x1f8   : > { %s4669_s27 = smov %s4665_s19 }
 0x1f9   :  { %2358 = vsyncpa [#allocation4], 1 }
 0x1fa   :  { %2360 = vsyncpa [#allocation4 + $0x1], 1 }
 0x1fb   :  { %2361 = vsyncpa [#allocation6], 1 }

// kernel: squeeze.71
= control target key start
LH: loop header
LB: loop body
LE: loop exit
PB: predicated region body
PF: predicated region fallthrough
CT: control target
= control target key end

     0   :  { %s67_s8 = smov 104   ;;  %vm8_vm0 = vcmask 64512   ;;  %s68_s11 = smov 112   ;;  %s118_s0 = inlined_call_operand.vmem [shape: f32[2,64], index: 0, kind: input, shape index: {}]   ;;  %s119_s1 = inlined_call_operand.vmem [shape: f32[2,8,8], index: 1, kind: output, shape index: {}]  }
   0x1   :  { %v5_v0 = vld [vmem:[%s118_s0] sm:$0x3]  ;;  %s66_s0 = smov 120   ;;  %s69_s12 = smov 96  }
   0x2   :  { %6 = vst [vmem:[#allocation0] sm:$0x3] %v5_v0  ;;  %s70_s13 = smov 88   ;;  %s71_s14 = smov 80  }
   0x3   :  { %s72_s15 = smov 72  }
   0x9   :  { %v10_v1 = vld [vmem:[#allocation0] sm:$0x3]  }
   0xa   :  { %v22_v2 = vld [vmem:[#allocation0] sm:$0x3]   ;;  %11 = vrot.lane.b32.xlu0 %v10_v1, %s66_s0 }
   0xb   :  { %23 = vrot.lane.b32.xlu1 %v22_v2, %s67_s8  ;;  %v16_v3 = vld [vmem:[#allocation0] sm:$0x3]  }
   0xc   :  { %v28_v4 = vld [vmem:[#allocation0] sm:$0x3]  }
   0xd   :  { %v7_v5 = vld [vmem:[#allocation0] sm:$0x3]  }
   0xe   :  { %9 = vst.msk [vmem:[%s119_s1] ss:$8 sm:$0x3] %vm8_vm0, %v7_v5   ;;  %17 = vrot.lane.b32.xlu0 %v16_v3, %s68_s11  ;;  %v34_v6 = vld [vmem:[#allocation0] sm:$0x3]  }
   0xf   :  { %29 = vrot.lane.b32.xlu1 %v28_v4, %s69_s12  ;;  %v40_v7 = vld [vmem:[#allocation0] sm:$0x3]  }
  0x10   :  { %v46_v8 = vld [vmem:[#allocation0] sm:$0x3]  }
  0x12   :  { %35 = vrot.lane.b32.xlu0 %v34_v6, %s70_s13 }
  0x13   :  { %41 = vrot.lane.b32.xlu1 %v40_v7, %s71_s14 }
  0x16   :  { %47 = vrot.lane.b32.xlu0 %v46_v8, %s72_s15 }
  0x7c   :  { %v12_v9 = vpop.permute.xlu0 %11  }
  0x7d   :  { %v24_v10 = vpop.permute.xlu1 %23   ;;  %52 = vst.msk [vmem:[%s119_s1 + $0x1] ss:$8 sm:$0x3] %vm8_vm0, %v12_v9  }
  0x7e   :  { %54 = vst.msk [vmem:[%s119_s1 + $0x3] ss:$8 sm:$0x3] %vm8_vm0, %v24_v10  }
  0x80   :  { %v18_v11 = vpop.permute.xlu0 %17  }
  0x81   :  { %v30_v12 = vpop.permute.xlu1 %29   ;;  %53 = vst.msk [vmem:[%s119_s1 + $0x2] ss:$8 sm:$0x3] %vm8_vm0, %v18_v11  }
  0x82   :  { %55 = vst.msk [vmem:[%s119_s1 + $0x4] ss:$8 sm:$0x3] %vm8_vm0, %v30_v12  }
  0x84   :  { %v36_v13 = vpop.permute.xlu0 %35  }
  0x85   :  { %v42_v14 = vpop.permute.xlu1 %41   ;;  %56 = vst.msk [vmem:[%s119_s1 + $0x5] ss:$8 sm:$0x3] %vm8_vm0, %v36_v13  }
  0x86   :  { %57 = vst.msk [vmem:[%s119_s1 + $0x6] ss:$8 sm:$0x3] %vm8_vm0, %v42_v14  }
  0x88   :  { %v48_v15 = vpop.permute.xlu0 %47  }
  0x89   :  { %58 = vst.msk [vmem:[%s119_s1 + $0x7] ss:$8 sm:$0x3] %vm8_vm0, %v48_v15  }

// kernel: cascade_rednet_forward.4
= control target key start
LH: loop header
LB: loop body
LE: loop exit
PB: predicated region body
PF: predicated region fallthrough
CT: control target
= control target key end

     0   :  { %s3326_s0 = inlined_call_operand.vmem [shape: bf16[2,32,128], index: 0, kind: input, shape index: {}]   ;;  %s3327_s1 = inlined_call_operand.vmem [shape: bf16[2,32,32,128], index: 1, kind: input, shape index: {}]   ;;  %s3328_s2 = inlined_call_operand.vmem [shape: bf16[2,32,32,128], index: 2, kind: input, shape index: {}]   ;;  %s3329_s3 = inlined_call_operand.vmem [shape: f32[2,32,128], index: 3, kind: input, shape index: {}]   ;;  %s3330_s4 = inlined_call_operand.vmem [shape: f32[32], index: 4, kind: input, shape index: {}]   ;;  %s3331_s5 = inlined_call_operand.vmem [shape: f32[32], index: 5, kind: input, shape index: {}]   ;;  %s3332_s6 = inlined_call_operand.vmem [shape: f32[2,1,128], index: 6, kind: output, shape index: {0}]   ;;  %s3333_s7 = inlined_call_operand.vmem [shape: f32[2,1,128], index: 7, kind: output, shape index: {1}]  }
   0x1   :  { %3337 = sst [smem:[#allocation11_spill]] %s3330_s4 }
   0x2   :  { %3338 = sst [smem:[#allocation12_spill]] %s3331_s5 }
   0x3   :  { %13 = vsyncpa [#allocation4], 0 }
   0x4   :  { %14 = vsyncpa [#allocation6], 0  ;;  %s2674_s24 = smov 0   ;;  %s2676_s25 = smov 0  }
   0x5   :  { %s2678_s26 = smov 0   ;;  %s2680_s27 = smov 0  }
   0x6   :  { %s2682_s28 = smov 0  }
   0x7 LB: > { %s2015_s29 = sadd.s32 4294967295, %s2629_s28   ;;  %s32_s30 = sadd.s32 1, %s2621_s26  ;;  %s2629_s28 = sphi %s2682_s28, %s20_s28   ;;  %s2625_s27 = sphi %s2680_s27, %s3353_s27   ;;  %s2621_s26 = sphi %s2678_s26, %s3352_s26   ;;  %s2617_s25 = sphi %s2676_s25, %s3351_s25   ;;  %s2613_s24 = sphi %s2674_s24, %s3350_s24  }
   0x8   : > { %p33_p0 = scmp.ge.s32.totalorder %s32_s30, 2  ;;  %s39_s8 = sadd.s32 1, %s2625_s27 }
   0x9   : > { %p2017_p1 = scmp.ge.s32.totalorder %s2629_s28, 1  ;;  %p260_p2 = scmp.lt.s32.totalorder %s2629_s28, 5 }
   0xa   : > { %s3355_s30 = smov (%p33_p0, %s32_s30), 0  ;;  %s3357_s8 = smov (!%p33_p0, %s39_s8), %s2625_s27 }
   0xb   : > { %3339 = sst [smem:[#allocation9_spill]] %s3355_s30  ;;  %p2707_p3 = pnand %p2017_p1, %p260_p2 }
   0xc   : > { %p41_p4 = scmp.ge.s32.totalorder %s3357_s8, 2  ;;  %p2711_p5 = scmp.eq.s32.totalorder %s2015_s29, 0 }
   0xd   : > { %s3340_s9 = scalar_select %p2707_p3, 1, 0 }
   0xe   : > { %s3341_s10 = scalar_select %p2711_p5, 1, 0 }
   0xf   : > { %p2489_p6 = pneg %p2707_p3  ;;  %s3342_s4 = sld [smem:[#allocation11_spill]] }
  0x10   : > { %s3359_s8 = smov (%p41_p4, %s3357_s8), 0  ;;  %s3345_s5 = sld [smem:[#allocation12_spill]] }
  0x11   : > { %3343 = sst [smem:[#allocation10_spill]] %s3359_s8  ;;  %p2724_p7 = pnand %p2711_p5, %p2489_p6 }
  0x13   : > { %p2555_p9 = pneg %p2724_p7 }
  0x15   : > { %s273_s13 = sshll.u32 %s3342_s4, 4  ;;  %s274_s13 = int_to_ptr.vmem [resolvable:$true] %s273_s13 }
  0x16   : > { %s284_s17 = sshll.u32 %s3345_s5, 4  ;;  %s2553_s18 = scalar_lea.vmem %s274_s13, 16  ;;  %s285_s17 = int_to_ptr.vmem [resolvable:$true] %s284_s17 }
  0x17   : > { %p2554_p8 = scmp.ne.s32.totalorder %s274_s13, %s2553_s18  ;;  %p2561_p12 = scmp.lt.s32.totalorder %s274_s13, %s274_s13 }
  0x18   : > { %p2562_p13 = scmp.lt.s32.totalorder %s2553_s18, %s2553_s18 }
  0x19   : > { %p2556_p10 = pnand %p2555_p9, %p2554_p8 }
  0x1a   : > { %p2563_p0 = por %p2562_p13, %p2561_p12 }
  0x1b   : > { %p2557_p11 = pneg %p2556_p10 }
  0x1d   : > { %p2564_p1 = pnand %p2563_p0, %p2557_p11 }
  0x1f   : > { %2567 = shalt.err (!%p2564_p1)
}
  0x20   : > { %s2631_s19 = smov [#allocation3]   ;;  %s2568_s20 = scalar_lea.vmem %s285_s17, 16 }
  0x21   : > { %2492 = dma.vmem_to_smem (!%p2724_p7), %s274_s13, 16, %s2631_s19, [#allocation4]  }
  0x22   : > { %p2569_p2 = scmp.ne.s32.totalorder %s285_s17, %s2568_s20  ;;  %p2576_p5 = scmp.lt.s32.totalorder %s285_s17, %s285_s17 }
  0x23   : > { %p2577_p3 = scmp.lt.s32.totalorder %s2568_s20, %s2568_s20 }
  0x24   : > { %p2571_p4 = pnand %p2569_p2, %p2555_p9 }
  0x25   : > { %p2578_p8 = por %p2577_p3, %p2576_p5 }
  0x26   : > { %p2572_p6 = pneg %p2571_p4 }
  0x28   : > { %p2579_p10 = pnand %p2578_p8, %p2572_p6 }
  0x2a   : > { %2582 = shalt.err (!%p2579_p10)
}
  0x2b   : > { %s2632_s21 = smov [#allocation5]   ;;  %p3346_p11 = scmp.ne.s32.totalorder %s3340_s9, 0 }
  0x2c   : > { %2495 = dma.vmem_to_smem (!%p2724_p7), %s285_s17, 16, %s2632_s21, [#allocation6]  }
  0x2d   : > { %358 = sbr.rel (%p3346_p11) target bundleno = 387 (0x183), region = 44  ;;  %p3347_p12 = scmp.ne.s32.totalorder (!%p3346_p11), %s3341_s10, 0 }
  0x32   : > { %2604 = dma.done.wait (%p3347_p12), [#allocation4], 16  }
  0x33   : > { %2606 = vsyncadd (%p3347_p12), [#allocation4], 4294967280 }
  0x34   : > { %2608 = dma.done.wait (%p3347_p12), [#allocation6], 16  }
  0x35   : > { %2610 = vsyncadd (%p3347_p12), [#allocation6], 4294967280 }
  0x36   : > { %368 = sfence }
  0x37   : > { %s2024_s22 = sshll.u32 %s2613_s24, 1  ;;  %p444_p3 = scmp.lt.s32.totalorder %s2617_s25, 1 }
  0x38   : > { %p446_p5 = scmp.lt.s32.totalorder %s2024_s22, 3  ;;  %s2750_s23 = sshll.u32 %s2613_s24, 4 }
  0x39   : > { %s3361_s25 = smov (!%p444_p3, %s2617_s25), 1  ;;  %p459_p7 = scmp.lt.s32.totalorder %s2750_s23, 31 }
  0x3a   : > { %s3363_s22 = smov (!%p446_p5, %s2024_s22), 3  ;;  %s2025_s29 = sshll.u32 %s3361_s25, 2 }
  0x3b   : > { %s452_s9 = sadd.s32 %s2025_s29, %s3363_s22  ;;  %s2029_s10 = sshll.u32 %s3361_s25, 7 }
  0x3c   : > { %s2026_s11 = sshll.u32 %s452_s9, 2  ;;  %s2162_s12 = sshll.u32 %s3361_s25, 5 }
  0x3d   : > { %s2762_s15 = scalar_lea.vmem %s3326_s0, %s2026_s11  ;;  %s2767_s18 = scalar_lea.vmem %s3329_s3, %s2162_s12 }
  0x3e   : > { %s460_s19 = scalar_select %p459_p7, %s2750_s23, 31 }
  0x3f   : > { %s497_s4 = scalar_lea.vmem %s3332_s6, %s3361_s25  ;;  %s503_s29 = scalar_lea.vmem %s3333_s7, %s3361_s25 }
  0x40   : > { %s2028_s9 = sshll.u32 %s460_s19, 2  ;;  %p2037_p9 = scmp.ne.s32.totalorder %s2613_s24, 0 }
  0x41   : > { %s466_s8 = sadd.s32 %s2029_s10, %s2028_s9 }
  0x42   : > { %s2030_s30 = sshll.u32 %s466_s8, 2  ;;  %507 = sbr.rel (%p2037_p9) target bundleno = 74 (0x4a), region = 56 }
  0x43   : > { %s2781_s14 = scalar_lea.vmem %s3327_s1, %s2030_s30  ;;  %s2786_s17 = scalar_lea.vmem %s3328_s2, %s2030_s30 }
  0x47   : > { %v2633_v0 = vmov 0.0  }
  0x48   : > { %508 = vst [vmem:[#allocation2 + $0x10] sm:$0xff] %v2633_v0  ;;  %509 = vst [vmem:[#allocation2] sm:$0xff] %v2633_v0 }
  0x49   : > { %510 = vst [vmem:[#allocation2 + $0x18] sm:$0xff] %v2633_v0  ;;  %511 = vst [vmem:[#allocation2 + $0x8] sm:$0xff] %v2633_v0 }
  0x4a PF: > { %v550_v1 = vlaneseq  ;;  %s2790_s5 = sld [smem:[#allocation3 + %s2750_s23]]  ;;  %v516_v2 = vld [vmem:[%s2762_s15] sm:$0x1]  ;;  %v2419_v7 = vld [vmem:[%s2781_s14 + $0x8] sm:$0xff]   ;;  %v2421_v31 = vld [vmem:[%s2781_s14 + $0x10] sm:$0xff]   ;;  %s642_s8 = sadd.s32 1, %s2750_s23 }
  0x4b   : > { %v2164_v3 = vld [vmem:[%s2781_s14] sm:$0xff]   ;;  %s2795_s30 = sld [smem:[#allocation5 + %s2750_s23]]  ;;  %v2797_v4 = vunpack.c.l.bf16 %v516_v2  ;;  %v2420_v9 = vld [vmem:[%s2786_s17 + $0x8] sm:$0xff]   ;;  %v2169_v11 = vunpack.c.l.bf16 %v2419_v7  ;;  %v2170_v12 = vunpack.c.h.bf16 %v2419_v7  ;;  %v2422_v32 = vld [vmem:[%s2781_s14 + $0x18] sm:$0xff]   ;;  %v2181_v41 = vunpack.c.l.bf16 %v2421_v31  ;;  %s720_s20 = sadd.s32 2, %s2750_s23 }
  0x4c   : > { %v2165_v5 = vunpack.c.l.bf16 %v2164_v3  ;;  %v2166_v6 = vunpack.c.h.bf16 %v2164_v3  ;;  %v2172_v8 = vld [vmem:[%s2786_s17] sm:$0xff]   ;;  %v2802_v10 = vshrl.u32 %v550_v1, 7  ;;  %v2177_v17 = vunpack.c.l.bf16 %v2420_v9  ;;  %s2820_s10 = sld [smem:[#allocation3 + %s642_s8]]  ;;  %v2423_v1 = vld [vmem:[%s2786_s17 + $0x10] sm:$0xff]   ;;  %v2424_v2 = vld [vmem:[%s2786_s17 + $0x18] sm:$0xff]   ;;  %s795_s9 = sadd.s32 3, %s2750_s23 }
  0x4d   : > { %v2173_v13 = vunpack.c.l.bf16 %v2172_v8  ;;  %v2174_v14 = vunpack.c.h.bf16 %v2172_v8  ;;  %v2178_v18 = vunpack.c.h.bf16 %v2420_v9  ;;  %v528_v19 = vmul.f32 %v2169_v11, %v2169_v11  ;;  %s2822_s19 = sld [smem:[#allocation5 + %s642_s8]]  ;;  %s873_s16 = sadd.s32 4, %s2750_s23 }
  0x4e   : > { %v526_v15 = vmul.f32 %v2165_v5, %v2165_v5  ;;  %v527_v16 = vmul.f32 %v2166_v6, %v2166_v6  ;;  %v529_v20 = vmul.f32 %v2170_v12, %v2170_v12  ;;  %v540_v23 = vadd.f32 %v2177_v17, %v2169_v11  ;;  %s2848_s21 = sld [smem:[#allocation3 + %s720_s20]]  ;;  %p2159_p13 = scmp.ne.s32.totalorder %s2613_s24, 1 }
  0x4f   : > { %v538_v21 = vadd.f32 %v2173_v13, %v2165_v5  ;;  %v539_v22 = vadd.f32 %v2174_v14, %v2166_v6  ;;  %v541_v24 = vadd.f32 %v2178_v18, %v2170_v12  ;;  %v542_v25 = vmul.f32 %v2173_v13, %v2173_v13  ;;  %v512_v3 = vld [vmem:[#allocation2 + $0x10] sm:$0xff]  ;;  %v513_v5 = vld [vmem:[#allocation2] sm:$0xff]  ;;  %s2852_s22 = sld [smem:[#allocation5 + %s720_s20]] }
  0x50   : > { %v543_v26 = vmul.f32 %v2174_v14, %v2174_v14  ;;  %v544_v27 = vmul.f32 %v2177_v17, %v2177_v17  ;;  %v545_v28 = vmul.f32 %v2178_v18, %v2178_v18  ;;  %v2805_v29 = vsub.s32 0, %v2802_v10  ;;  %v514_v6 = vld [vmem:[#allocation2 + $0x18] sm:$0xff]  ;;  %v515_v11 = vld [vmem:[#allocation2 + $0x8] sm:$0xff]  ;;  %s2886_s13 = sld [smem:[#allocation3 + %s795_s9]] }
  0x51   : > { %v2809_v30 = vmul.f32 %v2797_v4, %v2797_v4  ;;  %v546_v33 = vadd.f32 %v542_v25, %v526_v15  ;;  %v570_v35 = vstv %s2790_s5  ;;  %v579_v36 = vstv %s2795_s30  ;;  %s2888_s11 = sld [smem:[#allocation5 + %s795_s9]]  ;;  %s948_s30 = sadd.s32 5, %s2750_s23 }
  0x52   : > { %v547_v34 = vadd.f32 %v543_v26, %v527_v16  ;;  %v548_v37 = vadd.f32 %v544_v27, %v528_v19  ;;  %v549_v38 = vadd.f32 %v545_v28, %v529_v20  ;;  %v553_v39 = vrot.slane %v2797_v4, %v2805_v29  ;;  %s2918_s12 = sld [smem:[#allocation3 + %s873_s16]] }
  0x53   : > { %v562_v40 = vrot.slane %v2809_v30, %v2805_v29  ;;  %v2182_v42 = vunpack.c.h.bf16 %v2421_v31  ;;  %v2185_v43 = vunpack.c.l.bf16 %v2422_v32  ;;  %v2186_v44 = vunpack.c.h.bf16 %v2422_v32  ;;  %s2922_s5 = sld [smem:[#allocation5 + %s873_s16]] }
  0x54   : > { %v554_v45 = vadd.f32 %v553_v39, %v538_v21  ;;  %v555_v46 = vadd.f32 %v553_v39, %v539_v22  ;;  %v556_v47 = vadd.f32 %v553_v39, %v540_v23  ;;  %v557_v48 = vadd.f32 %v553_v39, %v541_v24  ;;  %v2426_v39 = vld [vmem:[%s2781_s14 + $0x28] sm:$0xff]   ;;  %s2956_s8 = sld [smem:[#allocation3 + %s948_s30]] }
  0x55   : > { %v563_v49 = vadd.f32 %v562_v40, %v546_v33  ;;  %v564_v50 = vadd.f32 %v562_v40, %v547_v34  ;;  %v565_v51 = vadd.f32 %v562_v40, %v548_v37  ;;  %v566_v52 = vadd.f32 %v562_v40, %v549_v38  ;;  %v2425_v34 = vld [vmem:[%s2781_s14 + $0x20] sm:$0xff]  }
  0x56   : > { %v575_v53 = vmul.f32 %v554_v45, %v554_v45  ;;  %v576_v54 = vmul.f32 %v555_v46, %v555_v46  ;;  %v577_v55 = vmul.f32 %v556_v47, %v556_v47  ;;  %v578_v56 = vmul.f32 %v557_v48, %v557_v48  ;;  %v2427_v40 = vld [vmem:[%s2786_s17 + $0x20] sm:$0xff]  }
  0x57   : > { %v571_v57 = vmul.f32 %v570_v35, %v563_v49  ;;  %v572_v58 = vmul.f32 %v570_v35, %v564_v50  ;;  %v573_v59 = vmul.f32 %v570_v35, %v565_v51  ;;  %v574_v60 = vmul.f32 %v570_v35, %v566_v52 }
  0x58   : > { %v580_v61 = vmul.f32 %v579_v36, %v575_v53  ;;  %v581_v62 = vmul.f32 %v579_v36, %v576_v54  ;;  %v582_v63 = vmul.f32 %v579_v36, %v577_v55  ;;  %v583_v0 = vmul.f32 %v579_v36, %v578_v56 }
  0x59   : > { %v601_v7 = vmul.f32 %v2181_v41, %v2181_v41  ;;  %v602_v8 = vmul.f32 %v2182_v42, %v2182_v42  ;;  %v603_v9 = vmul.f32 %v2185_v43, %v2185_v43  ;;  %v2189_v16 = vunpack.c.l.bf16 %v2423_v1 }
  0x5a   : > { %v584_v12 = vsub.f32 %v571_v57, %v580_v61  ;;  %v585_v13 = vsub.f32 %v572_v58, %v581_v62  ;;  %v586_v14 = vsub.f32 %v573_v59, %v582_v63  ;;  %v587_v15 = vsub.f32 %v574_v60, %v583_v0  ;;  %v667_v63 = vld [vmem:[%s2762_s15] sm:$0x2] }
  0x5b   : > { %v2190_v17 = vunpack.c.h.bf16 %v2423_v1  ;;  %v2193_v18 = vunpack.c.l.bf16 %v2424_v2  ;;  %v2194_v19 = vunpack.c.h.bf16 %v2424_v2  ;;  %v604_v23 = vmul.f32 %v2186_v44, %v2186_v44 }
  0x5c   : > { %v2826_v20 = vadd.f32 %v584_v12, %v512_v3  ;;  %v2828_v21 = vadd.f32 %v585_v13, %v513_v5  ;;  %v2830_v22 = vadd.f32 %v586_v14, %v514_v6  ;;  %v2832_v24 = vadd.f32 %v587_v15, %v515_v11 }
  0x5d   : > { %v614_v25 = vadd.f32 %v2189_v16, %v2181_v41  ;;  %v615_v26 = vadd.f32 %v2190_v17, %v2182_v42  ;;  %v616_v27 = vadd.f32 %v2193_v18, %v2185_v43  ;;  %v618_v28 = vmul.f32 %v2189_v16, %v2189_v16 }
  0x5e   : > { %v619_v31 = vmul.f32 %v2190_v17, %v2190_v17  ;;  %v620_v32 = vmul.f32 %v2193_v18, %v2193_v18  ;;  %v621_v33 = vmul.f32 %v2194_v19, %v2194_v19  ;;  %v617_v35 = vadd.f32 %v2194_v19, %v2186_v44 }
  0x5f   : > { %v2836_v36 = vsub.s32 1, %v2802_v10  ;;  %v645_v37 = vstv %s2820_s10  ;;  %v654_v38 = vstv %s2822_s19  ;;  %v622_v45 = vadd.f32 %v618_v28, %v601_v7  ;;  %s2958_s10 = sld [smem:[#allocation5 + %s948_s30]]  ;;  %s1026_s19 = sadd.s32 6, %s2750_s23 }
  0x60   : > { %v623_v46 = vadd.f32 %v619_v31, %v602_v8  ;;  %v624_v47 = vadd.f32 %v620_v32, %v603_v9  ;;  %v625_v41 = vadd.f32 %v621_v33, %v604_v23  ;;  %v2197_v48 = vunpack.c.l.bf16 %v2425_v34  ;;  %v2428_v9 = vld [vmem:[%s2786_s17 + $0x28] sm:$0xff]   ;;  %s2988_s20 = sld [smem:[#allocation3 + %s1026_s19]] }
  0x61   : > { %v629_v42 = vrot.slane %v2797_v4, %v2836_v36  ;;  %v637_v43 = vrot.slane %v2809_v30, %v2836_v36  ;;  %v2198_v44 = vunpack.c.h.bf16 %v2425_v34  ;;  %v2201_v49 = vunpack.c.l.bf16 %v2426_v39 }
  0x62   : > { %v2202_v50 = vunpack.c.h.bf16 %v2426_v39  ;;  %v2205_v51 = vunpack.c.l.bf16 %v2427_v40  ;;  %v2206_v52 = vunpack.c.h.bf16 %v2427_v40  ;;  %v2857_v11 = vunpack.c.l.bf16 %v667_v63 }
  0x63   : > { %v630_v53 = vadd.f32 %v629_v42, %v614_v25  ;;  %v631_v54 = vadd.f32 %v629_v42, %v615_v26  ;;  %v632_v55 = vadd.f32 %v629_v42, %v616_v27  ;;  %v633_v56 = vadd.f32 %v629_v42, %v617_v35 }
  0x64   : > { %v638_v57 = vadd.f32 %v637_v43, %v622_v45  ;;  %v639_v58 = vadd.f32 %v637_v43, %v623_v46  ;;  %v640_v59 = vadd.f32 %v637_v43, %v624_v47  ;;  %v641_v60 = vadd.f32 %v637_v43, %v625_v41  ;;  %v2430_v45 = vld [vmem:[%s2781_s14 + $0x38] sm:$0xff]  }
  0x65   : > { %v650_v4 = vmul.f32 %v630_v53, %v630_v53  ;;  %v651_v61 = vmul.f32 %v631_v54, %v631_v54  ;;  %v652_v30 = vmul.f32 %v632_v55, %v632_v55  ;;  %v653_v62 = vmul.f32 %v633_v56, %v633_v56 }
  0x66   : > { %v646_v0 = vmul.f32 %v645_v37, %v638_v57  ;;  %v647_v1 = vmul.f32 %v645_v37, %v639_v58  ;;  %v648_v2 = vmul.f32 %v645_v37, %v640_v59  ;;  %v2850_v3 = vmul.f32 %v645_v37, %v641_v60 }
  0x67   : > { %v655_v5 = vmul.f32 %v654_v38, %v650_v4  ;;  %v656_v6 = vmul.f32 %v654_v38, %v651_v61  ;;  %v657_v7 = vmul.f32 %v654_v38, %v652_v30  ;;  %v2854_v8 = vmul.f32 %v654_v38, %v653_v62 }
  0x68   : > { %v678_v12 = vmul.f32 %v2197_v48, %v2197_v48  ;;  %v679_v13 = vmul.f32 %v2198_v44, %v2198_v44  ;;  %v680_v14 = vmul.f32 %v2201_v49, %v2201_v49  ;;  %v681_v18 = vmul.f32 %v2202_v50, %v2202_v50 }
  0x69   : > { %v659_v15 = vsub.f32 %v646_v0, %v655_v5  ;;  %v660_v16 = vsub.f32 %v647_v1, %v656_v6  ;;  %v661_v17 = vsub.f32 %v648_v2, %v657_v7  ;;  %v662_v19 = vsub.f32 %v2850_v3, %v2854_v8  ;;  %v2431_v8 = vld [vmem:[%s2786_s17 + $0x30] sm:$0xff]  }
  0x6a   : > { %v2209_v23 = vunpack.c.l.bf16 %v2428_v9  ;;  %v2210_v25 = vunpack.c.h.bf16 %v2428_v9  ;;  %v691_v26 = vadd.f32 %v2205_v51, %v2197_v48  ;;  %v692_v32 = vadd.f32 %v2206_v52, %v2198_v44  ;;  %v2432_v9 = vld [vmem:[%s2786_s17 + $0x38] sm:$0xff]  }
  0x6b   : > { %v2862_v27 = vadd.f32 %v659_v15, %v2826_v20  ;;  %v2865_v28 = vadd.f32 %v660_v16, %v2828_v21  ;;  %v2868_v31 = vadd.f32 %v661_v17, %v2830_v22  ;;  %v695_v35 = vmul.f32 %v2205_v51, %v2205_v51  ;;  %v2429_v21 = vld [vmem:[%s2781_s14 + $0x30] sm:$0xff]  }
  0x6c   : > { %v693_v33 = vadd.f32 %v2209_v23, %v2201_v49  ;;  %v694_v34 = vadd.f32 %v2210_v25, %v2202_v50  ;;  %v696_v37 = vmul.f32 %v2206_v52, %v2206_v52  ;;  %v697_v38 = vmul.f32 %v2209_v23, %v2209_v23 }
  0x6d   : > { %v698_v39 = vmul.f32 %v2210_v25, %v2210_v25  ;;  %v2871_v40 = vsub.s32 2, %v2802_v10  ;;  %v2875_v20 = vmul.f32 %v2857_v11, %v2857_v11  ;;  %v699_v46 = vadd.f32 %v695_v35, %v678_v12 }
  0x6e   : > { %v700_v22 = vadd.f32 %v696_v37, %v679_v13  ;;  %v723_v47 = vstv %s2848_s21  ;;  %v732_v41 = vstv %s2852_s22  ;;  %v701_v42 = vadd.f32 %v697_v38, %v680_v14  ;;  %s2992_s21 = sld [smem:[#allocation5 + %s1026_s19]]  ;;  %s1101_s22 = sadd.s32 7, %s2750_s23 }
  0x6f   : > { %v702_v43 = vadd.f32 %v698_v39, %v681_v18  ;;  %v706_v48 = vrot.slane %v2857_v11, %v2871_v40  ;;  %v715_v44 = vrot.slane %v2875_v20, %v2871_v40  ;;  %v2213_v49 = vunpack.c.l.bf16 %v2429_v21  ;;  %s3026_s9 = sld [smem:[#allocation3 + %s1101_s22]] }
  0x70   : > { %v2214_v50 = vunpack.c.h.bf16 %v2429_v21  ;;  %v2217_v51 = vunpack.c.l.bf16 %v2430_v45  ;;  %v2218_v52 = vunpack.c.h.bf16 %v2430_v45  ;;  %v666_v12 = vadd.f32 %v662_v19, %v2832_v24 }
  0x71   : > { %v707_v53 = vadd.f32 %v706_v48, %v691_v26  ;;  %v708_v54 = vadd.f32 %v706_v48, %v692_v32  ;;  %v709_v55 = vadd.f32 %v706_v48, %v693_v33  ;;  %v710_v56 = vadd.f32 %v706_v48, %v694_v34  ;;  %v2435_v48 = vld [vmem:[%s2786_s17 + $0x40] sm:$0xff]  }
  0x72   : > { %v716_v57 = vadd.f32 %v715_v44, %v699_v46  ;;  %v717_v58 = vadd.f32 %v715_v44, %v700_v22  ;;  %v718_v59 = vadd.f32 %v715_v44, %v701_v42  ;;  %v719_v60 = vadd.f32 %v715_v44, %v702_v43  ;;  %v2434_v43 = vld [vmem:[%s2781_s14 + $0x48] sm:$0xff]  }
  0x73   : > { %v728_v4 = vmul.f32 %v707_v53, %v707_v53  ;;  %v729_v61 = vmul.f32 %v708_v54, %v708_v54  ;;  %v730_v30 = vmul.f32 %v709_v55, %v709_v55  ;;  %v731_v62 = vmul.f32 %v710_v56, %v710_v56 }
  0x74   : > { %v724_v63 = vmul.f32 %v723_v47, %v716_v57  ;;  %v725_v0 = vmul.f32 %v723_v47, %v717_v58  ;;  %v726_v1 = vmul.f32 %v723_v47, %v718_v59  ;;  %v727_v2 = vmul.f32 %v723_v47, %v719_v60  ;;  %v2433_v47 = vld [vmem:[%s2781_s14 + $0x40] sm:$0xff]  }
  0x75   : > { %v733_v3 = vmul.f32 %v732_v41, %v728_v4  ;;  %v734_v5 = vmul.f32 %v732_v41, %v729_v61  ;;  %v735_v6 = vmul.f32 %v732_v41, %v730_v30  ;;  %v736_v7 = vmul.f32 %v732_v41, %v731_v62 }
  0x76   : > { %v754_v13 = vmul.f32 %v2213_v49, %v2213_v49  ;;  %v755_v14 = vmul.f32 %v2214_v50, %v2214_v50  ;;  %v756_v15 = vmul.f32 %v2217_v51, %v2217_v51  ;;  %v2221_v25 = vunpack.c.l.bf16 %v2431_v8 }
  0x77   : > { %v737_v16 = vsub.f32 %v724_v63, %v733_v3  ;;  %v738_v17 = vsub.f32 %v725_v0, %v734_v5  ;;  %v739_v18 = vsub.f32 %v726_v1, %v735_v6  ;;  %v740_v23 = vsub.f32 %v727_v2, %v736_v7  ;;  %v820_v5 = vld [vmem:[%s2762_s15] sm:$0x4] }
  0x78   : > { %v2222_v26 = vunpack.c.h.bf16 %v2431_v8  ;;  %v2225_v32 = vunpack.c.l.bf16 %v2432_v9  ;;  %v2226_v33 = vunpack.c.h.bf16 %v2432_v9  ;;  %v757_v19 = vmul.f32 %v2218_v52, %v2218_v52 }
  0x79   : > { %v2894_v34 = vadd.f32 %v737_v16, %v2862_v27  ;;  %v2897_v35 = vadd.f32 %v738_v17, %v2865_v28  ;;  %v2900_v24 = vadd.f32 %v739_v18, %v2868_v31  ;;  %v2902_v37 = vadd.f32 %v740_v23, %v666_v12  ;;  %v2436_v16 = vld [vmem:[%s2786_s17 + $0x48] sm:$0xff]  }
  0x7a   : > { %v767_v38 = vadd.f32 %v2221_v25, %v2213_v49  ;;  %v768_v39 = vadd.f32 %v2222_v26, %v2214_v50  ;;  %v769_v21 = vadd.f32 %v2225_v32, %v2217_v51  ;;  %v771_v45 = vmul.f32 %v2221_v25, %v2221_v25 }
  0x7b   : > { %v772_v46 = vmul.f32 %v2222_v26, %v2222_v26  ;;  %v773_v22 = vmul.f32 %v2225_v32, %v2225_v32  ;;  %v774_v27 = vmul.f32 %v2226_v33, %v2226_v33  ;;  %v770_v41 = vadd.f32 %v2226_v33, %v2218_v52 }
  0x7c   : > { %v2906_v28 = vsub.s32 3, %v2802_v10  ;;  %v798_v42 = vstv %s2886_s13  ;;  %v807_v31 = vstv %s2888_s11  ;;  %v775_v44 = vadd.f32 %v771_v45, %v754_v13  ;;  %s3028_s13 = sld [smem:[#allocation5 + %s1101_s22]]  ;;  %s1179_s11 = sadd.s32 8, %s2750_s23 }
  0x7d   : > { %v776_v53 = vadd.f32 %v772_v46, %v755_v14  ;;  %v777_v54 = vadd.f32 %v773_v22, %v756_v15  ;;  %v778_v49 = vadd.f32 %v774_v27, %v757_v19  ;;  %v2229_v55 = vunpack.c.l.bf16 %v2433_v47  ;;  %s3058_s16 = sld [smem:[#allocation3 + %s1179_s11]] }
  0x7e   : > { %v782_v50 = vrot.slane %v2857_v11, %v2906_v28  ;;  %v790_v51 = vrot.slane %v2875_v20, %v2906_v28  ;;  %v2230_v52 = vunpack.c.h.bf16 %v2433_v47  ;;  %v2233_v56 = vunpack.c.l.bf16 %v2434_v43 }
  0x7f   : > { %v2234_v57 = vunpack.c.h.bf16 %v2434_v43  ;;  %v2237_v58 = vunpack.c.l.bf16 %v2435_v48  ;;  %v2238_v59 = vunpack.c.h.bf16 %v2435_v48  ;;  %v2927_v17 = vunpack.c.l.bf16 %v820_v5 }
  0x80   : > { %v783_v60 = vadd.f32 %v782_v50, %v767_v38  ;;  %v784_v4 = vadd.f32 %v782_v50, %v768_v39  ;;  %v785_v61 = vadd.f32 %v782_v50, %v769_v21  ;;  %v786_v30 = vadd.f32 %v782_v50, %v770_v41 }
  0x81   : > { %v791_v62 = vadd.f32 %v790_v51, %v775_v44  ;;  %v792_v63 = vadd.f32 %v790_v51, %v776_v53  ;;  %v793_v0 = vadd.f32 %v790_v51, %v777_v54  ;;  %v794_v1 = vadd.f32 %v790_v51, %v778_v49  ;;  %v2438_v54 = vld [vmem:[%s2781_s14 + $0x58] sm:$0xff]  }
  0x82   : > { %v803_v11 = vmul.f32 %v783_v60, %v783_v60  ;;  %v804_v2 = vmul.f32 %v784_v4, %v784_v4  ;;  %v805_v20 = vmul.f32 %v785_v61, %v785_v61  ;;  %v806_v3 = vmul.f32 %v786_v30, %v786_v30 }
  0x83   : > { %v799_v6 = vmul.f32 %v798_v42, %v791_v62  ;;  %v800_v7 = vmul.f32 %v798_v42, %v792_v63  ;;  %v801_v8 = vmul.f32 %v798_v42, %v793_v0  ;;  %v2920_v9 = vmul.f32 %v798_v42, %v794_v1 }
  0x84   : > { %v808_v12 = vmul.f32 %v807_v31, %v803_v11  ;;  %v809_v13 = vmul.f32 %v807_v31, %v804_v2  ;;  %v810_v14 = vmul.f32 %v807_v31, %v805_v20  ;;  %v2924_v15 = vmul.f32 %v807_v31, %v806_v3 }
  0x85   : > { %v831_v18 = vmul.f32 %v2229_v55, %v2229_v55  ;;  %v832_v23 = vmul.f32 %v2230_v52, %v2230_v52  ;;  %v833_v25 = vmul.f32 %v2233_v56, %v2233_v56  ;;  %v834_v19 = vmul.f32 %v2234_v57, %v2234_v57 }
  0x86   : > { %v812_v26 = vsub.f32 %v799_v6, %v808_v12  ;;  %v813_v32 = vsub.f32 %v800_v7, %v809_v13  ;;  %v814_v33 = vsub.f32 %v801_v8, %v810_v14  ;;  %v815_v38 = vsub.f32 %v2920_v9, %v2924_v15 }
  0x87   : > { %v2241_v39 = vunpack.c.l.bf16 %v2436_v16  ;;  %v2242_v21 = vunpack.c.h.bf16 %v2436_v16  ;;  %v844_v45 = vadd.f32 %v2237_v58, %v2229_v55  ;;  %v845_v47 = vadd.f32 %v2238_v59, %v2230_v52 }
  0x88   : > { %v2932_v46 = vadd.f32 %v812_v26, %v2894_v34  ;;  %v2935_v22 = vadd.f32 %v813_v32, %v2897_v35  ;;  %v2938_v27 = vadd.f32 %v814_v33, %v2900_v24  ;;  %v848_v31 = vmul.f32 %v2237_v58, %v2237_v58  ;;  %v2437_v35 = vld [vmem:[%s2781_s14 + $0x50] sm:$0xff]  }
  0x89   : > { %v846_v41 = vadd.f32 %v2241_v39, %v2233_v56  ;;  %v847_v42 = vadd.f32 %v2242_v21, %v2234_v57  ;;  %v849_v43 = vmul.f32 %v2238_v59, %v2238_v59  ;;  %v850_v48 = vmul.f32 %v2241_v39, %v2241_v39 }
  0x8a   : > { %v851_v44 = vmul.f32 %v2242_v21, %v2242_v21  ;;  %v2941_v53 = vsub.s32 4, %v2802_v10  ;;  %v2945_v34 = vmul.f32 %v2927_v17, %v2927_v17  ;;  %v852_v49 = vadd.f32 %v848_v31, %v831_v18  ;;  %v2439_v18 = vld [vmem:[%s2786_s17 + $0x50] sm:$0xff]  }
  0x8b   : > { %v853_v24 = vadd.f32 %v849_v43, %v832_v23  ;;  %v876_v50 = vstv %s2918_s12  ;;  %v885_v51 = vstv %s2922_s5  ;;  %v854_v55 = vadd.f32 %v850_v48, %v833_v25  ;;  %v2440_v23 = vld [vmem:[%s2786_s17 + $0x58] sm:$0xff]   ;;  %s3062_s12 = sld [smem:[#allocation5 + %s1179_s11]]  ;;  %s1254_s5 = sadd.s32 9, %s2750_s23 }
  0x8c   : > { %v855_v52 = vadd.f32 %v851_v44, %v834_v19  ;;  %v859_v56 = vrot.slane %v2927_v17, %v2941_v53  ;;  %v868_v57 = vrot.slane %v2945_v34, %v2941_v53  ;;  %v2245_v58 = vunpack.c.l.bf16 %v2437_v35  ;;  %s3087_s30 = sld [smem:[#allocation3 + %s1254_s5]] }
  0x8d   : > { %v2246_v59 = vunpack.c.h.bf16 %v2437_v35  ;;  %v2249_v60 = vunpack.c.l.bf16 %v2438_v54  ;;  %v2250_v4 = vunpack.c.h.bf16 %v2438_v54  ;;  %v819_v25 = vadd.f32 %v815_v38, %v2902_v37 }
  0x8e   : > { %v860_v61 = vadd.f32 %v859_v56, %v844_v45  ;;  %v861_v30 = vadd.f32 %v859_v56, %v845_v47  ;;  %v862_v62 = vadd.f32 %v859_v56, %v846_v41  ;;  %v863_v63 = vadd.f32 %v859_v56, %v847_v42 }
  0x8f   : > { %v869_v0 = vadd.f32 %v868_v57, %v852_v49  ;;  %v870_v1 = vadd.f32 %v868_v57, %v853_v24  ;;  %v871_v11 = vadd.f32 %v868_v57, %v854_v55  ;;  %v872_v2 = vadd.f32 %v868_v57, %v855_v52  ;;  %v2441_v55 = vld [vmem:[%s2781_s14 + $0x60] sm:$0xff]   ;;  %v2442_v57 = vld [vmem:[%s2781_s14 + $0x68] sm:$0xff]  }
  0x90   : > { %v881_v20 = vmul.f32 %v860_v61, %v860_v61  ;;  %v882_v3 = vmul.f32 %v861_v30, %v861_v30  ;;  %v883_v5 = vmul.f32 %v862_v62, %v862_v62  ;;  %v884_v6 = vmul.f32 %v863_v63, %v863_v63  ;;  %v2443_v61 = vld [vmem:[%s2786_s17 + $0x60] sm:$0xff]  }
  0x91   : > { %v877_v7 = vmul.f32 %v876_v50, %v869_v0  ;;  %v878_v8 = vmul.f32 %v876_v50, %v870_v1  ;;  %v879_v9 = vmul.f32 %v876_v50, %v871_v11  ;;  %v880_v12 = vmul.f32 %v876_v50, %v872_v2 }
  0x92   : > { %v886_v13 = vmul.f32 %v885_v51, %v881_v20  ;;  %v887_v14 = vmul.f32 %v885_v51, %v882_v3  ;;  %v888_v15 = vmul.f32 %v885_v51, %v883_v5  ;;  %v889_v16 = vmul.f32 %v885_v51, %v884_v6 }
  0x93   : > { %v907_v26 = vmul.f32 %v2245_v58, %v2245_v58  ;;  %v908_v32 = vmul.f32 %v2246_v59, %v2246_v59  ;;  %v909_v33 = vmul.f32 %v2249_v60, %v2249_v60  ;;  %v2253_v47 = vunpack.c.l.bf16 %v2439_v18 }
  0x94   : > { %v890_v19 = vsub.f32 %v877_v7, %v886_v13  ;;  %v891_v39 = vsub.f32 %v878_v8, %v887_v14  ;;  %v892_v21 = vsub.f32 %v879_v9, %v888_v15  ;;  %v893_v45 = vsub.f32 %v880_v12, %v889_v16  ;;  %v973_v16 = vld [vmem:[%s2762_s15] sm:$0x8] }
  0x95   : > { %v2254_v41 = vunpack.c.h.bf16 %v2439_v18  ;;  %v2257_v42 = vunpack.c.l.bf16 %v2440_v23  ;;  %v2258_v31 = vunpack.c.h.bf16 %v2440_v23  ;;  %v910_v38 = vmul.f32 %v2250_v4, %v2250_v4 }
  0x96   : > { %v2964_v43 = vadd.f32 %v890_v19, %v2932_v46  ;;  %v2967_v48 = vadd.f32 %v891_v39, %v2935_v22  ;;  %v2970_v37 = vadd.f32 %v892_v21, %v2938_v27  ;;  %v2972_v44 = vadd.f32 %v893_v45, %v819_v25  ;;  %v2444_v21 = vld [vmem:[%s2786_s17 + $0x68] sm:$0xff]  }
  0x97   : > { %v920_v35 = vadd.f32 %v2253_v47, %v2245_v58  ;;  %v921_v54 = vadd.f32 %v2254_v41, %v2246_v59  ;;  %v922_v49 = vadd.f32 %v2257_v42, %v2249_v60  ;;  %v924_v24 = vmul.f32 %v2253_v47, %v2253_v47 }
  0x98   : > { %v925_v50 = vmul.f32 %v2254_v41, %v2254_v41  ;;  %v926_v51 = vmul.f32 %v2257_v42, %v2257_v42  ;;  %v927_v46 = vmul.f32 %v2258_v31, %v2258_v31  ;;  %v923_v52 = vadd.f32 %v2258_v31, %v2250_v4 }
  0x99   : > { %v2976_v22 = vsub.s32 5, %v2802_v10  ;;  %v951_v56 = vstv %s2956_s8  ;;  %v960_v27 = vstv %s2958_s10  ;;  %v928_v30 = vadd.f32 %v924_v24, %v907_v26  ;;  %s3095_s8 = sld [smem:[#allocation5 + %s1254_s5]]  ;;  %s1332_s10 = sadd.s32 10, %s2750_s23 }
  0x9a   : > { %v929_v62 = vadd.f32 %v925_v50, %v908_v32  ;;  %v930_v63 = vadd.f32 %v926_v51, %v909_v33  ;;  %v931_v58 = vadd.f32 %v927_v46, %v910_v38  ;;  %v2261_v0 = vunpack.c.l.bf16 %v2441_v55  ;;  %s3103_s19 = sld [smem:[#allocation3 + %s1332_s10]] }
  0x9b   : > { %v935_v59 = vrot.slane %v2927_v17, %v2976_v22  ;;  %v943_v60 = vrot.slane %v2945_v34, %v2976_v22  ;;  %v2262_v4 = vunpack.c.h.bf16 %v2441_v55  ;;  %v2265_v1 = vunpack.c.l.bf16 %v2442_v57 }
  0x9c   : > { %v2266_v11 = vunpack.c.h.bf16 %v2442_v57  ;;  %v2269_v2 = vunpack.c.l.bf16 %v2443_v61  ;;  %v2270_v20 = vunpack.c.h.bf16 %v2443_v61  ;;  %v2997_v45 = vunpack.c.l.bf16 %v973_v16 }
  0x9d   : > { %v936_v3 = vadd.f32 %v935_v59, %v920_v35  ;;  %v937_v5 = vadd.f32 %v935_v59, %v921_v54  ;;  %v938_v6 = vadd.f32 %v935_v59, %v922_v49  ;;  %v939_v7 = vadd.f32 %v935_v59, %v923_v52  ;;  %v2446_v59 = vld [vmem:[%s2781_s14 + $0x78] sm:$0xff]  }
  0x9e   : > { %v944_v8 = vadd.f32 %v943_v60, %v928_v30  ;;  %v945_v9 = vadd.f32 %v943_v60, %v929_v62  ;;  %v946_v12 = vadd.f32 %v943_v60, %v930_v63  ;;  %v947_v13 = vadd.f32 %v943_v60, %v931_v58 }
  0x9f   : > { %v956_v17 = vmul.f32 %v936_v3, %v936_v3  ;;  %v957_v14 = vmul.f32 %v937_v5, %v937_v5  ;;  %v958_v34 = vmul.f32 %v938_v6, %v938_v6  ;;  %v959_v15 = vmul.f32 %v939_v7, %v939_v7 }
  0xa0   : > { %v952_v18 = vmul.f32 %v951_v56, %v944_v8  ;;  %v953_v23 = vmul.f32 %v951_v56, %v945_v9  ;;  %v954_v25 = vmul.f32 %v951_v56, %v946_v12  ;;  %v2990_v26 = vmul.f32 %v951_v56, %v947_v13 }
  0xa1   : > { %v961_v32 = vmul.f32 %v960_v27, %v956_v17  ;;  %v962_v33 = vmul.f32 %v960_v27, %v957_v14  ;;  %v963_v19 = vmul.f32 %v960_v27, %v958_v34  ;;  %v2994_v39 = vmul.f32 %v960_v27, %v959_v15 }
  0xa2   : > { %v984_v47 = vmul.f32 %v2261_v0, %v2261_v0  ;;  %v985_v41 = vmul.f32 %v2262_v4, %v2262_v4  ;;  %v986_v42 = vmul.f32 %v2265_v1, %v2265_v1  ;;  %v987_v54 = vmul.f32 %v2266_v11, %v2266_v11 }
  0xa3   : > { %v965_v31 = vsub.f32 %v952_v18, %v961_v32  ;;  %v966_v38 = vsub.f32 %v953_v23, %v962_v33  ;;  %v967_v35 = vsub.f32 %v954_v25, %v963_v19  ;;  %v968_v49 = vsub.f32 %v2990_v26, %v2994_v39 }
  0xa4   : > { %v2273_v24 = vunpack.c.l.bf16 %v2444_v21  ;;  %v2274_v50 = vunpack.c.h.bf16 %v2444_v21  ;;  %v997_v51 = vadd.f32 %v2269_v2, %v2261_v0  ;;  %v998_v56 = vadd.f32 %v2270_v20, %v2262_v4 }
  0xa5   : > { %v3002_v46 = vadd.f32 %v965_v31, %v2964_v43  ;;  %v3005_v55 = vadd.f32 %v966_v38, %v2967_v48  ;;  %v3008_v52 = vadd.f32 %v967_v35, %v2970_v37  ;;  %v1001_v61 = vmul.f32 %v2269_v2, %v2269_v2  ;;  %v2445_v48 = vld [vmem:[%s2781_s14 + $0x70] sm:$0xff]   ;;  %v2448_v31 = vld [vmem:[%s2786_s17 + $0x78] sm:$0xff]  }
  0xa6   : > { %v999_v27 = vadd.f32 %v2273_v24, %v2265_v1  ;;  %v1000_v57 = vadd.f32 %v2274_v50, %v2266_v11  ;;  %v1002_v30 = vmul.f32 %v2270_v20, %v2270_v20  ;;  %v1003_v62 = vmul.f32 %v2273_v24, %v2273_v24 }
  0xa7   : > { %v1004_v63 = vmul.f32 %v2274_v50, %v2274_v50  ;;  %v3011_v58 = vsub.s32 6, %v2802_v10  ;;  %v3015_v43 = vmul.f32 %v2997_v45, %v2997_v45  ;;  %v1005_v60 = vadd.f32 %v1001_v61, %v984_v47 }
  0xa8   : > { %v1006_v37 = vadd.f32 %v1002_v30, %v985_v41  ;;  %v1029_v0 = vstv %s2988_s20  ;;  %v1038_v4 = vstv %s2992_s21  ;;  %v1007_v1 = vadd.f32 %v1003_v62, %v986_v42  ;;  %v2447_v42 = vld [vmem:[%s2786_s17 + $0x70] sm:$0xff]   ;;  %s3107_s20 = sld [smem:[#allocation5 + %s1332_s10]]  ;;  %s1407_s21 = sadd.s32 11, %s2750_s23 }
  0xa9   : > { %v1008_v11 = vadd.f32 %v1004_v63, %v987_v54  ;;  %v1012_v2 = vrot.slane %v2997_v45, %v3011_v58  ;;  %v1021_v20 = vrot.slane %v3015_v43, %v3011_v58  ;;  %v2277_v3 = vunpack.c.l.bf16 %v2445_v48  ;;  %s3147_s22 = sld [smem:[#allocation3 + %s1407_s21]] }
  0xaa   : > { %v2278_v5 = vunpack.c.h.bf16 %v2445_v48  ;;  %v2281_v6 = vunpack.c.l.bf16 %v2446_v59  ;;  %v2282_v7 = vunpack.c.h.bf16 %v2446_v59  ;;  %v972_v38 = vadd.f32 %v968_v49, %v2972_v44 }
  0xab   : > { %v1013_v8 = vadd.f32 %v1012_v2, %v997_v51  ;;  %v1014_v9 = vadd.f32 %v1012_v2, %v998_v56  ;;  %v1015_v12 = vadd.f32 %v1012_v2, %v999_v27  ;;  %v1016_v13 = vadd.f32 %v1012_v2, %v1000_v57  ;;  %v2449_v2 = vld [vmem:[%s2781_s14 + $0x80] sm:$0xff]  }
  0xac   : > { %v1022_v17 = vadd.f32 %v1021_v20, %v1005_v60  ;;  %v1023_v14 = vadd.f32 %v1021_v20, %v1006_v37  ;;  %v1024_v34 = vadd.f32 %v1021_v20, %v1007_v1  ;;  %v1025_v15 = vadd.f32 %v1021_v20, %v1008_v11 }
  0xad   : > { %v1034_v16 = vmul.f32 %v1013_v8, %v1013_v8  ;;  %v1035_v18 = vmul.f32 %v1014_v9, %v1014_v9  ;;  %v1036_v23 = vmul.f32 %v1015_v12, %v1015_v12  ;;  %v1037_v25 = vmul.f32 %v1016_v13, %v1016_v13  ;;  %v2450_v9 = vld [vmem:[%s2781_s14 + $0x88] sm:$0xff]   ;;  %v2451_v12 = vld [vmem:[%s2786_s17 + $0x80] sm:$0xff]  }
  0xae   : > { %v1030_v26 = vmul.f32 %v1029_v0, %v1022_v17  ;;  %v1031_v32 = vmul.f32 %v1029_v0, %v1023_v14  ;;  %v1032_v33 = vmul.f32 %v1029_v0, %v1024_v34  ;;  %v1033_v19 = vmul.f32 %v1029_v0, %v1025_v15 }
  0xaf   : > { %v1039_v39 = vmul.f32 %v1038_v4, %v1034_v16  ;;  %v1040_v21 = vmul.f32 %v1038_v4, %v1035_v18  ;;  %v1041_v47 = vmul.f32 %v1038_v4, %v1036_v23  ;;  %v1042_v41 = vmul.f32 %v1038_v4, %v1037_v25 }
  0xb0   : > { %v1060_v35 = vmul.f32 %v2277_v3, %v2277_v3  ;;  %v1061_v54 = vmul.f32 %v2278_v5, %v2278_v5  ;;  %v1062_v24 = vmul.f32 %v2281_v6, %v2281_v6  ;;  %v2285_v57 = vunpack.c.l.bf16 %v2447_v42 }
  0xb1   : > { %v1043_v50 = vsub.f32 %v1030_v26, %v1039_v39  ;;  %v1044_v51 = vsub.f32 %v1031_v32, %v1040_v21  ;;  %v1045_v56 = vsub.f32 %v1032_v33, %v1041_v47  ;;  %v1046_v27 = vsub.f32 %v1033_v19, %v1042_v41 }
  0xb2   : > { %v2286_v61 = vunpack.c.h.bf16 %v2447_v42  ;;  %v2289_v30 = vunpack.c.l.bf16 %v2448_v31  ;;  %v2290_v62 = vunpack.c.h.bf16 %v2448_v31  ;;  %v1063_v49 = vmul.f32 %v2282_v7, %v2282_v7  ;;  %v1126_v42 = vld [vmem:[%s2762_s15 + $0x4] sm:$0x1] }
  0xb3   : > { %v3034_v63 = vadd.f32 %v1043_v50, %v3002_v46  ;;  %v3037_v48 = vadd.f32 %v1044_v51, %v3005_v55  ;;  %v3040_v44 = vadd.f32 %v1045_v56, %v3008_v52  ;;  %v3042_v59 = vadd.f32 %v1046_v27, %v972_v38  ;;  %v2452_v27 = vld [vmem:[%s2786_s17 + $0x88] sm:$0xff]  }
  0xb4   : > { %v1073_v60 = vadd.f32 %v2285_v57, %v2277_v3  ;;  %v1074_v37 = vadd.f32 %v2286_v61, %v2278_v5  ;;  %v1075_v0 = vadd.f32 %v2289_v30, %v2281_v6  ;;  %v1077_v4 = vmul.f32 %v2285_v57, %v2285_v57 }
  0xb5   : > { %v1078_v1 = vmul.f32 %v2286_v61, %v2286_v61  ;;  %v1079_v11 = vmul.f32 %v2289_v30, %v2289_v30  ;;  %v1080_v46 = vmul.f32 %v2290_v62, %v2290_v62  ;;  %v1076_v20 = vadd.f32 %v2290_v62, %v2282_v7 }
  0xb6   : > { %v3046_v55 = vsub.s32 7, %v2802_v10  ;;  %v1104_v8 = vstv %s3026_s9  ;;  %v1113_v52 = vstv %s3028_s13  ;;  %v1081_v13 = vadd.f32 %v1077_v4, %v1060_v35  ;;  %s3163_s9 = sld [smem:[#allocation5 + %s1407_s21]]  ;;  %s1485_s13 = sadd.s32 12, %s2750_s23 }
  0xb7   : > { %v1082_v17 = vadd.f32 %v1078_v1, %v1061_v54  ;;  %v1083_v14 = vadd.f32 %v1079_v11, %v1062_v24  ;;  %v1084_v3 = vadd.f32 %v1080_v46, %v1063_v49  ;;  %v2293_v34 = vunpack.c.l.bf16 %v2449_v2  ;;  %s3186_s11 = sld [smem:[#allocation3 + %s1485_s13]] }
  0xb8   : > { %v1088_v5 = vrot.slane %v2997_v45, %v3046_v55  ;;  %v1096_v6 = vrot.slane %v3015_v43, %v3046_v55  ;;  %v2294_v7 = vunpack.c.h.bf16 %v2449_v2  ;;  %v2297_v15 = vunpack.c.l.bf16 %v2450_v9 }
  0xb9   : > { %v2298_v10 = vunpack.c.h.bf16 %v2450_v9  ;;  %v2301_v16 = vunpack.c.l.bf16 %v2451_v12  ;;  %v2302_v18 = vunpack.c.h.bf16 %v2451_v12  ;;  %v3065_v57 = vunpack.c.l.bf16 %v1126_v42 }
  0xba   : > { %v1089_v23 = vadd.f32 %v1088_v5, %v1073_v60  ;;  %v1090_v25 = vadd.f32 %v1088_v5, %v1074_v37  ;;  %v1091_v26 = vadd.f32 %v1088_v5, %v1075_v0  ;;  %v1092_v32 = vadd.f32 %v1088_v5, %v1076_v20 }
  0xbb   : > { %v1097_v33 = vadd.f32 %v1096_v6, %v1081_v13  ;;  %v1098_v19 = vadd.f32 %v1096_v6, %v1082_v17  ;;  %v1099_v39 = vadd.f32 %v1096_v6, %v1083_v14  ;;  %v1100_v21 = vadd.f32 %v1096_v6, %v1084_v3 }
  0xbc   : > { %v1109_v45 = vmul.f32 %v1089_v23, %v1089_v23  ;;  %v1110_v47 = vmul.f32 %v1090_v25, %v1090_v25  ;;  %v1111_v43 = vmul.f32 %v1091_v26, %v1091_v26  ;;  %v1112_v41 = vmul.f32 %v1092_v32, %v1092_v32 }
  0xbd   : > { %v1105_v31 = vmul.f32 %v1104_v8, %v1097_v33  ;;  %v1106_v38 = vmul.f32 %v1104_v8, %v1098_v19  ;;  %v1107_v35 = vmul.f32 %v1104_v8, %v1099_v39  ;;  %v3060_v54 = vmul.f32 %v1104_v8, %v1100_v21 }
  0xbe   : > { %v1114_v24 = vmul.f32 %v1113_v52, %v1109_v45  ;;  %v1115_v50 = vmul.f32 %v1113_v52, %v1110_v47  ;;  %v1116_v51 = vmul.f32 %v1113_v52, %v1111_v43  ;;  %v1117_v56 = vmul.f32 %v1113_v52, %v1112_v41 }
  0xbf   : > { %v1137_v61 = vmul.f32 %v2293_v34, %v2293_v34  ;;  %v1138_v30 = vmul.f32 %v2294_v7, %v2294_v7  ;;  %v1139_v62 = vmul.f32 %v2297_v15, %v2297_v15  ;;  %v1140_v0 = vmul.f32 %v2298_v10, %v2298_v10 }
  0xc0   : > { %v1118_v49 = vsub.f32 %v1105_v31, %v1114_v24  ;;  %v1119_v60 = vsub.f32 %v1106_v38, %v1115_v50  ;;  %v1120_v37 = vsub.f32 %v1107_v35, %v1116_v51  ;;  %v1121_v4 = vsub.f32 %v3060_v54, %v1117_v56  ;;  %v2455_v56 = vld [vmem:[%s2786_s17 + $0x90] sm:$0xff]  }
  0xc1   : > { %v2305_v1 = vunpack.c.l.bf16 %v2452_v27  ;;  %v2306_v11 = vunpack.c.h.bf16 %v2452_v27  ;;  %v1150_v46 = vadd.f32 %v2301_v16, %v2293_v34  ;;  %v1151_v52 = vadd.f32 %v2302_v18, %v2294_v7  ;;  %v2454_v7 = vld [vmem:[%s2781_s14 + $0x98] sm:$0xff]  }
  0xc2   : > { %v1122_v2 = vadd.f32 %v1118_v49, %v3034_v63  ;;  %v1123_v20 = vadd.f32 %v1119_v60, %v3037_v48  ;;  %v1124_v8 = vadd.f32 %v1120_v37, %v3040_v44  ;;  %v1154_v13 = vmul.f32 %v2301_v16, %v2301_v16  ;;  %v2453_v63 = vld [vmem:[%s2781_s14 + $0x90] sm:$0xff]   ;;  %v2456_v49 = vld [vmem:[%s2786_s17 + $0x98] sm:$0xff]  }
  0xc3   : > { %v1152_v9 = vadd.f32 %v2305_v1, %v2297_v15  ;;  %v1153_v12 = vadd.f32 %v2306_v11, %v2298_v10  ;;  %v1155_v17 = vmul.f32 %v2302_v18, %v2302_v18  ;;  %v1156_v14 = vmul.f32 %v2305_v1, %v2305_v1 }
  0xc4   : > { %v1157_v3 = vmul.f32 %v2306_v11, %v2306_v11  ;;  %v1165_v5 = vrot.slane %v3065_v57, %v2805_v29  ;;  %v3075_v6 = vmul.f32 %v3065_v57, %v3065_v57  ;;  %v1158_v34 = vadd.f32 %v1154_v13, %v1137_v61 }
  0xc5   : > { %v1159_v48 = vadd.f32 %v1155_v17, %v1138_v30  ;;  %v1182_v23 = vstv %s3058_s16  ;;  %v1191_v44 = vstv %s3062_s12  ;;  %v1160_v15 = vadd.f32 %v1156_v14, %v1139_v62  ;;  %s3194_s16 = sld [smem:[#allocation5 + %s1485_s13]]  ;;  %s1560_s12 = sadd.s32 13, %s2750_s23 }
  0xc6   : > { %v1161_v10 = vadd.f32 %v1157_v3, %v1140_v0  ;;  %v1166_v16 = vadd.f32 %v1165_v5, %v1150_v46  ;;  %v1167_v18 = vadd.f32 %v1165_v5, %v1151_v52  ;;  %v1168_v25 = vadd.f32 %v1165_v5, %v1152_v9  ;;  %s3211_s5 = sld [smem:[#allocation3 + %s1560_s12]] }
  0xc7   : > { %v1169_v26 = vadd.f32 %v1165_v5, %v1153_v12  ;;  %v1174_v32 = vrot.slane %v3075_v6, %v2805_v29  ;;  %v2309_v33 = vunpack.c.l.bf16 %v2453_v63  ;;  %v2310_v21 = vunpack.c.h.bf16 %v2453_v63 }
  0xc8   : > { %v1187_v19 = vmul.f32 %v1166_v16, %v1166_v16  ;;  %v1188_v39 = vmul.f32 %v1167_v18, %v1167_v18  ;;  %v2313_v45 = vunpack.c.l.bf16 %v2454_v7  ;;  %v1189_v31 = vmul.f32 %v1168_v25, %v1168_v25 }
  0xc9   : > { %v1175_v47 = vadd.f32 %v1174_v32, %v1158_v34  ;;  %v1176_v43 = vadd.f32 %v1174_v32, %v1159_v48  ;;  %v1177_v41 = vadd.f32 %v1174_v32, %v1160_v15  ;;  %v1178_v42 = vadd.f32 %v1174_v32, %v1161_v10 }
  0xca   : > { %v1190_v38 = vmul.f32 %v1169_v26, %v1169_v26  ;;  %v1192_v35 = vmul.f32 %v1191_v44, %v1187_v19  ;;  %v1193_v54 = vmul.f32 %v1191_v44, %v1188_v39  ;;  %v1125_v27 = vadd.f32 %v1121_v4, %v3042_v59 }
  0xcb   : > { %v1183_v24 = vmul.f32 %v1182_v23, %v1175_v47  ;;  %v1184_v50 = vmul.f32 %v1182_v23, %v1176_v43  ;;  %v1185_v29 = vmul.f32 %v1182_v23, %v1177_v41  ;;  %v1186_v51 = vmul.f32 %v1182_v23, %v1178_v42 }
  0xcc   : > { %v1194_v61 = vmul.f32 %v1191_v44, %v1189_v31  ;;  %v1195_v30 = vmul.f32 %v1191_v44, %v1190_v38  ;;  %v2314_v62 = vunpack.c.h.bf16 %v2454_v7  ;;  %v1213_v0 = vmul.f32 %v2309_v33, %v2309_v33  ;;  %v2457_v31 = vld [vmem:[%s2781_s14 + $0xa0] sm:$0xff]   ;;  %v2458_v38 = vld [vmem:[%s2781_s14 + $0xa8] sm:$0xff]  }
  0xcd   : > { %v1196_v60 = vsub.f32 %v1183_v24, %v1192_v35  ;;  %v1197_v37 = vsub.f32 %v1184_v50, %v1193_v54  ;;  %v1214_v1 = vmul.f32 %v2310_v21, %v2310_v21  ;;  %v1215_v52 = vmul.f32 %v2313_v45, %v2313_v45 }
  0xce   : > { %v1198_v11 = vsub.f32 %v1185_v29, %v1194_v61  ;;  %v1199_v46 = vsub.f32 %v1186_v51, %v1195_v30  ;;  %v2317_v9 = vunpack.c.l.bf16 %v2455_v56  ;;  %v1216_v13 = vmul.f32 %v2314_v62, %v2314_v62  ;;  %v1279_v29 = vld [vmem:[%s2762_s15 + $0x4] sm:$0x2] }
  0xcf   : > { %v3091_v12 = vadd.f32 %v1196_v60, %v1122_v2  ;;  %v2318_v17 = vunpack.c.h.bf16 %v2455_v56  ;;  %v2321_v14 = vunpack.c.l.bf16 %v2456_v49  ;;  %v1201_v3 = vadd.f32 %v1197_v37, %v1123_v20 }
  0xd0   : > { %v1202_v59 = vadd.f32 %v1198_v11, %v1124_v8  ;;  %v2322_v4 = vunpack.c.h.bf16 %v2456_v49  ;;  %v1226_v5 = vadd.f32 %v2317_v9, %v2309_v33  ;;  %v1230_v48 = vmul.f32 %v2317_v9, %v2317_v9 }
  0xd1   : > { %v1227_v63 = vadd.f32 %v2318_v17, %v2310_v21  ;;  %v1228_v34 = vadd.f32 %v2321_v14, %v2313_v45  ;;  %v1231_v23 = vmul.f32 %v2318_v17, %v2318_v17  ;;  %v1232_v7 = vmul.f32 %v2321_v14, %v2321_v14 }
  0xd2   : > { %v1229_v44 = vadd.f32 %v2322_v4, %v2314_v62  ;;  %v1233_v2 = vmul.f32 %v2322_v4, %v2322_v4  ;;  %v1241_v15 = vrot.slane %v3065_v57, %v2836_v36  ;;  %v1234_v10 = vadd.f32 %v1230_v48, %v1213_v0 }
  0xd3   : > { %v1235_v20 = vadd.f32 %v1231_v23, %v1214_v1  ;;  %v1249_v8 = vrot.slane %v3075_v6, %v2836_v36  ;;  %v1257_v16 = vstv %s3087_s30  ;;  %v1236_v18 = vadd.f32 %v1232_v7, %v1215_v52  ;;  %v2460_v52 = vld [vmem:[%s2786_s17 + $0xa8] sm:$0xff]   ;;  %s3228_s30 = sld [smem:[#allocation5 + %s1560_s12]] }
  0xd4   : > { %v1237_v25 = vadd.f32 %v1233_v2, %v1216_v13  ;;  %v1242_v26 = vadd.f32 %v1241_v15, %v1226_v5  ;;  %v1243_v32 = vadd.f32 %v1241_v15, %v1227_v63  ;;  %v1244_v33 = vadd.f32 %v1241_v15, %v1228_v34 }
  0xd5   : > { %v1245_v19 = vadd.f32 %v1241_v15, %v1229_v44  ;;  %v1250_v39 = vadd.f32 %v1249_v8, %v1234_v10  ;;  %v1251_v21 = vadd.f32 %v1249_v8, %v1235_v20  ;;  %v1252_v45 = vadd.f32 %v1249_v8, %v1236_v18 }
  0xd6   : > { %v1253_v57 = vadd.f32 %v1249_v8, %v1237_v25  ;;  %v1262_v47 = vmul.f32 %v1242_v26, %v1242_v26  ;;  %v1263_v43 = vmul.f32 %v1243_v32, %v1243_v32  ;;  %v1264_v41 = vmul.f32 %v1244_v33, %v1244_v33 }
  0xd7   : > { %v1258_v36 = vmul.f32 %v1257_v16, %v1250_v39  ;;  %v1259_v6 = vmul.f32 %v1257_v16, %v1251_v21  ;;  %v1265_v42 = vmul.f32 %v1245_v19, %v1245_v19  ;;  %v3109_v35 = vadd.f32 %v1199_v46, %v1125_v27  ;;  %v2459_v46 = vld [vmem:[%s2786_s17 + $0xa0] sm:$0xff]   ;;  %v2461_v21 = vld [vmem:[%s2781_s14 + $0xb0] sm:$0xff]  }
  0xd8   : > { %v1260_v54 = vmul.f32 %v1257_v16, %v1252_v45  ;;  %v3111_v24 = vmul.f32 %v1257_v16, %v1253_v57  ;;  %v1266_v50 = vstv %s3095_s8  ;;  %v2325_v62 = vunpack.c.l.bf16 %v2457_v31  ;;  %v2462_v45 = vld [vmem:[%s2781_s14 + $0xb8] sm:$0xff]   ;;  %s1638_s8 = sadd.s32 14, %s2750_s23 }
  0xd9   : > { %v1267_v51 = vmul.f32 %v1266_v50, %v1262_v47  ;;  %v1268_v56 = vmul.f32 %v1266_v50, %v1263_v43  ;;  %v1269_v61 = vmul.f32 %v1266_v50, %v1264_v41  ;;  %v3115_v30 = vmul.f32 %v1266_v50, %v1265_v42  ;;  %s3236_s10 = sld [smem:[#allocation3 + %s1638_s8]] }
  0xda   : > { %v2326_v49 = vunpack.c.h.bf16 %v2457_v31  ;;  %v2329_v60 = vunpack.c.l.bf16 %v2458_v38  ;;  %v2330_v37 = vunpack.c.h.bf16 %v2458_v38  ;;  %v3117_v11 = vunpack.c.l.bf16 %v1279_v29 }
  0xdb   : > { %v1271_v0 = vsub.f32 %v1258_v36, %v1267_v51  ;;  %v1272_v1 = vsub.f32 %v1259_v6, %v1268_v56  ;;  %v1273_v27 = vsub.f32 %v1260_v54, %v1269_v61  ;;  %v1274_v9 = vsub.f32 %v3111_v24, %v3115_v30 }
  0xdc   : > { %v1290_v13 = vmul.f32 %v2325_v62, %v2325_v62  ;;  %v1291_v17 = vmul.f32 %v2326_v49, %v2326_v49  ;;  %v1292_v14 = vmul.f32 %v2329_v60, %v2329_v60  ;;  %v1293_v34 = vmul.f32 %v2330_v37, %v2330_v37 }
  0xdd   : > { %v3124_v4 = vadd.f32 %v1271_v0, %v3091_v12  ;;  %v3126_v5 = vadd.f32 %v1272_v1, %v1201_v3  ;;  %v3128_v63 = vadd.f32 %v1273_v27, %v1202_v59  ;;  %v2333_v48 = vunpack.c.l.bf16 %v2459_v46  ;;  %v2463_v27 = vld [vmem:[%s2786_s17 + $0xb0] sm:$0xff]  }
  0xde   : > { %v2334_v23 = vunpack.c.h.bf16 %v2459_v46  ;;  %v2337_v44 = vunpack.c.l.bf16 %v2460_v52  ;;  %v2338_v7 = vunpack.c.h.bf16 %v2460_v52  ;;  %v1318_v2 = vrot.slane %v3117_v11, %v2871_v40  ;;  %v2464_v46 = vld [vmem:[%s2786_s17 + $0xb8] sm:$0xff]  }
  0xdf   : > { %v3134_v15 = vmul.f32 %v3117_v11, %v3117_v11  ;;  %v1335_v12 = vstv %s3103_s19  ;;  %v1344_v10 = vstv %s3107_s20  ;;  %v1303_v3 = vadd.f32 %v2333_v48, %v2325_v62  ;;  %s3240_s19 = sld [smem:[#allocation5 + %s1638_s8]] }
  0xe0   : > { %v1304_v20 = vadd.f32 %v2334_v23, %v2326_v49  ;;  %v1305_v59 = vadd.f32 %v2337_v44, %v2329_v60  ;;  %v1306_v8 = vadd.f32 %v2338_v7, %v2330_v37  ;;  %v1307_v16 = vmul.f32 %v2333_v48, %v2333_v48 }
  0xe1   : > { %v1308_v18 = vmul.f32 %v2334_v23, %v2334_v23  ;;  %v1309_v25 = vmul.f32 %v2337_v44, %v2337_v44  ;;  %v1310_v26 = vmul.f32 %v2338_v7, %v2338_v7  ;;  %v1319_v32 = vadd.f32 %v1318_v2, %v1303_v3 }
  0xe2   : > { %v1320_v33 = vadd.f32 %v1318_v2, %v1304_v20  ;;  %v1321_v19 = vadd.f32 %v1318_v2, %v1305_v59  ;;  %v1322_v39 = vadd.f32 %v1318_v2, %v1306_v8  ;;  %v1311_v57 = vadd.f32 %v1307_v16, %v1290_v13 }
  0xe3   : > { %v1312_v47 = vadd.f32 %v1308_v18, %v1291_v17  ;;  %v1313_v43 = vadd.f32 %v1309_v25, %v1292_v14  ;;  %v1314_v36 = vadd.f32 %v1310_v26, %v1293_v34  ;;  %v1327_v6 = vrot.slane %v3134_v15, %v2871_v40 }
  0xe4   : > { %v1340_v41 = vmul.f32 %v1319_v32, %v1319_v32  ;;  %v1341_v42 = vmul.f32 %v1320_v33, %v1320_v33  ;;  %v1342_v31 = vmul.f32 %v1321_v19, %v1321_v19  ;;  %v1343_v38 = vmul.f32 %v1322_v39, %v1322_v39 }
  0xe5   : > { %v2341_v54 = vunpack.c.l.bf16 %v2461_v21  ;;  %v2342_v24 = vunpack.c.h.bf16 %v2461_v21  ;;  %v2345_v50 = vunpack.c.l.bf16 %v2462_v45  ;;  %v1328_v29 = vadd.f32 %v1327_v6, %v1311_v57 }
  0xe6   : > { %v1329_v51 = vadd.f32 %v1327_v6, %v1312_v47  ;;  %v1330_v56 = vadd.f32 %v1327_v6, %v1313_v43  ;;  %v1331_v61 = vadd.f32 %v1327_v6, %v1314_v36  ;;  %v1345_v30 = vmul.f32 %v1344_v10, %v1340_v41 }
  0xe7   : > { %v1346_v62 = vmul.f32 %v1344_v10, %v1341_v42  ;;  %v1347_v49 = vmul.f32 %v1344_v10, %v1342_v31  ;;  %v3143_v60 = vmul.f32 %v1344_v10, %v1343_v38  ;;  %v1336_v40 = vmul.f32 %v1335_v12, %v1328_v29 }
  0xe8   : > { %v1337_v37 = vmul.f32 %v1335_v12, %v1329_v51  ;;  %v1338_v0 = vmul.f32 %v1335_v12, %v1330_v56  ;;  %v3149_v1 = vmul.f32 %v1335_v12, %v1331_v61  ;;  %v3154_v52 = vadd.f32 %v1274_v9, %v3109_v35 }
  0xe9   : > { %v2346_v13 = vunpack.c.h.bf16 %v2462_v45  ;;  %v1366_v17 = vmul.f32 %v2341_v54, %v2341_v54  ;;  %v1367_v14 = vmul.f32 %v2342_v24, %v2342_v24  ;;  %v1349_v34 = vsub.f32 %v1336_v40, %v1345_v30  ;;  %v2466_v30 = vld [vmem:[%s2781_s14 + $0xc8] sm:$0xff]  }
  0xea   : > { %v1350_v48 = vsub.f32 %v1337_v37, %v1346_v62  ;;  %v1351_v23 = vsub.f32 %v1338_v0, %v1347_v49  ;;  %v1368_v44 = vmul.f32 %v2345_v50, %v2345_v50  ;;  %v1352_v7 = vsub.f32 %v3149_v1, %v3143_v60 }
  0xeb   : > { %v2349_v2 = vunpack.c.l.bf16 %v2463_v27  ;;  %v2350_v10 = vunpack.c.h.bf16 %v2463_v27  ;;  %v2353_v12 = vunpack.c.l.bf16 %v2464_v46  ;;  %v1353_v3 = vadd.f32 %v1349_v34, %v3124_v4  ;;  %v2467_v34 = vld [vmem:[%s2786_s17 + $0xc0] sm:$0xff]  }
  0xec   : > { %v1354_v35 = vadd.f32 %v1350_v48, %v3126_v5  ;;  %v1355_v9 = vadd.f32 %v1351_v23, %v3128_v63  ;;  %v1369_v20 = vmul.f32 %v2346_v13, %v2346_v13  ;;  %v2354_v59 = vunpack.c.h.bf16 %v2464_v46 }
  0xed   : > { %v1379_v8 = vadd.f32 %v2349_v2, %v2341_v54  ;;  %v1380_v16 = vadd.f32 %v2350_v10, %v2342_v24  ;;  %v1381_v18 = vadd.f32 %v2353_v12, %v2345_v50  ;;  %v1383_v25 = vmul.f32 %v2349_v2, %v2349_v2  ;;  %v1432_v24 = vld [vmem:[%s2762_s15 + $0x4] sm:$0x4] }
  0xee   : > { %v1384_v26 = vmul.f32 %v2350_v10, %v2350_v10  ;;  %v1385_v32 = vmul.f32 %v2353_v12, %v2353_v12  ;;  %v1394_v33 = vrot.slane %v3117_v11, %v2906_v28  ;;  %v1382_v4 = vadd.f32 %v2354_v59, %v2346_v13  ;;  %v2465_v50 = vld [vmem:[%s2781_s14 + $0xc0] sm:$0xff]   ;;  %v2468_v10 = vld [vmem:[%s2786_s17 + $0xc8] sm:$0xff]  }
  0xef   : > { %v1386_v19 = vmul.f32 %v2354_v59, %v2354_v59  ;;  %v1402_v5 = vrot.slane %v3134_v15, %v2906_v28  ;;  %v1410_v63 = vstv %s3147_s22  ;;  %v1387_v39 = vadd.f32 %v1383_v25, %v1366_v17 }
  0xf0   : > { %v1388_v21 = vadd.f32 %v1384_v26, %v1367_v14  ;;  %v1389_v45 = vadd.f32 %v1385_v32, %v1368_v44  ;;  %v1395_v57 = vadd.f32 %v1394_v33, %v1379_v8  ;;  %v1396_v43 = vadd.f32 %v1394_v33, %v1380_v16 }
  0xf1   : > { %v1390_v47 = vadd.f32 %v1386_v19, %v1369_v20  ;;  %v1397_v36 = vadd.f32 %v1394_v33, %v1381_v18  ;;  %v1398_v6 = vadd.f32 %v1394_v33, %v1382_v4  ;;  %v1403_v41 = vadd.f32 %v1402_v5, %v1387_v39 }
  0xf2   : > { %v1404_v11 = vadd.f32 %v1402_v5, %v1388_v21  ;;  %v1405_v42 = vadd.f32 %v1402_v5, %v1389_v45  ;;  %v1415_v31 = vmul.f32 %v1395_v57, %v1395_v57  ;;  %v1416_v28 = vmul.f32 %v1396_v43, %v1396_v43  ;;  %v2469_v43 = vld [vmem:[%s2781_s14 + $0xd0] sm:$0xff]  }
  0xf3   : > { %v1406_v38 = vadd.f32 %v1402_v5, %v1390_v47  ;;  %v1417_v15 = vmul.f32 %v1397_v36, %v1397_v36  ;;  %v1418_v54 = vmul.f32 %v1398_v6, %v1398_v6  ;;  %v1411_v29 = vmul.f32 %v1410_v63, %v1403_v41 }
  0xf4   : > { %v1412_v51 = vmul.f32 %v1410_v63, %v1404_v11  ;;  %v1413_v56 = vmul.f32 %v1410_v63, %v1405_v42  ;;  %v1419_v61 = vstv %s3163_s9  ;;  %v3179_v0 = vunpack.c.l.bf16 %v1432_v24 }
  0xf5   : > { %v3174_v62 = vmul.f32 %v1410_v63, %v1406_v38  ;;  %v1420_v49 = vmul.f32 %v1419_v61, %v1415_v31  ;;  %v1421_v60 = vmul.f32 %v1419_v61, %v1416_v28  ;;  %v1422_v40 = vmul.f32 %v1419_v61, %v1417_v15 }
  0xf6   : > { %v3177_v37 = vmul.f32 %v1419_v61, %v1418_v54  ;;  %v2357_v1 = vunpack.c.l.bf16 %v2465_v50  ;;  %v2358_v27 = vunpack.c.h.bf16 %v2465_v50  ;;  %v2361_v14 = vunpack.c.l.bf16 %v2466_v30 }
  0xf7   : > { %v1424_v46 = vsub.f32 %v1411_v29, %v1420_v49  ;;  %v1425_v13 = vsub.f32 %v1412_v51, %v1421_v60  ;;  %v1426_v17 = vsub.f32 %v1413_v56, %v1422_v40  ;;  %v1356_v48 = vadd.f32 %v1352_v7, %v3154_v52 }
  0xf8   : > { %v1427_v23 = vsub.f32 %v3174_v62, %v3177_v37  ;;  %v2362_v44 = vunpack.c.h.bf16 %v2466_v30  ;;  %v1443_v2 = vmul.f32 %v2357_v1, %v2357_v1  ;;  %v1444_v8 = vmul.f32 %v2358_v27, %v2358_v27  ;;  %v2470_v30 = vld [vmem:[%s2781_s14 + $0xd8] sm:$0xff]  }
  0xf9   : > { %v3188_v12 = vadd.f32 %v1424_v46, %v1353_v3  ;;  %v3190_v20 = vadd.f32 %v1425_v13, %v1354_v35  ;;  %v3192_v59 = vadd.f32 %v1426_v17, %v1355_v9  ;;  %v1445_v16 = vmul.f32 %v2361_v14, %v2361_v14  ;;  %v2471_v46 = vld [vmem:[%s2786_s17 + $0xd0] sm:$0xff]  }
  0xfa   : > { %v1446_v18 = vmul.f32 %v2362_v44, %v2362_v44  ;;  %v2365_v52 = vunpack.c.l.bf16 %v2467_v34  ;;  %v2366_v7 = vunpack.c.h.bf16 %v2467_v34  ;;  %v2369_v25 = vunpack.c.l.bf16 %v2468_v10 }
  0xfb   : > { %v2370_v26 = vunpack.c.h.bf16 %v2468_v10  ;;  %v1471_v32 = vrot.slane %v3179_v0, %v2941_v53  ;;  %v3200_v3 = vmul.f32 %v3179_v0, %v3179_v0  ;;  %v1488_v31 = vstv %s3186_s11 }
  0xfc   : > { %v1456_v35 = vadd.f32 %v2365_v52, %v2357_v1  ;;  %v1457_v9 = vadd.f32 %v2366_v7, %v2358_v27  ;;  %v1460_v33 = vmul.f32 %v2365_v52, %v2365_v52  ;;  %v1461_v4 = vmul.f32 %v2366_v7, %v2366_v7 }
  0xfd   : > { %v1458_v19 = vadd.f32 %v2369_v25, %v2361_v14  ;;  %v1459_v5 = vadd.f32 %v2370_v26, %v2362_v44  ;;  %v1462_v63 = vmul.f32 %v2369_v25, %v2369_v25  ;;  %v1463_v39 = vmul.f32 %v2370_v26, %v2370_v26 }
  0xfe   : > { %v1464_v21 = vadd.f32 %v1460_v33, %v1443_v2  ;;  %v1465_v45 = vadd.f32 %v1461_v4, %v1444_v8  ;;  %v1472_v57 = vadd.f32 %v1471_v32, %v1456_v35  ;;  %v1473_v47 = vadd.f32 %v1471_v32, %v1457_v9 }
  0xff   : > { %v1466_v36 = vadd.f32 %v1462_v63, %v1445_v16  ;;  %v1467_v6 = vadd.f32 %v1463_v39, %v1446_v18  ;;  %v1474_v41 = vadd.f32 %v1471_v32, %v1458_v19  ;;  %v1475_v11 = vadd.f32 %v1471_v32, %v1459_v5  ;;  %v2472_v16 = vld [vmem:[%s2786_s17 + $0xd8] sm:$0xff]  }
 0x100   : > { %v1480_v42 = vrot.slane %v3200_v3, %v2941_v53  ;;  %v1493_v38 = vmul.f32 %v1472_v57, %v1472_v57  ;;  %v1494_v28 = vmul.f32 %v1473_v47, %v1473_v47  ;;  %v1497_v24 = vstv %s3194_s16 }
 0x101   : > { %v1495_v15 = vmul.f32 %v1474_v41, %v1474_v41  ;;  %v1496_v54 = vmul.f32 %v1475_v11, %v1475_v11  ;;  %v2373_v50 = vunpack.c.l.bf16 %v2469_v43  ;;  %v1431_v13 = vadd.f32 %v1427_v23, %v1356_v48 }
 0x102   : > { %v1481_v29 = vadd.f32 %v1480_v42, %v1464_v21  ;;  %v1482_v51 = vadd.f32 %v1480_v42, %v1465_v45  ;;  %v1483_v56 = vadd.f32 %v1480_v42, %v1466_v36  ;;  %v1484_v61 = vadd.f32 %v1480_v42, %v1467_v6 }
 0x103   : > { %v1498_v62 = vmul.f32 %v1497_v24, %v1493_v38  ;;  %v1499_v49 = vmul.f32 %v1497_v24, %v1494_v28  ;;  %v1500_v53 = vmul.f32 %v1497_v24, %v1495_v15  ;;  %v3213_v60 = vmul.f32 %v1497_v24, %v1496_v54 }
 0x104   : > { %v1489_v40 = vmul.f32 %v1488_v31, %v1481_v29  ;;  %v1490_v37 = vmul.f32 %v1488_v31, %v1482_v51  ;;  %v1491_v1 = vmul.f32 %v1488_v31, %v1483_v56  ;;  %v3215_v27 = vmul.f32 %v1488_v31, %v1484_v61  ;;  %v2473_v51 = vld [vmem:[%s2781_s14 + $0xe0] sm:$0xff]  }
 0x105   : > { %v2374_v17 = vunpack.c.h.bf16 %v2469_v43  ;;  %v2377_v14 = vunpack.c.l.bf16 %v2470_v30  ;;  %v2378_v34 = vunpack.c.h.bf16 %v2470_v30  ;;  %v1519_v8 = vmul.f32 %v2373_v50, %v2373_v50 }
 0x106   : > { %v1502_v44 = vsub.f32 %v1489_v40, %v1498_v62  ;;  %v1503_v2 = vsub.f32 %v1490_v37, %v1499_v49  ;;  %v1504_v10 = vsub.f32 %v1491_v1, %v1500_v53  ;;  %v1505_v18 = vsub.f32 %v3215_v27, %v3213_v60  ;;  %v1585_v49 = vld [vmem:[%s2762_s15 + $0x4] sm:$0x8]  ;;  %v2474_v53 = vld [vmem:[%s2781_s14 + $0xe8] sm:$0xff]   ;;  %s1713_s15 = sadd.s32 15, %s2750_s23 }
 0x107   : > { %v1520_v52 = vmul.f32 %v2374_v17, %v2374_v17  ;;  %v1521_v7 = vmul.f32 %v2377_v14, %v2377_v14  ;;  %v2381_v25 = vunpack.c.l.bf16 %v2471_v46  ;;  %v1522_v32 = vmul.f32 %v2378_v34, %v2378_v34 }
 0x108   : > { %v1506_v26 = vadd.f32 %v1502_v44, %v3188_v12  ;;  %v1507_v48 = vadd.f32 %v1503_v2, %v3190_v20  ;;  %v3224_v23 = vadd.f32 %v1504_v10, %v3192_v59  ;;  %v2382_v35 = vunpack.c.h.bf16 %v2471_v46 }
 0x109   : > { %v2385_v9 = vunpack.c.l.bf16 %v2472_v16  ;;  %v2386_v33 = vunpack.c.h.bf16 %v2472_v16  ;;  %v1532_v4 = vadd.f32 %v2381_v25, %v2373_v50  ;;  %v1536_v19 = vmul.f32 %v2381_v25, %v2381_v25  ;;  %v2476_v16 = vld [vmem:[%s2786_s17 + $0xe8] sm:$0xff]  }
 0x10a   : > { %v1547_v5 = vrot.slane %v3179_v0, %v2976_v22  ;;  %v1555_v12 = vrot.slane %v3200_v3, %v2976_v22  ;;  %v1563_v20 = vstv %s3211_s5  ;;  %v1533_v63 = vadd.f32 %v2382_v35, %v2374_v17 }
 0x10b   : > { %v1534_v59 = vadd.f32 %v2385_v9, %v2377_v14  ;;  %v1535_v39 = vadd.f32 %v2386_v33, %v2378_v34  ;;  %v1537_v21 = vmul.f32 %v2382_v35, %v2382_v35  ;;  %v1538_v45 = vmul.f32 %v2385_v9, %v2385_v9 }
 0x10c   : > { %v1539_v57 = vmul.f32 %v2386_v33, %v2386_v33  ;;  %v1540_v47 = vadd.f32 %v1536_v19, %v1519_v8  ;;  %v1548_v43 = vadd.f32 %v1547_v5, %v1532_v4  ;;  %v1549_v6 = vadd.f32 %v1547_v5, %v1533_v63  ;;  %v2475_v8 = vld [vmem:[%s2786_s17 + $0xe0] sm:$0xff]  }
 0x10d   : > { %v1541_v36 = vadd.f32 %v1537_v21, %v1520_v52  ;;  %v1550_v41 = vadd.f32 %v1547_v5, %v1534_v59  ;;  %v1551_v11 = vadd.f32 %v1547_v5, %v1535_v39  ;;  %v1542_v0 = vadd.f32 %v1538_v45, %v1521_v7 }
 0x10e   : > { %v1543_v42 = vadd.f32 %v1539_v57, %v1522_v32  ;;  %v1556_v31 = vadd.f32 %v1555_v12, %v1540_v47  ;;  %v1568_v22 = vmul.f32 %v1548_v43, %v1548_v43  ;;  %v1569_v38 = vmul.f32 %v1549_v6, %v1549_v6 }
 0x10f   : > { %v1557_v3 = vadd.f32 %v1555_v12, %v1541_v36  ;;  %v1570_v28 = vmul.f32 %v1550_v41, %v1550_v41  ;;  %v1571_v15 = vmul.f32 %v1551_v11, %v1551_v11  ;;  %v1558_v54 = vadd.f32 %v1555_v12, %v1542_v0  ;;  %v2477_v11 = vld [vmem:[%s2781_s14 + $0xf0] sm:$0xff]   ;;  %v2478_v0 = vld [vmem:[%s2781_s14 + $0xf8] sm:$0xff]   ;;  %s3278_s14 = sld [smem:[#allocation3 + %s1713_s15]] }
 0x110   : > { %v1559_v24 = vadd.f32 %v1555_v12, %v1543_v42  ;;  %v1564_v50 = vmul.f32 %v1563_v20, %v1556_v31  ;;  %v1572_v29 = vstv %s3228_s30  ;;  %v3244_v60 = vadd.f32 %v1505_v18, %v1431_v13 }
 0x111   : > { %v1565_v56 = vmul.f32 %v1563_v20, %v1557_v3  ;;  %v1573_v61 = vmul.f32 %v1572_v29, %v1568_v22  ;;  %v1574_v30 = vmul.f32 %v1572_v29, %v1569_v38  ;;  %v1575_v62 = vmul.f32 %v1572_v29, %v1570_v28 }
 0x112   : > { %v1566_v40 = vmul.f32 %v1563_v20, %v1558_v54  ;;  %v3246_v37 = vmul.f32 %v1563_v20, %v1559_v24  ;;  %v3248_v1 = vmul.f32 %v1572_v29, %v1571_v15  ;;  %v2389_v17 = vunpack.c.l.bf16 %v2473_v51 }
 0x113   : > { %v1577_v27 = vsub.f32 %v1564_v50, %v1573_v61  ;;  %v1578_v46 = vsub.f32 %v1565_v56, %v1574_v30  ;;  %v2390_v14 = vunpack.c.h.bf16 %v2473_v51  ;;  %v3250_v44 = vunpack.c.l.bf16 %v1585_v49 }
 0x114   : > { %v1579_v34 = vsub.f32 %v1566_v40, %v1575_v62  ;;  %v2393_v2 = vunpack.c.l.bf16 %v2474_v53  ;;  %v2394_v10 = vunpack.c.h.bf16 %v2474_v53  ;;  %v1580_v13 = vsub.f32 %v3246_v37, %v3248_v1 }
 0x115   : > { %v3256_v18 = vadd.f32 %v1577_v27, %v1506_v26  ;;  %v3258_v52 = vadd.f32 %v1578_v46, %v1507_v48  ;;  %v1596_v7 = vmul.f32 %v2389_v17, %v2389_v17  ;;  %v1597_v32 = vmul.f32 %v2390_v14, %v2390_v14 }
 0x116   : > { %v3261_v25 = vadd.f32 %v1579_v34, %v3224_v23  ;;  %v1598_v35 = vmul.f32 %v2393_v2, %v2393_v2  ;;  %v1599_v9 = vmul.f32 %v2394_v10, %v2394_v10  ;;  %v2397_v33 = vunpack.c.l.bf16 %v2475_v8 }
 0x117   : > { %v2398_v4 = vunpack.c.h.bf16 %v2475_v8  ;;  %v2401_v19 = vunpack.c.l.bf16 %v2476_v16  ;;  %v2402_v5 = vunpack.c.h.bf16 %v2476_v16  ;;  %v1624_v12 = vrot.slane %v3250_v44, %v3011_v58 }
 0x118   : > { %v3267_v26 = vmul.f32 %v3250_v44, %v3250_v44  ;;  %v1641_v48 = vstv %s3236_s10  ;;  %v1650_v20 = vstv %s3240_s19  ;;  %v1609_v23 = vadd.f32 %v2397_v33, %v2389_v17  ;;  %v2479_v17 = vld [vmem:[%s2786_s17 + $0xf0] sm:$0xff]  }
 0x119   : > { %v1610_v63 = vadd.f32 %v2398_v4, %v2390_v14  ;;  %v1611_v59 = vadd.f32 %v2401_v19, %v2393_v2  ;;  %v1612_v39 = vadd.f32 %v2402_v5, %v2394_v10  ;;  %v1613_v21 = vmul.f32 %v2397_v33, %v2397_v33  ;;  %v2480_v14 = vld [vmem:[%s2786_s17 + $0xf8] sm:$0xff]   ;;  %s3288_s17 = sld [smem:[#allocation5 + %s1713_s15]] }
 0x11a   : > { %v1614_v45 = vmul.f32 %v2398_v4, %v2398_v4  ;;  %v1615_v57 = vmul.f32 %v2401_v19, %v2401_v19  ;;  %v1616_v47 = vmul.f32 %v2402_v5, %v2402_v5  ;;  %v1625_v43 = vadd.f32 %v1624_v12, %v1609_v23 }
 0x11b   : > { %v1626_v36 = vadd.f32 %v1624_v12, %v1610_v63  ;;  %v1627_v6 = vadd.f32 %v1624_v12, %v1611_v59  ;;  %v1628_v41 = vadd.f32 %v1624_v12, %v1612_v39  ;;  %v1617_v42 = vadd.f32 %v1613_v21, %v1596_v7 }
 0x11c   : > { %v1618_v31 = vadd.f32 %v1614_v45, %v1597_v32  ;;  %v1619_v22 = vadd.f32 %v1615_v57, %v1598_v35  ;;  %v1620_v3 = vadd.f32 %v1616_v47, %v1599_v9  ;;  %v1633_v38 = vrot.slane %v3267_v26, %v3011_v58 }
 0x11d   : > { %v1646_v28 = vmul.f32 %v1625_v43, %v1625_v43  ;;  %v1647_v15 = vmul.f32 %v1626_v36, %v1626_v36  ;;  %v1648_v54 = vmul.f32 %v1627_v6, %v1627_v6  ;;  %v1649_v24 = vmul.f32 %v1628_v41, %v1628_v41 }
 0x11e   : > { %v2405_v50 = vunpack.c.l.bf16 %v2477_v11  ;;  %v2406_v29 = vunpack.c.h.bf16 %v2477_v11  ;;  %v2409_v51 = vunpack.c.l.bf16 %v2478_v0  ;;  %v1634_v56 = vadd.f32 %v1633_v38, %v1617_v42 }
 0x11f   : > { %v1635_v61 = vadd.f32 %v1633_v38, %v1618_v31  ;;  %v1636_v30 = vadd.f32 %v1633_v38, %v1619_v22  ;;  %v1637_v62 = vadd.f32 %v1633_v38, %v1620_v3  ;;  %v1651_v49 = vmul.f32 %v1650_v20, %v1646_v28 }
 0x120   : > { %v1652_v53 = vmul.f32 %v1650_v20, %v1647_v15  ;;  %v1653_v40 = vmul.f32 %v1650_v20, %v1648_v54  ;;  %v1654_v37 = vmul.f32 %v1650_v20, %v1649_v24  ;;  %v1642_v58 = vmul.f32 %v1641_v48, %v1634_v56 }
 0x121   : > { %v1643_v1 = vmul.f32 %v1641_v48, %v1635_v61  ;;  %v1644_v27 = vmul.f32 %v1641_v48, %v1636_v30  ;;  %v1645_v46 = vmul.f32 %v1641_v48, %v1637_v62  ;;  %v1584_v34 = vadd.f32 %v1580_v13, %v3244_v60 }
 0x122   : > { %v2410_v2 = vunpack.c.h.bf16 %v2478_v0  ;;  %v1672_v10 = vmul.f32 %v2405_v50, %v2405_v50  ;;  %v1673_v8 = vmul.f32 %v2406_v29, %v2406_v29  ;;  %v1655_v16 = vsub.f32 %v1642_v58, %v1651_v49 }
 0x123   : > { %v1656_v7 = vsub.f32 %v1643_v1, %v1652_v53  ;;  %v1657_v32 = vsub.f32 %v1644_v27, %v1653_v40  ;;  %v1674_v35 = vmul.f32 %v2409_v51, %v2409_v51  ;;  %v1658_v9 = vsub.f32 %v1645_v46, %v1654_v37 }
 0x124   : > { %v2413_v33 = vunpack.c.l.bf16 %v2479_v17  ;;  %v2414_v4 = vunpack.c.h.bf16 %v2479_v17  ;;  %v2417_v19 = vunpack.c.l.bf16 %v2480_v14  ;;  %v1659_v5 = vadd.f32 %v1655_v16, %v3256_v18 }
 0x125   : > { %v1660_v12 = vadd.f32 %v1656_v7, %v3258_v52  ;;  %v1661_v48 = vadd.f32 %v1657_v32, %v3261_v25  ;;  %v1675_v60 = vmul.f32 %v2410_v2, %v2410_v2  ;;  %v2418_v13 = vunpack.c.h.bf16 %v2480_v14 }
 0x126   : > { %v1685_v20 = vadd.f32 %v2413_v33, %v2405_v50  ;;  %v1686_v23 = vadd.f32 %v2414_v4, %v2406_v29  ;;  %v1687_v63 = vadd.f32 %v2417_v19, %v2409_v51  ;;  %v1689_v59 = vmul.f32 %v2413_v33, %v2413_v33 }
 0x127   : > { %v1690_v39 = vmul.f32 %v2414_v4, %v2414_v4  ;;  %v1691_v21 = vmul.f32 %v2417_v19, %v2417_v19  ;;  %v1700_v45 = vrot.slane %v3250_v44, %v3046_v55  ;;  %v1688_v18 = vadd.f32 %v2418_v13, %v2410_v2 }
 0x128   : > { %v1692_v57 = vmul.f32 %v2418_v13, %v2418_v13  ;;  %v1708_v52 = vrot.slane %v3267_v26, %v3046_v55  ;;  %v1716_v25 = vstv %s3278_s14  ;;  %v1693_v47 = vadd.f32 %v1689_v59, %v1672_v10 }
 0x129   : > { %v1694_v43 = vadd.f32 %v1690_v39, %v1673_v8  ;;  %v1695_v36 = vadd.f32 %v1691_v21, %v1674_v35  ;;  %v1701_v6 = vadd.f32 %v1700_v45, %v1685_v20  ;;  %v1702_v11 = vadd.f32 %v1700_v45, %v1686_v23 }
 0x12a   : > { %v1696_v41 = vadd.f32 %v1692_v57, %v1675_v60  ;;  %v1703_v0 = vadd.f32 %v1700_v45, %v1687_v63  ;;  %v1704_v42 = vadd.f32 %v1700_v45, %v1688_v18  ;;  %v1709_v31 = vadd.f32 %v1708_v52, %v1693_v47 }
 0x12b   : > { %v1710_v22 = vadd.f32 %v1708_v52, %v1694_v43  ;;  %v1711_v3 = vadd.f32 %v1708_v52, %v1695_v36  ;;  %v1721_v38 = vmul.f32 %v1701_v6, %v1701_v6  ;;  %v1722_v28 = vmul.f32 %v1702_v11, %v1702_v11 }
 0x12c   : > { %v1712_v44 = vadd.f32 %v1708_v52, %v1696_v41  ;;  %v1723_v15 = vmul.f32 %v1703_v0, %v1703_v0  ;;  %v1724_v54 = vmul.f32 %v1704_v42, %v1704_v42  ;;  %v1717_v24 = vmul.f32 %v1716_v25, %v1709_v31 }
 0x12d   : > { %v1718_v55 = vmul.f32 %v1716_v25, %v1710_v22  ;;  %v1719_v26 = vmul.f32 %v1716_v25, %v1711_v3  ;;  %v1725_v50 = vstv %s3288_s17  ;;  %v1662_v30 = vadd.f32 %v1658_v9, %v1584_v34 }
 0x12e   : > { %v1720_v29 = vmul.f32 %v1716_v25, %v1712_v44  ;;  %v1726_v51 = vmul.f32 %v1725_v50, %v1721_v38  ;;  %v1727_v56 = vmul.f32 %v1725_v50, %v1722_v28  ;;  %v1728_v61 = vmul.f32 %v1725_v50, %v1723_v15 }
 0x12f   : > { %v1729_v62 = vmul.f32 %v1725_v50, %v1724_v54 }
 0x130   : > { %v1730_v49 = vsub.f32 %v1717_v24, %v1726_v51  ;;  %v1731_v53 = vsub.f32 %v1718_v55, %v1727_v56  ;;  %v1732_v40 = vsub.f32 %v1719_v26, %v1728_v61 }
 0x131   : > { %v1733_v37 = vsub.f32 %v1720_v29, %v1729_v62  ;;  %1745 = sbr.rel (%p2159_p13) target bundleno = 387 (0x183), region = 60 }
 0x132   : > { %v1734_v58 = vadd.f32 %v1730_v49, %v1659_v5  ;;  %v1735_v1 = vadd.f32 %v1731_v53, %v1660_v12  ;;  %v1736_v27 = vadd.f32 %v1732_v40, %v1661_v48 }
 0x133   : > { %v1737_v46 = vadd.f32 %v1733_v37, %v1662_v30 }
 0x134   : > { %1738 = vst [vmem:[#allocation2 + $0x10] sm:$0xff] %v1734_v58  ;;  %1739 = vst [vmem:[#allocation2] sm:$0xff] %v1735_v1 }
 0x135   : > { %1740 = vst [vmem:[#allocation2 + $0x18] sm:$0xff] %v1736_v27  ;;  %1741 = vst [vmem:[#allocation2 + $0x8] sm:$0xff] %v1737_v46 }
 0x136   : > { %v1780_v63 = vld [vmem:[%s2767_s18] sm:$0xff]  ;;  %v1781_v59 = vld [vmem:[%s2767_s18 + $0x8] sm:$0xff]  ;;  %v1782_v21 = vld [vmem:[%s2767_s18 + $0x10] sm:$0xff] }
 0x137   : > { %v1783_v18 = vld [vmem:[%s2767_s18 + $0x18] sm:$0xff] }
 0x13b   : > { %v1746_v17 = vld [vmem:[#allocation2 + $0x10] sm:$0xff]  ;;  %v1747_v14 = vld [vmem:[#allocation2] sm:$0xff] }
 0x13c   : > { %v1748_v2 = vld [vmem:[#allocation2 + $0x18] sm:$0xff]  ;;  %v1749_v34 = vld [vmem:[#allocation2 + $0x8] sm:$0xff]  ;;  %v1750_v10 = vmax.f32 %v1746_v17, %v1747_v14 }
 0x13d   : > { %v1751_v8 = vmax.f32 %v1748_v2, %v1749_v34 }
 0x13f   : > { %v1752_v16 = vmax.f32 %v1750_v10, %v1751_v8 }
 0x141   : > { %v1753_v7 = vrot.slane %v1752_v16, 4 }
 0x143   : > { %v1754_v32 = vmax.f32 %v1752_v16, %v1753_v7 }
 0x145   : > { %v1755_v35 = vrot.slane %v1754_v32, 2 }
 0x147   : > { %v1756_v9 = vmax.f32 %v1754_v32, %v1755_v35 }
 0x149   : > { %v1757_v33 = vrot.slane %v1756_v9, 1 }
 0x14b   : > { %v1758_v4 = vmax.f32 %v1756_v9, %v1757_v33 }
 0x14d   : > { %v1759_v19 = vsub.f32 %v1746_v17, %v1758_v4  ;;  %v1760_v5 = vsub.f32 %v1747_v14, %v1758_v4  ;;  %v1761_v12 = vsub.f32 %v1748_v2, %v1758_v4  ;;  %v1762_v48 = vsub.f32 %v1749_v34, %v1758_v4 }
 0x14f   : > { %v1763_v60 = vmul.f32 1.442695, %v1759_v19  ;;  %v1765_v13 = vmul.f32 1.442695, %v1760_v5  ;;  %v1767_v20 = vmul.f32 1.442695, %v1761_v12 }
 0x150   : > { %v1769_v23 = vmul.f32 1.442695, %v1762_v48 }
 0x151   : > { %2543 = vpow2.f32 %v1763_v60 }
 0x152   : > { %2545 = vpow2.f32 %v1765_v13 }
 0x153   : > { %2547 = vpow2.f32 %v1767_v20 }
 0x154   : > { %2549 = vpow2.f32 %v1769_v23 }
 0x15e   : > { %v2544_v39 = vpop.eup %2543 }
 0x15f   : > { %v2546_v45 = vpop.eup %2545  ;;  %v1784_v57 = vmul.f32 %v2544_v39, %v1780_v63 }
 0x160   : > { %v2548_v52 = vpop.eup %2547  ;;  %v1771_v25 = vadd.f32 %v2546_v45, %v2544_v39  ;;  %v1785_v47 = vmul.f32 %v2546_v45, %v1781_v59  ;;  %v1797_v43 = vmax.f32 %v2544_v39, %v2546_v45 }
 0x161   : > { %v2550_v36 = vpop.eup %2549  ;;  %v1786_v6 = vmul.f32 %v2548_v52, %v1782_v21 }
 0x162   : > { %v1772_v41 = vadd.f32 %v2548_v52, %v1771_v25  ;;  %v1787_v11 = vmul.f32 %v2550_v36, %v1783_v18  ;;  %v1788_v0 = vadd.f32 %v1785_v47, %v1784_v57  ;;  %v1798_v42 = vmax.f32 %v2548_v52, %v2550_v36 }
 0x164   : > { %v1773_v31 = vadd.f32 %v2550_v36, %v1772_v41  ;;  %v1789_v22 = vadd.f32 %v1788_v0, %v1786_v6  ;;  %v1799_v3 = vmax.f32 %v1797_v43, %v1798_v42 }
 0x166   : > { %v1774_v38 = vrot.slane %v1773_v31, 4  ;;  %v1790_v44 = vadd.f32 %v1789_v22, %v1787_v11  ;;  %v1800_v54 = vrot.slane %v1799_v3, 4 }
 0x168   : > { %v1775_v28 = vadd.f32 %v1774_v38, %v1773_v31  ;;  %v1791_v15 = vrot.slane %v1790_v44, 4  ;;  %v1801_v50 = vmax.f32 %v1799_v3, %v1800_v54 }
 0x16a   : > { %v1776_v24 = vrot.slane %v1775_v28, 2  ;;  %v1792_v26 = vadd.f32 %v1791_v15, %v1790_v44  ;;  %v1802_v61 = vrot.slane %v1801_v50, 2 }
 0x16c   : > { %v1777_v55 = vadd.f32 %v1776_v24, %v1775_v28  ;;  %v1793_v56 = vrot.slane %v1792_v26, 2  ;;  %v1803_v62 = vmax.f32 %v1801_v50, %v1802_v61 }
 0x16e   : > { %v1778_v29 = vrot.slane %v1777_v55, 1  ;;  %v1794_v30 = vadd.f32 %v1793_v56, %v1792_v26  ;;  %v1804_v53 = vrot.slane %v1803_v62, 1 }
 0x170   : > { %v1779_v51 = vadd.f32 %v1778_v29, %v1777_v55  ;;  %v1795_v49 = vrot.slane %v1794_v30, 1  ;;  %v1805_v37 = vmax.f32 %v1803_v62, %v1804_v53 }
 0x172   : > { %2551 = vrcp.f32 %v1779_v51  ;;  %v1796_v40 = vadd.f32 %v1795_v49, %v1794_v30 }
 0x17f   : > { %v2552_v58 = vpop.eup %2551 }
 0x180   : > { %v1807_v1 = vmul.f32 %v2552_v58, %v1796_v40  ;;  %v1809_v27 = vmul.f32 %v2552_v58, %v1805_v37 }
 0x182   : > { %1808 = vst [vmem:[%s497_s4] sm:$0x1] %v1807_v1  ;;  %1810 = vst [vmem:[%s503_s29] sm:$0x1] %v1809_v27 }
 0x183 PF: > { %s20_s28 = sadd.s32 1, %s2629_s28   ;;  %s3348_s21 = sld [smem:[#allocation9_spill]] }
 0x184   : > { %p17_p0 = scmp.ge.s32.totalorder %s20_s28, 6   ;;  %s3349_s22 = sld [smem:[#allocation10_spill]] }
 0x185   : > { %s3350_s24 = smov %s2621_s26  ;;  %s3351_s25 = smov %s2625_s27 }
 0x186   :  { %19 = sbr.rel (!%p17_p0) target bundleno = 7 (0x7), region = 142 }
 0x189   : > { %s3352_s26 = smov %s3348_s21 }
 0x18a   : > { %s3353_s27 = smov %s3349_s22 }
 0x18b   :  { %1852 = vsyncpa [#allocation4], 1 }
 0x18c   :  { %1854 = vsyncpa [#allocation4 + $0x1], 1 }
 0x18d   :  { %1855 = vsyncpa [#allocation6], 1 }

// kernel: cascade_rednet_forward.5
= control target key start
LH: loop header
LB: loop body
LE: loop exit
PB: predicated region body
PF: predicated region fallthrough
CT: control target
= control target key end

     0   :  { %13 = vsyncpa [#allocation4], 0  ;;  %s2406_s0 = inlined_call_operand.vmem [shape: bf16[2,16,256], index: 0, kind: input, shape index: {}]   ;;  %s2407_s1 = inlined_call_operand.vmem [shape: bf16[2,16,8,256], index: 1, kind: input, shape index: {}]   ;;  %s2408_s2 = inlined_call_operand.vmem [shape: bf16[2,16,8,256], index: 2, kind: input, shape index: {}]   ;;  %s2409_s3 = inlined_call_operand.vmem [shape: f32[2,8,256], index: 3, kind: input, shape index: {}]   ;;  %s2410_s4 = inlined_call_operand.vmem [shape: f32[16], index: 4, kind: input, shape index: {}]   ;;  %s2411_s5 = inlined_call_operand.vmem [shape: f32[16], index: 5, kind: input, shape index: {}]   ;;  %s2412_s6 = inlined_call_operand.vmem [shape: f32[2,1,256], index: 6, kind: output, shape index: {0}]   ;;  %s2413_s7 = inlined_call_operand.vmem [shape: f32[2,1,256], index: 7, kind: output, shape index: {1}]  }
   0x1   :  { %14 = vsyncpa [#allocation6], 0  ;;  %s1978_s24 = smov 0   ;;  %s1980_s25 = smov 0  }
   0x2   :  { %s1982_s26 = smov 0  }
   0x3 LB: > { %s1734_s27 = sadd.s32 4294967295, %s1933_s26   ;;  %s39_s28 = sadd.s32 1, %s1929_s25  ;;  %s1933_s26 = sphi %s1982_s26, %s20_s26   ;;  %s1929_s25 = sphi %s1980_s25, %s2423_s25   ;;  %s1925_s24 = sphi %s1978_s24, %s2422_s24  }
   0x4   : > { %p41_p0 = scmp.ge.s32.totalorder %s39_s28, 2  ;;  %p1736_p1 = scmp.ge.s32.totalorder %s1933_s26, 1 }
   0x5   : > { %p260_p2 = scmp.lt.s32.totalorder %s1933_s26, 3  ;;  %p2003_p4 = scmp.eq.s32.totalorder %s1734_s27, 0 }
   0x6   : > { %s2425_s28 = smov (%p41_p0, %s39_s28), 0  ;;  %s273_s10 = sshll.u32 %s2410_s4, 4  ;;  %s274_s10 = int_to_ptr.vmem [resolvable:$true] %s273_s10 }
   0x7   : > { %p1999_p3 = pnand %p1736_p1, %p260_p2  ;;  %s284_s13 = sshll.u32 %s2411_s5, 4  ;;  %s285_s13 = int_to_ptr.vmem [resolvable:$true] %s284_s13 }
   0x8   : > { %s2418_s30 = scalar_select %p2003_p4, 1, 0 }
   0x9   : > { %s2417_s29 = scalar_select %p1999_p3, 1, 0 }
   0xa   : > { %p1827_p5 = pneg %p1999_p3  ;;  %s1873_s15 = scalar_lea.vmem %s274_s10, 16 }
   0xb   : > { %p1874_p7 = scmp.ne.s32.totalorder %s274_s10, %s1873_s15  ;;  %p1881_p11 = scmp.lt.s32.totalorder %s274_s10, %s274_s10 }
   0xc   : > { %p2017_p6 = pnand %p2003_p4, %p1827_p5  ;;  %p1882_p12 = scmp.lt.s32.totalorder %s1873_s15, %s1873_s15 }
   0xe   : > { %p1875_p8 = pneg %p2017_p6  ;;  %p1883_p13 = por %p1882_p12, %p1881_p11 }
  0x10   : > { %p1876_p9 = pnand %p1875_p8, %p1874_p7 }
  0x12   : > { %p1877_p10 = pneg %p1876_p9 }
  0x14   : > { %p1884_p0 = pnand %p1883_p13, %p1877_p10 }
  0x16   : > { %1887 = shalt.err (!%p1884_p0)
}
  0x17   : > { %s1935_s16 = smov [#allocation3]   ;;  %s1888_s17 = scalar_lea.vmem %s285_s13, 16 }
  0x18   : > { %1830 = dma.vmem_to_smem (!%p2017_p6), %s274_s10, 16, %s1935_s16, [#allocation4]  }
  0x19   : > { %p1889_p1 = scmp.ne.s32.totalorder %s285_s13, %s1888_s17  ;;  %p1896_p4 = scmp.lt.s32.totalorder %s285_s13, %s285_s13 }
  0x1a   : > { %p1897_p3 = scmp.lt.s32.totalorder %s1888_s17, %s1888_s17 }
  0x1b   : > { %p1891_p2 = pnand %p1889_p1, %p1875_p8 }
  0x1c   : > { %p1898_p7 = por %p1897_p3, %p1896_p4 }
  0x1d   : > { %p1892_p5 = pneg %p1891_p2 }
  0x1f   : > { %p1899_p9 = pnand %p1898_p7, %p1892_p5 }
  0x21   : > { %1902 = shalt.err (!%p1899_p9)
}
  0x22   : > { %s1936_s18 = smov [#allocation5]   ;;  %p2420_p10 = scmp.ne.s32.totalorder %s2417_s29, 0 }
  0x23   : > { %1833 = dma.vmem_to_smem (!%p2017_p6), %s285_s13, 16, %s1936_s18, [#allocation6]  }
  0x24   : > { %367 = sbr.rel (%p2420_p10) target bundleno = 258 (0x102), region = 44  ;;  %p2421_p11 = scmp.ne.s32.totalorder (!%p2420_p10), %s2418_s30, 0 }
  0x29   : > { %1916 = dma.done.wait (%p2421_p11), [#allocation4], 16  }
  0x2a   : > { %1918 = vsyncadd (%p2421_p11), [#allocation4], 4294967280 }
  0x2b   : > { %1920 = dma.done.wait (%p2421_p11), [#allocation6], 16  }
  0x2c   : > { %1922 = vsyncadd (%p2421_p11), [#allocation6], 4294967280 }
  0x2d   : > { %377 = sfence }
  0x2e   : > { %p463_p3 = scmp.lt.s32.totalorder %s1925_s24, 1  ;;  %v562_v0 = vlaneseq  ;;  %s2038_s19 = sld [smem:[#allocation5]] }
  0x2f   : > { %s2090_s12 = sld [smem:[#allocation3]] }
  0x30   : > { %s2427_s24 = smov (!%p463_p3, %s1925_s24), 1  ;;  %v2044_v1 = vshrl.u32 %v562_v0, 7  ;;  %s2096_s13 = sld [smem:[#allocation3 + $0x1]]  ;;  %vm1488_vm0 = vcmp.lt.s32.totalorder %v562_v0, 256 }
  0x31   : > { %s1815_s20 = sshll.u32 %s2427_s24, 4  ;;  %s1816_s21 = sshll.u32 %s2427_s24, 7 }
  0x32   : > { %v2049_v2 = vsub.s32 0, %v2044_v1  ;;  %s2056_s27 = scalar_lea.vmem %s2406_s0, %s1815_s20  ;;  %s2061_s8 = scalar_lea.vmem %s2407_s1, %s1816_s21  ;;  %v2064_v3 = vsub.s32 1, %v2044_v1  ;;  %v2067_v4 = vsub.s32 2, %v2044_v1  ;;  %v2070_v5 = vsub.s32 3, %v2044_v1 }
  0x33   : > { %v2073_v6 = vsub.s32 4, %v2044_v1  ;;  %s2078_s11 = scalar_lea.vmem %s2408_s2, %s1816_s21  ;;  %v545_v7 = vld [vmem:[%s2056_s27] sm:$0x11]  ;;  %v1753_v9 = vld [vmem:[%s2061_s8 + $0x8] sm:$0xff]  ;;  %v2084_v10 = vsub.s32 5, %v2044_v1  ;;  %v2087_v11 = vsub.s32 6, %v2044_v1 }
  0x34   : > { %v548_v8 = vld [vmem:[%s2061_s8] sm:$0xff]  ;;  %v546_v12 = vunpack.c.l.bf16 %v545_v7  ;;  %v547_v13 = vunpack.c.h.bf16 %v545_v7  ;;  %v592_v19 = vstv %s2038_s19  ;;  %v601_v20 = vunpack.c.l.bf16 %v1753_v9  ;;  %v1754_v29 = vld [vmem:[%s2078_s11 + $0x8] sm:$0xff]  ;;  %s2098_s14 = sld [smem:[#allocation5 + $0x1]]  ;;  %v1757_v63 = vld [vmem:[%s2061_s8 + $0x10] sm:$0xff] }
  0x35   : > { %v549_v14 = vunpack.c.l.bf16 %v548_v8  ;;  %v550_v15 = vunpack.c.h.bf16 %v548_v8  ;;  %v553_v16 = vld [vmem:[%s2078_s11] sm:$0xff]  ;;  %v602_v32 = vunpack.c.h.bf16 %v1753_v9  ;;  %v607_v41 = vunpack.c.l.bf16 %v1754_v29  ;;  %s2123_s15 = sld [smem:[#allocation3 + $0x2]] }
  0x36   : > { %v554_v17 = vunpack.c.l.bf16 %v553_v16  ;;  %v555_v18 = vunpack.c.h.bf16 %v553_v16  ;;  %v565_v23 = vrot.slane %v546_v12, %v2049_v2  ;;  %v569_v24 = vrot.slane %v547_v13, %v2049_v2  ;;  %v650_v62 = vld [vmem:[%s2056_s27] sm:$0x22]  ;;  %s2129_s16 = sld [smem:[#allocation5 + $0x2]] }
  0x37   : > { %v551_v21 = vmul.f32 %v549_v14, %v549_v14  ;;  %v552_v22 = vmul.f32 %v550_v15, %v550_v15  ;;  %v572_v30 = vmul.f32 %v546_v12, %v546_v12  ;;  %v573_v31 = vmul.f32 %v547_v13, %v547_v13  ;;  %s2148_s17 = sld [smem:[#allocation3 + $0x3]] }
  0x38   : > { %v556_v25 = vadd.f32 %v554_v17, %v549_v14  ;;  %v557_v26 = vadd.f32 %v555_v18, %v550_v15  ;;  %v558_v27 = vmul.f32 %v554_v17, %v554_v17  ;;  %v559_v28 = vmul.f32 %v555_v18, %v555_v18  ;;  %v1758_v18 = vld [vmem:[%s2078_s11 + $0x10] sm:$0xff]  ;;  %s2151_s18 = sld [smem:[#allocation5 + $0x3]] }
  0x39   : > { %v603_v33 = vmul.f32 %v601_v20, %v601_v20  ;;  %v577_v38 = vrot.slane %v572_v30, %v2049_v2  ;;  %v581_v39 = vrot.slane %v573_v31, %v2049_v2  ;;  %v604_v40 = vmul.f32 %v602_v32, %v602_v32  ;;  %s2164_s19 = sld [smem:[#allocation3 + $0x4]] }
  0x3a   : > { %v560_v34 = vadd.f32 %v558_v27, %v551_v21  ;;  %v561_v35 = vadd.f32 %v559_v28, %v552_v22  ;;  %v570_v36 = vadd.f32 %v565_v23, %v556_v25  ;;  %v571_v37 = vadd.f32 %v569_v24, %v557_v26  ;;  %s2170_s21 = sld [smem:[#allocation5 + $0x4]] }
  0x3b   : > { %v608_v44 = vunpack.c.h.bf16 %v1754_v29  ;;  %v618_v45 = vrot.slane %v546_v12, %v2064_v3  ;;  %v609_v48 = vadd.f32 %v607_v41, %v601_v20  ;;  %v611_v49 = vmul.f32 %v607_v41, %v607_v41  ;;  %s2185_s22 = sld [smem:[#allocation3 + $0x5]] }
  0x3c   : > { %v590_v42 = vmul.f32 %v570_v36, %v570_v36  ;;  %v591_v43 = vmul.f32 %v571_v37, %v571_v37  ;;  %v582_v46 = vadd.f32 %v577_v38, %v560_v34  ;;  %v583_v47 = vadd.f32 %v581_v39, %v561_v35  ;;  %s2188_s23 = sld [smem:[#allocation5 + $0x5]] }
  0x3d   : > { %v587_v50 = vstv %s2090_s12  ;;  %v610_v51 = vadd.f32 %v608_v44, %v602_v32  ;;  %v612_v52 = vmul.f32 %v608_v44, %v608_v44  ;;  %v2105_v53 = vsub.s32 7, %v2044_v1  ;;  %s2201_s29 = sld [smem:[#allocation3 + $0x6]] }
  0x3e   : > { %v2107_v54 = vmul.f32 %v592_v19, %v590_v42  ;;  %v2109_v55 = vmul.f32 %v592_v19, %v591_v43  ;;  %v613_v56 = vadd.f32 %v611_v49, %v603_v33  ;;  %v622_v57 = vrot.slane %v547_v13, %v2064_v3  ;;  %v1761_v42 = vld [vmem:[%s2061_s8 + $0x18] sm:$0xff]  ;;  %s2207_s30 = sld [smem:[#allocation5 + $0x6]] }
  0x3f   : > { %v614_v58 = vadd.f32 %v612_v52, %v604_v40  ;;  %v623_v59 = vadd.f32 %v618_v45, %v609_v48  ;;  %v628_v60 = vrot.slane %v572_v30, %v2064_v3  ;;  %v632_v61 = vrot.slane %v573_v31, %v2064_v3  ;;  %s2222_s9 = sld [smem:[#allocation3 + $0x7]] }
  0x40   : > { %v2116_v7 = vmul.f32 %v587_v50, %v582_v46  ;;  %v2118_v8 = vmul.f32 %v587_v50, %v583_v47  ;;  %v624_v9 = vadd.f32 %v622_v57, %v610_v51  ;;  %v638_v12 = vstv %s2096_s13  ;;  %v1762_v47 = vld [vmem:[%s2078_s11 + $0x18] sm:$0xff]  ;;  %s2225_s10 = sld [smem:[#allocation5 + $0x7]] }
  0x41   : > { %v633_v14 = vadd.f32 %v628_v60, %v613_v56  ;;  %v634_v15 = vadd.f32 %v632_v61, %v614_v58  ;;  %v641_v16 = vmul.f32 %v623_v59, %v623_v59  ;;  %v643_v17 = vstv %s2098_s14  ;;  %s2238_s12 = sld [smem:[#allocation3 + $0x8]] }
  0x42   : > { %v642_v13 = vmul.f32 %v624_v9, %v624_v9  ;;  %v2125_v19 = vunpack.c.l.bf16 %v650_v62  ;;  %v2127_v20 = vunpack.c.h.bf16 %v650_v62  ;;  %v655_v21 = vunpack.c.l.bf16 %v1757_v63  ;;  %s2244_s13 = sld [smem:[#allocation5 + $0x8]] }
  0x43   : > { %v639_v22 = vmul.f32 %v638_v12, %v633_v14  ;;  %v640_v23 = vmul.f32 %v638_v12, %v634_v15  ;;  %v644_v24 = vmul.f32 %v643_v17, %v641_v16  ;;  %v656_v25 = vunpack.c.h.bf16 %v1757_v63  ;;  %s2259_s14 = sld [smem:[#allocation3 + $0x9]] }
  0x44   : > { %v645_v26 = vmul.f32 %v643_v17, %v642_v13  ;;  %v657_v27 = vmul.f32 %v655_v21, %v655_v21  ;;  %v661_v28 = vunpack.c.l.bf16 %v1758_v18  ;;  %v662_v29 = vunpack.c.h.bf16 %v1758_v18 }
  0x45   : > { %v595_v30 = vsub.f32 %v2116_v7, %v2107_v54  ;;  %v658_v31 = vmul.f32 %v656_v25, %v656_v25  ;;  %v672_v32 = vrot.slane %v2125_v19, %v2067_v4  ;;  %v676_v33 = vrot.slane %v2127_v20, %v2067_v4 }
  0x46   : > { %v596_v34 = vsub.f32 %v2118_v8, %v2109_v55  ;;  %v663_v35 = vadd.f32 %v661_v28, %v655_v21  ;;  %v664_v36 = vadd.f32 %v662_v29, %v656_v25  ;;  %v665_v37 = vmul.f32 %v661_v28, %v661_v28  ;;  %v757_v28 = vld [vmem:[%s2056_s27] sm:$0x44] }
  0x47   : > { %v646_v38 = vsub.f32 %v639_v22, %v644_v24  ;;  %v666_v39 = vmul.f32 %v662_v29, %v662_v29  ;;  %v679_v40 = vmul.f32 %v2125_v19, %v2125_v19  ;;  %v680_v41 = vmul.f32 %v2127_v20, %v2127_v20  ;;  %v1765_v29 = vld [vmem:[%s2061_s8 + $0x20] sm:$0xff] }
  0x48   : > { %v647_v43 = vsub.f32 %v640_v23, %v645_v26  ;;  %v667_v44 = vadd.f32 %v665_v37, %v657_v27  ;;  %v677_v45 = vadd.f32 %v672_v32, %v663_v35  ;;  %v678_v46 = vadd.f32 %v676_v33, %v664_v36  ;;  %v1766_v37 = vld [vmem:[%s2078_s11 + $0x20] sm:$0xff] }
  0x49   : > { %v668_v48 = vadd.f32 %v666_v39, %v658_v31  ;;  %v684_v49 = vrot.slane %v679_v40, %v2067_v4  ;;  %v688_v50 = vrot.slane %v680_v41, %v2067_v4  ;;  %v694_v51 = vstv %s2123_s15  ;;  %s2262_s15 = sld [smem:[#allocation5 + $0x9]] }
  0x4a   : > { %v697_v52 = vmul.f32 %v677_v45, %v677_v45  ;;  %v698_v54 = vmul.f32 %v678_v46, %v678_v46  ;;  %v699_v55 = vstv %s2129_s16  ;;  %v708_v56 = vunpack.c.l.bf16 %v1761_v42  ;;  %s2275_s16 = sld [smem:[#allocation3 + $0xa]] }
  0x4b   : > { %v689_v57 = vadd.f32 %v684_v49, %v667_v44  ;;  %v690_v58 = vadd.f32 %v688_v50, %v668_v48  ;;  %v709_v59 = vunpack.c.h.bf16 %v1761_v42  ;;  %v714_v60 = vunpack.c.l.bf16 %v1762_v47 }
  0x4c   : > { %v700_v61 = vmul.f32 %v699_v55, %v697_v52  ;;  %v701_v62 = vmul.f32 %v699_v55, %v698_v54  ;;  %v710_v63 = vmul.f32 %v708_v56, %v708_v56  ;;  %v715_v7 = vunpack.c.h.bf16 %v1762_v47 }
  0x4d   : > { %v695_v8 = vmul.f32 %v694_v51, %v689_v57  ;;  %v696_v9 = vmul.f32 %v694_v51, %v690_v58  ;;  %v711_v12 = vmul.f32 %v709_v59, %v709_v59  ;;  %v716_v14 = vadd.f32 %v714_v60, %v708_v56 }
  0x4e   : > { %v717_v15 = vadd.f32 %v715_v7, %v709_v59  ;;  %v718_v16 = vmul.f32 %v714_v60, %v714_v60  ;;  %v719_v17 = vmul.f32 %v715_v7, %v715_v7  ;;  %v725_v18 = vrot.slane %v2125_v19, %v2070_v5 }
  0x4f   : > { %v648_v13 = vadd.f32 %v646_v38, %v595_v30  ;;  %v649_v21 = vadd.f32 %v647_v43, %v596_v34  ;;  %v729_v22 = vrot.slane %v2127_v20, %v2070_v5  ;;  %v735_v23 = vrot.slane %v679_v40, %v2070_v5 }
  0x50   : > { %v720_v24 = vadd.f32 %v718_v16, %v710_v63  ;;  %v721_v25 = vadd.f32 %v719_v17, %v711_v12  ;;  %v730_v26 = vadd.f32 %v725_v18, %v716_v14  ;;  %v739_v27 = vrot.slane %v680_v41, %v2070_v5  ;;  %v1770_v12 = vld [vmem:[%s2078_s11 + $0x28] sm:$0xff] }
  0x51   : > { %v702_v31 = vsub.f32 %v695_v8, %v700_v61  ;;  %v703_v32 = vsub.f32 %v696_v9, %v701_v62  ;;  %v731_v33 = vadd.f32 %v729_v22, %v717_v15  ;;  %v745_v19 = vstv %s2148_s17  ;;  %v1769_v62 = vld [vmem:[%s2061_s8 + $0x28] sm:$0xff]  ;;  %s2281_s17 = sld [smem:[#allocation5 + $0xa]] }
  0x52   : > { %v740_v30 = vadd.f32 %v735_v23, %v720_v24  ;;  %v741_v34 = vadd.f32 %v739_v27, %v721_v25  ;;  %v748_v35 = vmul.f32 %v730_v26, %v730_v26  ;;  %v750_v36 = vstv %s2151_s18  ;;  %s2296_s18 = sld [smem:[#allocation3 + $0xb]] }
  0x53   : > { %v749_v20 = vmul.f32 %v731_v33, %v731_v33  ;;  %v2166_v38 = vunpack.c.l.bf16 %v757_v28  ;;  %v2168_v39 = vunpack.c.h.bf16 %v757_v28  ;;  %v762_v40 = vunpack.c.l.bf16 %v1765_v29 }
  0x54   : > { %v746_v41 = vmul.f32 %v745_v19, %v740_v30  ;;  %v747_v42 = vmul.f32 %v745_v19, %v741_v34  ;;  %v751_v43 = vmul.f32 %v750_v36, %v748_v35  ;;  %v763_v44 = vunpack.c.h.bf16 %v1765_v29 }
  0x55   : > { %v752_v45 = vmul.f32 %v750_v36, %v749_v20  ;;  %v764_v46 = vmul.f32 %v762_v40, %v762_v40  ;;  %v768_v47 = vunpack.c.l.bf16 %v1766_v37  ;;  %v769_v48 = vunpack.c.h.bf16 %v1766_v37 }
  0x56   : > { %v704_v49 = vadd.f32 %v702_v31, %v648_v13  ;;  %v765_v50 = vmul.f32 %v763_v44, %v763_v44  ;;  %v779_v51 = vrot.slane %v2166_v38, %v2073_v6  ;;  %v783_v52 = vrot.slane %v2168_v39, %v2073_v6 }
  0x57   : > { %v705_v54 = vadd.f32 %v703_v32, %v649_v21  ;;  %v770_v55 = vadd.f32 %v768_v47, %v762_v40  ;;  %v771_v56 = vadd.f32 %v769_v48, %v763_v44  ;;  %v772_v57 = vmul.f32 %v768_v47, %v768_v47  ;;  %v864_v47 = vld [vmem:[%s2056_s27] sm:$0x88] }
  0x58   : > { %v753_v58 = vsub.f32 %v746_v41, %v751_v43  ;;  %v773_v59 = vmul.f32 %v769_v48, %v769_v48  ;;  %v786_v60 = vmul.f32 %v2166_v38, %v2166_v38  ;;  %v787_v61 = vmul.f32 %v2168_v39, %v2168_v39  ;;  %v1773_v48 = vld [vmem:[%s2061_s8 + $0x30] sm:$0xff] }
  0x59   : > { %v754_v63 = vsub.f32 %v747_v42, %v752_v45  ;;  %v774_v7 = vadd.f32 %v772_v57, %v764_v46  ;;  %v784_v8 = vadd.f32 %v779_v51, %v770_v55  ;;  %v785_v9 = vadd.f32 %v783_v52, %v771_v56  ;;  %v1774_v57 = vld [vmem:[%s2078_s11 + $0x30] sm:$0xff] }
  0x5a   : > { %v775_v14 = vadd.f32 %v773_v59, %v765_v50  ;;  %v791_v15 = vrot.slane %v786_v60, %v2073_v6  ;;  %v795_v16 = vrot.slane %v787_v61, %v2073_v6  ;;  %v801_v17 = vstv %s2164_s19  ;;  %s2299_s19 = sld [smem:[#allocation5 + $0xb]] }
  0x5b   : > { %v804_v18 = vmul.f32 %v784_v8, %v784_v8  ;;  %v805_v13 = vmul.f32 %v785_v9, %v785_v9  ;;  %v806_v21 = vstv %s2170_s21  ;;  %v815_v22 = vunpack.c.l.bf16 %v1769_v62  ;;  %s2312_s21 = sld [smem:[#allocation3 + $0xc]] }
  0x5c   : > { %v796_v23 = vadd.f32 %v791_v15, %v774_v7  ;;  %v797_v24 = vadd.f32 %v795_v16, %v775_v14  ;;  %v816_v25 = vunpack.c.h.bf16 %v1769_v62  ;;  %v821_v26 = vunpack.c.l.bf16 %v1770_v12 }
  0x5d   : > { %v807_v27 = vmul.f32 %v806_v21, %v804_v18  ;;  %v808_v28 = vmul.f32 %v806_v21, %v805_v13  ;;  %v817_v29 = vmul.f32 %v815_v22, %v815_v22  ;;  %v822_v31 = vunpack.c.h.bf16 %v1770_v12 }
  0x5e   : > { %v802_v32 = vmul.f32 %v801_v17, %v796_v23  ;;  %v803_v33 = vmul.f32 %v801_v17, %v797_v24  ;;  %v818_v19 = vmul.f32 %v816_v25, %v816_v25  ;;  %v823_v30 = vadd.f32 %v821_v26, %v815_v22 }
  0x5f   : > { %v824_v34 = vadd.f32 %v822_v31, %v816_v25  ;;  %v825_v35 = vmul.f32 %v821_v26, %v821_v26  ;;  %v826_v36 = vmul.f32 %v822_v31, %v822_v31  ;;  %v832_v37 = vrot.slane %v2166_v38, %v2084_v10 }
  0x60   : > { %v755_v20 = vadd.f32 %v753_v58, %v704_v49  ;;  %v756_v40 = vadd.f32 %v754_v63, %v705_v54  ;;  %v836_v41 = vrot.slane %v2168_v39, %v2084_v10  ;;  %v842_v42 = vrot.slane %v786_v60, %v2084_v10 }
  0x61   : > { %v827_v43 = vadd.f32 %v825_v35, %v817_v29  ;;  %v828_v44 = vadd.f32 %v826_v36, %v818_v19  ;;  %v837_v45 = vadd.f32 %v832_v37, %v823_v30  ;;  %v846_v46 = vrot.slane %v787_v61, %v2084_v10  ;;  %v1778_v19 = vld [vmem:[%s2078_s11 + $0x38] sm:$0xff] }
  0x62   : > { %v809_v50 = vsub.f32 %v802_v32, %v807_v27  ;;  %v810_v51 = vsub.f32 %v803_v33, %v808_v28  ;;  %v838_v52 = vadd.f32 %v836_v41, %v824_v34  ;;  %v852_v38 = vstv %s2185_s22  ;;  %v1777_v28 = vld [vmem:[%s2061_s8 + $0x38] sm:$0xff]  ;;  %s2318_s22 = sld [smem:[#allocation5 + $0xc]] }
  0x63   : > { %v847_v49 = vadd.f32 %v842_v42, %v827_v43  ;;  %v848_v54 = vadd.f32 %v846_v46, %v828_v44  ;;  %v855_v55 = vmul.f32 %v837_v45, %v837_v45  ;;  %v857_v56 = vstv %s2188_s23  ;;  %s2333_s23 = sld [smem:[#allocation3 + $0xd]] }
  0x64   : > { %v856_v39 = vmul.f32 %v838_v52, %v838_v52  ;;  %v2203_v58 = vunpack.c.l.bf16 %v864_v47  ;;  %v2205_v59 = vunpack.c.h.bf16 %v864_v47  ;;  %v869_v60 = vunpack.c.l.bf16 %v1773_v48 }
  0x65   : > { %v853_v61 = vmul.f32 %v852_v38, %v847_v49  ;;  %v854_v62 = vmul.f32 %v852_v38, %v848_v54  ;;  %v858_v63 = vmul.f32 %v857_v56, %v855_v55  ;;  %v870_v7 = vunpack.c.h.bf16 %v1773_v48 }
  0x66   : > { %v859_v8 = vmul.f32 %v857_v56, %v856_v39  ;;  %v871_v9 = vmul.f32 %v869_v60, %v869_v60  ;;  %v875_v12 = vunpack.c.l.bf16 %v1774_v57  ;;  %v876_v14 = vunpack.c.h.bf16 %v1774_v57 }
  0x67   : > { %v811_v15 = vadd.f32 %v809_v50, %v755_v20  ;;  %v872_v16 = vmul.f32 %v870_v7, %v870_v7  ;;  %v886_v17 = vrot.slane %v2203_v58, %v2087_v11  ;;  %v890_v18 = vrot.slane %v2205_v59, %v2087_v11 }
  0x68   : > { %v812_v13 = vadd.f32 %v810_v51, %v756_v40  ;;  %v877_v21 = vadd.f32 %v875_v12, %v869_v60  ;;  %v878_v22 = vadd.f32 %v876_v14, %v870_v7  ;;  %v879_v23 = vmul.f32 %v875_v12, %v875_v12  ;;  %v971_v12 = vld [vmem:[%s2056_s27 + $0x8] sm:$0x11] }
  0x69   : > { %v860_v24 = vsub.f32 %v853_v61, %v858_v63  ;;  %v880_v25 = vmul.f32 %v876_v14, %v876_v14  ;;  %v893_v26 = vmul.f32 %v2203_v58, %v2203_v58  ;;  %v894_v27 = vmul.f32 %v2205_v59, %v2205_v59  ;;  %v1781_v14 = vld [vmem:[%s2061_s8 + $0x40] sm:$0xff] }
  0x6a   : > { %v861_v29 = vsub.f32 %v854_v62, %v859_v8  ;;  %v881_v31 = vadd.f32 %v879_v23, %v871_v9  ;;  %v891_v32 = vadd.f32 %v886_v17, %v877_v21  ;;  %v892_v33 = vadd.f32 %v890_v18, %v878_v22  ;;  %v1782_v23 = vld [vmem:[%s2078_s11 + $0x40] sm:$0xff] }
  0x6b   : > { %v882_v30 = vadd.f32 %v880_v25, %v872_v16  ;;  %v898_v34 = vrot.slane %v893_v26, %v2087_v11  ;;  %v902_v35 = vrot.slane %v894_v27, %v2087_v11  ;;  %v908_v36 = vstv %s2201_s29  ;;  %s2336_s29 = sld [smem:[#allocation5 + $0xd]] }
  0x6c   : > { %v911_v37 = vmul.f32 %v891_v32, %v891_v32  ;;  %v912_v20 = vmul.f32 %v892_v33, %v892_v33  ;;  %v913_v40 = vstv %s2207_s30  ;;  %v922_v41 = vunpack.c.l.bf16 %v1777_v28  ;;  %s2349_s30 = sld [smem:[#allocation3 + $0xe]] }
  0x6d   : > { %v903_v42 = vadd.f32 %v898_v34, %v881_v31  ;;  %v904_v43 = vadd.f32 %v902_v35, %v882_v30  ;;  %v923_v44 = vunpack.c.h.bf16 %v1777_v28  ;;  %v928_v45 = vunpack.c.l.bf16 %v1778_v19 }
  0x6e   : > { %v914_v46 = vmul.f32 %v913_v40, %v911_v37  ;;  %v915_v47 = vmul.f32 %v913_v40, %v912_v20  ;;  %v924_v48 = vmul.f32 %v922_v41, %v922_v41  ;;  %v929_v50 = vunpack.c.h.bf16 %v1778_v19 }
  0x6f   : > { %v909_v51 = vmul.f32 %v908_v36, %v903_v42  ;;  %v910_v52 = vmul.f32 %v908_v36, %v904_v43  ;;  %v925_v38 = vmul.f32 %v923_v44, %v923_v44  ;;  %v930_v49 = vadd.f32 %v928_v45, %v922_v41 }
  0x70   : > { %v931_v54 = vadd.f32 %v929_v50, %v923_v44  ;;  %v932_v55 = vmul.f32 %v928_v45, %v928_v45  ;;  %v933_v56 = vmul.f32 %v929_v50, %v929_v50  ;;  %v939_v57 = vrot.slane %v2203_v58, %v2105_v53 }
  0x71   : > { %v862_v39 = vadd.f32 %v860_v24, %v811_v15  ;;  %v863_v60 = vadd.f32 %v861_v29, %v812_v13  ;;  %v943_v61 = vrot.slane %v2205_v59, %v2105_v53  ;;  %v949_v62 = vrot.slane %v893_v26, %v2105_v53 }
  0x72   : > { %v934_v63 = vadd.f32 %v932_v55, %v924_v48  ;;  %v935_v7 = vadd.f32 %v933_v56, %v925_v38  ;;  %v944_v8 = vadd.f32 %v939_v57, %v930_v49  ;;  %v953_v9 = vrot.slane %v894_v27, %v2105_v53  ;;  %v1786_v38 = vld [vmem:[%s2078_s11 + $0x48] sm:$0xff] }
  0x73   : > { %v916_v16 = vsub.f32 %v909_v51, %v914_v46  ;;  %v917_v17 = vsub.f32 %v910_v52, %v915_v47  ;;  %v945_v18 = vadd.f32 %v943_v61, %v931_v54  ;;  %v959_v58 = vstv %s2222_s9  ;;  %v1785_v47 = vld [vmem:[%s2061_s8 + $0x48] sm:$0xff]  ;;  %s2355_s9 = sld [smem:[#allocation5 + $0xe]] }
  0x74   : > { %v954_v15 = vadd.f32 %v949_v62, %v934_v63  ;;  %v955_v13 = vadd.f32 %v953_v9, %v935_v7  ;;  %v962_v21 = vmul.f32 %v944_v8, %v944_v8  ;;  %v964_v22 = vstv %s2225_s10  ;;  %s2373_s10 = sld [smem:[#allocation5 + $0xf]] }
  0x75   : > { %v963_v59 = vmul.f32 %v945_v18, %v945_v18  ;;  %v2240_v24 = vunpack.c.l.bf16 %v971_v12  ;;  %v2242_v25 = vunpack.c.h.bf16 %v971_v12  ;;  %v976_v26 = vunpack.c.l.bf16 %v1781_v14 }
  0x76   : > { %v960_v27 = vmul.f32 %v959_v58, %v954_v15  ;;  %v961_v28 = vmul.f32 %v959_v58, %v955_v13  ;;  %v965_v29 = vmul.f32 %v964_v22, %v962_v21  ;;  %v977_v31 = vunpack.c.h.bf16 %v1781_v14 }
  0x77   : > { %v966_v32 = vmul.f32 %v964_v22, %v963_v59  ;;  %v978_v33 = vmul.f32 %v976_v26, %v976_v26  ;;  %v982_v19 = vunpack.c.l.bf16 %v1782_v23  ;;  %v983_v30 = vunpack.c.h.bf16 %v1782_v23 }
  0x78   : > { %v918_v34 = vadd.f32 %v916_v16, %v862_v39  ;;  %v979_v35 = vmul.f32 %v977_v31, %v977_v31  ;;  %v993_v36 = vrot.slane %v2240_v24, %v2049_v2  ;;  %v997_v37 = vrot.slane %v2242_v25, %v2049_v2 }
  0x79   : > { %v919_v20 = vadd.f32 %v917_v17, %v863_v60  ;;  %v984_v40 = vadd.f32 %v982_v19, %v976_v26  ;;  %v985_v41 = vadd.f32 %v983_v30, %v977_v31  ;;  %v986_v42 = vmul.f32 %v982_v19, %v982_v19  ;;  %v1789_v19 = vld [vmem:[%s2061_s8 + $0x50] sm:$0xff] }
  0x7a   : > { %v967_v43 = vsub.f32 %v960_v27, %v965_v29  ;;  %v987_v44 = vmul.f32 %v983_v30, %v983_v30  ;;  %v1000_v45 = vmul.f32 %v2240_v24, %v2240_v24  ;;  %v1001_v46 = vmul.f32 %v2242_v25, %v2242_v25 }
  0x7b   : > { %v968_v48 = vsub.f32 %v961_v28, %v966_v32  ;;  %v988_v50 = vadd.f32 %v986_v42, %v978_v33  ;;  %v998_v51 = vadd.f32 %v993_v36, %v984_v40  ;;  %v999_v52 = vadd.f32 %v997_v37, %v985_v41  ;;  %v1078_v33 = vld [vmem:[%s2056_s27 + $0x8] sm:$0x22]  ;;  %v1790_v41 = vld [vmem:[%s2078_s11 + $0x50] sm:$0xff] }
  0x7c   : > { %v989_v49 = vadd.f32 %v987_v44, %v979_v35  ;;  %v1005_v54 = vrot.slane %v1000_v45, %v2049_v2  ;;  %v1009_v55 = vrot.slane %v1001_v46, %v2049_v2  ;;  %v1015_v56 = vstv %s2238_s12  ;;  %s517_s12 = scalar_lea.vmem %s2409_s3, %s1815_s20  ;;  %s1751_s20 = sshll.u32 %s2427_s24, 1 }
  0x7d   : > { %v1018_v57 = vmul.f32 %v998_v51, %v998_v51  ;;  %v1019_v39 = vmul.f32 %v999_v52, %v999_v52  ;;  %v1020_v60 = vstv %s2244_s13  ;;  %v1029_v61 = vunpack.c.l.bf16 %v1785_v47 }
  0x7e   : > { %v1010_v62 = vadd.f32 %v1005_v54, %v988_v50  ;;  %v1011_v63 = vadd.f32 %v1009_v55, %v989_v49  ;;  %v1030_v7 = vunpack.c.h.bf16 %v1785_v47  ;;  %v1035_v8 = vunpack.c.l.bf16 %v1786_v38 }
  0x7f   : > { %v1021_v9 = vmul.f32 %v1020_v60, %v1018_v57  ;;  %v1022_v12 = vmul.f32 %v1020_v60, %v1019_v39  ;;  %v1031_v14 = vmul.f32 %v1029_v61, %v1029_v61  ;;  %v1036_v16 = vunpack.c.h.bf16 %v1786_v38 }
  0x80   : > { %v1016_v17 = vmul.f32 %v1015_v56, %v1010_v62  ;;  %v1017_v2 = vmul.f32 %v1015_v56, %v1011_v63  ;;  %v1032_v18 = vmul.f32 %v1030_v7, %v1030_v7  ;;  %v1037_v58 = vadd.f32 %v1035_v8, %v1029_v61 }
  0x81   : > { %v1038_v15 = vadd.f32 %v1036_v16, %v1030_v7  ;;  %v1039_v13 = vmul.f32 %v1035_v8, %v1035_v8  ;;  %v1040_v21 = vmul.f32 %v1036_v16, %v1036_v16  ;;  %v1046_v22 = vrot.slane %v2240_v24, %v2064_v3  ;;  %v1793_v8 = vld [vmem:[%s2061_s8 + $0x58] sm:$0xff] }
  0x82   : > { %v969_v23 = vadd.f32 %v967_v43, %v918_v34  ;;  %v970_v59 = vadd.f32 %v968_v48, %v919_v20  ;;  %v1050_v26 = vrot.slane %v2242_v25, %v2064_v3  ;;  %v1056_v27 = vrot.slane %v1000_v45, %v2064_v3 }
  0x83   : > { %v1041_v28 = vadd.f32 %v1039_v13, %v1031_v14  ;;  %v1042_v29 = vadd.f32 %v1040_v21, %v1032_v18  ;;  %v1051_v31 = vadd.f32 %v1046_v22, %v1037_v58  ;;  %v1060_v32 = vrot.slane %v1001_v46, %v2064_v3 }
  0x84   : > { %v1023_v30 = vsub.f32 %v1016_v17, %v1021_v9  ;;  %v1024_v35 = vsub.f32 %v1017_v2, %v1022_v12  ;;  %v1052_v36 = vadd.f32 %v1050_v26, %v1038_v15  ;;  %v1066_v24 = vstv %s2259_s14  ;;  %v1794_v17 = vld [vmem:[%s2078_s11 + $0x58] sm:$0xff] }
  0x85   : > { %v1061_v34 = vadd.f32 %v1056_v27, %v1041_v28  ;;  %v1062_v37 = vadd.f32 %v1060_v32, %v1042_v29  ;;  %v1069_v20 = vmul.f32 %v1051_v31, %v1051_v31  ;;  %v1071_v40 = vstv %s2262_s15  ;;  %s526_s15 = scalar_lea.vmem %s2412_s6, %s1751_s20 }
  0x86   : > { %v1070_v25 = vmul.f32 %v1052_v36, %v1052_v36  ;;  %v2277_v42 = vunpack.c.l.bf16 %v1078_v33  ;;  %v2279_v43 = vunpack.c.h.bf16 %v1078_v33  ;;  %v1083_v44 = vunpack.c.l.bf16 %v1789_v19 }
  0x87   : > { %v1067_v3 = vmul.f32 %v1066_v24, %v1061_v34  ;;  %v1068_v45 = vmul.f32 %v1066_v24, %v1062_v37  ;;  %v1072_v46 = vmul.f32 %v1071_v40, %v1069_v20  ;;  %v1084_v47 = vunpack.c.h.bf16 %v1789_v19 }
  0x88   : > { %v1073_v48 = vmul.f32 %v1071_v40, %v1070_v25  ;;  %v1085_v50 = vmul.f32 %v1083_v44, %v1083_v44  ;;  %v1089_v51 = vunpack.c.l.bf16 %v1790_v41  ;;  %v1090_v52 = vunpack.c.h.bf16 %v1790_v41 }
  0x89   : > { %v1025_v38 = vadd.f32 %v1023_v30, %v969_v23  ;;  %v1086_v49 = vmul.f32 %v1084_v47, %v1084_v47  ;;  %v1100_v54 = vrot.slane %v2277_v42, %v2067_v4  ;;  %v1104_v55 = vrot.slane %v2279_v43, %v2067_v4 }
  0x8a   : > { %v1026_v56 = vadd.f32 %v1024_v35, %v970_v59  ;;  %v1091_v57 = vadd.f32 %v1089_v51, %v1083_v44  ;;  %v1092_v39 = vadd.f32 %v1090_v52, %v1084_v47  ;;  %v1093_v60 = vmul.f32 %v1089_v51, %v1089_v51  ;;  %v1185_v47 = vld [vmem:[%s2056_s27 + $0x8] sm:$0x44] }
  0x8b   : > { %v1074_v61 = vsub.f32 %v1067_v3, %v1072_v46  ;;  %v1094_v62 = vmul.f32 %v1090_v52, %v1090_v52  ;;  %v1107_v63 = vmul.f32 %v2277_v42, %v2277_v42  ;;  %v1108_v7 = vmul.f32 %v2279_v43, %v2279_v43 }
  0x8c   : > { %v1075_v9 = vsub.f32 %v1068_v45, %v1073_v48  ;;  %v1095_v12 = vadd.f32 %v1093_v60, %v1085_v50  ;;  %v1105_v14 = vadd.f32 %v1100_v54, %v1091_v57  ;;  %v1106_v16 = vadd.f32 %v1104_v55, %v1092_v39  ;;  %v1797_v48 = vld [vmem:[%s2061_s8 + $0x60] sm:$0xff] }
  0x8d   : > { %v1096_v2 = vadd.f32 %v1094_v62, %v1086_v49  ;;  %v1112_v18 = vrot.slane %v1107_v63, %v2067_v4  ;;  %v1116_v58 = vrot.slane %v1108_v7, %v2067_v4  ;;  %v1122_v15 = vstv %s2275_s16 }
  0x8e   : > { %v1125_v13 = vmul.f32 %v1105_v14, %v1105_v14  ;;  %v1126_v21 = vmul.f32 %v1106_v16, %v1106_v16  ;;  %v1127_v22 = vstv %s2281_s17  ;;  %v1136_v23 = vunpack.c.l.bf16 %v1793_v8 }
  0x8f   : > { %v1117_v59 = vadd.f32 %v1112_v18, %v1095_v12  ;;  %v1118_v26 = vadd.f32 %v1116_v58, %v1096_v2  ;;  %v1137_v27 = vunpack.c.h.bf16 %v1793_v8  ;;  %v1142_v28 = vunpack.c.l.bf16 %v1794_v17 }
  0x90   : > { %v1128_v29 = vmul.f32 %v1127_v22, %v1125_v13  ;;  %v1129_v31 = vmul.f32 %v1127_v22, %v1126_v21  ;;  %v1138_v32 = vmul.f32 %v1136_v23, %v1136_v23  ;;  %v1143_v33 = vunpack.c.h.bf16 %v1794_v17 }
  0x91   : > { %v1123_v19 = vmul.f32 %v1122_v15, %v1117_v59  ;;  %v1124_v4 = vmul.f32 %v1122_v15, %v1118_v26  ;;  %v1139_v30 = vmul.f32 %v1137_v27, %v1137_v27  ;;  %v1144_v35 = vadd.f32 %v1142_v28, %v1136_v23  ;;  %v1801_v26 = vld [vmem:[%s2061_s8 + $0x68] sm:$0xff] }
  0x92   : > { %v1145_v36 = vadd.f32 %v1143_v33, %v1137_v27  ;;  %v1146_v24 = vmul.f32 %v1142_v28, %v1142_v28  ;;  %v1147_v34 = vmul.f32 %v1143_v33, %v1143_v33  ;;  %v1153_v37 = vrot.slane %v2277_v42, %v2070_v5 }
  0x93   : > { %v1076_v20 = vadd.f32 %v1074_v61, %v1025_v38  ;;  %v1077_v40 = vadd.f32 %v1075_v9, %v1026_v56  ;;  %v1157_v41 = vrot.slane %v2279_v43, %v2070_v5  ;;  %v1163_v25 = vrot.slane %v1107_v63, %v2070_v5  ;;  %v1798_v56 = vld [vmem:[%s2078_s11 + $0x60] sm:$0xff] }
  0x94   : > { %v1148_v44 = vadd.f32 %v1146_v24, %v1138_v32  ;;  %v1149_v3 = vadd.f32 %v1147_v34, %v1139_v30  ;;  %v1158_v45 = vadd.f32 %v1153_v37, %v1144_v35  ;;  %v1167_v46 = vrot.slane %v1108_v7, %v2070_v5  ;;  %v1802_v32 = vld [vmem:[%s2078_s11 + $0x68] sm:$0xff] }
  0x95   : > { %v1130_v50 = vsub.f32 %v1123_v19, %v1128_v29  ;;  %v1131_v51 = vsub.f32 %v1124_v4, %v1129_v31  ;;  %v1159_v52 = vadd.f32 %v1157_v41, %v1145_v36  ;;  %v1173_v42 = vstv %s2296_s18  ;;  %s535_s18 = scalar_lea.vmem %s2413_s7, %s1751_s20 }
  0x96   : > { %v1168_v38 = vadd.f32 %v1163_v25, %v1148_v44  ;;  %v1169_v49 = vadd.f32 %v1167_v46, %v1149_v3  ;;  %v1176_v54 = vmul.f32 %v1158_v45, %v1158_v45  ;;  %v1178_v55 = vstv %s2299_s19 }
  0x97   : > { %v1177_v43 = vmul.f32 %v1159_v52, %v1159_v52  ;;  %v2314_v57 = vunpack.c.l.bf16 %v1185_v47  ;;  %v2316_v39 = vunpack.c.h.bf16 %v1185_v47  ;;  %v1190_v60 = vunpack.c.l.bf16 %v1797_v48 }
  0x98   : > { %v1174_v5 = vmul.f32 %v1173_v42, %v1168_v38  ;;  %v1175_v61 = vmul.f32 %v1173_v42, %v1169_v49  ;;  %v1179_v62 = vmul.f32 %v1178_v55, %v1176_v54  ;;  %v1191_v63 = vunpack.c.h.bf16 %v1797_v48 }
  0x99   : > { %v1180_v7 = vmul.f32 %v1178_v55, %v1177_v43  ;;  %v1192_v8 = vmul.f32 %v1190_v60, %v1190_v60  ;;  %v1196_v9 = vunpack.c.l.bf16 %v1798_v56  ;;  %v1197_v12 = vunpack.c.h.bf16 %v1798_v56 }
  0x9a   : > { %v1132_v14 = vadd.f32 %v1130_v50, %v1076_v20  ;;  %v1193_v16 = vmul.f32 %v1191_v63, %v1191_v63  ;;  %v1207_v17 = vrot.slane %v2314_v57, %v2073_v6  ;;  %v1211_v2 = vrot.slane %v2316_v39, %v2073_v6 }
  0x9b   : > { %v1133_v18 = vadd.f32 %v1131_v51, %v1077_v40  ;;  %v1198_v58 = vadd.f32 %v1196_v9, %v1190_v60  ;;  %v1199_v15 = vadd.f32 %v1197_v12, %v1191_v63  ;;  %v1200_v13 = vmul.f32 %v1196_v9, %v1196_v9 }
  0x9c   : > { %v1181_v21 = vsub.f32 %v1174_v5, %v1179_v62  ;;  %v1201_v22 = vmul.f32 %v1197_v12, %v1197_v12  ;;  %v1214_v23 = vmul.f32 %v2314_v57, %v2314_v57  ;;  %v1215_v59 = vmul.f32 %v2316_v39, %v2316_v39  ;;  %v1805_v62 = vld [vmem:[%s2061_s8 + $0x70] sm:$0xff] }
  0x9d   : > { %v1182_v27 = vsub.f32 %v1175_v61, %v1180_v7  ;;  %v1202_v28 = vadd.f32 %v1200_v13, %v1192_v8  ;;  %v1212_v29 = vadd.f32 %v1207_v17, %v1198_v58  ;;  %v1213_v31 = vadd.f32 %v1211_v2, %v1199_v15  ;;  %v1292_v61 = vld [vmem:[%s2056_s27 + $0x8] sm:$0x88]  ;;  %v1806_v17 = vld [vmem:[%s2078_s11 + $0x70] sm:$0xff]  ;;  %s2370_s27 = sld [smem:[#allocation3 + $0xf]] }
  0x9e   : > { %v1203_v33 = vadd.f32 %v1201_v22, %v1193_v16  ;;  %v1219_v19 = vrot.slane %v1214_v23, %v2073_v6  ;;  %v1223_v4 = vrot.slane %v1215_v59, %v2073_v6  ;;  %v1229_v30 = vstv %s2312_s21 }
  0x9f   : > { %v1232_v35 = vmul.f32 %v1212_v29, %v1212_v29  ;;  %v1233_v36 = vmul.f32 %v1213_v31, %v1213_v31  ;;  %v1234_v24 = vstv %s2318_s22  ;;  %v1243_v34 = vunpack.c.l.bf16 %v1801_v26 }
  0xa0   : > { %v1224_v37 = vadd.f32 %v1219_v19, %v1202_v28  ;;  %v1225_v20 = vadd.f32 %v1223_v4, %v1203_v33  ;;  %v1244_v40 = vunpack.c.h.bf16 %v1801_v26  ;;  %v1249_v41 = vunpack.c.l.bf16 %v1802_v32 }
  0xa1   : > { %v1235_v25 = vmul.f32 %v1234_v24, %v1232_v35  ;;  %v1236_v44 = vmul.f32 %v1234_v24, %v1233_v36  ;;  %v1245_v3 = vmul.f32 %v1243_v34, %v1243_v34  ;;  %v1250_v45 = vunpack.c.h.bf16 %v1802_v32 }
  0xa2   : > { %v1230_v46 = vmul.f32 %v1229_v30, %v1224_v37  ;;  %v1231_v6 = vmul.f32 %v1229_v30, %v1225_v20  ;;  %v1246_v47 = vmul.f32 %v1244_v40, %v1244_v40  ;;  %v1251_v48 = vadd.f32 %v1249_v41, %v1243_v34  ;;  %v1809_v34 = vld [vmem:[%s2061_s8 + $0x78] sm:$0xff] }
  0xa3   : > { %v1252_v50 = vadd.f32 %v1250_v45, %v1244_v40  ;;  %v1253_v51 = vmul.f32 %v1249_v41, %v1249_v41  ;;  %v1254_v52 = vmul.f32 %v1250_v45, %v1250_v45  ;;  %v1260_v42 = vrot.slane %v2314_v57, %v2084_v10 }
  0xa4   : > { %v1183_v38 = vadd.f32 %v1181_v21, %v1132_v14  ;;  %v1184_v49 = vadd.f32 %v1182_v27, %v1133_v18  ;;  %v1264_v54 = vrot.slane %v2316_v39, %v2084_v10  ;;  %v1270_v55 = vrot.slane %v1214_v23, %v2084_v10 }
  0xa5   : > { %v1255_v56 = vadd.f32 %v1253_v51, %v1245_v3  ;;  %v1256_v43 = vadd.f32 %v1254_v52, %v1246_v47  ;;  %v1265_v60 = vadd.f32 %v1260_v42, %v1251_v48  ;;  %v1274_v5 = vrot.slane %v1215_v59, %v2084_v10 }
  0xa6   : > { %v1237_v63 = vsub.f32 %v1230_v46, %v1235_v25  ;;  %v1238_v7 = vsub.f32 %v1231_v6, %v1236_v44  ;;  %v1266_v8 = vadd.f32 %v1264_v54, %v1252_v50  ;;  %v1280_v57 = vstv %s2333_s23  ;;  %v1810_v25 = vld [vmem:[%s2078_s11 + $0x78] sm:$0xff] }
  0xa7   : > { %v1275_v9 = vadd.f32 %v1270_v55, %v1255_v56  ;;  %v1276_v12 = vadd.f32 %v1274_v5, %v1256_v43  ;;  %v1283_v14 = vmul.f32 %v1265_v60, %v1265_v60  ;;  %v1285_v16 = vstv %s2336_s29 }
  0xa8   : > { %v1284_v39 = vmul.f32 %v1266_v8, %v1266_v8  ;;  %v2351_v2 = vunpack.c.l.bf16 %v1292_v61  ;;  %v2353_v18 = vunpack.c.h.bf16 %v1292_v61  ;;  %v1297_v58 = vunpack.c.l.bf16 %v1805_v62 }
  0xa9   : > { %v1281_v10 = vmul.f32 %v1280_v57, %v1275_v9  ;;  %v1282_v15 = vmul.f32 %v1280_v57, %v1276_v12  ;;  %v1286_v13 = vmul.f32 %v1285_v16, %v1283_v14  ;;  %v1298_v21 = vunpack.c.h.bf16 %v1805_v62 }
  0xaa   : > { %v1287_v22 = vmul.f32 %v1285_v16, %v1284_v39  ;;  %v1299_v23 = vmul.f32 %v1297_v58, %v1297_v58  ;;  %v1303_v59 = vunpack.c.l.bf16 %v1806_v17  ;;  %v1304_v26 = vunpack.c.h.bf16 %v1806_v17 }
  0xab   : > { %v1239_v27 = vadd.f32 %v1237_v63, %v1183_v38  ;;  %v1300_v28 = vmul.f32 %v1298_v21, %v1298_v21  ;;  %v1314_v29 = vrot.slane %v2351_v2, %v2087_v11  ;;  %v1318_v31 = vrot.slane %v2353_v18, %v2087_v11 }
  0xac   : > { %v1240_v32 = vadd.f32 %v1238_v7, %v1184_v49  ;;  %v1305_v33 = vadd.f32 %v1303_v59, %v1297_v58  ;;  %v1306_v19 = vadd.f32 %v1304_v26, %v1298_v21  ;;  %v1307_v4 = vmul.f32 %v1303_v59, %v1303_v59 }
  0xad   : > { %v1288_v30 = vsub.f32 %v1281_v10, %v1286_v13  ;;  %v1308_v35 = vmul.f32 %v1304_v26, %v1304_v26  ;;  %v1321_v36 = vmul.f32 %v2351_v2, %v2351_v2  ;;  %v1322_v24 = vmul.f32 %v2353_v18, %v2353_v18 }
  0xae   : > { %v1289_v37 = vsub.f32 %v1282_v15, %v1287_v22  ;;  %v1309_v20 = vadd.f32 %v1307_v4, %v1299_v23  ;;  %v1319_v40 = vadd.f32 %v1314_v29, %v1305_v33  ;;  %v1320_v41 = vadd.f32 %v1318_v31, %v1306_v19 }
  0xaf   : > { %v1310_v44 = vadd.f32 %v1308_v35, %v1300_v28  ;;  %v1326_v3 = vrot.slane %v1321_v36, %v2087_v11  ;;  %v1330_v45 = vrot.slane %v1322_v24, %v2087_v11  ;;  %v1336_v46 = vstv %s2349_s30 }
  0xb0   : > { %v1339_v6 = vmul.f32 %v1319_v40, %v1319_v40  ;;  %v1340_v47 = vmul.f32 %v1320_v41, %v1320_v41  ;;  %v1341_v48 = vstv %s2355_s9  ;;  %v1350_v50 = vunpack.c.l.bf16 %v1809_v34 }
  0xb1   : > { %v1331_v51 = vadd.f32 %v1326_v3, %v1309_v20  ;;  %v1332_v52 = vadd.f32 %v1330_v45, %v1310_v44  ;;  %v1351_v42 = vunpack.c.h.bf16 %v1809_v34  ;;  %v1356_v38 = vunpack.c.l.bf16 %v1810_v25 }
  0xb2   : > { %v1342_v49 = vmul.f32 %v1341_v48, %v1339_v6  ;;  %v1343_v54 = vmul.f32 %v1341_v48, %v1340_v47  ;;  %v1352_v55 = vmul.f32 %v1350_v50, %v1350_v50  ;;  %v1357_v56 = vunpack.c.h.bf16 %v1810_v25  ;;  %v1436_v47 = vld [vmem:[%s517_s12] sm:$0xff]  ;;  %v1437_v48 = vld [vmem:[%s517_s12 + $0x8] sm:$0xff] }
  0xb3   : > { %v1337_v43 = vmul.f32 %v1336_v46, %v1331_v51  ;;  %v1338_v60 = vmul.f32 %v1336_v46, %v1332_v52  ;;  %v1353_v11 = vmul.f32 %v1351_v42, %v1351_v42  ;;  %v1358_v5 = vadd.f32 %v1356_v38, %v1350_v50 }
  0xb4   : > { %v1359_v61 = vadd.f32 %v1357_v56, %v1351_v42  ;;  %v1360_v62 = vmul.f32 %v1356_v38, %v1356_v38  ;;  %v1361_v63 = vmul.f32 %v1357_v56, %v1357_v56  ;;  %v1367_v7 = vrot.slane %v2351_v2, %v2105_v53 }
  0xb5   : > { %v1290_v8 = vadd.f32 %v1288_v30, %v1239_v27  ;;  %v1344_v57 = vsub.f32 %v1337_v43, %v1342_v49  ;;  %v1371_v9 = vrot.slane %v2353_v18, %v2105_v53  ;;  %v1377_v12 = vrot.slane %v1321_v36, %v2105_v53 }
  0xb6   : > { %v1362_v14 = vadd.f32 %v1360_v62, %v1352_v55  ;;  %v1363_v16 = vadd.f32 %v1361_v63, %v1353_v11  ;;  %v1372_v17 = vadd.f32 %v1367_v7, %v1358_v5  ;;  %v1381_v39 = vrot.slane %v1322_v24, %v2105_v53 }
  0xb7   : > { %v1291_v58 = vadd.f32 %v1289_v37, %v1240_v32  ;;  %v1345_v10 = vsub.f32 %v1338_v60, %v1343_v54  ;;  %v1373_v15 = vadd.f32 %v1371_v9, %v1359_v61  ;;  %v1387_v13 = vstv %s2370_s27 }
  0xb8   : > { %v1382_v21 = vadd.f32 %v1377_v12, %v1362_v14  ;;  %v1383_v22 = vadd.f32 %v1381_v39, %v1363_v16  ;;  %v1390_v2 = vmul.f32 %v1372_v17, %v1372_v17  ;;  %v1392_v23 = vstv %s2373_s10 }
  0xb9   : > { %v1391_v59 = vmul.f32 %v1373_v15, %v1373_v15  ;;  %v1346_v26 = vadd.f32 %v1344_v57, %v1290_v8  ;;  %v1347_v29 = vadd.f32 %v1345_v10, %v1291_v58 }
  0xba   : > { %v1388_v27 = vmul.f32 %v1387_v13, %v1382_v21  ;;  %v1389_v28 = vmul.f32 %v1387_v13, %v1383_v22  ;;  %v1393_v18 = vmul.f32 %v1392_v23, %v1390_v2 }
  0xbb   : > { %v1394_v31 = vmul.f32 %v1392_v23, %v1391_v59 }
  0xbc   : > { %v1395_v33 = vsub.f32 %v1388_v27, %v1393_v18 }
  0xbd   : > { %v1396_v19 = vsub.f32 %v1389_v28, %v1394_v31 }
  0xbe   : > { %v1397_v4 = vadd.f32 %v1395_v33, %v1346_v26  ;;  %v1937_v26 = vmov 1966171168  }
  0xbf   : > { %v1398_v30 = vadd.f32 %v1396_v19, %v1347_v29  ;;  %v1472_v27 = vunpack.c.l.s4 %v1937_v26 }
  0xc0   : > { %v1406_v53 = vrot.slane %v1397_v4, 4 }
  0xc1   : > { %v1412_v32 = vrot.slane %v1398_v30, 4  ;;  %v1473_v33 = vunpack.c.0.s8 %v1472_v27 }
  0xc2   : > { %v1407_v35 = vmax.f32 %v1397_v4, %v1406_v53 }
  0xc3   : > { %v1413_v36 = vmax.f32 %v1398_v30, %v1412_v32 }
  0xc4   : > { %v1408_v24 = vrot.slane %v1407_v35, 2 }
  0xc5   : > { %v1414_v34 = vrot.slane %v1413_v36, 2 }
  0xc6   : > { %v1409_v37 = vmax.f32 %v1407_v35, %v1408_v24  ;;  %v1476_v35 = vsub.s32 %v1473_v33, %v2044_v1 }
  0xc7   : > { %v1415_v20 = vmax.f32 %v1413_v36, %v1414_v34 }
  0xc8   : > { %v1410_v40 = vrot.slane %v1409_v37, 1 }
  0xc9   : > { %v1416_v41 = vrot.slane %v1415_v20, 1 }
  0xca   : > { %v1411_v25 = vmax.f32 %v1409_v37, %v1410_v40 }
  0xcb   : > { %v1417_v44 = vmax.f32 %v1415_v20, %v1416_v41 }
  0xcc   : > { %v1418_v3 = vsub.f32 %v1397_v4, %v1411_v25 }
  0xcd   : > { %v1419_v45 = vsub.f32 %v1398_v30, %v1417_v44 }
  0xce   : > { %v1420_v46 = vmul.f32 1.442695, %v1418_v3 }
  0xcf   : > { %v1422_v6 = vmul.f32 1.442695, %v1419_v45 }
  0xd0   : > { %1865 = vpow2.f32 %v1420_v46 }
  0xd1   : > { %1867 = vpow2.f32 %v1422_v6 }
  0xdd   : > { %v1866_v50 = vpop.eup %1865 }
  0xde   : > { %v1868_v51 = vpop.eup %1867  ;;  %v1424_v52 = vrot.slane %v1866_v50, 4  ;;  %v1438_v42 = vmul.f32 %v1866_v50, %v1436_v47 }
  0xdf   : > { %v1430_v38 = vrot.slane %v1868_v51, 4  ;;  %v1439_v49 = vmul.f32 %v1868_v51, %v1437_v48 }
  0xe0   : > { %v1425_v54 = vadd.f32 %v1866_v50, %v1424_v52  ;;  %v1440_v55 = vrot.slane %v1438_v42, 4  ;;  %v1453_v62 = vmax.f32 %v1866_v50, %v1424_v52 }
  0xe1   : > { %v1431_v56 = vadd.f32 %v1868_v51, %v1430_v38  ;;  %v1446_v43 = vrot.slane %v1439_v49, 4  ;;  %v1459_v8 = vmax.f32 %v1868_v51, %v1430_v38 }
  0xe2   : > { %v1426_v60 = vrot.slane %v1425_v54, 2  ;;  %v1441_v61 = vadd.f32 %v1440_v55, %v1438_v42  ;;  %v1454_v16 = vrot.slane %v1453_v62, 2 }
  0xe3   : > { %v1432_v11 = vrot.slane %v1431_v56, 2  ;;  %v1447_v7 = vadd.f32 %v1446_v43, %v1439_v49  ;;  %v1460_v58 = vrot.slane %v1459_v8, 2 }
  0xe4   : > { %v1427_v5 = vadd.f32 %v1426_v60, %v1425_v54  ;;  %v1442_v14 = vrot.slane %v1441_v61, 2  ;;  %v1455_v15 = vmax.f32 %v1453_v62, %v1454_v16 }
  0xe5   : > { %v1433_v63 = vadd.f32 %v1432_v11, %v1431_v56  ;;  %v1448_v39 = vrot.slane %v1447_v7, 2  ;;  %v1461_v21 = vmax.f32 %v1459_v8, %v1460_v58 }
  0xe6   : > { %v1428_v57 = vrot.slane %v1427_v5, 1  ;;  %v1443_v10 = vadd.f32 %v1442_v14, %v1441_v61  ;;  %v1456_v2 = vrot.slane %v1455_v15, 1 }
  0xe7   : > { %v1434_v9 = vrot.slane %v1433_v63, 1  ;;  %v1449_v13 = vadd.f32 %v1448_v39, %v1447_v7  ;;  %v1462_v59 = vrot.slane %v1461_v21, 1 }
  0xe8   : > { %v1429_v12 = vadd.f32 %v1428_v57, %v1427_v5  ;;  %v1444_v22 = vrot.slane %v1443_v10, 1  ;;  %v1457_v18 = vmax.f32 %v1455_v15, %v1456_v2 }
  0xe9   : > { %v1435_v17 = vadd.f32 %v1434_v9, %v1433_v63  ;;  %v1450_v23 = vrot.slane %v1449_v13, 1  ;;  %v1463_v31 = vmax.f32 %v1461_v21, %v1462_v59 }
  0xea   : > { %1869 = vrcp.f32 %v1429_v12  ;;  %v1445_v28 = vadd.f32 %v1444_v22, %v1443_v10 }
  0xeb   : > { %1871 = vrcp.f32 %v1435_v17  ;;  %v1451_v29 = vadd.f32 %v1450_v23, %v1449_v13 }
  0xf7   : > { %v1870_v19 = vpop.eup %1869 }
  0xf8   : > { %v1872_v4 = vpop.eup %1871  ;;  %v1466_v30 = vmul.f32 %v1870_v19, %v1445_v28  ;;  %v1491_v53 = vmul.f32 %v1870_v19, %v1457_v18 }
  0xf9   : > { %v1467_v32 = vmul.f32 %v1872_v4, %v1451_v29  ;;  %v1492_v36 = vmul.f32 %v1872_v4, %v1463_v31 }
  0xfb   : > { %v1470_v24 = vcombine.low %v1466_v30, %v1467_v32  ;;  %v1495_v34 = vcombine.low %v1491_v53, %v1492_v36 }
  0xfd   : > { %v1477_v37 = vrot.slane %v1470_v24, %v1476_v35  ;;  %v1502_v20 = vrot.slane %v1495_v34, %v1476_v35 }
  0xff   : > { %v1484_v40 = vrot.slane %v1477_v37, %v1476_v35  ;;  %v1509_v41 = vrot.slane %v1502_v20, %v1476_v35 }
 0x101   : > { %1490 = vst.msk [vmem:[%s526_s15] sm:$0x3] %vm1488_vm0, %v1484_v40  ;;  %1511 = vst.msk [vmem:[%s535_s18] sm:$0x3] %vm1488_vm0, %v1509_v41 }
 0x102 PF: > { %s20_s26 = sadd.s32 1, %s1933_s26   ;;  %s2422_s24 = smov %s1929_s25 }
 0x103   : > { %p17_p4 = scmp.ge.s32.totalorder %s20_s26, 4   ;;  %s2423_s25 = smov %s2425_s28 }
 0x105   :  { %19 = sbr.rel (!%p17_p4) target bundleno = 3 (0x3), region = 142 }
 0x10a   :  { %1563 = vsyncpa [#allocation4], 1 }
 0x10b   :  { %1565 = vsyncpa [#allocation4 + $0x1], 1 }
 0x10c   :  { %1566 = vsyncpa [#allocation6], 1 }

// kernel: squeeze.82
= control target key start
LH: loop header
LB: loop body
LE: loop exit
PB: predicated region body
PF: predicated region fallthrough
CT: control target
= control target key end

     0   :  { %vm12_vm0 = vcmask 130048   ;;  %s78_s10 = smov 80   ;;  %s79_s15 = smov 96   ;;  %s136_s0 = inlined_call_operand.vmem [shape: f32[2,256], index: 0, kind: input, shape index: {}]   ;;  %s137_s1 = inlined_call_operand.vmem [shape: f32[2,16,16], index: 1, kind: output, shape index: {}]  }
   0x1   :  { %v61_v0 = vld [vmem:[%s136_s0 + $0x2] sm:$0x3]  ;;  %v9_v1 = vld [vmem:[%s136_s0] sm:$0x3]  ;;  %s77_s0 = smov 112   ;;  %s80_s16 = smov 64  }
   0x2   :  { %8 = vst [vmem:[#allocation0 + $0x8] sm:$0x3] %v61_v0  ;;  %10 = vst [vmem:[#allocation0] sm:$0x3] %v9_v1  ;;  %s81_s17 = smov 48   ;;  %s82_s18 = smov 32  }
   0x3   :  { %s83_s19 = smov 16  }
   0x9   :  { %v19_v2 = vld.sshfl [vmem:[#allocation0] sm:$0xff pattern:$0x99999180]  }
   0xa   :  { %v11_v3 = vld [vmem:[#allocation0] sm:$0x3]   ;;  %20 = vrot.lane.b32.xlu0 %v19_v2, %s77_s0  ;;  %32 = vrot.lane.b32.xlu1 %v19_v2, %s78_s10  ;;  %v15_v4 = vld [vmem:[#allocation0 + $0x8] sm:$0x3]  }
   0xb   :  { %13 = vst.msk [vmem:[%s137_s1] ss:$16 sm:$0x3] %vm12_vm0, %v11_v3   ;;  %62 = vst.msk [vmem:[%s137_s1 + $0x8] ss:$16 sm:$0x3] %vm12_vm0, %v15_v4  }
   0xe   :  { %26 = vrot.lane.b32.xlu0 %v19_v2, %s79_s15  ;;  %38 = vrot.lane.b32.xlu1 %v19_v2, %s80_s16 }
  0x12   :  { %44 = vrot.lane.b32.xlu0 %v19_v2, %s81_s17  ;;  %50 = vrot.lane.b32.xlu1 %v19_v2, %s82_s18 }
  0x16   :  { %56 = vrot.lane.b32.xlu0 %v19_v2, %s83_s19 }
  0x7c   :  { %v21_v5 = vpop.permute.xlu0 %20   ;;  %v33_v6 = vpop.permute.xlu1 %32  }
  0x7d   :  { %63 = vst.msk [vmem:[%s137_s1 + $0x1] ss:$8 sm:$0xf] %vm12_vm0, %v21_v5   ;;  %65 = vst.msk [vmem:[%s137_s1 + $0x3] ss:$8 sm:$0xf] %vm12_vm0, %v33_v6  }
  0x80   :  { %v27_v7 = vpop.permute.xlu0 %26   ;;  %v39_v8 = vpop.permute.xlu1 %38  }
  0x81   :  { %64 = vst.msk [vmem:[%s137_s1 + $0x2] ss:$8 sm:$0xf] %vm12_vm0, %v27_v7   ;;  %66 = vst.msk [vmem:[%s137_s1 + $0x4] ss:$8 sm:$0xf] %vm12_vm0, %v39_v8  }
  0x84   :  { %v45_v9 = vpop.permute.xlu0 %44   ;;  %v51_v10 = vpop.permute.xlu1 %50  }
  0x85   :  { %67 = vst.msk [vmem:[%s137_s1 + $0x5] ss:$8 sm:$0xf] %vm12_vm0, %v45_v9   ;;  %68 = vst.msk [vmem:[%s137_s1 + $0x6] ss:$8 sm:$0xf] %vm12_vm0, %v51_v10  }
  0x88   :  { %v57_v11 = vpop.permute.xlu0 %56  }
  0x89   :  { %69 = vst.msk [vmem:[%s137_s1 + $0x7] ss:$8 sm:$0xf] %vm12_vm0, %v57_v11  }

// kernel: squeeze.72
= control target key start
LH: loop header
LB: loop body
LE: loop exit
PB: predicated region body
PF: predicated region fallthrough
CT: control target
= control target key end

     0   :  { %s125_s0 = inlined_call_operand.vmem [shape: f32[2,64], index: 0, kind: input, shape index: {}]   ;;  %s126_s1 = inlined_call_operand.hbm [shape: f32[2,8,8], index: 1, kind: output, shape index: {}]  }
   0x1   :  { %v6_v0 = vld [vmem:[%s125_s0] sm:$0x3] }
   0x2   :  { %7 = vst [vmem:[#allocation2] sm:$0x3] %v6_v0 }
   0x3   :  { %2 = vsyncpa [#allocation1], 0  ;;  %s93_s0 = smov 120   ;;  %s94_s8 = smov 104   ;;  %vm9_vm0 = vcmask 64512  }
   0x4   :  { %s95_s9 = smov 112   ;;  %s96_s10 = smov 96  }
   0x5   :  { %s97_s11 = smov 88   ;;  %s98_s12 = smov 80  }
   0x6   :  { %s99_s13 = smov 72   ;;  %s100_s14 = smov [#allocation0]  }
   0x7   :  { %s57_s15 = sshll.u32 %s100_s14, 4  ;;  %s58_s15 = int_to_ptr.vmem [resolvable:$true] %s57_s15 }
   0x8   :  { %s71_s16 = scalar_lea.vmem %s58_s15, 256  ;;  %p76_p1 = scmp.lt.s32.totalorder %s58_s15, %s58_s15 }
   0x9   :  { %v11_v1 = vld [vmem:[#allocation2] sm:$0x3]   ;;  %p72_p0 = scmp.ne.s32.totalorder %s58_s15, %s71_s16  ;;  %p77_p2 = scmp.lt.s32.totalorder %s71_s16, %s71_s16 }
   0xa   :  { %v23_v2 = vld [vmem:[#allocation2] sm:$0x3]   ;;  %12 = vrot.lane.b32.xlu0 %v11_v1, %s93_s0 }
   0xb   :  { %24 = vrot.lane.b32.xlu1 %v23_v2, %s94_s8  ;;  %v17_v3 = vld [vmem:[#allocation2] sm:$0x3]   ;;  %p78_p3 = por %p77_p2, %p76_p1 }
   0xc   :  { %v29_v4 = vld [vmem:[#allocation2] sm:$0x3]  }
   0xd   :  { %v8_v5 = vld [vmem:[#allocation2] sm:$0x3]   ;;  %p79_p4 = pnand %p78_p3, %p72_p0 }
   0xe   :  { %10 = vst.msk [vmem:[#allocation0] ss:$8 sm:$0x3] %vm9_vm0, %v8_v5   ;;  %18 = vrot.lane.b32.xlu0 %v17_v3, %s95_s9  ;;  %v35_v6 = vld [vmem:[#allocation2] sm:$0x3]  }
   0xf   :  { %30 = vrot.lane.b32.xlu1 %v29_v4, %s96_s10  ;;  %v41_v7 = vld [vmem:[#allocation2] sm:$0x3]  }
  0x10   :  { %v47_v8 = vld [vmem:[#allocation2] sm:$0x3]  }
  0x12   :  { %36 = vrot.lane.b32.xlu0 %v35_v6, %s97_s11 }
  0x13   :  { %42 = vrot.lane.b32.xlu1 %v41_v7, %s98_s12 }
  0x16   :  { %48 = vrot.lane.b32.xlu0 %v47_v8, %s99_s13 }
  0x7c   :  { %v13_v9 = vpop.permute.xlu0 %12  }
  0x7d   :  { %v25_v10 = vpop.permute.xlu1 %24   ;;  %16 = vst.msk [vmem:[#allocation0 + $0x1] ss:$8 sm:$0x3] %vm9_vm0, %v13_v9  }
  0x7e   :  { %28 = vst.msk [vmem:[#allocation0 + $0x3] ss:$8 sm:$0x3] %vm9_vm0, %v25_v10  }
  0x80   :  { %v19_v11 = vpop.permute.xlu0 %18  }
  0x81   :  { %v31_v12 = vpop.permute.xlu1 %30   ;;  %22 = vst.msk [vmem:[#allocation0 + $0x2] ss:$8 sm:$0x3] %vm9_vm0, %v19_v11  }
  0x82   :  { %34 = vst.msk [vmem:[#allocation0 + $0x4] ss:$8 sm:$0x3] %vm9_vm0, %v31_v12  }
  0x84   :  { %v37_v13 = vpop.permute.xlu0 %36  }
  0x85   :  { %v43_v14 = vpop.permute.xlu1 %42   ;;  %40 = vst.msk [vmem:[#allocation0 + $0x5] ss:$8 sm:$0x3] %vm9_vm0, %v37_v13  }
  0x86   :  { %46 = vst.msk [vmem:[#allocation0 + $0x6] ss:$8 sm:$0x3] %vm9_vm0, %v43_v14  }
  0x88   :  { %v49_v15 = vpop.permute.xlu0 %48  }
  0x89   :  { %52 = vst.msk [vmem:[#allocation0 + $0x7] ss:$8 sm:$0x3] %vm9_vm0, %v49_v15  }
  0x8a   :  { %82 = shalt.err (!%p79_p4)
}
  0x8b   :  { %60 = dma.vmem_to_hbm [thread:$0]  %s58_s15, 256, %s126_s1, [#allocation1]  }
  0x8c   :  { %91 = dma.done.wait [#allocation1], 256  }
  0x8d   :  { %92 = vsyncadd [#allocation1], 4294967040 }
  0x8e   :  { %62 = vsyncpa [#allocation1], 1 }

// kernel: squeeze.61
= control target key start
LH: loop header
LB: loop body
LE: loop exit
PB: predicated region body
PF: predicated region fallthrough
CT: control target
= control target key end

     0   :  { %s99_s0 = inlined_call_operand.vmem [shape: f32[2,16], index: 0, kind: input, shape index: {}]   ;;  %s100_s1 = inlined_call_operand.hbm [shape: f32[2,4,4], index: 1, kind: output, shape index: {}]  }
   0x1   :  { %v6_v0 = vld [vmem:[%s99_s0] sm:$0x3] }
   0x2   :  { %7 = vst [vmem:[#allocation3] sm:$0x3] %v6_v0 }
   0x3   :  { %2 = vsyncpa [#allocation1], 0  ;;  %s79_s0 = smov 124   ;;  %s80_s8 = smov 116   ;;  %vm9_vm0 = vcmask 31744  }
   0x4   :  { %s81_s9 = smov 120   ;;  %s82_s10 = smov [#allocation0]  }
   0x5   :  { %s47_s11 = sshll.u32 %s82_s10, 4  ;;  %s48_s11 = int_to_ptr.vmem [resolvable:$true] %s47_s11 }
   0x6   :  { %s57_s12 = scalar_lea.vmem %s48_s11, 128  ;;  %p62_p1 = scmp.lt.s32.totalorder %s48_s11, %s48_s11 }
   0x7   :  { %p58_p0 = scmp.ne.s32.totalorder %s48_s11, %s57_s12  ;;  %p63_p2 = scmp.lt.s32.totalorder %s57_s12, %s57_s12 }
   0x9   :  { %v11_v1 = vld [vmem:[#allocation3] sm:$0x3]   ;;  %p64_p3 = por %p63_p2, %p62_p1 }
   0xa   :  { %v23_v2 = vld [vmem:[#allocation3] sm:$0x3]   ;;  %12 = vrot.lane.b32.xlu0 %v11_v1, %s79_s0 }
   0xb   :  { %24 = vrot.lane.b32.xlu1 %v23_v2, %s80_s8  ;;  %v8_v3 = vld [vmem:[#allocation3] sm:$0x3]   ;;  %p65_p4 = pnand %p64_p3, %p58_p0 }
   0xc   :  { %v17_v4 = vld [vmem:[#allocation3] sm:$0x3]   ;;  %10 = vst.msk [vmem:[#allocation2] ss:$8 sm:$0x3] %vm9_vm0, %v8_v3  }
   0xe   :  { %18 = vrot.lane.b32.xlu0 %v17_v4, %s81_s9 }
  0x7c   :  { %v13_v5 = vpop.permute.xlu0 %12  }
  0x7d   :  { %v25_v6 = vpop.permute.xlu1 %24   ;;  %16 = vst.msk [vmem:[#allocation2 + $0x1] ss:$8 sm:$0x3] %vm9_vm0, %v13_v5  }
  0x7e   :  { %28 = vst.msk [vmem:[#allocation2 + $0x3] ss:$8 sm:$0x3] %vm9_vm0, %v25_v6  }
  0x80   :  { %v19_v7 = vpop.permute.xlu0 %18  }
  0x81   :  { %22 = vst.msk [vmem:[#allocation2 + $0x2] ss:$8 sm:$0x3] %vm9_vm0, %v19_v7  }
  0x88   :  { %v33_v8 = vld [vmem:[#allocation2] sm:$0xf]  ;;  %v38_v9 = vld [vmem:[#allocation2 + $0x8] sm:$0xf] }
  0x89   :  { %36 = vst [vmem:[#allocation0] sm:$0xf] %v33_v8  ;;  %42 = vst [vmem:[#allocation0 + $0x4] sm:$0xf] %v38_v9 }
  0x8a   :  { %68 = shalt.err (!%p65_p4)
}
  0x8b   :  { %50 = dma.vmem_to_hbm [thread:$0]  %s48_s11, 128, %s100_s1, [#allocation1]  }
  0x8c   :  { %77 = dma.done.wait [#allocation1], 128  }
  0x8d   :  { %78 = vsyncadd [#allocation1], 4294967168 }
  0x8e   :  { %52 = vsyncpa [#allocation1], 1 }

</bundles_post_ra>
